<compile_context>
chip_gen: v5e
topology: v5e:2x2
jax: 0.10.0
libtpu: 0.0.40
codegen_flags: <defaults>
</compile_context>

<pallas_src>
import functools

import numpy as np
import jax
import jax.numpy as jnp
from jax import lax
from jax.experimental import pallas as pl
from jax.experimental.pallas import tpu as pltpu

LANE = 128   # lane width (last axis)
SUB = 16     # channel (sublane) alignment: bf16 packs 16 rows per vreg


def _round_up(x, m):
    return (x + m - 1) // m * m


# ---------------------------------------------------------------------------
# Kernel
# ---------------------------------------------------------------------------
def _rdb_kernel(x_ref, mask_ref, *args, C0p, Gp, L, Wp, Stot, Mp):
    """One grid step: RDB forward over a group of lane-folded images.

    Layout: channels on sublanes; flattened zero-padded spatial (x batch
    fold) on lanes.  feat_ref rows = [input C0p | layer0 Gp | ... ],
    lanes = [Mp margin | Stot data | Mp margin].  patch_ref is a persistent
    group-major im2col buffer (tap-major inside each channel group).
    """
    out_ref = args[2 * L + 2]
    feat_ref = args[2 * L + 3]       # (cfin_p, Mp + Stot + Mp)  bf16
    patch_ref = args[2 * L + 4]      # (9 * cmax_in_p, Stot)     bf16

    cfin_p = C0p + L * Gp

    # Zero the lane margins once (they only feed masked-out halo lanes, but
    # keep everything the MXU reads deterministic — never stale VMEM).
    zeros_m = jnp.zeros((cfin_p, Mp), jnp.bfloat16)
    feat_ref[:, 0:Mp] = zeros_m
    feat_ref[:, Mp + Stot:Mp + Stot + Mp] = zeros_m

    # Input channels -> feature rows [0, C0p).  x is NOT kept live in vregs;
    # the residual is re-read from VMEM at the very end.
    feat_ref[0:C0p, Mp:Mp + Stot] = x_ref[0]

    # Interior (non-halo, non-pad) mask; broadcast hoisted out of the unrolled
    # layer loop (JAX does not CSE broadcast_in_dim).  Small at these channel
    # counts; for very large Gp keep it (1, Stot) instead.
    mask = mask_ref[...]                                  # (1, Stot) f32
    mask_g = jnp.broadcast_to(mask, (Gp, Stot))

    taps = tuple((dh - 1) * Wp + (dw - 1) for dh in range(3) for dw in range(3))

    def append_group(feat_row, patch_row, size):
        # Copy the 9 tap-shifted views of feat rows [feat_row, feat_row+size)
        # into the persistent im2col buffer.  Each store is a contiguous,
        # sublane/lane-aligned (size, Stot) block.
        for t, off in enumerate(taps):
            patch_ref[patch_row + t * size:patch_row + (t + 1) * size, :] = \
                feat_ref[feat_row:feat_row + size, Mp + off:Mp + off + Stot]

    append_group(0, 0, C0p)                               # taps of the input

    cin_p = C0p
    patch_row = 9 * C0p
    for i in range(L):
        w2d = args[2 * i][...]                            # (Gp, 9*cin_p) bf16
        b = args[2 * i + 1][...]                          # (Gp, 1) f32
        # One MXU matmul per dense layer (bf16 x bf16 -> f32 accumulate).
        acc = jnp.dot(w2d, patch_ref[0:9 * cin_p, :],
                      preferred_element_type=jnp.float32) + b
        new = jnp.maximum(acc, 0.0) * mask_g              # ReLU; halo/pad -> 0
        feat_ref[cin_p:cin_p + Gp, Mp:Mp + Stot] = new.astype(jnp.bfloat16)
        if i + 1 < L:                                     # last layer's taps unused
            append_group(cin_p, patch_row, Gp)
            patch_row += 9 * Gp
        cin_p += Gp

    # Final 1x1 conv over all dense channels (one matmul) + residual add.
    wf = args[2 * L][...]                                 # (C0p, cfin_p) bf16
    bf = args[2 * L + 1][...]                             # (C0p, 1) f32
    y = jnp.dot(wf, feat_ref[:, Mp:Mp + Stot],
                preferred_element_type=jnp.float32) + bf
    # Re-zero halo/pad lanes so the output (same padded layout) can feed the
    # next RDB block directly; the residual rows already have a zero halo.
    y = y * jnp.broadcast_to(mask, (C0p, Stot)) \
        + feat_ref[0:C0p, Mp:Mp + Stot].astype(jnp.float32)
    out_ref[0] = y.astype(jnp.bfloat16)


# ---------------------------------------------------------------------------
# Weight packing (row order matches the persistent im2col buffer)
# ---------------------------------------------------------------------------
def _pack_conv3x3(w, b, layer_idx, C0, G, C0p, Gp):
    """(3,3,cin,G) HWIO conv -> (Gp, 9*cin_p) bf16 matrix.  K-axis order:
    channel group (input, layer0, ...), then tap (dh*3+dw), then channel."""
    w = np.asarray(w, np.float32)
    b = np.asarray(b, np.float32)
    cin = C0 + layer_idx * G
    cin_p = C0p + layer_idx * Gp
    w2d = np.zeros((Gp, 9 * cin_p), np.float32)
    for c in range(cin):
        if c < C0:
            base, size, cw = 0, C0p, c
        else:
            j, cw = divmod(c - C0, G)
            base, size = 9 * C0p + j * 9 * Gp, Gp
        for dh in range(3):
            for dw in range(3):
                k = base + (dh * 3 + dw) * size + cw
                w2d[:G, k] = w[dh, dw, c, :]
    b2 = np.zeros((Gp, 1), np.float32)
    b2[:G, 0] = b
    return jnp.asarray(w2d, jnp.bfloat16), jnp.asarray(b2, jnp.float32)


def _pack_conv1x1(wf, bf, C0, G, L, C0p, Gp):
    """(cfin, C0) 1x1 conv -> (C0p, cfin_p) bf16, columns = feat row order."""
    wf = np.asarray(wf, np.float32)
    bf = np.asarray(bf, np.float32)
    cfin = C0 + L * G
    cfin_p = C0p + L * Gp
    w2d = np.zeros((C0p, cfin_p), np.float32)
    for c in range(cfin):
        if c < C0:
            row = c
        else:
            j, g = divmod(c - C0, G)
            row = C0p + j * Gp + g
        w2d[:C0, row] = wf[c, :]
    b2 = np.zeros((C0p, 1), np.float32)
    b2[:C0, 0] = bf
    return jnp.asarray(w2d, jnp.bfloat16), jnp.asarray(b2, jnp.float32)


# ---------------------------------------------------------------------------
# pallas_call wrapper for one RDB block (operates on the padded lane layout)
# ---------------------------------------------------------------------------
def _rdb_block_call(x_lane, mask, packed, dims):
    C0p, Gp, L, Wp, Stot, Mp, cmax_in_p = dims
    num_groups = x_lane.shape[0]
    cfin_p = C0p + L * Gp

    kernel = functools.partial(_rdb_kernel, C0p=C0p, Gp=Gp, L=L, Wp=Wp,
                               Stot=Stot, Mp=Mp)

    in_specs = [pl.BlockSpec((1, C0p, Stot), lambda n: (n, 0, 0)),
                pl.BlockSpec((1, Stot), lambda n: (0, 0))]
    flat_inputs = [x_lane, mask]
    for w2d, b2 in packed:
        in_specs.append(pl.BlockSpec(w2d.shape, lambda n: (0, 0)))
        in_specs.append(pl.BlockSpec(b2.shape, lambda n: (0, 0)))
        flat_inputs += [w2d, b2]

    feat_bytes = cfin_p * (Stot + 2 * Mp) * 2
    patch_bytes = 9 * cmax_in_p * Stot * 2
    io_bytes = 2 * 2 * 2 * (C0p * Stot * 2)      # double-buffered in + out
    vmem_limit = int(min(max(feat_bytes + patch_bytes + io_bytes + (16 << 20),
                             32 << 20), 64 << 20))

    return pl.pallas_call(
        kernel,
        out_shape=jax.ShapeDtypeStruct((num_groups, C0p, Stot), jnp.bfloat16),
        grid_spec=pltpu.PrefetchScalarGridSpec(
            num_scalar_prefetch=0,
            grid=(num_groups,),
            in_specs=in_specs,
            out_specs=pl.BlockSpec((1, C0p, Stot), lambda n: (n, 0, 0)),
            scratch_shapes=[
                pltpu.VMEM((cfin_p, Stot + 2 * Mp), jnp.bfloat16),   # features
                pltpu.VMEM((9 * cmax_in_p, Stot), jnp.bfloat16),     # im2col
            ],
        ),
        compiler_params=pltpu.CompilerParams(
            dimension_semantics=("parallel",),
            vmem_limit_bytes=vmem_limit),
    )(*flat_inputs)


def rdb_chain_pallas(x_nchw, block_params, *, growth_rate, images_per_step=None):
    """Run a chain of RDB blocks.  Pads/flattens to the kernel's lane-dense
    layout ONCE before the first block, strips it ONCE after the last block.

    x_nchw: (N, C0, H, W) f32.  block_params: list of (dense_params, wf, bf);
    dense_params = L pairs of (w (3,3,cin,G) HWIO, b (G,)); wf: (cfin, C0).
    images_per_step: images folded onto the lane axis per grid step.
      None -> all N (best for single-TC v5e/v6e); use 1 (or N//2) on v7x so
      the grid has >=2 independent steps for the two TensorCores.
    """
    N, C0, H, W = x_nchw.shape
    L = len(block_params[0][0])
    G = growth_rate
    C0p = _round_up(C0, SUB)
    Gp = _round_up(G, SUB)
    cmax_in_p = C0p + (L - 1) * Gp
    Hp, Wp = H + 2, W + 2
    Sp = Hp * Wp
    Sp_pad = _round_up(Sp, LANE)          # per-image lane stride (128-aligned)
    Mp = _round_up(Wp + 1, LANE)          # lane margin for tap slices

    B = N if images_per_step is None else images_per_step
    assert N % B == 0
    num_groups = N // B
    Stot = B * Sp_pad
    dims = (C0p, Gp, L, Wp, Stot, Mp, cmax_in_p)

    # ---- pad / flatten once: zero halo + channel pad + lane pad + batch fold
    x = jnp.pad(x_nchw, ((0, 0), (0, C0p - C0), (1, 1), (1, 1)))
    x = x.reshape(N, C0p, Sp)
    x = jnp.pad(x, ((0, 0), (0, 0), (0, Sp_pad - Sp)))
    x = x.reshape(num_groups, B, C0p, Sp_pad).transpose(0, 2, 1, 3)
    x = x.reshape(num_groups, C0p, Stot).astype(jnp.bfloat16)

    hh = jnp.arange(Hp)[:, None]
    ww = jnp.arange(Wp)[None, :]
    interior = ((hh >= 1) & (hh <= H) & (ww >= 1) & (ww <= W)).reshape(1, Sp)
    mask = jnp.pad(interior.astype(jnp.float32), ((0, 0), (0, Sp_pad - Sp)))
    mask = jnp.tile(mask, (1, B))                         # (1, Stot)

    for dense_params, wf, bf in block_params:
        packed = [_pack_conv3x3(w, b, i, C0, G, C0p, Gp)
                  for i, (w, b) in enumerate(dense_params)]
        packed.append(_pack_conv1x1(wf, bf, C0, G, L, C0p, Gp))
        x = _rdb_block_call(x, mask, packed, dims)

    # ---- strip halo / channel / lane padding once
    y = x.reshape(num_groups, C0p, B, Sp_pad).transpose(0, 2, 1, 3)
    y = y.reshape(N, C0p, Sp_pad)[:, :C0, :Sp]
    y = y.reshape(N, C0, Hp, Wp)[:, :, 1:H + 1, 1:W + 1]
    return y.astype(jnp.float32)


def rdb_pallas(x, dense_params, wf, bf, *, growth_rate, images_per_step=None):
    return rdb_chain_pallas(x, [(dense_params, wf, bf)],
                            growth_rate=growth_rate,
                            images_per_step=images_per_step)


# ---------------------------------------------------------------------------
# Reference + init
# ---------------------------------------------------------------------------
def init_params(key, C0, L, G):
    """Deterministic Conv2d-style uniform init (shapes match the PyTorch RDB)."""
    dense = []
    cin = C0
    for _ in range(L):
        key, k1, k2 = jax.random.split(key, 3)
        bound = 1.0 / np.sqrt(cin * 9)
        w = jax.random.uniform(k1, (3, 3, cin, G), jnp.float32, -bound, bound)
        b = jax.random.uniform(k2, (G,), jnp.float32, -bound, bound)
        dense.append((w, b))
        cin += G
    key, k1, k2 = jax.random.split(key, 3)
    bound = 1.0 / np.sqrt(cin)
    wf = jax.random.uniform(k1, (cin, C0), jnp.float32, -bound, bound)
    bf = jax.random.uniform(k2, (C0,), jnp.float32, -bound, bound)
    return dense, wf, bf


def rdb_reference(x_nchw, dense_params, wf, bf):
    """Pure-JAX (f32) reference matching the PyTorch RDB forward (NCHW)."""
    x = jnp.transpose(x_nchw, (0, 2, 3, 1))     # NHWC
    cur = x
    for w, b in dense_params:
        out = lax.conv_general_dilated(
            cur, w, (1, 1), "SAME",
            dimension_numbers=("NHWC", "HWIO", "NHWC")) + b.reshape(1, 1, 1, -1)
        cur = jnp.concatenate([cur, jnp.maximum(out, 0.0)], axis=-1)
    cfin, C0 = wf.shape
    y = lax.conv_general_dilated(
        cur, wf.reshape(1, 1, cfin, C0), (1, 1), "SAME",
        dimension_numbers=("NHWC", "HWIO", "NHWC")) + bf.reshape(1, 1, 1, -1)
    return jnp.transpose(y + x, (0, 3, 1, 2))


if __name__ == "__main__":
    # RDB as used inside GlobalGenerator (num_dense_layer=4), at small shapes;
    # chain two blocks to exercise the block-to-block padded-layout handoff.
    N, C0, H, W = 2, 4, 16, 16
    L, G = 4, 4
    n_chain = 2

    key = jax.random.PRNGKey(0)
    key, kx = jax.random.split(key)
    x = jax.random.normal(kx, (N, C0, H, W), jnp.float32)   # NCHW like PyTorch

    blocks = []
    for _ in range(n_chain):
        key, kp = jax.random.split(key)
        blocks.append(init_params(kp, C0, L, G))

    out = rdb_chain_pallas(x, blocks, growth_rate=G)
    out = jax.block_until_ready(out)

    ref = x
    for dp, wf, bf in blocks:
        ref = rdb_reference(ref, dp, wf, bf)

    # bf16 MXU operands / inter-block activations -> relaxed tolerance.
    np.testing.assert_allclose(np.asarray(out), np.asarray(ref),
                               rtol=3e-2, atol=3e-2)
    print("KERNEL_OK")
</pallas_src>

<mosaic_0001>
module attributes {stable_mosaic.version = 11 : i64} {
  func.func @_rdb_kernel(%arg0: i32, %arg1: memref<1x16x768xbf16, #tpu.memory_space<vmem>>, %arg2: memref<1x768xf32, #tpu.memory_space<vmem>>, %arg3: memref<16x144xbf16, #tpu.memory_space<vmem>>, %arg4: memref<16x1xf32, #tpu.memory_space<vmem>>, %arg5: memref<16x288xbf16, #tpu.memory_space<vmem>>, %arg6: memref<16x1xf32, #tpu.memory_space<vmem>>, %arg7: memref<16x432xbf16, #tpu.memory_space<vmem>>, %arg8: memref<16x1xf32, #tpu.memory_space<vmem>>, %arg9: memref<16x576xbf16, #tpu.memory_space<vmem>>, %arg10: memref<16x1xf32, #tpu.memory_space<vmem>>, %arg11: memref<16x80xbf16, #tpu.memory_space<vmem>>, %arg12: memref<16x1xf32, #tpu.memory_space<vmem>>, %arg13: memref<1x16x768xbf16, #tpu.memory_space<vmem>>, %arg14: memref<80x1024xbf16, #tpu.memory_space<vmem>>, %arg15: memref<576x768xbf16, #tpu.memory_space<vmem>>) attributes {dimension_semantics = [#tpu.dimension_semantics<parallel>], iteration_bounds = array<i64: 1>, scalar_prefetch = 0 : i64, scratch_operands = 2 : i64, tpu.core_type = #tpu.core_type<tc>, window_params = [{transform_indices = @transform_0, window_bounds = array<i64: 1, 16, 768>}, {pipeline_mode = #tpu.pipeline_mode<synchronous>, transform_indices = @transform_1, window_bounds = array<i64: 1, 768>}, {pipeline_mode = #tpu.pipeline_mode<synchronous>, transform_indices = @transform_2, window_bounds = array<i64: 16, 144>}, {pipeline_mode = #tpu.pipeline_mode<synchronous>, transform_indices = @transform_3, window_bounds = array<i64: 16, 1>}, {pipeline_mode = #tpu.pipeline_mode<synchronous>, transform_indices = @transform_4, window_bounds = array<i64: 16, 288>}, {pipeline_mode = #tpu.pipeline_mode<synchronous>, transform_indices = @transform_5, window_bounds = array<i64: 16, 1>}, {pipeline_mode = #tpu.pipeline_mode<synchronous>, transform_indices = @transform_6, window_bounds = array<i64: 16, 432>}, {pipeline_mode = #tpu.pipeline_mode<synchronous>, transform_indices = @transform_7, window_bounds = array<i64: 16, 1>}, {pipeline_mode = #tpu.pipeline_mode<synchronous>, transform_indices = @transform_8, window_bounds = array<i64: 16, 576>}, {pipeline_mode = #tpu.pipeline_mode<synchronous>, transform_indices = @transform_9, window_bounds = array<i64: 16, 1>}, {pipeline_mode = #tpu.pipeline_mode<synchronous>, transform_indices = @transform_10, window_bounds = array<i64: 16, 80>}, {pipeline_mode = #tpu.pipeline_mode<synchronous>, transform_indices = @transform_11, window_bounds = array<i64: 16, 1>}, {transform_indices = @transform_12, window_bounds = array<i64: 1, 16, 768>}]} {
    %cst = arith.constant 0.000000e+00 : bf16
    %0 = vector.broadcast %cst : bf16 to vector<80x128xbf16>
    %c0 = arith.constant 0 : index
    %c0_0 = arith.constant 0 : index
    %1 = vector.load %arg14[%c0, %c0_0] : memref<80x1024xbf16, #tpu.memory_space<vmem>>, vector<80x128xbf16>
    tpu.vector_store %arg14[%c0, %c0_0], %0 {strides = array<i32>} : memref<80x1024xbf16, #tpu.memory_space<vmem>>, vector<80x128xbf16>,
    %c0_1 = arith.constant 0 : index
    %c896 = arith.constant 896 : index
    %2 = vector.load %arg14[%c0_1, %c896] : memref<80x1024xbf16, #tpu.memory_space<vmem>>, vector<80x128xbf16>
    tpu.vector_store %arg14[%c0_1, %c896], %0 {strides = array<i32>} : memref<80x1024xbf16, #tpu.memory_space<vmem>>, vector<80x128xbf16>,
    %c0_2 = arith.constant 0 : index
    %c0_3 = arith.constant 0 : index
    %c0_4 = arith.constant 0 : index
    %3 = vector.load %arg1[%c0_2, %c0_3, %c0_4] : memref<1x16x768xbf16, #tpu.memory_space<vmem>>, vector<1x16x768xbf16>
    %4 = vector.shape_cast %3 : vector<1x16x768xbf16> to vector<16x768xbf16>
    %c0_5 = arith.constant 0 : index
    %c128 = arith.constant 128 : index
    %5 = vector.load %arg14[%c0_5, %c128] : memref<80x1024xbf16, #tpu.memory_space<vmem>>, vector<16x768xbf16>
    tpu.vector_store %arg14[%c0_5, %c128], %4 {strides = array<i32>} : memref<80x1024xbf16, #tpu.memory_space<vmem>>, vector<16x768xbf16>,
    %c0_6 = arith.constant 0 : index
    %c0_7 = arith.constant 0 : index
    %6 = vector.load %arg2[%c0_6, %c0_7] : memref<1x768xf32, #tpu.memory_space<vmem>>, vector<1x768xf32>
    %7 = vector.shape_cast %6 : vector<1x768xf32> to vector<1x768xf32>
    %8 = vector.broadcast %7 : vector<1x768xf32> to vector<16x768xf32>
    %c0_8 = arith.constant 0 : index
    %c109 = arith.constant 109 : index
    %9 = vector.load %arg14[%c0_8, %c109] : memref<80x1024xbf16, #tpu.memory_space<vmem>>, vector<16x768xbf16>
    %c0_9 = arith.constant 0 : index
    %c0_10 = arith.constant 0 : index
    %10 = vector.load %arg15[%c0_9, %c0_10] : memref<576x768xbf16, #tpu.memory_space<vmem>>, vector<16x768xbf16>
    tpu.vector_store %arg15[%c0_9, %c0_10], %9 {strides = array<i32>} : memref<576x768xbf16, #tpu.memory_space<vmem>>, vector<16x768xbf16>,
    %c0_11 = arith.constant 0 : index
    %c110 = arith.constant 110 : index
    %11 = vector.load %arg14[%c0_11, %c110] : memref<80x1024xbf16, #tpu.memory_space<vmem>>, vector<16x768xbf16>
    %c16 = arith.constant 16 : index
    %c0_12 = arith.constant 0 : index
    %12 = vector.load %arg15[%c16, %c0_12] : memref<576x768xbf16, #tpu.memory_space<vmem>>, vector<16x768xbf16>
    tpu.vector_store %arg15[%c16, %c0_12], %11 {strides = array<i32>} : memref<576x768xbf16, #tpu.memory_space<vmem>>, vector<16x768xbf16>,
    %c0_13 = arith.constant 0 : index
    %c111 = arith.constant 111 : index
    %13 = vector.load %arg14[%c0_13, %c111] : memref<80x1024xbf16, #tpu.memory_space<vmem>>, vector<16x768xbf16>
    %c32 = arith.constant 32 : index
    %c0_14 = arith.constant 0 : index
    %14 = vector.load %arg15[%c32, %c0_14] : memref<576x768xbf16, #tpu.memory_space<vmem>>, vector<16x768xbf16>
    tpu.vector_store %arg15[%c32, %c0_14], %13 {strides = array<i32>} : memref<576x768xbf16, #tpu.memory_space<vmem>>, vector<16x768xbf16>,
    %c0_15 = arith.constant 0 : index
    %c127 = arith.constant 127 : index
    %15 = vector.load %arg14[%c0_15, %c127] : memref<80x1024xbf16, #tpu.memory_space<vmem>>, vector<16x768xbf16>
    %c48 = arith.constant 48 : index
    %c0_16 = arith.constant 0 : index
    %16 = vector.load %arg15[%c48, %c0_16] : memref<576x768xbf16, #tpu.memory_space<vmem>>, vector<16x768xbf16>
    tpu.vector_store %arg15[%c48, %c0_16], %15 {strides = array<i32>} : memref<576x768xbf16, #tpu.memory_space<vmem>>, vector<16x768xbf16>,
    %c0_17 = arith.constant 0 : index
    %c128_18 = arith.constant 128 : index
    %17 = vector.load %arg14[%c0_17, %c128_18] : memref<80x1024xbf16, #tpu.memory_space<vmem>>, vector<16x768xbf16>
    %c64 = arith.constant 64 : index
    %c0_19 = arith.constant 0 : index
    %18 = vector.load %arg15[%c64, %c0_19] : memref<576x768xbf16, #tpu.memory_space<vmem>>, vector<16x768xbf16>
    tpu.vector_store %arg15[%c64, %c0_19], %17 {strides = array<i32>} : memref<576x768xbf16, #tpu.memory_space<vmem>>, vector<16x768xbf16>,
    %c0_20 = arith.constant 0 : index
    %c129 = arith.constant 129 : index
    %19 = vector.load %arg14[%c0_20, %c129] : memref<80x1024xbf16, #tpu.memory_space<vmem>>, vector<16x768xbf16>
    %c80 = arith.constant 80 : index
    %c0_21 = arith.constant 0 : index
    %20 = vector.load %arg15[%c80, %c0_21] : memref<576x768xbf16, #tpu.memory_space<vmem>>, vector<16x768xbf16>
    tpu.vector_store %arg15[%c80, %c0_21], %19 {strides = array<i32>} : memref<576x768xbf16, #tpu.memory_space<vmem>>, vector<16x768xbf16>,
    %c0_22 = arith.constant 0 : index
    %c145 = arith.constant 145 : index
    %21 = vector.load %arg14[%c0_22, %c145] : memref<80x1024xbf16, #tpu.memory_space<vmem>>, vector<16x768xbf16>
    %c96 = arith.constant 96 : index
    %c0_23 = arith.constant 0 : index
    %22 = vector.load %arg15[%c96, %c0_23] : memref<576x768xbf16, #tpu.memory_space<vmem>>, vector<16x768xbf16>
    tpu.vector_store %arg15[%c96, %c0_23], %21 {strides = array<i32>} : memref<576x768xbf16, #tpu.memory_space<vmem>>, vector<16x768xbf16>,
    %c0_24 = arith.constant 0 : index
    %c146 = arith.constant 146 : index
    %23 = vector.load %arg14[%c0_24, %c146] : memref<80x1024xbf16, #tpu.memory_space<vmem>>, vector<16x768xbf16>
    %c112 = arith.constant 112 : index
    %c0_25 = arith.constant 0 : index
    %24 = vector.load %arg15[%c112, %c0_25] : memref<576x768xbf16, #tpu.memory_space<vmem>>, vector<16x768xbf16>
    tpu.vector_store %arg15[%c112, %c0_25], %23 {strides = array<i32>} : memref<576x768xbf16, #tpu.memory_space<vmem>>, vector<16x768xbf16>,
    %c0_26 = arith.constant 0 : index
    %c147 = arith.constant 147 : index
    %25 = vector.load %arg14[%c0_26, %c147] : memref<80x1024xbf16, #tpu.memory_space<vmem>>, vector<16x768xbf16>
    %c128_27 = arith.constant 128 : index
    %c0_28 = arith.constant 0 : index
    %26 = vector.load %arg15[%c128_27, %c0_28] : memref<576x768xbf16, #tpu.memory_space<vmem>>, vector<16x768xbf16>
    tpu.vector_store %arg15[%c128_27, %c0_28], %25 {strides = array<i32>} : memref<576x768xbf16, #tpu.memory_space<vmem>>, vector<16x768xbf16>,
    %c0_29 = arith.constant 0 : index
    %c0_30 = arith.constant 0 : index
    %27 = vector.load %arg3[%c0_29, %c0_30] : memref<16x144xbf16, #tpu.memory_space<vmem>>, vector<16x144xbf16>
    %c0_31 = arith.constant 0 : index
    %c0_32 = arith.constant 0 : index
    %28 = vector.load %arg4[%c0_31, %c0_32] : memref<16x1xf32, #tpu.memory_space<vmem>>, vector<16x1xf32>
    %c0_33 = arith.constant 0 : index
    %c0_34 = arith.constant 0 : index
    %29 = vector.load %arg15[%c0_33, %c0_34] : memref<576x768xbf16, #tpu.memory_space<vmem>>, vector<144x768xbf16>
    %cst_35 = arith.constant dense<0.000000e+00> : vector<16x768xf32>
    %30 = tpu.matmul %27, %29, %cst_35 {dimension_numbers = #tpu.dot_dimension_numbers<[1], [0], [0], [1], [0, 0, 1, 1], [], []>} : vector<16x144xbf16>, vector<144x768xbf16>, vector<16x768xf32> -> vector<16x768xf32>
    %31 = vector.broadcast %28 : vector<16x1xf32> to vector<16x768xf32>
    %32 = arith.addf %30, %31 : vector<16x768xf32>
    %cst_36 = arith.constant 0.000000e+00 : f32
    %33 = vector.broadcast %cst_36 : f32 to vector<16x768xf32>
    %34 = arith.maximumf %32, %33 : vector<16x768xf32>
    %35 = arith.mulf %34, %8 : vector<16x768xf32>
    %36 = arith.truncf %35 : vector<16x768xf32> to vector<16x768xbf16>
    %c16_37 = arith.constant 16 : index
    %c128_38 = arith.constant 128 : index
    %37 = vector.load %arg14[%c16_37, %c128_38] : memref<80x1024xbf16, #tpu.memory_space<vmem>>, vector<16x768xbf16>
    tpu.vector_store %arg14[%c16_37, %c128_38], %36 {strides = array<i32>} : memref<80x1024xbf16, #tpu.memory_space<vmem>>, vector<16x768xbf16>,
    %c16_39 = arith.constant 16 : index
    %c109_40 = arith.constant 109 : index
    %38 = vector.load %arg14[%c16_39, %c109_40] : memref<80x1024xbf16, #tpu.memory_space<vmem>>, vector<16x768xbf16>
    %c144 = arith.constant 144 : index
    %c0_41 = arith.constant 0 : index
    %39 = vector.load %arg15[%c144, %c0_41] : memref<576x768xbf16, #tpu.memory_space<vmem>>, vector<16x768xbf16>
    tpu.vector_store %arg15[%c144, %c0_41], %38 {strides = array<i32>} : memref<576x768xbf16, #tpu.memory_space<vmem>>, vector<16x768xbf16>,
    %c16_42 = arith.constant 16 : index
    %c110_43 = arith.constant 110 : index
    %40 = vector.load %arg14[%c16_42, %c110_43] : memref<80x1024xbf16, #tpu.memory_space<vmem>>, vector<16x768xbf16>
    %c160 = arith.constant 160 : index
    %c0_44 = arith.constant 0 : index
    %41 = vector.load %arg15[%c160, %c0_44] : memref<576x768xbf16, #tpu.memory_space<vmem>>, vector<16x768xbf16>
    tpu.vector_store %arg15[%c160, %c0_44], %40 {strides = array<i32>} : memref<576x768xbf16, #tpu.memory_space<vmem>>, vector<16x768xbf16>,
    %c16_45 = arith.constant 16 : index
    %c111_46 = arith.constant 111 : index
    %42 = vector.load %arg14[%c16_45, %c111_46] : memref<80x1024xbf16, #tpu.memory_space<vmem>>, vector<16x768xbf16>
    %c176 = arith.constant 176 : index
    %c0_47 = arith.constant 0 : index
    %43 = vector.load %arg15[%c176, %c0_47] : memref<576x768xbf16, #tpu.memory_space<vmem>>, vector<16x768xbf16>
    tpu.vector_store %arg15[%c176, %c0_47], %42 {strides = array<i32>} : memref<576x768xbf16, #tpu.memory_space<vmem>>, vector<16x768xbf16>,
    %c16_48 = arith.constant 16 : index
    %c127_49 = arith.constant 127 : index
    %44 = vector.load %arg14[%c16_48, %c127_49] : memref<80x1024xbf16, #tpu.memory_space<vmem>>, vector<16x768xbf16>
    %c192 = arith.constant 192 : index
    %c0_50 = arith.constant 0 : index
    %45 = vector.load %arg15[%c192, %c0_50] : memref<576x768xbf16, #tpu.memory_space<vmem>>, vector<16x768xbf16>
    tpu.vector_store %arg15[%c192, %c0_50], %44 {strides = array<i32>} : memref<576x768xbf16, #tpu.memory_space<vmem>>, vector<16x768xbf16>,
    %c16_51 = arith.constant 16 : index
    %c128_52 = arith.constant 128 : index
    %46 = vector.load %arg14[%c16_51, %c128_52] : memref<80x1024xbf16, #tpu.memory_space<vmem>>, vector<16x768xbf16>
    %c208 = arith.constant 208 : index
    %c0_53 = arith.constant 0 : index
    %47 = vector.load %arg15[%c208, %c0_53] : memref<576x768xbf16, #tpu.memory_space<vmem>>, vector<16x768xbf16>
    tpu.vector_store %arg15[%c208, %c0_53], %46 {strides = array<i32>} : memref<576x768xbf16, #tpu.memory_space<vmem>>, vector<16x768xbf16>,
    %c16_54 = arith.constant 16 : index
    %c129_55 = arith.constant 129 : index
    %48 = vector.load %arg14[%c16_54, %c129_55] : memref<80x1024xbf16, #tpu.memory_space<vmem>>, vector<16x768xbf16>
    %c224 = arith.constant 224 : index
    %c0_56 = arith.constant 0 : index
    %49 = vector.load %arg15[%c224, %c0_56] : memref<576x768xbf16, #tpu.memory_space<vmem>>, vector<16x768xbf16>
    tpu.vector_store %arg15[%c224, %c0_56], %48 {strides = array<i32>} : memref<576x768xbf16, #tpu.memory_space<vmem>>, vector<16x768xbf16>,
    %c16_57 = arith.constant 16 : index
    %c145_58 = arith.constant 145 : index
    %50 = vector.load %arg14[%c16_57, %c145_58] : memref<80x1024xbf16, #tpu.memory_space<vmem>>, vector<16x768xbf16>
    %c240 = arith.constant 240 : index
    %c0_59 = arith.constant 0 : index
    %51 = vector.load %arg15[%c240, %c0_59] : memref<576x768xbf16, #tpu.memory_space<vmem>>, vector<16x768xbf16>
    tpu.vector_store %arg15[%c240, %c0_59], %50 {strides = array<i32>} : memref<576x768xbf16, #tpu.memory_space<vmem>>, vector<16x768xbf16>,
    %c16_60 = arith.constant 16 : index
    %c146_61 = arith.constant 146 : index
    %52 = vector.load %arg14[%c16_60, %c146_61] : memref<80x1024xbf16, #tpu.memory_space<vmem>>, vector<16x768xbf16>
    %c256 = arith.constant 256 : index
    %c0_62 = arith.constant 0 : index
    %53 = vector.load %arg15[%c256, %c0_62] : memref<576x768xbf16, #tpu.memory_space<vmem>>, vector<16x768xbf16>
    tpu.vector_store %arg15[%c256, %c0_62], %52 {strides = array<i32>} : memref<576x768xbf16, #tpu.memory_space<vmem>>, vector<16x768xbf16>,
    %c16_63 = arith.constant 16 : index
    %c147_64 = arith.constant 147 : index
    %54 = vector.load %arg14[%c16_63, %c147_64] : memref<80x1024xbf16, #tpu.memory_space<vmem>>, vector<16x768xbf16>
    %c272 = arith.constant 272 : index
    %c0_65 = arith.constant 0 : index
    %55 = vector.load %arg15[%c272, %c0_65] : memref<576x768xbf16, #tpu.memory_space<vmem>>, vector<16x768xbf16>
    tpu.vector_store %arg15[%c272, %c0_65], %54 {strides = array<i32>} : memref<576x768xbf16, #tpu.memory_space<vmem>>, vector<16x768xbf16>,
    %c0_66 = arith.constant 0 : index
    %c0_67 = arith.constant 0 : index
    %56 = vector.load %arg5[%c0_66, %c0_67] : memref<16x288xbf16, #tpu.memory_space<vmem>>, vector<16x288xbf16>
    %c0_68 = arith.constant 0 : index
    %c0_69 = arith.constant 0 : index
    %57 = vector.load %arg6[%c0_68, %c0_69] : memref<16x1xf32, #tpu.memory_space<vmem>>, vector<16x1xf32>
    %c0_70 = arith.constant 0 : index
    %c0_71 = arith.constant 0 : index
    %58 = vector.load %arg15[%c0_70, %c0_71] : memref<576x768xbf16, #tpu.memory_space<vmem>>, vector<288x768xbf16>
    %cst_72 = arith.constant dense<0.000000e+00> : vector<16x768xf32>
    %59 = tpu.matmul %56, %58, %cst_72 {dimension_numbers = #tpu.dot_dimension_numbers<[1], [0], [0], [1], [0, 0, 1, 1], [], []>} : vector<16x288xbf16>, vector<288x768xbf16>, vector<16x768xf32> -> vector<16x768xf32>
    %60 = vector.broadcast %57 : vector<16x1xf32> to vector<16x768xf32>
    %61 = arith.addf %59, %60 : vector<16x768xf32>
    %cst_73 = arith.constant 0.000000e+00 : f32
    %62 = vector.broadcast %cst_73 : f32 to vector<16x768xf32>
    %63 = arith.maximumf %61, %62 : vector<16x768xf32>
    %64 = arith.mulf %63, %8 : vector<16x768xf32>
    %65 = arith.truncf %64 : vector<16x768xf32> to vector<16x768xbf16>
    %c32_74 = arith.constant 32 : index
    %c128_75 = arith.constant 128 : index
    %66 = vector.load %arg14[%c32_74, %c128_75] : memref<80x1024xbf16, #tpu.memory_space<vmem>>, vector<16x768xbf16>
    tpu.vector_store %arg14[%c32_74, %c128_75], %65 {strides = array<i32>} : memref<80x1024xbf16, #tpu.memory_space<vmem>>, vector<16x768xbf16>,
    %c32_76 = arith.constant 32 : index
    %c109_77 = arith.constant 109 : index
    %67 = vector.load %arg14[%c32_76, %c109_77] : memref<80x1024xbf16, #tpu.memory_space<vmem>>, vector<16x768xbf16>
    %c288 = arith.constant 288 : index
    %c0_78 = arith.constant 0 : index
    %68 = vector.load %arg15[%c288, %c0_78] : memref<576x768xbf16, #tpu.memory_space<vmem>>, vector<16x768xbf16>
    tpu.vector_store %arg15[%c288, %c0_78], %67 {strides = array<i32>} : memref<576x768xbf16, #tpu.memory_space<vmem>>, vector<16x768xbf16>,
    %c32_79 = arith.constant 32 : index
    %c110_80 = arith.constant 110 : index
    %69 = vector.load %arg14[%c32_79, %c110_80] : memref<80x1024xbf16, #tpu.memory_space<vmem>>, vector<16x768xbf16>
    %c304 = arith.constant 304 : index
    %c0_81 = arith.constant 0 : index
    %70 = vector.load %arg15[%c304, %c0_81] : memref<576x768xbf16, #tpu.memory_space<vmem>>, vector<16x768xbf16>
    tpu.vector_store %arg15[%c304, %c0_81], %69 {strides = array<i32>} : memref<576x768xbf16, #tpu.memory_space<vmem>>, vector<16x768xbf16>,
    %c32_82 = arith.constant 32 : index
    %c111_83 = arith.constant 111 : index
    %71 = vector.load %arg14[%c32_82, %c111_83] : memref<80x1024xbf16, #tpu.memory_space<vmem>>, vector<16x768xbf16>
    %c320 = arith.constant 320 : index
    %c0_84 = arith.constant 0 : index
    %72 = vector.load %arg15[%c320, %c0_84] : memref<576x768xbf16, #tpu.memory_space<vmem>>, vector<16x768xbf16>
    tpu.vector_store %arg15[%c320, %c0_84], %71 {strides = array<i32>} : memref<576x768xbf16, #tpu.memory_space<vmem>>, vector<16x768xbf16>,
    %c32_85 = arith.constant 32 : index
    %c127_86 = arith.constant 127 : index
    %73 = vector.load %arg14[%c32_85, %c127_86] : memref<80x1024xbf16, #tpu.memory_space<vmem>>, vector<16x768xbf16>
    %c336 = arith.constant 336 : index
    %c0_87 = arith.constant 0 : index
    %74 = vector.load %arg15[%c336, %c0_87] : memref<576x768xbf16, #tpu.memory_space<vmem>>, vector<16x768xbf16>
    tpu.vector_store %arg15[%c336, %c0_87], %73 {strides = array<i32>} : memref<576x768xbf16, #tpu.memory_space<vmem>>, vector<16x768xbf16>,
    %c32_88 = arith.constant 32 : index
    %c128_89 = arith.constant 128 : index
    %75 = vector.load %arg14[%c32_88, %c128_89] : memref<80x1024xbf16, #tpu.memory_space<vmem>>, vector<16x768xbf16>
    %c352 = arith.constant 352 : index
    %c0_90 = arith.constant 0 : index
    %76 = vector.load %arg15[%c352, %c0_90] : memref<576x768xbf16, #tpu.memory_space<vmem>>, vector<16x768xbf16>
    tpu.vector_store %arg15[%c352, %c0_90], %75 {strides = array<i32>} : memref<576x768xbf16, #tpu.memory_space<vmem>>, vector<16x768xbf16>,
    %c32_91 = arith.constant 32 : index
    %c129_92 = arith.constant 129 : index
    %77 = vector.load %arg14[%c32_91, %c129_92] : memref<80x1024xbf16, #tpu.memory_space<vmem>>, vector<16x768xbf16>
    %c368 = arith.constant 368 : index
    %c0_93 = arith.constant 0 : index
    %78 = vector.load %arg15[%c368, %c0_93] : memref<576x768xbf16, #tpu.memory_space<vmem>>, vector<16x768xbf16>
    tpu.vector_store %arg15[%c368, %c0_93], %77 {strides = array<i32>} : memref<576x768xbf16, #tpu.memory_space<vmem>>, vector<16x768xbf16>,
    %c32_94 = arith.constant 32 : index
    %c145_95 = arith.constant 145 : index
    %79 = vector.load %arg14[%c32_94, %c145_95] : memref<80x1024xbf16, #tpu.memory_space<vmem>>, vector<16x768xbf16>
    %c384 = arith.constant 384 : index
    %c0_96 = arith.constant 0 : index
    %80 = vector.load %arg15[%c384, %c0_96] : memref<576x768xbf16, #tpu.memory_space<vmem>>, vector<16x768xbf16>
    tpu.vector_store %arg15[%c384, %c0_96], %79 {strides = array<i32>} : memref<576x768xbf16, #tpu.memory_space<vmem>>, vector<16x768xbf16>,
    %c32_97 = arith.constant 32 : index
    %c146_98 = arith.constant 146 : index
    %81 = vector.load %arg14[%c32_97, %c146_98] : memref<80x1024xbf16, #tpu.memory_space<vmem>>, vector<16x768xbf16>
    %c400 = arith.constant 400 : index
    %c0_99 = arith.constant 0 : index
    %82 = vector.load %arg15[%c400, %c0_99] : memref<576x768xbf16, #tpu.memory_space<vmem>>, vector<16x768xbf16>
    tpu.vector_store %arg15[%c400, %c0_99], %81 {strides = array<i32>} : memref<576x768xbf16, #tpu.memory_space<vmem>>, vector<16x768xbf16>,
    %c32_100 = arith.constant 32 : index
    %c147_101 = arith.constant 147 : index
    %83 = vector.load %arg14[%c32_100, %c147_101] : memref<80x1024xbf16, #tpu.memory_space<vmem>>, vector<16x768xbf16>
    %c416 = arith.constant 416 : index
    %c0_102 = arith.constant 0 : index
    %84 = vector.load %arg15[%c416, %c0_102] : memref<576x768xbf16, #tpu.memory_space<vmem>>, vector<16x768xbf16>
    tpu.vector_store %arg15[%c416, %c0_102], %83 {strides = array<i32>} : memref<576x768xbf16, #tpu.memory_space<vmem>>, vector<16x768xbf16>,
    %c0_103 = arith.constant 0 : index
    %c0_104 = arith.constant 0 : index
    %85 = vector.load %arg7[%c0_103, %c0_104] : memref<16x432xbf16, #tpu.memory_space<vmem>>, vector<16x432xbf16>
    %c0_105 = arith.constant 0 : index
    %c0_106 = arith.constant 0 : index
    %86 = vector.load %arg8[%c0_105, %c0_106] : memref<16x1xf32, #tpu.memory_space<vmem>>, vector<16x1xf32>
    %c0_107 = arith.constant 0 : index
    %c0_108 = arith.constant 0 : index
    %87 = vector.load %arg15[%c0_107, %c0_108] : memref<576x768xbf16, #tpu.memory_space<vmem>>, vector<432x768xbf16>
    %cst_109 = arith.constant dense<0.000000e+00> : vector<16x768xf32>
    %88 = tpu.matmul %85, %87, %cst_109 {dimension_numbers = #tpu.dot_dimension_numbers<[1], [0], [0], [1], [0, 0, 1, 1], [], []>} : vector<16x432xbf16>, vector<432x768xbf16>, vector<16x768xf32> -> vector<16x768xf32>
    %89 = vector.broadcast %86 : vector<16x1xf32> to vector<16x768xf32>
    %90 = arith.addf %88, %89 : vector<16x768xf32>
    %cst_110 = arith.constant 0.000000e+00 : f32
    %91 = vector.broadcast %cst_110 : f32 to vector<16x768xf32>
    %92 = arith.maximumf %90, %91 : vector<16x768xf32>
    %93 = arith.mulf %92, %8 : vector<16x768xf32>
    %94 = arith.truncf %93 : vector<16x768xf32> to vector<16x768xbf16>
    %c48_111 = arith.constant 48 : index
    %c128_112 = arith.constant 128 : index
    %95 = vector.load %arg14[%c48_111, %c128_112] : memref<80x1024xbf16, #tpu.memory_space<vmem>>, vector<16x768xbf16>
    tpu.vector_store %arg14[%c48_111, %c128_112], %94 {strides = array<i32>} : memref<80x1024xbf16, #tpu.memory_space<vmem>>, vector<16x768xbf16>,
    %c48_113 = arith.constant 48 : index
    %c109_114 = arith.constant 109 : index
    %96 = vector.load %arg14[%c48_113, %c109_114] : memref<80x1024xbf16, #tpu.memory_space<vmem>>, vector<16x768xbf16>
    %c432 = arith.constant 432 : index
    %c0_115 = arith.constant 0 : index
    %97 = vector.load %arg15[%c432, %c0_115] : memref<576x768xbf16, #tpu.memory_space<vmem>>, vector<16x768xbf16>
    tpu.vector_store %arg15[%c432, %c0_115], %96 {strides = array<i32>} : memref<576x768xbf16, #tpu.memory_space<vmem>>, vector<16x768xbf16>,
    %c48_116 = arith.constant 48 : index
    %c110_117 = arith.constant 110 : index
    %98 = vector.load %arg14[%c48_116, %c110_117] : memref<80x1024xbf16, #tpu.memory_space<vmem>>, vector<16x768xbf16>
    %c448 = arith.constant 448 : index
    %c0_118 = arith.constant 0 : index
    %99 = vector.load %arg15[%c448, %c0_118] : memref<576x768xbf16, #tpu.memory_space<vmem>>, vector<16x768xbf16>
    tpu.vector_store %arg15[%c448, %c0_118], %98 {strides = array<i32>} : memref<576x768xbf16, #tpu.memory_space<vmem>>, vector<16x768xbf16>,
    %c48_119 = arith.constant 48 : index
    %c111_120 = arith.constant 111 : index
    %100 = vector.load %arg14[%c48_119, %c111_120] : memref<80x1024xbf16, #tpu.memory_space<vmem>>, vector<16x768xbf16>
    %c464 = arith.constant 464 : index
    %c0_121 = arith.constant 0 : index
    %101 = vector.load %arg15[%c464, %c0_121] : memref<576x768xbf16, #tpu.memory_space<vmem>>, vector<16x768xbf16>
    tpu.vector_store %arg15[%c464, %c0_121], %100 {strides = array<i32>} : memref<576x768xbf16, #tpu.memory_space<vmem>>, vector<16x768xbf16>,
    %c48_122 = arith.constant 48 : index
    %c127_123 = arith.constant 127 : index
    %102 = vector.load %arg14[%c48_122, %c127_123] : memref<80x1024xbf16, #tpu.memory_space<vmem>>, vector<16x768xbf16>
    %c480 = arith.constant 480 : index
    %c0_124 = arith.constant 0 : index
    %103 = vector.load %arg15[%c480, %c0_124] : memref<576x768xbf16, #tpu.memory_space<vmem>>, vector<16x768xbf16>
    tpu.vector_store %arg15[%c480, %c0_124], %102 {strides = array<i32>} : memref<576x768xbf16, #tpu.memory_space<vmem>>, vector<16x768xbf16>,
    %c48_125 = arith.constant 48 : index
    %c128_126 = arith.constant 128 : index
    %104 = vector.load %arg14[%c48_125, %c128_126] : memref<80x1024xbf16, #tpu.memory_space<vmem>>, vector<16x768xbf16>
    %c496 = arith.constant 496 : index
    %c0_127 = arith.constant 0 : index
    %105 = vector.load %arg15[%c496, %c0_127] : memref<576x768xbf16, #tpu.memory_space<vmem>>, vector<16x768xbf16>
    tpu.vector_store %arg15[%c496, %c0_127], %104 {strides = array<i32>} : memref<576x768xbf16, #tpu.memory_space<vmem>>, vector<16x768xbf16>,
    %c48_128 = arith.constant 48 : index
    %c129_129 = arith.constant 129 : index
    %106 = vector.load %arg14[%c48_128, %c129_129] : memref<80x1024xbf16, #tpu.memory_space<vmem>>, vector<16x768xbf16>
    %c512 = arith.constant 512 : index
    %c0_130 = arith.constant 0 : index
    %107 = vector.load %arg15[%c512, %c0_130] : memref<576x768xbf16, #tpu.memory_space<vmem>>, vector<16x768xbf16>
    tpu.vector_store %arg15[%c512, %c0_130], %106 {strides = array<i32>} : memref<576x768xbf16, #tpu.memory_space<vmem>>, vector<16x768xbf16>,
    %c48_131 = arith.constant 48 : index
    %c145_132 = arith.constant 145 : index
    %108 = vector.load %arg14[%c48_131, %c145_132] : memref<80x1024xbf16, #tpu.memory_space<vmem>>, vector<16x768xbf16>
    %c528 = arith.constant 528 : index
    %c0_133 = arith.constant 0 : index
    %109 = vector.load %arg15[%c528, %c0_133] : memref<576x768xbf16, #tpu.memory_space<vmem>>, vector<16x768xbf16>
    tpu.vector_store %arg15[%c528, %c0_133], %108 {strides = array<i32>} : memref<576x768xbf16, #tpu.memory_space<vmem>>, vector<16x768xbf16>,
    %c48_134 = arith.constant 48 : index
    %c146_135 = arith.constant 146 : index
    %110 = vector.load %arg14[%c48_134, %c146_135] : memref<80x1024xbf16, #tpu.memory_space<vmem>>, vector<16x768xbf16>
    %c544 = arith.constant 544 : index
    %c0_136 = arith.constant 0 : index
    %111 = vector.load %arg15[%c544, %c0_136] : memref<576x768xbf16, #tpu.memory_space<vmem>>, vector<16x768xbf16>
    tpu.vector_store %arg15[%c544, %c0_136], %110 {strides = array<i32>} : memref<576x768xbf16, #tpu.memory_space<vmem>>, vector<16x768xbf16>,
    %c48_137 = arith.constant 48 : index
    %c147_138 = arith.constant 147 : index
    %112 = vector.load %arg14[%c48_137, %c147_138] : memref<80x1024xbf16, #tpu.memory_space<vmem>>, vector<16x768xbf16>
    %c560 = arith.constant 560 : index
    %c0_139 = arith.constant 0 : index
    %113 = vector.load %arg15[%c560, %c0_139] : memref<576x768xbf16, #tpu.memory_space<vmem>>, vector<16x768xbf16>
    tpu.vector_store %arg15[%c560, %c0_139], %112 {strides = array<i32>} : memref<576x768xbf16, #tpu.memory_space<vmem>>, vector<16x768xbf16>,
    %c0_140 = arith.constant 0 : index
    %c0_141 = arith.constant 0 : index
    %114 = vector.load %arg9[%c0_140, %c0_141] : memref<16x576xbf16, #tpu.memory_space<vmem>>, vector<16x576xbf16>
    %c0_142 = arith.constant 0 : index
    %c0_143 = arith.constant 0 : index
    %115 = vector.load %arg10[%c0_142, %c0_143] : memref<16x1xf32, #tpu.memory_space<vmem>>, vector<16x1xf32>
    %c0_144 = arith.constant 0 : index
    %c0_145 = arith.constant 0 : index
    %116 = vector.load %arg15[%c0_144, %c0_145] : memref<576x768xbf16, #tpu.memory_space<vmem>>, vector<576x768xbf16>
    %cst_146 = arith.constant dense<0.000000e+00> : vector<16x768xf32>
    %117 = tpu.matmul %114, %116, %cst_146 {dimension_numbers = #tpu.dot_dimension_numbers<[1], [0], [0], [1], [0, 0, 1, 1], [], []>} : vector<16x576xbf16>, vector<576x768xbf16>, vector<16x768xf32> -> vector<16x768xf32>
    %118 = vector.broadcast %115 : vector<16x1xf32> to vector<16x768xf32>
    %119 = arith.addf %117, %118 : vector<16x768xf32>
    %cst_147 = arith.constant 0.000000e+00 : f32
    %120 = vector.broadcast %cst_147 : f32 to vector<16x768xf32>
    %121 = arith.maximumf %119, %120 : vector<16x768xf32>
    %122 = arith.mulf %121, %8 : vector<16x768xf32>
    %123 = arith.truncf %122 : vector<16x768xf32> to vector<16x768xbf16>
    %c64_148 = arith.constant 64 : index
    %c128_149 = arith.constant 128 : index
    %124 = vector.load %arg14[%c64_148, %c128_149] : memref<80x1024xbf16, #tpu.memory_space<vmem>>, vector<16x768xbf16>
    tpu.vector_store %arg14[%c64_148, %c128_149], %123 {strides = array<i32>} : memref<80x1024xbf16, #tpu.memory_space<vmem>>, vector<16x768xbf16>,
    %c0_150 = arith.constant 0 : index
    %c0_151 = arith.constant 0 : index
    %125 = vector.load %arg11[%c0_150, %c0_151] : memref<16x80xbf16, #tpu.memory_space<vmem>>, vector<16x80xbf16>
    %c0_152 = arith.constant 0 : index
    %c0_153 = arith.constant 0 : index
    %126 = vector.load %arg12[%c0_152, %c0_153] : memref<16x1xf32, #tpu.memory_space<vmem>>, vector<16x1xf32>
    %c0_154 = arith.constant 0 : index
    %c128_155 = arith.constant 128 : index
    %127 = vector.load %arg14[%c0_154, %c128_155] : memref<80x1024xbf16, #tpu.memory_space<vmem>>, vector<80x768xbf16>
    %cst_156 = arith.constant dense<0.000000e+00> : vector<16x768xf32>
    %128 = tpu.matmul %125, %127, %cst_156 {dimension_numbers = #tpu.dot_dimension_numbers<[1], [0], [0], [1], [0, 0, 1, 1], [], []>} : vector<16x80xbf16>, vector<80x768xbf16>, vector<16x768xf32> -> vector<16x768xf32>
    %129 = vector.broadcast %126 : vector<16x1xf32> to vector<16x768xf32>
    %130 = arith.addf %128, %129 : vector<16x768xf32>
    %131 = vector.shape_cast %6 : vector<1x768xf32> to vector<1x768xf32>
    %132 = vector.broadcast %131 : vector<1x768xf32> to vector<16x768xf32>
    %133 = arith.mulf %130, %132 : vector<16x768xf32>
    %c0_157 = arith.constant 0 : index
    %c128_158 = arith.constant 128 : index
    %134 = vector.load %arg14[%c0_157, %c128_158] : memref<80x1024xbf16, #tpu.memory_space<vmem>>, vector<16x768xbf16>
    %135 = arith.extf %134 : vector<16x768xbf16> to vector<16x768xf32>
    %136 = arith.addf %133, %135 : vector<16x768xf32>
    %137 = arith.truncf %136 : vector<16x768xf32> to vector<16x768xbf16>
    %c0_159 = arith.constant 0 : index
    %c0_160 = arith.constant 0 : index
    %c0_161 = arith.constant 0 : index
    %138 = vector.load %arg13[%c0_159, %c0_160, %c0_161] : memref<1x16x768xbf16, #tpu.memory_space<vmem>>, vector<1x16x768xbf16>
    %139 = vector.shape_cast %138 : vector<1x16x768xbf16> to vector<16x768xbf16>
    %140 = vector.shape_cast %137 : vector<16x768xbf16> to vector<1x16x768xbf16>
    tpu.vector_store %arg13[%c0_159, %c0_160, %c0_161], %140 {strides = array<i32>} : memref<1x16x768xbf16, #tpu.memory_space<vmem>>, vector<1x16x768xbf16>,
    return
  }
  func.func @transform_0(%arg0: i32) -> (i32, i32, i32) {
    %c0_i32 = arith.constant 0 : i32
    %c0_i32_0 = arith.constant 0 : i32
    %c0_i32_1 = arith.constant 0 : i32
    return %arg0, %c0_i32, %c0_i32_0 : i32, i32, i32
  }
  func.func @transform_1(%arg0: i32) -> (i32, i32) {
    %c0_i32 = arith.constant 0 : i32
    %c0_i32_0 = arith.constant 0 : i32
    %c0_i32_1 = arith.constant 0 : i32
    return %c0_i32, %c0_i32_0 : i32, i32
  }
  func.func @transform_2(%arg0: i32) -> (i32, i32) {
    %c0_i32 = arith.constant 0 : i32
    %c0_i32_0 = arith.constant 0 : i32
    %c0_i32_1 = arith.constant 0 : i32
    return %c0_i32, %c0_i32_0 : i32, i32
  }
  func.func @transform_3(%arg0: i32) -> (i32, i32) {
    %c0_i32 = arith.constant 0 : i32
    %c0_i32_0 = arith.constant 0 : i32
    %c0_i32_1 = arith.constant 0 : i32
    return %c0_i32, %c0_i32_0 : i32, i32
  }
  func.func @transform_4(%arg0: i32) -> (i32, i32) {
    %c0_i32 = arith.constant 0 : i32
    %c0_i32_0 = arith.constant 0 : i32
    %c0_i32_1 = arith.constant 0 : i32
    return %c0_i32, %c0_i32_0 : i32, i32
  }
  func.func @transform_5(%arg0: i32) -> (i32, i32) {
    %c0_i32 = arith.constant 0 : i32
    %c0_i32_0 = arith.constant 0 : i32
    %c0_i32_1 = arith.constant 0 : i32
    return %c0_i32, %c0_i32_0 : i32, i32
  }
  func.func @transform_6(%arg0: i32) -> (i32, i32) {
    %c0_i32 = arith.constant 0 : i32
    %c0_i32_0 = arith.constant 0 : i32
    %c0_i32_1 = arith.constant 0 : i32
    return %c0_i32, %c0_i32_0 : i32, i32
  }
  func.func @transform_7(%arg0: i32) -> (i32, i32) {
    %c0_i32 = arith.constant 0 : i32
    %c0_i32_0 = arith.constant 0 : i32
    %c0_i32_1 = arith.constant 0 : i32
    return %c0_i32, %c0_i32_0 : i32, i32
  }
  func.func @transform_8(%arg0: i32) -> (i32, i32) {
    %c0_i32 = arith.constant 0 : i32
    %c0_i32_0 = arith.constant 0 : i32
    %c0_i32_1 = arith.constant 0 : i32
    return %c0_i32, %c0_i32_0 : i32, i32
  }
  func.func @transform_9(%arg0: i32) -> (i32, i32) {
    %c0_i32 = arith.constant 0 : i32
    %c0_i32_0 = arith.constant 0 : i32
    %c0_i32_1 = arith.constant 0 : i32
    return %c0_i32, %c0_i32_0 : i32, i32
  }
  func.func @transform_10(%arg0: i32) -> (i32, i32) {
    %c0_i32 = arith.constant 0 : i32
    %c0_i32_0 = arith.constant 0 : i32
    %c0_i32_1 = arith.constant 0 : i32
    return %c0_i32, %c0_i32_0 : i32, i32
  }
  func.func @transform_11(%arg0: i32) -> (i32, i32) {
    %c0_i32 = arith.constant 0 : i32
    %c0_i32_0 = arith.constant 0 : i32
    %c0_i32_1 = arith.constant 0 : i32
    return %c0_i32, %c0_i32_0 : i32, i32
  }
  func.func @transform_12(%arg0: i32) -> (i32, i32, i32) {
    %c0_i32 = arith.constant 0 : i32
    %c0_i32_0 = arith.constant 0 : i32
    %c0_i32_1 = arith.constant 0 : i32
    return %arg0, %c0_i32, %c0_i32_0 : i32, i32, i32
  }
}

</mosaic_0001>

<bundles_post_ra>
// kernel: tpu_custom_call.1
= control target key start
LH: loop header
LB: loop body
LE: loop exit
PB: predicated region body
PF: predicated region fallthrough
CT: control target
= control target key end

     0   :  { %17 = vsyncpa [#allocation5], 0  ;;  %s12654_s0 = inlined_call_operand.hbm [shape: bf16[1,16,768], index: 0, kind: input, shape index: {}]   ;;  %s12655_s1 = inlined_call_operand.hbm [shape: f32[1,768], index: 1, kind: input, shape index: {}]   ;;  %s12656_s2 = inlined_call_operand.vmem [shape: bf16[16,144], index: 2, kind: input, shape index: {}]   ;;  %s12657_s3 = inlined_call_operand.vmem [shape: f32[16,1], index: 3, kind: input, shape index: {}]   ;;  %s12658_s4 = inlined_call_operand.vmem [shape: bf16[16,288], index: 4, kind: input, shape index: {}]   ;;  %s12659_s5 = inlined_call_operand.vmem [shape: f32[16,1], index: 5, kind: input, shape index: {}]   ;;  %s12660_s6 = inlined_call_operand.vmem [shape: bf16[16,432], index: 6, kind: input, shape index: {}]   ;;  %s12661_s7 = inlined_call_operand.vmem [shape: f32[16,1], index: 7, kind: input, shape index: {}]   ;;  %s12662_s8 = inlined_call_operand.hbm [shape: bf16[16,576], index: 8, kind: input, shape index: {}]   ;;  %s12663_s9 = inlined_call_operand.vmem [shape: f32[16,1], index: 9, kind: input, shape index: {}]   ;;  %s12664_s10 = inlined_call_operand.vmem [shape: bf16[16,80], index: 10, kind: input, shape index: {}]   ;;  %s12665_s11 = inlined_call_operand.vmem [shape: f32[16,1], index: 11, kind: input, shape index: {}]   ;;  %s12666_s12 = inlined_call_operand.hbm [shape: bf16[1,16,768], index: 12, kind: output, shape index: {}]  }
   0x1   :  { %18 = vsyncpa [#allocation8], 0  ;;  %s38_s23 = sshll.u32 %s12655_s1, 4  ;;  %s39_s23 = int_to_ptr.hbm [resolvable:$true] %s38_s23 }
   0x2   :  { %19 = vsyncpa [#allocation6], 0  ;;  %s10385_s24 = smov [#allocation7]   ;;  %s24_s28 = sshll.u32 %s12654_s0, 4  ;;  %s25_s28 = int_to_ptr.hbm [resolvable:$true] %s24_s28 }
   0x3   :  { %s40_s25 = sshll.u32 %s10385_s24, 4  ;;  %s10386_s29 = smov [#allocation4]   ;;  %s41_s25 = int_to_ptr.vmem [resolvable:$true] %s40_s25 }
   0x4   :  { %43 = dma.hbm_to_vmem [thread:$0]  %s39_s23, 96, %s41_s25, [#allocation8]  }
   0x5   :  { %s26_s30 = sshll.u32 %s10386_s29, 4  ;;  %s10387_s13 = smov 384   ;;  %s27_s30 = int_to_ptr.vmem [resolvable:$true] %s26_s30 }
   0x6   :  { %s10388_s14 = smov 24   ;;  %s60_s16 = sshll.u32 %s12662_s8, 4  ;;  %s61_s16 = int_to_ptr.hbm [resolvable:$true] %s60_s16 }
   0x7   :  { %32 = dma.hbm_to_vmem [thread:$0]  %s25_s28, 768, %s27_s30, [#allocation5], %s10387_s13, %s10387_s13, %s10388_s14  }
   0x8   :  { %s10389_s17 = smov [#allocation9]   ;;  %s10390_s0 = smov 320  }
   0x9   :  { %s62_s18 = sshll.u32 %s10389_s17, 4  ;;  %s10391_s19 = smov 20   ;;  %s63_s18 = int_to_ptr.vmem [resolvable:$true] %s62_s18 }
   0xa   :  { %68 = dma.hbm_to_vmem [thread:$0]  %s61_s16, 640, %s63_s18, [#allocation8], %s10390_s0, %s10390_s0, %s10391_s19  }
   0xb   :  { %10379 = dma.done.wait [#allocation5], 768  }
   0xc   :  { %10380 = vsyncadd [#allocation5], 4294966528 }
   0xd   :  { %10381 = dma.done.wait [#allocation8], 736  }
   0xe   :  { %10382 = vsyncadd [#allocation8], 4294966560  ;;  %v111_v0 = vld [vmem:[#allocation4 + $0x18] sm:$0xff]  ;;  %v108_v1 = vld [vmem:[#allocation4] sm:$0xff]  ;;  %s10392_s20 = smov 110   ;;  %s10393_s8 = smov 111  }
   0xf   :  { %117 = vst [vmem:[#allocation2 + $0x24] sm:$0xff] %v111_v0  ;;  %561 = vrot.lane.b32.xlu1 %v111_v0, %s10392_s20  ;;  %553 = vrot.lane.b32.xlu0 %v108_v1, %s10392_s20  ;;  %v112_v2 = vld [vmem:[#allocation4 + $0x20] sm:$0xff]  ;;  %v109_v3 = vld [vmem:[#allocation4 + $0x8] sm:$0xff]  ;;  %v110_v4 = vld [vmem:[#allocation4 + $0x10] sm:$0xff]  ;;  %v10394_v6 = vmov 0   ;;  %s10395_s21 = smov 109  }
  0x10   :  { %114 = vst [vmem:[#allocation2 + $0x4] sm:$0xff] %v108_v1  ;;  %488 = vrot.lane.b32.xlu2 %v108_v1, %s10393_s8  ;;  %v113_v5 = vld [vmem:[#allocation4 + $0x28] sm:$0xff]  ;;  %10280 = vset.pattern.permute.xlu1 %v10394_v6  ;;  %s10396_s22 = smov 127   ;;  %s10397_s23 = smov 1   ;;  %vm174_vm0 = vcmask 1043456   ;;  %vm513_vm1 = vcmask 908288  }
  0x11   :  { %118 = vst [vmem:[#allocation2 + $0x2c] sm:$0xff] %v112_v2  ;;  %10281 = vset.pattern.permute.xlu2 %v10394_v6  ;;  %10282 = vset.pattern.permute.xlu0 %v10394_v6  ;;  %s10398_s24 = smov 17   ;;  %s10399_s25 = smov 18   ;;  %vm578_vm2 = vcmask 900096   ;;  %vm643_vm3 = vcmask 891904   ;;  %vm448_vm4 = vcmask 1039360  }
  0x12   :  { %115 = vst [vmem:[#allocation2 + $0xc] sm:$0xff] %v109_v3  ;;  %s10400_s26 = smov 19   ;;  %vm371_vm5 = vcmask 7168   ;;  %vm1014_vm6 = vcmask 130048   ;;  %vm306_vm7 = vcmask 138240   ;;  %vm241_vm8 = vcmask 146432  }
  0x13   :  { %116 = vst [vmem:[#allocation2 + $0x14] sm:$0xff] %v110_v4  ;;  %vm176_vm9 = vcmask 154624   ;;  %vm2425_vm10 = vcmask 261120   ;;  %vm4248_vm11 = vcmask 392192   ;;  %vm6487_vm12 = vcmask 523264   ;;  %s7294_s16 = sshll.u32 %s12666_s12, 4  ;;  %s7295_s16 = int_to_ptr.hbm [resolvable:$true] %s7294_s16 }
  0x14   :  { %401 = vst [vmem:[#allocation3 + $0xc0] sm:$0xff] %v108_v1  ;;  %vm7146_vm13 = vcmask 654336  }
  0x15   :  { %404 = vst [vmem:[#allocation3 + $0xd8] sm:$0xff] %v111_v0 }
  0x16   :  { %402 = vst [vmem:[#allocation3 + $0xc8] sm:$0xff] %v109_v3 }
  0x17   :  { %563 = vrot.lane.b32.xlu1 %v112_v2, %s10392_s20  ;;  %555 = vrot.lane.b32.xlu0 %v109_v3, %s10392_s20  ;;  %405 = vst [vmem:[#allocation3 + $0xe0] sm:$0xff] %v112_v2 }
  0x18   :  { %490 = vrot.lane.b32.xlu2 %v109_v3, %s10393_s8  ;;  %119 = vst [vmem:[#allocation2 + $0x34] sm:$0xff] %v113_v5  ;;  %v335_v10 = vld [vmem:[#allocation2 + $0x28] sm:$0xff] }
  0x19   :  { %88 = vst [vmem:[#allocation2] sm:$0xf] %v10394_v6  ;;  %v331_v8 = vld [vmem:[#allocation2 + $0x8] sm:$0xff] }
  0x1a   :  { %89 = vst [vmem:[#allocation2 + $0x20] sm:$0xf] %v10394_v6  ;;  %v332_v12 = vld [vmem:[#allocation2 + $0x10] sm:$0xff] }
  0x1b   :  { %90 = vst [vmem:[#allocation2 + $0x40] sm:$0xf] %v10394_v6 }
  0x1c   :  { %91 = vst [vmem:[#allocation2 + $0x60] sm:$0xf] %v10394_v6 }
  0x1d   :  { %92 = vst [vmem:[#allocation2 + $0x80] sm:$0xf] %v10394_v6 }
  0x1e   :  { %93 = vst [vmem:[#allocation2 + $0xa0] sm:$0xf] %v10394_v6 }
  0x1f   :  { %498 = vrot.lane.b32.xlu1 %v112_v2, %s10393_s8  ;;  %496 = vrot.lane.b32.xlu0 %v111_v0, %s10393_s8  ;;  %94 = vst [vmem:[#allocation2 + $0xc0] sm:$0xf] %v10394_v6  ;;  %v336_v13 = vld [vmem:[#allocation2 + $0x30] sm:$0xff] }
  0x20   :  { %618 = vrot.lane.b32.xlu2 %v108_v1, %s10395_s21  ;;  %95 = vst [vmem:[#allocation2 + $0xe0] sm:$0xf] %v10394_v6  ;;  %v330_v7 = vld [vmem:[#allocation2] sm:$0xff] }
  0x21   :  { %98 = vst [vmem:[#allocation2 + $0x1c] sm:$0xf] %v10394_v6  ;;  %v334_v9 = vld [vmem:[#allocation2 + $0x20] sm:$0xff] }
  0x22   :  { %99 = vst [vmem:[#allocation2 + $0x3c] sm:$0xf] %v10394_v6 }
  0x23   :  { %100 = vst [vmem:[#allocation2 + $0x5c] sm:$0xf] %v10394_v6 }
  0x24   :  { %101 = vst [vmem:[#allocation2 + $0x7c] sm:$0xf] %v10394_v6 }
  0x25   :  { %102 = vst [vmem:[#allocation2 + $0x9c] sm:$0xf] %v10394_v6 }
  0x26   :  { %103 = vst [vmem:[#allocation2 + $0xbc] sm:$0xf] %v10394_v6 }
  0x27   :  { %626 = vrot.lane.b32.xlu1 %v111_v0, %s10395_s21  ;;  %620 = vrot.lane.b32.xlu0 %v109_v3, %s10395_s21  ;;  %104 = vst [vmem:[#allocation2 + $0xdc] sm:$0xf] %v10394_v6 }
  0x28   :  { %628 = vrot.lane.b32.xlu2 %v112_v2, %s10395_s21  ;;  %105 = vst [vmem:[#allocation2 + $0xfc] sm:$0xf] %v10394_v6  ;;  %v540_v32 = vld [vmem:[#allocation2 + $0x1c] sm:$0xf] }
  0x29   :  { %v544_v33 = vld [vmem:[#allocation2 + $0x3c] sm:$0xf] }
  0x2a   :  { %v475_v36 = vld [vmem:[#allocation2 + $0x1c] sm:$0xf] }
  0x2b   :  { %v479_v44 = vld [vmem:[#allocation2 + $0x3c] sm:$0xf] }
  0x2c   :  { %v410_v45 = vld [vmem:[#allocation2 + $0x1c] sm:$0xf] }
  0x2d   :  { %v414_v48 = vld [vmem:[#allocation2 + $0x3c] sm:$0xf] }
  0x2f   :  { %425 = vrot.lane.b32.xlu1 %v109_v3, %s10396_s22  ;;  %423 = vrot.lane.b32.xlu0 %v108_v1, %s10396_s22  ;;  %v337_v3 = vld [vmem:[#allocation2 + $0x38] sm:$0xf] }
  0x30   :  { %431 = vrot.lane.b32.xlu2 %v111_v0, %s10396_s22 }
  0x37   :  { %557 = vrot.lane.b32.xlu1 %v110_v4, %s10392_s20  ;;  %433 = vrot.lane.b32.xlu0 %v112_v2, %s10396_s22  ;;  %v333_v2 = vld [vmem:[#allocation2 + $0x18] sm:$0xf] }
  0x38   :  { %565 = vrot.lane.b32.xlu2 %v113_v5, %s10392_s20 }
  0x3f   :  { %500 = vrot.lane.b32.xlu1 %v113_v5, %s10393_s8  ;;  %492 = vrot.lane.b32.xlu0 %v110_v4, %s10393_s8 }
  0x40   :  { %346 = vrot.lane.b32.xlu2 %v330_v7, %s10397_s23 }
  0x47   :  { %348 = vrot.lane.b32.xlu0 %v331_v8, %s10397_s23  ;;  %354 = vrot.lane.b32.xlu1 %v334_v9, %s10397_s23 }
  0x48   :  { %356 = vrot.lane.b32.xlu2 %v335_v10, %s10397_s23 }
  0x4f   :  { %427 = vrot.lane.b32.xlu0 %v110_v4, %s10396_s22  ;;  %435 = vrot.lane.b32.xlu1 %v113_v5, %s10396_s22 }
  0x50   :  { %281 = vrot.lane.b32.xlu2 %v330_v7, %s10398_s24 }
  0x57   :  { %283 = vrot.lane.b32.xlu0 %v331_v8, %s10398_s24  ;;  %289 = vrot.lane.b32.xlu1 %v334_v9, %s10398_s24 }
  0x58   :  { %291 = vrot.lane.b32.xlu2 %v335_v10, %s10398_s24 }
  0x5f   :  { %622 = vrot.lane.b32.xlu0 %v110_v4, %s10395_s21  ;;  %630 = vrot.lane.b32.xlu1 %v113_v5, %s10395_s21 }
  0x60   :  { %216 = vrot.lane.b32.xlu2 %v330_v7, %s10399_s25 }
  0x67   :  { %218 = vrot.lane.b32.xlu0 %v331_v8, %s10399_s25  ;;  %224 = vrot.lane.b32.xlu1 %v334_v9, %s10399_s25 }
  0x68   :  { %226 = vrot.lane.b32.xlu2 %v335_v10, %s10399_s25 }
  0x6a   :  { %v489_v11 = vpop.permute.xlu2 %488 }
  0x6b   :  { %v504_v14 = vrot.slane %v489_v11, 4 }
  0x6f   :  { %350 = vrot.lane.b32.xlu0 %v332_v12, %s10397_s23  ;;  %358 = vrot.lane.b32.xlu1 %v336_v13, %s10397_s23 }
  0x70   :  { %150 = vrot.lane.b32.xlu2 %v330_v7, %s10400_s26  ;;  %v268_v7 = vld [vmem:[#allocation2 + $0x18] sm:$0xf] }
  0x72   :  { %v10518_v15 = vpop.permute.xlu2 %490 }
  0x73   :  { %v505_v16 = vrot.slane %v10518_v15, 4 }
  0x75   :  { %v512_v17 = vsel %vm174_vm0, %v504_v14, %v505_v16 }
  0x76   :  { %v514_v18 = vsel %vm513_vm1, %v489_v11, %v512_v17 }
  0x77   :  { %531 = vst [vmem:[#allocation3 + $0x120] sm:$0xff] %v514_v18  ;;  %152 = vrot.lane.b32.xlu0 %v331_v8, %s10400_s26  ;;  %158 = vrot.lane.b32.xlu1 %v334_v9, %s10400_s26 }
  0x78   :  { %160 = vrot.lane.b32.xlu2 %v335_v10, %s10400_s26 }
  0x7a   :  { %v10528_v19 = vpop.permute.xlu2 %618 }
  0x7b   :  { %v634_v59 = vrot.slane %v10528_v19, 4 }
  0x7e   :  { %v7462_v63 = vld [vmem:[#allocation3 + $0x120] sm:$0xf]  ;;  %v9716_v4 = vld [vmem:[#allocation3 + $0x124] sm:$0xf] }
  0x7f   :  { %285 = vrot.lane.b32.xlu0 %v332_v12, %s10398_s24  ;;  %293 = vrot.lane.b32.xlu1 %v336_v13, %s10398_s24 }
  0x80   :  { %220 = vrot.lane.b32.xlu2 %v332_v12, %s10399_s25 }
  0x81   :  { %v562_v20 = vpop.permute.xlu1 %561  ;;  %v554_v21 = vpop.permute.xlu0 %553 }
  0x82   :  { %v10533_v22 = vpop.permute.xlu2 %628  ;;  %v573_v25 = vrot.slane %v562_v20, 4  ;;  %v569_v26 = vrot.slane %v554_v21, 4 }
  0x83   :  { %v639_v56 = vrot.slane %v10533_v22, 4 }
  0x87   :  { %228 = vrot.lane.b32.xlu0 %v336_v13, %s10399_s25  ;;  %154 = vrot.lane.b32.xlu1 %v332_v12, %s10400_s26 }
  0x88   :  { %162 = vrot.lane.b32.xlu2 %v336_v13, %s10400_s26 }
  0x89   :  { %v564_v23 = vpop.permute.xlu1 %563  ;;  %v10538_v24 = vpop.permute.xlu0 %555 }
  0x8a   :  { %v574_v27 = vrot.slane %v564_v23, 4  ;;  %v570_v28 = vrot.slane %v10538_v24, 4  ;;  %v10541_v29 = vpop.permute.xlu2 %431 }
  0x8c   :  { %v584_v30 = vsel %vm174_vm0, %v573_v25, %v574_v27  ;;  %v577_v31 = vsel %vm174_vm0, %v569_v26, %v570_v28  ;;  %v609_v25 = vld [vmem:[#allocation2 + $0x3c] sm:$0xf] }
  0x8d   :  { %v585_v34 = vsel %vm578_vm2, %v562_v20, %v584_v30  ;;  %v579_v35 = vsel %vm578_vm2, %v554_v21, %v577_v31  ;;  %v272_v20 = vld [vmem:[#allocation2 + $0x38] sm:$0xf]  ;;  %v605_v21 = vld [vmem:[#allocation2 + $0x1c] sm:$0xf] }
  0x8e   :  { %599 = vst [vmem:[#allocation3 + $0x168] sm:$0xff] %v585_v34 }
  0x8f   :  { %596 = vst [vmem:[#allocation3 + $0x150] sm:$0xff] %v579_v35  ;;  %559 = vrot.lane.b32.xlu0 %v540_v32, %s10392_s20  ;;  %567 = vrot.lane.b32.xlu1 %v544_v33, %s10392_s20 }
  0x90   :  { %494 = vrot.lane.b32.xlu2 %v475_v36, %s10393_s8  ;;  %v443_v36 = vrot.slane %v10541_v29, 4 }
  0x91   :  { %v10552_v37 = vpop.permute.xlu1 %498  ;;  %v497_v38 = vpop.permute.xlu0 %496 }
  0x92   :  { %v509_v39 = vrot.slane %v10552_v37, 4  ;;  %v508_v40 = vrot.slane %v497_v38, 4  ;;  %v10555_v41 = vpop.permute.xlu2 %565 }
  0x93   :  { %v575_v42 = vrot.slane %v10555_v41, 4 }
  0x94   :  { %v519_v43 = vsel %vm174_vm0, %v508_v40, %v509_v39 }
  0x95   :  { %v520_v46 = vsel %vm513_vm1, %v497_v38, %v519_v43  ;;  %v586_v47 = vsel %vm174_vm0, %v574_v27, %v575_v42  ;;  %v9725_v49 = vld [vmem:[#allocation3 + $0x164] sm:$0xf0]  ;;  %v7488_v50 = vld [vmem:[#allocation3 + $0x168] sm:$0xf0] }
  0x96   :  { %534 = vst [vmem:[#allocation3 + $0x138] sm:$0xff] %v520_v46  ;;  %v587_v51 = vsel %vm578_vm2, %v564_v23, %v586_v47  ;;  %v7486_v52 = vld [vmem:[#allocation3 + $0x150] sm:$0xf]  ;;  %v9722_v53 = vld [vmem:[#allocation3 + $0x154] sm:$0xf] }
  0x97   :  { %600 = vst [vmem:[#allocation3 + $0x170] sm:$0xff] %v587_v51  ;;  %502 = vrot.lane.b32.xlu0 %v479_v44, %s10393_s8  ;;  %429 = vrot.lane.b32.xlu1 %v410_v45, %s10396_s22  ;;  %v7487_v54 = vor.u32 %v9725_v49, %v7486_v52  ;;  %v7491_v55 = vor.u32 %v9722_v53, %v7488_v50  ;;  %v203_v46 = vld [vmem:[#allocation2 + $0x18] sm:$0xf] }
  0x98   :  { %437 = vrot.lane.b32.xlu2 %v414_v48, %s10396_s22  ;;  %v207_v47 = vld [vmem:[#allocation2 + $0x38] sm:$0xf] }
  0x99   :  { %1018 = vmatpush.bf16.msra.mxu0 %v7487_v54  ;;  %1046 = vmatpush.bf16.msra.mxu2 %v7491_v55  ;;  %v627_v57 = vpop.permute.xlu1 %626  ;;  %v10570_v58 = vpop.permute.xlu0 %620  ;;  %v137_v50 = vld [vmem:[#allocation2 + $0x18] sm:$0xf] }
  0x9a   :  { %v638_v60 = vrot.slane %v627_v57, 4  ;;  %v635_v61 = vrot.slane %v10570_v58, 4  ;;  %v10574_v62 = vpop.permute.xlu2 %346 }
  0x9c   :  { %v649_v0 = vsel %vm174_vm0, %v638_v60, %v639_v56  ;;  %v642_v1 = vsel %vm174_vm0, %v634_v59, %v635_v61  ;;  %v7414_v59 = vld [vmem:[#allocation3 + $0xc0] sm:$0xf]  ;;  %v9707_v60 = vld [vmem:[#allocation3 + $0xd4] sm:$0xf0] }
  0x9d   :  { %v650_v5 = vsel %vm643_vm3, %v627_v57, %v649_v0  ;;  %v644_v6 = vsel %vm643_vm3, %v10528_v19, %v642_v1  ;;  %v9719_v8 = vld [vmem:[#allocation3 + $0x134] sm:$0xf0]  ;;  %v7464_v9 = vld [vmem:[#allocation3 + $0x138] sm:$0xf0] }
  0x9e   :  { %664 = vst [vmem:[#allocation3 + $0x198] sm:$0xff] %v650_v5  ;;  %v7463_v10 = vor.u32 %v9719_v8, %v7462_v63  ;;  %v7467_v11 = vor.u32 %v9716_v4, %v7464_v9  ;;  %v9726_v54 = vld [vmem:[#allocation3 + $0x16c] sm:$0xf0]  ;;  %v9704_v63 = vld [vmem:[#allocation3 + $0xc4] sm:$0xf] }
  0x9f   :  { %661 = vst [vmem:[#allocation3 + $0x180] sm:$0xff] %v644_v6  ;;  %352 = vrot.lane.b32.xlu0 %v333_v2, %s10397_s23  ;;  %360 = vrot.lane.b32.xlu1 %v337_v3, %s10397_s23  ;;  %v7416_v0 = vld [vmem:[#allocation3 + $0xd8] sm:$0xf0] }
  0xa0   :  { %287 = vrot.lane.b32.xlu2 %v268_v7, %s10398_s24  ;;  %1019 = vmatpush.bf16.msra.mxu0 %v7463_v10  ;;  %v7415_v10 = vor.u32 %v9707_v60, %v7414_v59 }
  0xa1   :  { %1047 = vmatpush.bf16.msra.mxu2 %v7467_v11  ;;  %v10588_v12 = vpop.permute.xlu1 %425  ;;  %v424_v13 = vpop.permute.xlu0 %423  ;;  %v7419_v11 = vor.u32 %v9704_v63, %v7416_v0 }
  0xa2   :  { %v440_v14 = vrot.slane %v10588_v12, 4  ;;  %v439_v17 = vrot.slane %v424_v13, 4  ;;  %v10591_v18 = vpop.permute.xlu2 %356 }
  0xa3   :  { %v367_v9 = vrot.slane %v10591_v18, 4 }
  0xa4   :  { %v447_v19 = vsel %vm174_vm0, %v439_v17, %v440_v14 }
  0xa5   :  { %v449_v23 = vsel %vm448_vm4, %v424_v13, %v447_v19  ;;  %v9731_v26 = vld [vmem:[#allocation3 + $0x194] sm:$0xf0]  ;;  %v7512_v27 = vld [vmem:[#allocation3 + $0x198] sm:$0xf0]  ;;  %v362_v13 = vrot.slane %v10574_v62, 4 }
  0xa6   :  { %466 = vst [vmem:[#allocation3 + $0xf0] sm:$0xff] %v449_v23  ;;  %v7510_v30 = vld [vmem:[#allocation3 + $0x180] sm:$0xf]  ;;  %v9728_v31 = vld [vmem:[#allocation3 + $0x184] sm:$0xf] }
  0xa7   :  { %295 = vrot.lane.b32.xlu0 %v272_v20, %s10398_s24  ;;  %624 = vrot.lane.b32.xlu1 %v605_v21, %s10395_s21  ;;  %v7511_v32 = vor.u32 %v9731_v26, %v7510_v30  ;;  %v7515_v33 = vor.u32 %v9728_v31, %v7512_v27 }
  0xa8   :  { %632 = vrot.lane.b32.xlu2 %v609_v25, %s10395_s21 }
  0xa9   :  { %1039 = vmatpush.bf16.msra.mxu1 %v7511_v32  ;;  %1067 = vmatpush.bf16.msra.mxu3 %v7515_v33  ;;  %v10600_v34 = vpop.permute.xlu1 %557  ;;  %v10602_v35 = vpop.permute.xlu0 %433  ;;  %v9678_v32 = vld [vmem:[%s12656_s2 + $0x4] sm:$0xf]  ;;  %v7312_v33 = vld [vmem:[%s12656_s2 + $0x8] sm:$0xf0] }
  0xaa   :  { %v571_v38 = vrot.slane %v10600_v34, 4  ;;  %v444_v40 = vrot.slane %v10602_v35, 4  ;;  %v10607_v43 = vpop.permute.xlu2 %281 }
  0xac   :  { %v580_v44 = vsel %vm174_vm0, %v570_v28, %v571_v38  ;;  %v454_v45 = vsel %vm174_vm0, %v443_v36, %v444_v40 }
  0xad   :  { %v581_v48 = vsel %vm578_vm2, %v10538_v24, %v580_v44  ;;  %v455_v49 = vsel %vm448_vm4, %v10541_v29, %v454_v45  ;;  %v141_v29 = vld [vmem:[#allocation2 + $0x38] sm:$0xf]  ;;  %v7438_v3 = vld [vmem:[#allocation3 + $0xf0] sm:$0xf]  ;;  %v9710_v4 = vld [vmem:[#allocation3 + $0xf4] sm:$0xf]  ;;  %v10673_v44 = vor.u32 %v9678_v32, %v7312_v33 }
  0xae   :  { %597 = vst [vmem:[#allocation3 + $0x158] sm:$0xff] %v581_v48 }
  0xaf   :  { %469 = vst [vmem:[#allocation3 + $0x108] sm:$0xff] %v455_v49  ;;  %222 = vrot.lane.b32.xlu0 %v203_v46, %s10399_s25  ;;  %230 = vrot.lane.b32.xlu1 %v207_v47, %s10399_s25 }
  0xb0   :  { %156 = vrot.lane.b32.xlu2 %v137_v50, %s10400_s26  ;;  %7533 = vmatmul.msk.bf16.vlgmr.msra.gmra.mxu3 %vm1014_vm6, %v10673_v44 }
  0xb1   :  { %v10624_v28 = vpop.permute.xlu1 %500  ;;  %v10626_v51 = vpop.permute.xlu0 %492  ;;  %7532 = vmatmul.msk.bf16.vlgmr.msra.gmra.mxu1 %vm1014_vm6, %v10673_v44 }
  0xb2   :  { %v510_v52 = vrot.slane %v10624_v28, 4  ;;  %v506_v24 = vrot.slane %v10626_v51, 4  ;;  %v10630_v53 = vpop.permute.xlu2 %291 }
  0xb3   :  { %v302_v63 = vrot.slane %v10630_v53, 4 }
  0xb4   :  { %v521_v55 = vsel %vm174_vm0, %v509_v39, %v510_v52  ;;  %v515_v57 = vsel %vm174_vm0, %v505_v16, %v506_v24 }
  0xb5   :  { %v522_v1 = vsel %vm513_vm1, %v10552_v37, %v521_v55  ;;  %v516_v2 = vsel %vm513_vm1, %v10518_v15, %v515_v57  ;;  %v7494_v5 = vld [vmem:[#allocation3 + $0x158] sm:$0xf] }
  0xb6   :  { %535 = vst [vmem:[#allocation3 + $0x140] sm:$0xff] %v522_v1  ;;  %v9713_v39 = vld [vmem:[#allocation3 + $0x104] sm:$0xf0]  ;;  %v7440_v6 = vld [vmem:[#allocation3 + $0x108] sm:$0xf0]  ;;  %v7495_v7 = vor.u32 %v9726_v54, %v7494_v5 }
  0xb7   :  { %532 = vst [vmem:[#allocation3 + $0x128] sm:$0xff] %v516_v2  ;;  %164 = vrot.lane.b32.xlu0 %v141_v29, %s10400_s26  ;;  %v7439_v16 = vor.u32 %v9713_v39, %v7438_v3  ;;  %v7443_v8 = vor.u32 %v9710_v4, %v7440_v6 }
  0xb8   :  { %1074 = vmatpush.bf16.msrb.mxu1 %v7495_v7  ;;  %v7422_v7 = vld [vmem:[#allocation3 + $0xc8] sm:$0xf] }
  0xb9   :  { %1020 = vmatpush.bf16.msra.mxu0 %v7439_v16  ;;  %1048 = vmatpush.bf16.msra.mxu2 %v7443_v8  ;;  %v10648_v37 = vpop.permute.xlu0 %348  ;;  %v355_v15 = vpop.permute.xlu1 %354  ;;  %v9708_v8 = vld [vmem:[#allocation3 + $0xdc] sm:$0xf0] }
  0xba   :  { %v363_v17 = vrot.slane %v10648_v37, 4  ;;  %v366_v19 = vrot.slane %v355_v15, 4  ;;  %v10652_v20 = vpop.permute.xlu2 %216 }
  0xbc   :  { %v370_v21 = vsel %vm174_vm0, %v362_v13, %v363_v17  ;;  %v377_v23 = vsel %vm174_vm0, %v366_v19, %v367_v9  ;;  %v7423_v13 = vor.u32 %v9708_v8, %v7422_v7 }
  0xbd   :  { %v372_v25 = vsel %vm371_vm5, %v10574_v62, %v370_v21  ;;  %v378_v26 = vsel %vm371_vm5, %v355_v15, %v377_v23  ;;  %v9720_v27 = vld [vmem:[#allocation3 + $0x13c] sm:$0xf0]  ;;  %1021 = vmatpush.bf16.msra.mxu0 %v7415_v10  ;;  %1049 = vmatpush.bf16.msra.mxu2 %v7419_v11 }
  0xbe   :  { %389 = vst [vmem:[#allocation3 + $0x90] sm:$0xff] %v372_v25  ;;  %v7470_v30 = vld [vmem:[#allocation3 + $0x128] sm:$0xf]  ;;  %v9717_v8 = vld [vmem:[#allocation3 + $0x12c] sm:$0xf] }
  0xbf   :  { %392 = vst [vmem:[#allocation3 + $0xa8] sm:$0xff] %v378_v26  ;;  %v7471_v31 = vor.u32 %v9720_v27, %v7470_v30 }
  0xc1   :  { %1075 = vmatpush.bf16.msrb.mxu1 %v7471_v31  ;;  %v10669_v36 = vpop.permute.xlu0 %427  ;;  %v10671_v62 = vpop.permute.xlu1 %435 }
  0xc2   :  { %v441_v45 = vrot.slane %v10669_v36, 4  ;;  %v445_v46 = vrot.slane %v10671_v62, 4  ;;  %v10677_v47 = vpop.permute.xlu2 %226 }
  0xc4   :  { %v450_v48 = vsel %vm174_vm0, %v440_v14, %v441_v45  ;;  %v456_v49 = vsel %vm174_vm0, %v444_v40, %v445_v46 }
  0xc5   :  { %v451_v50 = vsel %vm448_vm4, %v10588_v12, %v450_v48  ;;  %v457_v29 = vsel %vm448_vm4, %v10602_v35, %v456_v49  ;;  %v7390_v54 = vld [vmem:[#allocation3 + $0x90] sm:$0xf]  ;;  %v9698_v55 = vld [vmem:[#allocation3 + $0x94] sm:$0xf]  ;;  %v297_v12 = vrot.slane %v10607_v43, 4  ;;  %v237_v49 = vrot.slane %v10677_v47, 4 }
  0xc6   :  { %467 = vst [vmem:[#allocation3 + $0xf8] sm:$0xff] %v451_v50  ;;  %v9701_v57 = vld [vmem:[#allocation3 + $0xa4] sm:$0xf0]  ;;  %v7392_v59 = vld [vmem:[#allocation3 + $0xa8] sm:$0xf0] }
  0xc7   :  { %470 = vst [vmem:[#allocation3 + $0x110] sm:$0xff] %v457_v29  ;;  %v7391_v60 = vor.u32 %v9701_v57, %v7390_v54  ;;  %v7395_v14 = vor.u32 %v9698_v55, %v7392_v59 }
  0xc9   :  { %1022 = vmatpush.bf16.msra.mxu0 %v7391_v60  ;;  %1050 = vmatpush.bf16.msra.mxu2 %v7395_v14  ;;  %v10698_v0 = vpop.permute.xlu0 %283  ;;  %v290_v40 = vpop.permute.xlu1 %289 }
  0xca   :  { %v298_v35 = vrot.slane %v10698_v0, 4  ;;  %v301_v1 = vrot.slane %v290_v40, 4  ;;  %v10702_v2 = vpop.permute.xlu2 %150 }
  0xcc   :  { %v305_v3 = vsel %vm174_vm0, %v297_v12, %v298_v35  ;;  %v312_v4 = vsel %vm174_vm0, %v301_v1, %v302_v63  ;;  %v9723_v1 = vld [vmem:[#allocation3 + $0x15c] sm:$0xf] }
  0xcd   :  { %v307_v5 = vsel %vm306_vm7, %v10607_v43, %v305_v3  ;;  %v313_v39 = vsel %vm306_vm7, %v290_v40, %v312_v4  ;;  %v7446_v6 = vld [vmem:[#allocation3 + $0xf8] sm:$0xf] }
  0xce   :  { %324 = vst [vmem:[#allocation3 + $0x60] sm:$0xff] %v307_v5  ;;  %v9714_v16 = vld [vmem:[#allocation3 + $0x10c] sm:$0xf0] }
  0xcf   :  { %327 = vst [vmem:[#allocation3 + $0x78] sm:$0xff] %v313_v39  ;;  %v7447_v15 = vor.u32 %v9714_v16, %v7446_v6  ;;  %v7496_v39 = vld [vmem:[#allocation3 + $0x170] sm:$0xf0] }
  0xd0   :  { %v7499_v6 = vor.u32 %v9723_v1, %v7496_v39 }
  0xd1   :  { %1076 = vmatpush.bf16.msrb.mxu1 %v7447_v15  ;;  %v10713_v10 = vpop.permute.xlu0 %622  ;;  %v10715_v11 = vpop.permute.xlu1 %630  ;;  %v7472_v15 = vld [vmem:[#allocation3 + $0x140] sm:$0xf0] }
  0xd2   :  { %v636_v19 = vrot.slane %v10713_v10, 4  ;;  %v640_v21 = vrot.slane %v10715_v11, 4  ;;  %v10719_v43 = vpop.permute.xlu2 %160 }
  0xd3   :  { %v171_v7 = vrot.slane %v10719_v43, 4 }
  0xd4   :  { %v645_v23 = vsel %vm174_vm0, %v635_v61, %v636_v19  ;;  %v651_v25 = vsel %vm174_vm0, %v639_v56, %v640_v21 }
  0xd5   :  { %v646_v26 = vsel %vm643_vm3, %v10570_v58, %v645_v23  ;;  %v652_v27 = vsel %vm643_vm3, %v10533_v22, %v651_v25  ;;  %v7366_v30 = vld [vmem:[#allocation3 + $0x60] sm:$0xf]  ;;  %v9692_v31 = vld [vmem:[#allocation3 + $0x64] sm:$0xf]  ;;  %1077 = vmatpush.bf16.msrb.mxu1 %v7423_v13  ;;  %v232_v58 = vrot.slane %v10652_v20, 4 }
  0xd6   :  { %662 = vst [vmem:[#allocation3 + $0x188] sm:$0xff] %v646_v26  ;;  %v9695_v32 = vld [vmem:[#allocation3 + $0x74] sm:$0xf0]  ;;  %v7368_v33 = vld [vmem:[#allocation3 + $0x78] sm:$0xf0] }
  0xd7   :  { %665 = vst [vmem:[#allocation3 + $0x1a0] sm:$0xff] %v652_v27  ;;  %v7367_v61 = vor.u32 %v9695_v32, %v7366_v30  ;;  %v7371_v48 = vor.u32 %v9692_v31, %v7368_v33  ;;  %v7475_v31 = vor.u32 %v9717_v8, %v7472_v15  ;;  %v9711_v32 = vld [vmem:[#allocation3 + $0xfc] sm:$0xf] }
  0xd9   :  { %1023 = vmatpush.bf16.msra.mxu0 %v7367_v61  ;;  %1051 = vmatpush.bf16.msra.mxu2 %v7371_v48  ;;  %v219_v56 = vpop.permute.xlu0 %218  ;;  %v225_v50 = vpop.permute.xlu1 %224 }
  0xda   :  { %v233_v29 = vrot.slane %v219_v56, 4  ;;  %v236_v22 = vrot.slane %v225_v50, 4  ;;  %v10737_v54 = vpop.permute.xlu2 %220 }
  0xdb   :  { %v234_v55 = vrot.slane %v10737_v54, 4 }
  0xdc   :  { %v240_v57 = vsel %vm174_vm0, %v232_v58, %v233_v29  ;;  %v247_v59 = vsel %vm174_vm0, %v236_v22, %v237_v49 }
  0xdd   :  { %v242_v60 = vsel %vm241_vm8, %v10652_v20, %v240_v57  ;;  %v248_v14 = vsel %vm241_vm8, %v225_v50, %v247_v59  ;;  %v243_v40 = vsel %vm174_vm0, %v233_v29, %v234_v55  ;;  %v7518_v12 = vld [vmem:[#allocation3 + $0x188] sm:$0xf]  ;;  %v7448_v50 = vld [vmem:[#allocation3 + $0x110] sm:$0xf0]  ;;  %v9705_v57 = vld [vmem:[#allocation3 + $0xcc] sm:$0xf] }
  0xde   :  { %259 = vst [vmem:[#allocation3 + $0x30] sm:$0xff] %v242_v60  ;;  %v244_v3 = vsel %vm241_vm8, %v219_v56, %v243_v40  ;;  %v9732_v4 = vld [vmem:[#allocation3 + $0x19c] sm:$0xf0]  ;;  %v7424_v59 = vld [vmem:[#allocation3 + $0xe0] sm:$0xf0]  ;;  %v166_v40 = vrot.slane %v10702_v2, 4 }
  0xdf   :  { %262 = vst [vmem:[#allocation3 + $0x48] sm:$0xff] %v248_v14  ;;  %v7519_v5 = vor.u32 %v9732_v4, %v7518_v12 }
  0xe0   :  { %260 = vst [vmem:[#allocation3 + $0x38] sm:$0xff] %v244_v3  ;;  %v7427_v3 = vor.u32 %v9705_v57, %v7424_v59 }
  0xe1   :  { %1095 = vmatpush.bf16.msrb.mxu3 %v7519_v5  ;;  %v10752_v20 = vpop.permute.xlu0 %350  ;;  %v10754_v16 = vpop.permute.xlu1 %358 }
  0xe2   :  { %v364_v13 = vrot.slane %v10752_v20, 4  ;;  %v368_v23 = vrot.slane %v10754_v16, 4  ;;  %v10758_v25 = vpop.permute.xlu2 %162 }
  0xe3   :  { %v172_v26 = vrot.slane %v10758_v25, 4 }
  0xe4   :  { %v373_v27 = vsel %vm174_vm0, %v363_v17, %v364_v13  ;;  %v379_v30 = vsel %vm174_vm0, %v367_v9, %v368_v23  ;;  %7534 = vmatmul.msk.bf16.vlgmr.msrb.gmra.mxu3 %vm1014_vm6, %v10673_v44 }
  0xe5   :  { %1102 = vmatpush.bf16.msra.mxu3 %v7499_v6  ;;  %v374_v33 = vsel %vm371_vm5, %v10648_v37, %v373_v27  ;;  %v380_v61 = vsel %vm371_vm5, %v10591_v18, %v379_v30  ;;  %v184_v17 = vsel %vm174_vm0, %v171_v7, %v172_v26  ;;  %v7342_v48 = vld [vmem:[#allocation3 + $0x30] sm:$0xf]  ;;  %v9686_v56 = vld [vmem:[#allocation3 + $0x34] sm:$0xf]  ;;  %v7451_v18 = vor.u32 %v9711_v32, %v7448_v50 }
  0xe6   :  { %390 = vst [vmem:[#allocation3 + $0x98] sm:$0xff] %v374_v33  ;;  %v185_v9 = vsel %vm176_vm9, %v10719_v43, %v184_v17  ;;  %v9689_v58 = vld [vmem:[#allocation3 + $0x44] sm:$0xf0]  ;;  %v7344_v29 = vld [vmem:[#allocation3 + $0x48] sm:$0xf0] }
  0xe7   :  { %393 = vst [vmem:[#allocation3 + $0xb0] sm:$0xff] %v380_v61  ;;  %v7343_v22 = vor.u32 %v9689_v58, %v7342_v48  ;;  %v7347_v37 = vor.u32 %v9686_v56, %v7344_v29  ;;  %v9729_v29 = vld [vmem:[#allocation3 + $0x18c] sm:$0xf] }
  0xe8   :  { %198 = vst [vmem:[#allocation3 + $0x20] sm:$0xff] %v185_v9 }
  0xe9   :  { %1103 = vmatpush.bf16.msra.mxu3 %v7475_v31  ;;  %1024 = vmatpush.bf16.msra.mxu0 %v7343_v22  ;;  %v10782_v60 = vpop.permute.xlu0 %152  ;;  %v159_v14 = vpop.permute.xlu1 %158  ;;  %v669_v31 = vld [vmem:[%s12657_s3] sm:$0xff] }
  0xea   :  { %1052 = vmatpush.bf16.msra.mxu2 %v7347_v37  ;;  %v167_v12 = vrot.slane %v10782_v60, 4  ;;  %v170_v43 = vrot.slane %v159_v14, 4  ;;  %v495_v1 = vpop.permute.xlu2 %494  ;;  %727 = vperm.xlu1 %10280, %v669_v31   ;;  %v7310_v22 = vld [vmem:[%s12656_s2] sm:$0xf]  ;;  %v9679_v37 = vld [vmem:[%s12656_s2 + $0x4] sm:$0xf0] }
  0xeb   :  { %v507_v4 = vrot.slane %v495_v1, 4 }
  0xec   :  { %v175_v5 = vsel %vm174_vm0, %v166_v40, %v167_v12  ;;  %v182_v39 = vsel %vm174_vm0, %v170_v43, %v171_v7 }
  0xed   :  { %1104 = vmatpush.bf16.msra.mxu3 %v7451_v18  ;;  %v177_v6 = vsel %vm176_vm9, %v10702_v2, %v175_v5  ;;  %v183_v8 = vsel %vm176_vm9, %v159_v14, %v182_v39  ;;  %v517_v15 = vsel %vm174_vm0, %v506_v24, %v507_v4  ;;  %v7398_v27 = vld [vmem:[#allocation3 + $0x98] sm:$0xf]  ;;  %v9699_v30 = vld [vmem:[#allocation3 + $0x9c] sm:$0xf]  ;;  %v7520_v14 = vld [vmem:[#allocation3 + $0x1a0] sm:$0xf0] }
  0xee   :  { %194 = vst [vmem:[#allocation3] sm:$0xff] %v177_v6  ;;  %v518_v32 = vsel %vm513_vm1, %v10626_v51, %v517_v15  ;;  %v9702_v7 = vld [vmem:[#allocation3 + $0xac] sm:$0xf0]  ;;  %v7400_v33 = vld [vmem:[#allocation3 + $0xb0] sm:$0xf0]  ;;  %v7523_v5 = vor.u32 %v9729_v29, %v7520_v14 }
  0xef   :  { %197 = vst [vmem:[#allocation3 + $0x18] sm:$0xff] %v183_v8  ;;  %v7399_v2 = vor.u32 %v9702_v7, %v7398_v27  ;;  %v7403_v61 = vor.u32 %v9699_v30, %v7400_v33  ;;  %v400_v39 = vld [vmem:[#allocation2 + $0x34] sm:$0xff]  ;;  %v9687_v14 = vld [vmem:[#allocation3 + $0x3c] sm:$0xf] }
  0xf0   :  { %533 = vst [vmem:[#allocation3 + $0x130] sm:$0xff] %v518_v32 }
  0xf1   :  { %1105 = vmatpush.bf16.msra.mxu3 %v7427_v3  ;;  %1078 = vmatpush.bf16.msrb.mxu1 %v7399_v2  ;;  %v286_v24 = vpop.permute.xlu0 %285  ;;  %v10801_v17 = vpop.permute.xlu1 %293  ;;  %406 = vst [vmem:[#allocation3 + $0xe8] sm:$0xff] %v400_v39  ;;  %v7328_v39 = vld [vmem:[#allocation3 + $0x20] sm:$0xf0] }
  0xf2   :  { %v299_v48 = vrot.slane %v286_v24, 4  ;;  %v303_v56 = vrot.slane %v10801_v17, 4  ;;  %v438_v50 = vpop.permute.xlu2 %437 }
  0xf3   :  { %v446_v9 = vrot.slane %v438_v50, 4 }
  0xf4   :  { %v308_v51 = vsel %vm174_vm0, %v298_v35, %v299_v48  ;;  %v314_v58 = vsel %vm174_vm0, %v302_v63, %v303_v56 }
  0xf5   :  { %1106 = vmatpush.bf16.msra.mxu3 %v7403_v61  ;;  %v309_v57 = vsel %vm306_vm7, %v10698_v0, %v308_v51  ;;  %v315_v35 = vsel %vm306_vm7, %v10630_v53, %v314_v58  ;;  %v458_v59 = vsel %vm174_vm0, %v445_v46, %v446_v9  ;;  %v7318_v63 = vld [vmem:[#allocation3] sm:$0xf]  ;;  %v9680_v18 = vld [vmem:[#allocation3 + $0x4] sm:$0xf]  ;;  %v397_v0 = vld [vmem:[#allocation2 + $0x14] sm:$0xff]  ;;  %v10827_v53 = vor.u32 %v9679_v37, %v7310_v22 }
  0xf6   :  { %325 = vst [vmem:[#allocation3 + $0x68] sm:$0xff] %v309_v57  ;;  %v459_v40 = vsel %vm448_vm4, %v10671_v62, %v458_v59  ;;  %v9683_v43 = vld [vmem:[#allocation3 + $0x14] sm:$0xf0]  ;;  %v7320_v1 = vld [vmem:[#allocation3 + $0x18] sm:$0xf0] }
  0xf7   :  { %328 = vst [vmem:[#allocation3 + $0x80] sm:$0xff] %v315_v35  ;;  %v7319_v3 = vor.u32 %v9683_v43, %v7318_v63  ;;  %v7323_v4 = vor.u32 %v9680_v18, %v7320_v1  ;;  %v7350_v57 = vld [vmem:[#allocation3 + $0x38] sm:$0xf] }
  0xf8   :  { %471 = vst [vmem:[#allocation3 + $0x118] sm:$0xff] %v459_v40 }
  0xf9   :  { %1025 = vmatpush.bf16.msra.mxu0 %v7319_v3  ;;  %1053 = vmatpush.bf16.msra.mxu2 %v7323_v4  ;;  %v10829_v46 = vpop.permute.xlu0 %228  ;;  %v10831_v6 = vpop.permute.xlu1 %154  ;;  %403 = vst [vmem:[#allocation3 + $0xd0] sm:$0xff] %v397_v0 }
  0xfa   :  { %v238_v62 = vrot.slane %v10829_v46, 4  ;;  %v168_v8 = vrot.slane %v10831_v6, 4  ;;  %v288_v15 = vpop.permute.xlu2 %287 }
  0xfb   :  { %v300_v27 = vrot.slane %v288_v15, 4 }
  0xfc   :  { %v249_v30 = vsel %vm174_vm0, %v237_v49, %v238_v62  ;;  %v178_v31 = vsel %vm174_vm0, %v167_v12, %v168_v8  ;;  %1026 = vmatmul.bf16.vlgmr.msra.gmra.mxu0 %v10827_v53  ;;  %1054 = vmatmul.bf16.vlgmr.msra.gmra.mxu2 %v10827_v53 }
  0xfd   :  { %1123 = vmatpush.bf16.msrb.mxu0 %v7523_v5  ;;  %v250_v32 = vsel %vm241_vm8, %v10677_v47, %v249_v30  ;;  %v179_v7 = vsel %vm176_vm9, %v10782_v60, %v178_v31  ;;  %v310_v33 = vsel %vm174_vm0, %v299_v48, %v300_v27  ;;  %v7374_v2 = vld [vmem:[#allocation3 + $0x68] sm:$0xf]  ;;  %v9693_v49 = vld [vmem:[#allocation3 + $0x6c] sm:$0xf]  ;;  %v9684_v5 = vld [vmem:[#allocation3 + $0x1c] sm:$0xf0] }
  0xfe   :  { %263 = vst [vmem:[#allocation3 + $0x50] sm:$0xff] %v250_v32  ;;  %v311_v61 = vsel %vm306_vm7, %v286_v24, %v310_v33  ;;  %v9696_v50 = vld [vmem:[#allocation3 + $0x7c] sm:$0xf0]  ;;  %v7376_v9 = vld [vmem:[#allocation3 + $0x80] sm:$0xf0] }
  0xff   :  { %195 = vst [vmem:[#allocation3 + $0x8] sm:$0xff] %v179_v7  ;;  %v7375_v12 = vor.u32 %v9696_v50, %v7374_v2  ;;  %v7379_v51 = vor.u32 %v9693_v49, %v7376_v9 }
 0x100   :  { %326 = vst [vmem:[#allocation3 + $0x70] sm:$0xff] %v311_v61 }
 0x101   :  { %1079 = vmatpush.bf16.msrb.mxu1 %v7375_v12  ;;  %1107 = vmatpush.bf16.msra.mxu3 %v7379_v51  ;;  %v560_v58 = vpop.permute.xlu0 %559  ;;  %v568_v47 = vpop.permute.xlu1 %567 }
 0x102   :  { %v572_v29 = vrot.slane %v560_v58, 4  ;;  %v576_v22 = vrot.slane %v568_v47, 4  ;;  %v633_v60 = vpop.permute.xlu2 %632  ;;  %v7696_v58 = vld [vmem:[#allocation3 + $0x120] sm:$0xf] }
 0x103   :  { %v641_v37 = vrot.slane %v633_v60, 4  ;;  %v9770_v60 = vld [vmem:[#allocation3 + $0x104] sm:$0xf0] }
 0x104   :  { %v582_v48 = vsel %vm174_vm0, %v571_v38, %v572_v29  ;;  %v588_v24 = vsel %vm174_vm0, %v575_v42, %v576_v22 }
 0x105   :  { %v583_v35 = vsel %vm578_vm2, %v10600_v34, %v582_v48  ;;  %v589_v59 = vsel %vm578_vm2, %v10555_v41, %v588_v24  ;;  %v653_v63 = vsel %vm174_vm0, %v640_v21, %v641_v37  ;;  %v9690_v18 = vld [vmem:[#allocation3 + $0x4c] sm:$0xf0]  ;;  %v7352_v40 = vld [vmem:[#allocation3 + $0x50] sm:$0xf0]  ;;  %v670_v41 = vld [vmem:[%s12657_s3 + $0x8] sm:$0xff] }
 0x106   :  { %598 = vst [vmem:[#allocation3 + $0x160] sm:$0xff] %v583_v35  ;;  %v654_v38 = vsel %vm643_vm3, %v10715_v11, %v653_v63  ;;  %v7351_v43 = vor.u32 %v9690_v18, %v7350_v57  ;;  %v7355_v42 = vor.u32 %v9687_v14, %v7352_v40  ;;  %v7326_v1 = vld [vmem:[#allocation3 + $0x8] sm:$0xf]  ;;  %v9681_v3 = vld [vmem:[#allocation3 + $0xc] sm:$0xf]  ;;  %732 = vperm.xlu2 %10281, %v670_v41  }
 0x107   :  { %601 = vst [vmem:[#allocation3 + $0x178] sm:$0xff] %v589_v59  ;;  %v7720_v34 = vld [vmem:[#allocation3 + $0x150] sm:$0xf]  ;;  %v9782_v21 = vld [vmem:[#allocation3 + $0x164] sm:$0xf0]  ;;  %v7327_v30 = vor.u32 %v9684_v5, %v7326_v1  ;;  %v7331_v31 = vor.u32 %v9681_v3, %v7328_v39 }
 0x108   :  { %666 = vst [vmem:[#allocation3 + $0x1a8] sm:$0xff] %v654_v38  ;;  %1080 = vmatpush.bf16.msrb.mxu1 %v7351_v43  ;;  %1108 = vmatpush.bf16.msra.mxu3 %v7355_v42  ;;  %v7721_v7 = vor.u32 %v9782_v21, %v7720_v34  ;;  %v7648_v24 = vld [vmem:[#allocation3 + $0xc0] sm:$0xf]  ;;  %v9764_v57 = vld [vmem:[#allocation3 + $0xd4] sm:$0xf0] }
 0x109   :  { %v503_v4 = vpop.permute.xlu0 %502  ;;  %v430_v0 = vpop.permute.xlu1 %429  ;;  %v7478_v18 = vld [vmem:[#allocation3 + $0x130] sm:$0xf]  ;;  %v9718_v43 = vld [vmem:[#allocation3 + $0x134] sm:$0xf]  ;;  %v9758_v34 = vld [vmem:[#allocation3 + $0xa4] sm:$0xf0] }
 0x10a   :  { %v511_v11 = vrot.slane %v503_v4, 4  ;;  %v442_v15 = vrot.slane %v430_v0, 4  ;;  %v157_v27 = vpop.permute.xlu2 %156  ;;  %v7624_v41 = vld [vmem:[#allocation3 + $0x90] sm:$0xf]  ;;  %v9715_v4 = vld [vmem:[#allocation3 + $0x114] sm:$0xf0] }
 0x10b   :  { %v169_v32 = vrot.slane %v157_v27, 4  ;;  %v9709_v0 = vld [vmem:[#allocation3 + $0xe4] sm:$0xf0]  ;;  %v7456_v39 = vld [vmem:[#allocation3 + $0x118] sm:$0xf0] }
 0x10c   :  { %v523_v33 = vsel %vm174_vm0, %v510_v52, %v511_v11  ;;  %v452_v2 = vsel %vm174_vm0, %v441_v45, %v442_v15  ;;  %1081 = vmatpush.bf16.msrb.mxu1 %v7327_v30  ;;  %1109 = vmatpush.bf16.msra.mxu3 %v7331_v31  ;;  %v9776_v52 = vld [vmem:[#allocation3 + $0x134] sm:$0xf0]  ;;  %v9706_v11 = vld [vmem:[#allocation3 + $0xd4] sm:$0xf]  ;;  %v7432_v15 = vld [vmem:[#allocation3 + $0xe8] sm:$0xf0] }
 0x10d   :  { %v524_v49 = vsel %vm513_vm1, %v10624_v28, %v523_v33  ;;  %v453_v61 = vsel %vm448_vm4, %v10669_v36, %v452_v2  ;;  %v180_v50 = vsel %vm174_vm0, %v168_v8, %v169_v32  ;;  %v7502_v9 = vld [vmem:[#allocation3 + $0x160] sm:$0xf]  ;;  %v9724_v12 = vld [vmem:[#allocation3 + $0x164] sm:$0xf]  ;;  %7535 = vmatmul.msk.bf16.vlgmr.msrb.gmra.mxu0 %vm1014_vm6, %v10673_v44  ;;  %v7697_v47 = vor.u32 %v9776_v52, %v7696_v58  ;;  %v9752_v52 = vld [vmem:[#allocation3 + $0x74] sm:$0xf0] }
 0x10e   :  { %536 = vst [vmem:[#allocation3 + $0x148] sm:$0xff] %v524_v49  ;;  %v181_v45 = vsel %vm176_vm9, %v10831_v6, %v180_v50  ;;  %v9727_v51 = vld [vmem:[#allocation3 + $0x174] sm:$0xf0]  ;;  %v7504_v28 = vld [vmem:[#allocation3 + $0x178] sm:$0xf0] }
 0x10f   :  { %468 = vst [vmem:[#allocation3 + $0x100] sm:$0xff] %v453_v61  ;;  %1082 = vmatmul.bf16.vlgmr.msrb.gmra.mxu1 %v10827_v53  ;;  %1110 = vmatmul.bf16.vlgmr.msra.gmra.mxu3 %v10827_v53  ;;  %v7503_v36 = vor.u32 %v9727_v51, %v7502_v9  ;;  %v7507_v8 = vor.u32 %v9724_v12, %v7504_v28  ;;  %v7672_v6 = vld [vmem:[#allocation3 + $0xf0] sm:$0xf]  ;;  %v7600_v12 = vld [vmem:[#allocation3 + $0x60] sm:$0xf] }
 0x110   :  { %2429 = vmatpush.bf16.msrb.mxu3 %v7721_v7  ;;  %196 = vst [vmem:[#allocation3 + $0x10] sm:$0xff] %v181_v45  ;;  %v7673_v63 = vor.u32 %v9770_v60, %v7672_v6  ;;  %v7625_v7 = vor.u32 %v9758_v34, %v7624_v41  ;;  %v7435_v61 = vor.u32 %v9706_v11, %v7432_v15  ;;  %v7576_v58 = vld [vmem:[#allocation3 + $0x30] sm:$0xf]  ;;  %v7552_v60 = vld [vmem:[#allocation3] sm:$0xf] }
 0x111   :  { %1130 = vmatpush.bf16.msrb.mxu2 %v7503_v36  ;;  %1158 = vmatpush.bf16.msra.mxu0 %v7507_v8  ;;  %v353_v29 = vpop.permute.xlu0 %352  ;;  %v361_v22 = vpop.permute.xlu1 %360  ;;  %v7722_v11 = vld [vmem:[#allocation3 + $0x168] sm:$0xf0] }
 0x112   :  { %v365_v37 = vrot.slane %v353_v29, 4  ;;  %v369_v48 = vrot.slane %v361_v22, 4 }
 0x114   :  { %2430 = vmatpush.bf16.msrb.mxu3 %v7697_v47  ;;  %v375_v35 = vsel %vm174_vm0, %v364_v13, %v365_v37  ;;  %v381_v59 = vsel %vm174_vm0, %v368_v23, %v369_v48  ;;  %v7649_v13 = vor.u32 %v9764_v57, %v7648_v24  ;;  %v9746_v47 = vld [vmem:[#allocation3 + $0x44] sm:$0xf0]  ;;  %v9740_v37 = vld [vmem:[#allocation3 + $0x14] sm:$0xf0]  ;;  %v7382_v57 = vld [vmem:[#allocation3 + $0x70] sm:$0xf] }
 0x115   :  { %v376_v14 = vsel %vm371_vm5, %v10752_v20, %v375_v35  ;;  %v382_v40 = vsel %vm371_vm5, %v10754_v16, %v381_v59  ;;  %v9721_v38 = vld [vmem:[#allocation3 + $0x144] sm:$0xf0]  ;;  %v7480_v42 = vld [vmem:[#allocation3 + $0x148] sm:$0xf0]  ;;  %v7430_v20 = vld [vmem:[#allocation3 + $0xd0] sm:$0xf]  ;;  %v7577_v24 = vor.u32 %v9746_v47, %v7576_v58 }
 0x116   :  { %391 = vst [vmem:[#allocation3 + $0xa0] sm:$0xff] %v376_v14  ;;  %v7479_v1 = vor.u32 %v9721_v38, %v7478_v18  ;;  %v7483_v3 = vor.u32 %v9718_v43, %v7480_v42  ;;  %v7454_v23 = vld [vmem:[#allocation3 + $0x100] sm:$0xf]  ;;  %v9712_v21 = vld [vmem:[#allocation3 + $0x104] sm:$0xf]  ;;  %v7431_v33 = vor.u32 %v9709_v0, %v7430_v20 }
 0x117   :  { %394 = vst [vmem:[#allocation3 + $0xb8] sm:$0xff] %v382_v40  ;;  %v7455_v31 = vor.u32 %v9715_v4, %v7454_v23  ;;  %v7459_v32 = vor.u32 %v9712_v21, %v7456_v39  ;;  %v9733_v35 = vld [vmem:[#allocation3 + $0x1a4] sm:$0xf0]  ;;  %v9694_v59 = vld [vmem:[#allocation3 + $0x74] sm:$0xf] }
 0x118   :  { %2431 = vmatpush.bf16.msrb.mxu3 %v7673_v63  ;;  %1131 = vmatpush.bf16.msrb.mxu2 %v7479_v1  ;;  %v7528_v38 = vld [vmem:[#allocation3 + $0x1a8] sm:$0xf0]  ;;  %v9779_v39 = vld [vmem:[#allocation3 + $0x154] sm:$0xf]  ;;  %v7554_v58 = vld [vmem:[#allocation3 + $0x18] sm:$0xf0] }
 0x119   :  { %1159 = vmatpush.bf16.msra.mxu0 %v7483_v3  ;;  %v296_v5 = vpop.permute.xlu0 %295  ;;  %v625_v16 = vpop.permute.xlu1 %624 }
 0x11a   :  { %v304_v27 = vrot.slane %v296_v5, 4  ;;  %v637_v30 = vrot.slane %v625_v16, 4  ;;  %v7334_v16 = vld [vmem:[#allocation3 + $0x10] sm:$0xf] }
 0x11c   :  { %2432 = vmatpush.bf16.msrb.mxu3 %v7649_v13  ;;  %v316_v2 = vsel %vm174_vm0, %v303_v56, %v304_v27  ;;  %v647_v49 = vsel %vm174_vm0, %v636_v19, %v637_v30  ;;  %1132 = vmatpush.bf16.msrb.mxu2 %v7455_v31  ;;  %v7601_v19 = vor.u32 %v9752_v52, %v7600_v12  ;;  %v9755_v52 = vld [vmem:[#allocation3 + $0x94] sm:$0xf] }
 0x11d   :  { %1160 = vmatpush.bf16.msra.mxu0 %v7459_v32  ;;  %v317_v50 = vsel %vm306_vm7, %v10801_v17, %v316_v2  ;;  %v648_v9 = vsel %vm643_vm3, %v10713_v10, %v647_v49  ;;  %v7406_v45 = vld [vmem:[#allocation3 + $0xa0] sm:$0xf]  ;;  %v9700_v51 = vld [vmem:[#allocation3 + $0xa4] sm:$0xf]  ;;  %v7553_v13 = vor.u32 %v9740_v37, %v7552_v60  ;;  %v7725_v32 = vor.u32 %v9779_v39, %v7722_v11  ;;  %v7674_v2 = vld [vmem:[#allocation3 + $0x108] sm:$0xf0] }
 0x11e   :  { %329 = vst [vmem:[#allocation3 + $0x88] sm:$0xff] %v317_v50  ;;  %v9703_v56 = vld [vmem:[#allocation3 + $0xb4] sm:$0xf0]  ;;  %v7408_v28 = vld [vmem:[#allocation3 + $0xb8] sm:$0xf0] }
 0x11f   :  { %663 = vst [vmem:[#allocation3 + $0x190] sm:$0xff] %v648_v9  ;;  %v7407_v10 = vor.u32 %v9703_v56, %v7406_v45  ;;  %v7411_v22 = vor.u32 %v9700_v51, %v7408_v28  ;;  %v9767_v49 = vld [vmem:[#allocation3 + $0xf4] sm:$0xf]  ;;  %v7650_v50 = vld [vmem:[#allocation3 + $0xd8] sm:$0xf0] }
 0x120   :  { %2433 = vmatpush.bf16.msrb.mxu3 %v7625_v7  ;;  %1133 = vmatpush.bf16.msrb.mxu2 %v7431_v33  ;;  %v9773_v7 = vld [vmem:[#allocation3 + $0x124] sm:$0xf]  ;;  %v7677_v9 = vor.u32 %v9767_v49, %v7674_v2  ;;  %v7626_v45 = vld [vmem:[#allocation3 + $0xa8] sm:$0xf0]  ;;  %v7602_v28 = vld [vmem:[#allocation3 + $0x78] sm:$0xf0] }
 0x121   :  { %1161 = vmatpush.bf16.msra.mxu0 %v7435_v61  ;;  %v223_v36 = vpop.permute.xlu0 %222  ;;  %v231_v8 = vpop.permute.xlu1 %230  ;;  %v9761_v61 = vld [vmem:[#allocation3 + $0xc4] sm:$0xf]  ;;  %v7629_v51 = vor.u32 %v9755_v52, %v7626_v45 }
 0x122   :  { %v235_v17 = vrot.slane %v223_v36, 4  ;;  %v239_v29 = vrot.slane %v231_v8, 4  ;;  %v7653_v12 = vor.u32 %v9761_v61, %v7650_v50  ;;  %v9749_v56 = vld [vmem:[#allocation3 + $0x64] sm:$0xf]  ;;  %v7578_v36 = vld [vmem:[#allocation3 + $0x48] sm:$0xf0] }
 0x123   :  { %v9737_v8 = vld [vmem:[#allocation3 + $0x4] sm:$0xf] }
 0x124   :  { %2434 = vmatpush.bf16.msrb.mxu3 %v7601_v19  ;;  %v245_v48 = vsel %vm174_vm0, %v234_v55, %v235_v17  ;;  %v251_v6 = vsel %vm174_vm0, %v238_v62, %v239_v29  ;;  %1134 = vmatpush.bf16.msrb.mxu2 %v7407_v10  ;;  %v9743_v19 = vld [vmem:[#allocation3 + $0x34] sm:$0xf]  ;;  %v7557_v47 = vor.u32 %v9737_v8, %v7554_v58  ;;  %v1557_v17 = vld [vmem:[#allocation2 + $0x5c] sm:$0xf] }
 0x125   :  { %1162 = vmatpush.bf16.msra.mxu0 %v7411_v22  ;;  %v246_v63 = vsel %vm241_vm8, %v10737_v54, %v245_v48  ;;  %v252_v18 = vsel %vm241_vm8, %v10829_v46, %v251_v6  ;;  %v9697_v14 = vld [vmem:[#allocation3 + $0x84] sm:$0xf0]  ;;  %v7384_v40 = vld [vmem:[#allocation3 + $0x88] sm:$0xf0]  ;;  %1576 = vrot.lane.b32.xlu0 %v1557_v17, %s10393_s8 }
 0x126   :  { %261 = vst [vmem:[#allocation3 + $0x40] sm:$0xff] %v246_v63  ;;  %v7383_v55 = vor.u32 %v9697_v14, %v7382_v57  ;;  %v7526_v43 = vld [vmem:[#allocation3 + $0x190] sm:$0xf]  ;;  %v7387_v62 = vor.u32 %v9694_v59, %v7384_v40  ;;  %v9730_v42 = vld [vmem:[#allocation3 + $0x194] sm:$0xf] }
 0x127   :  { %264 = vst [vmem:[#allocation3 + $0x58] sm:$0xff] %v252_v18  ;;  %v7527_v1 = vor.u32 %v9733_v35, %v7526_v43  ;;  %v7531_v3 = vor.u32 %v9730_v42, %v7528_v38 }
 0x128   :  { %2435 = vmatpush.bf16.msrb.mxu3 %v7577_v24  ;;  %1135 = vmatpush.bf16.msrb.mxu2 %v7383_v55  ;;  %v10935_v24 = vld [vmem:[#allocation7] sm:$0x3f] }
 0x129   :  { %1163 = vmatpush.bf16.msra.mxu0 %v7387_v62  ;;  %1151 = vmatpush.bf16.msra.mxu1 %v7527_v1  ;;  %v165_v54 = vpop.permute.xlu0 %164  ;;  %v10940_v63 = vperm.slane %v10935_v24, 0  ;;  %v10944_v38 = vperm.slane %v10935_v24, 1 }
 0x12a   :  { %v173_v41 = vrot.slane %v165_v54, 4 }
 0x12c   :  { %2436 = vmatpush.bf16.msrb.mxu3 %v7553_v13  ;;  %v186_v46 = vsel %vm174_vm0, %v172_v26, %v173_v41  ;;  %7536 = vmatmul.msk.bf16.vlgmr.msra.gmra.mxu1 %vm1014_vm6, %v10673_v44  ;;  %v9682_v26 = vld [vmem:[#allocation3 + $0x14] sm:$0xf] }
 0x12d   :  { %1179 = vmatpush.bf16.msrb.mxu1 %v7531_v3  ;;  %v187_v34 = vsel %vm176_vm9, %v10758_v25, %v186_v46  ;;  %v7358_v23 = vld [vmem:[#allocation3 + $0x40] sm:$0xf]  ;;  %v9688_v21 = vld [vmem:[#allocation3 + $0x44] sm:$0xf]  ;;  %v7698_v25 = vld [vmem:[#allocation3 + $0x138] sm:$0xf0] }
 0x12e   :  { %199 = vst [vmem:[#allocation3 + $0x28] sm:$0xff] %v187_v34  ;;  %v9691_v4 = vld [vmem:[#allocation3 + $0x54] sm:$0xf0]  ;;  %v7360_v20 = vld [vmem:[#allocation3 + $0x58] sm:$0xf0]  ;;  %v7701_v33 = vor.u32 %v9773_v7, %v7698_v25  ;;  %v1041_v37 = vpop.f32.mrf.mxu1  ;;  %v10967_v7 = vperm.slane %v10935_v24, 3 }
 0x12f   :  { %v7359_v0 = vor.u32 %v9691_v4, %v7358_v23  ;;  %v7363_v5 = vor.u32 %v9688_v21, %v7360_v20 }
 0x131   :  { %1136 = vmatpush.bf16.msrb.mxu2 %v7359_v0  ;;  %1164 = vmatpush.bf16.msra.mxu0 %v7363_v5 }
 0x133   :  { %v1069_v29 = vpop.f32.mrf.mxu3 }
 0x135   :  { %v9685_v15 = vld [vmem:[#allocation3 + $0x24] sm:$0xf0]  ;;  %v7336_v27 = vld [vmem:[#allocation3 + $0x28] sm:$0xf0] }
 0x136   :  { %v7335_v30 = vor.u32 %v9685_v15, %v7334_v16  ;;  %v7339_v31 = vor.u32 %v9682_v26, %v7336_v27  ;;  %v1043_v1 = vpop.f32.mrf.mxu1 }
 0x138   :  { %1137 = vmatpush.bf16.msrb.mxu2 %v7335_v30  ;;  %1165 = vmatpush.bf16.msra.mxu0 %v7339_v31  ;;  %v10964_v31 = vperm.slane %v10935_v24, 2 }
 0x13b   :  { %1138 = vmatmul.bf16.vlgmr.msrb.gmra.mxu2 %v10827_v53  ;;  %1166 = vmatmul.bf16.vlgmr.msra.gmra.mxu0 %v10827_v53  ;;  %v7605_v53 = vor.u32 %v9749_v56, %v7602_v28  ;;  %v1071_v10 = vpop.f32.mrf.mxu3 }
 0x13c   :  { %2471 = vmatpush.bf16.msrb.mxu0 %v7725_v32  ;;  %7537 = vmatmul.msk.bf16.vlgmr.msrb.gmra.mxu1 %vm1014_vm6, %v10673_v44  ;;  %v7581_v44 = vor.u32 %v9743_v19, %v7578_v36 }
 0x140   :  { %2472 = vmatpush.bf16.msrb.mxu0 %v7701_v33 }
 0x144   :  { %2473 = vmatpush.bf16.msrb.mxu0 %v7677_v9 }
 0x148   :  { %2474 = vmatpush.bf16.msrb.mxu0 %v7653_v12 }
 0x14c   :  { %2475 = vmatpush.bf16.msrb.mxu0 %v7629_v51 }
 0x150   :  { %2476 = vmatpush.bf16.msrb.mxu0 %v7605_v53 }
 0x154   :  { %2477 = vmatpush.bf16.msrb.mxu0 %v7581_v44 }
 0x158   :  { %2478 = vmatpush.bf16.msrb.mxu0 %v7557_v47 }
 0x15c   :  { %v10932_v22 = vpop.permute.xlu1 %727 }
 0x160   :  { %v10937_v59 = vpop.permute.xlu2 %732 }
 0x167   :  { %v1097_v57 = vpop.f32.mrf.mxu3 }
 0x16f   :  { %v1099_v34 = vpop.f32.mrf.mxu3 }
 0x179   :  { %v1027_v60 = vpop.f32.mrf.mxu0 }
 0x17a   :  { %v1028_v48 = vadd.f32 %v1027_v60, %v10932_v22 }
 0x17c   :  { %v1042_v6 = vadd.f32 %v1041_v37, %v1028_v48 }
 0x17e   :  { %v1186_v14 = vmax.f32 %v1042_v6, 0.0 }
 0x17f   :  { %v1055_v35 = vpop.f32.mrf.mxu2 }
 0x180   :  { %v1056_v18 = vadd.f32 %v1055_v35, %v10932_v22  ;;  %v1198_v42 = vmul.f32 %v1186_v14, %v10940_v63  ;;  %v10998_v14 = vperm.slane %v10935_v24, 4 }
 0x181   :  { %v1029_v40 = vpop.f32.mrf.mxu0 }
 0x182   :  { %v1070_v55 = vadd.f32 %v1069_v29, %v1056_v18  ;;  %v1030_v43 = vadd.f32 %v1029_v40, %v10937_v59 }
 0x184   :  { %v1187_v62 = vmax.f32 %v1070_v55, 0.0  ;;  %v1044_v13 = vadd.f32 %v1043_v1, %v1030_v43 }
 0x186   :  { %v1199_v3 = vmul.f32 %v1187_v62, %v10944_v38  ;;  %v1192_v21 = vmax.f32 %v1044_v13, 0.0 }
 0x187   :  { %v1057_v54 = vpop.f32.mrf.mxu2 }
 0x188   :  { %v1210_v41 = vpack.c.bf16 %v1199_v3, %v1198_v42  ;;  %v1058_v46 = vadd.f32 %v1057_v54, %v10937_v59  ;;  %v1204_v5 = vmul.f32 %v1192_v21, %v10940_v63 }
 0x18a   :  { %1216 = vst [vmem:[#allocation2 + $0x44] sm:$0xff] %v1210_v41  ;;  %v1072_v23 = vadd.f32 %v1071_v10, %v1058_v46  ;;  %1570 = vrot.lane.b32.xlu0 %v1210_v41, %s10393_s8  ;;  %1506 = vrot.lane.b32.xlu1 %v1210_v41, %s10396_s22  ;;  %v1125_v11 = vpop.f32.mrf.mxu0 }
 0x18b   :  { %1484 = vst [vmem:[#allocation3 + $0x270] sm:$0xff] %v1210_v41 }
 0x18c   :  { %v1193_v4 = vmax.f32 %v1072_v23, 0.0  ;;  %v1083_v20 = vpop.f32.mrf.mxu1 }
 0x18d   :  { %v1084_v0 = vadd.f32 %v1083_v20, %v10932_v22 }
 0x18e   :  { %v1205_v16 = vmul.f32 %v1193_v4, %v10944_v38 }
 0x18f   :  { %v1098_v15 = vadd.f32 %v1097_v57, %v1084_v0  ;;  %v10995_v57 = vperm.slane %v10935_v24, 5 }
 0x190   :  { %v10955_v39 = vpack.c.bf16 %v1205_v16, %v1204_v5  ;;  %v7540_v5 = vld [vmem:[%s12658_s4] sm:$0xf]  ;;  %v9735_v16 = vld [vmem:[%s12658_s4 + $0x8] sm:$0xf0] }
 0x191   :  { %v1414_v26 = vld [vmem:[#allocation2 + $0x40] sm:$0xff]  ;;  %v1188_v25 = vmax.f32 %v1098_v15, 0.0 }
 0x192   :  { %1219 = vst [vmem:[#allocation2 + $0x64] sm:$0xff] %v10955_v39  ;;  %1430 = vrot.lane.b32.xlu2 %v1414_v26, %s10397_s23  ;;  %v1111_v27 = vpop.f32.mrf.mxu3  ;;  %1366 = vrot.lane.b32.xlu0 %v1414_v26, %s10398_s24  ;;  %v1127_v52 = vpop.f32.mrf.mxu0 }
 0x193   :  { %v1112_v30 = vadd.f32 %v1111_v27, %v10932_v22  ;;  %1302 = vrot.lane.b32.xlu1 %v1414_v26, %s10399_s25  ;;  %1487 = vst [vmem:[#allocation3 + $0x288] sm:$0xff] %v10955_v39  ;;  %v1200_v61 = vmul.f32 %v1188_v25, %v10964_v31 }
 0x194   :  { %v1085_v32 = vpop.f32.mrf.mxu1 }
 0x195   :  { %v1126_v33 = vadd.f32 %v1125_v11, %v1112_v30  ;;  %v1086_v2 = vadd.f32 %v1085_v32, %v10937_v59 }
 0x197   :  { %v1189_v49 = vmax.f32 %v1126_v33, 0.0  ;;  %v1100_v9 = vadd.f32 %v1099_v34, %v1086_v2  ;;  %v11040_v15 = vpop.permute.xlu0 %1576 }
 0x199   :  { %v1201_v50 = vmul.f32 %v1189_v49, %v10967_v7  ;;  %v1194_v56 = vmax.f32 %v1100_v9, 0.0  ;;  %v1418_v8 = vld [vmem:[#allocation2 + $0x60] sm:$0xff] }
 0x19a   :  { %1238 = vrot.lane.b32.xlu2 %v1414_v26, %s10400_s26  ;;  %v1113_v12 = vpop.f32.mrf.mxu3  ;;  %1698 = vrot.lane.b32.xlu0 %v1210_v41, %s10395_s21 }
 0x19b   :  { %v1211_v45 = vpack.c.bf16 %v1201_v50, %v1200_v61  ;;  %v1114_v51 = vadd.f32 %v1113_v12, %v10937_v59  ;;  %v1206_v19 = vmul.f32 %v1194_v56, %v10964_v31  ;;  %v1497_v12 = vld [vmem:[#allocation2 + $0x7c] sm:$0xf] }
 0x19d   :  { %1217 = vst [vmem:[#allocation2 + $0x4c] sm:$0xff] %v1211_v45  ;;  %v1128_v28 = vadd.f32 %v1127_v52, %v1114_v51  ;;  %1572 = vrot.lane.b32.xlu1 %v1211_v45, %s10393_s8 }
 0x19e   :  { %1485 = vst [vmem:[#allocation3 + $0x278] sm:$0xff] %v1211_v45 }
 0x19f   :  { %v1195_v53 = vmax.f32 %v1128_v28, 0.0  ;;  %v1493_v28 = vld [vmem:[#allocation2 + $0x5c] sm:$0xf] }
 0x1a1   :  { %v1207_v36 = vmul.f32 %v1195_v53, %v10967_v7 }
 0x1a2   :  { %1578 = vrot.lane.b32.xlu2 %v10955_v39, %s10393_s8  ;;  %1634 = vrot.lane.b32.xlu0 %v1210_v41, %s10392_s20 }
 0x1a3   :  { %v1214_v44 = vpack.c.bf16 %v1207_v36, %v1206_v19  ;;  %v1685_v19 = vld [vmem:[#allocation2 + $0x5c] sm:$0xf] }
 0x1a4   :  { %v1351_v47 = vld [vmem:[#allocation2 + $0x48] sm:$0xff] }
 0x1a5   :  { %1220 = vst [vmem:[#allocation2 + $0x6c] sm:$0xff] %v1214_v44  ;;  %1438 = vrot.lane.b32.xlu1 %v1418_v8, %s10397_s23 }
 0x1a6   :  { %1488 = vst [vmem:[#allocation3 + $0x290] sm:$0xff] %v1214_v44 }
 0x1a9   :  { %v1153_v58 = vpop.f32.mrf.mxu1 }
 0x1aa   :  { %1508 = vrot.lane.b32.xlu2 %v1211_v45, %s10396_s22  ;;  %1514 = vrot.lane.b32.xlu0 %v10955_v39, %s10396_s22 }
 0x1ac   :  { %v1419_v4 = vld [vmem:[#allocation2 + $0x68] sm:$0xff] }
 0x1ad   :  { %1368 = vrot.lane.b32.xlu1 %v1351_v47, %s10398_s24 }
 0x1b1   :  { %v1155_v17 = vpop.f32.mrf.mxu1 }
 0x1b2   :  { %1374 = vrot.lane.b32.xlu2 %v1418_v8, %s10398_s24  ;;  %1432 = vrot.lane.b32.xlu0 %v1351_v47, %s10397_s23 }
 0x1b5   :  { %1246 = vrot.lane.b32.xlu1 %v1418_v8, %s10400_s26 }
 0x1b8   :  { %v1167_v29 = vpop.f32.mrf.mxu0 }
 0x1b9   :  { %v1168_v10 = vadd.f32 %v1167_v29, %v10932_v22  ;;  %v1181_v60 = vpop.f32.mrf.mxu1 }
 0x1ba   :  { %1304 = vrot.lane.b32.xlu2 %v1351_v47, %s10399_s25  ;;  %1310 = vrot.lane.b32.xlu0 %v1418_v8, %s10399_s25 }
 0x1bb   :  { %v1182_v37 = vadd.f32 %v1181_v60, %v1168_v10 }
 0x1bd   :  { %1700 = vrot.lane.b32.xlu1 %v1211_v45, %s10395_s21  ;;  %v1191_v18 = vmax.f32 %v1182_v37, 0.0 }
 0x1be   :  { %v1139_v48 = vpop.f32.mrf.mxu2 }
 0x1bf   :  { %v1140_v6 = vadd.f32 %v1139_v48, %v10932_v22  ;;  %v1203_v22 = vmul.f32 %v1191_v18, %v10995_v57 }
 0x1c0   :  { %v1169_v35 = vpop.f32.mrf.mxu0 }
 0x1c1   :  { %v1154_v40 = vadd.f32 %v1153_v58, %v1140_v6  ;;  %v1170_v55 = vadd.f32 %v1169_v35, %v10937_v59  ;;  %v1183_v43 = vpop.f32.mrf.mxu1 }
 0x1c2   :  { %1706 = vrot.lane.b32.xlu2 %v10955_v39, %s10395_s21  ;;  %1240 = vrot.lane.b32.xlu0 %v1351_v47, %s10400_s26 }
 0x1c3   :  { %v1190_v62 = vmax.f32 %v1154_v40, 0.0  ;;  %v1184_v1 = vadd.f32 %v1183_v43, %v1170_v55  ;;  %v1689_v40 = vld [vmem:[#allocation2 + $0x7c] sm:$0xf] }
 0x1c5   :  { %v1202_v42 = vmul.f32 %v1190_v62, %v10998_v14  ;;  %1636 = vrot.lane.b32.xlu1 %v1211_v45, %s10392_s20  ;;  %v1197_v54 = vmax.f32 %v1184_v1, 0.0  ;;  %v1561_v45 = vld [vmem:[#allocation2 + $0x7c] sm:$0xf] }
 0x1c6   :  { %v1141_v3 = vpop.f32.mrf.mxu2 }
 0x1c7   :  { %v1212_v24 = vpack.c.bf16 %v1203_v22, %v1202_v42  ;;  %v1142_v13 = vadd.f32 %v1141_v3, %v10937_v59  ;;  %v1209_v34 = vmul.f32 %v1197_v54, %v10995_v57 }
 0x1c9   :  { %1218 = vst [vmem:[#allocation2 + $0x54] sm:$0xff] %v1212_v24  ;;  %v1156_v41 = vadd.f32 %v1155_v17, %v1142_v13  ;;  %v1621_v13 = vld [vmem:[#allocation2 + $0x5c] sm:$0xf] }
 0x1ca   :  { %1642 = vrot.lane.b32.xlu2 %v10955_v39, %s10392_s20  ;;  %1580 = vrot.lane.b32.xlu0 %v1214_v44, %s10393_s8  ;;  %v11031_v39 = vor.u32 %v9735_v16, %v7540_v5 }
 0x1cb   :  { %v1196_v46 = vmax.f32 %v1156_v41, 0.0 }
 0x1cc   :  { %2437 = vmatmul.bf16.vlgmr.msrb.gmra.mxu3 %v11031_v39  ;;  %2479 = vmatmul.bf16.vlgmr.msrb.gmra.mxu0 %v11031_v39 }
 0x1cd   :  { %v1208_v23 = vmul.f32 %v1196_v46, %v10998_v14  ;;  %1516 = vrot.lane.b32.xlu1 %v1214_v44, %s10396_s22 }
 0x1cf   :  { %v1215_v21 = vpack.c.bf16 %v1209_v34, %v1208_v23 }
 0x1d0   :  { %v1480_v20 = vld [vmem:[#allocation2 + $0x54] sm:$0xff] }
 0x1d1   :  { %1221 = vst [vmem:[#allocation2 + $0x74] sm:$0xff] %v1215_v21  ;;  %v1288_v0 = vld [vmem:[#allocation2 + $0x50] sm:$0xff]  ;;  %v1417_v29 = vld [vmem:[#allocation2 + $0x58] sm:$0xf] }
 0x1d2   :  { %1440 = vrot.lane.b32.xlu2 %v1419_v4, %s10397_s23  ;;  %1376 = vrot.lane.b32.xlu0 %v1419_v4, %s10398_s24  ;;  %1486 = vst [vmem:[#allocation3 + $0x280] sm:$0xff] %v1480_v20  ;;  %v1353_v35 = vld [vmem:[#allocation2 + $0x58] sm:$0xf] }
 0x1d3   :  { %v1289_v18 = vld [vmem:[#allocation2 + $0x58] sm:$0xf] }
 0x1d5   :  { %1312 = vrot.lane.b32.xlu1 %v1419_v4, %s10399_s25 }
 0x1d8   :  { %v1483_v59 = vld [vmem:[#allocation2 + $0x74] sm:$0xff] }
 0x1d9   :  { %1489 = vst [vmem:[#allocation3 + $0x298] sm:$0xff] %v1483_v59  ;;  %v1356_v30 = vld [vmem:[#allocation2 + $0x70] sm:$0xff]  ;;  %v1421_v1 = vld [vmem:[#allocation2 + $0x78] sm:$0xf] }
 0x1da   :  { %1248 = vrot.lane.b32.xlu2 %v1419_v4, %s10400_s26  ;;  %1708 = vrot.lane.b32.xlu0 %v1214_v44, %s10395_s21  ;;  %v1357_v3 = vld [vmem:[#allocation2 + $0x78] sm:$0xf] }
 0x1dd   :  { %1574 = vrot.lane.b32.xlu1 %v1212_v24, %s10393_s8 }
 0x1e2   :  { %1702 = vrot.lane.b32.xlu2 %v1212_v24, %s10395_s21  ;;  %1644 = vrot.lane.b32.xlu0 %v1214_v44, %s10392_s20 }
 0x1e5   :  { %1510 = vrot.lane.b32.xlu1 %v1212_v24, %s10396_s22 }
 0x1ea   :  { %1306 = vrot.lane.b32.xlu2 %v1288_v0, %s10399_s25  ;;  %1434 = vrot.lane.b32.xlu0 %v1288_v0, %s10397_s23 }
 0x1ec   :  { %v11033_v11 = vpop.permute.xlu2 %1430 }
 0x1ed   :  { %1370 = vrot.lane.b32.xlu1 %v1288_v0, %s10398_s24  ;;  %v1446_v34 = vrot.slane %v11033_v11, 4 }
 0x1f2   :  { %1582 = vrot.lane.b32.xlu2 %v1215_v21, %s10393_s8  ;;  %1638 = vrot.lane.b32.xlu0 %v1212_v24, %s10392_s20 }
 0x1f4   :  { %v11042_v26 = vpop.permute.xlu2 %1238 }
 0x1f5   :  { %1242 = vrot.lane.b32.xlu1 %v1288_v0, %s10400_s26  ;;  %v1229_v0 = vld [vmem:[#allocation2 + $0x78] sm:$0xf] }
 0x1fa   :  { %1518 = vrot.lane.b32.xlu2 %v1215_v21, %s10396_s22  ;;  %1710 = vrot.lane.b32.xlu0 %v1215_v21, %s10395_s21 }
 0x1fc   :  { %v11047_v27 = vpop.permute.xlu2 %1578  ;;  %v1571_v32 = vpop.permute.xlu0 %1570 }
 0x1fd   :  { %v1507_v25 = vpop.permute.xlu1 %1506  ;;  %1442 = vrot.lane.b32.xlu1 %v1356_v30, %s10397_s23  ;;  %v1586_v36 = vrot.slane %v1571_v32, 4 }
 0x1fe   :  { %v1522_v49 = vrot.slane %v1507_v25, 4 }
 0x202   :  { %1378 = vrot.lane.b32.xlu2 %v1356_v30, %s10398_s24  ;;  %1314 = vrot.lane.b32.xlu0 %v1356_v30, %s10399_s25 }
 0x204   :  { %v11052_v33 = vpop.permute.xlu2 %1508  ;;  %v1367_v2 = vpop.permute.xlu0 %1366 }
 0x205   :  { %v1523_v61 = vrot.slane %v11052_v33, 4  ;;  %1646 = vrot.lane.b32.xlu1 %v1215_v21, %s10392_s20  ;;  %v1303_v9 = vpop.permute.xlu1 %1302  ;;  %v1382_v22 = vrot.slane %v1367_v2, 4  ;;  %v1625_v21 = vld [vmem:[#allocation2 + $0x7c] sm:$0xf] }
 0x206   :  { %v1318_v10 = vrot.slane %v1303_v9, 4 }
 0x207   :  { %v1530_v50 = vsel %vm174_vm0, %v1522_v49, %v1523_v61 }
 0x208   :  { %v1531_v52 = vsel %vm448_vm4, %v1507_v25, %v1530_v50 }
 0x209   :  { %1548 = vst [vmem:[#allocation3 + $0x2a0] sm:$0xff] %v1531_v52 }
 0x20a   :  { %1250 = vrot.lane.b32.xlu2 %v1356_v30, %s10400_s26  ;;  %1520 = vrot.lane.b32.xlu0 %v1497_v12, %s10396_s22  ;;  %v1293_v30 = vld [vmem:[#allocation2 + $0x78] sm:$0xf] }
 0x20b   :  { %v1225_v12 = vld [vmem:[#allocation2 + $0x58] sm:$0xf] }
 0x20c   :  { %v11062_v51 = vpop.permute.xlu2 %1374  ;;  %v11064_v56 = vpop.permute.xlu0 %1698 }
 0x20d   :  { %1584 = vrot.lane.b32.xlu1 %v1561_v45, %s10393_s8  ;;  %v1714_v49 = vrot.slane %v11064_v56, 4  ;;  %v1750_v45 = vld [vmem:[%s12659_s5] sm:$0xff] }
 0x20f   :  { %v11067_v53 = vpop.permute.xlu1 %1572 }
 0x210   :  { %v1587_v44 = vrot.slane %v11067_v53, 4 }
 0x212   :  { %1512 = vrot.lane.b32.xlu2 %v1493_v28, %s10396_s22  ;;  %v1594_v8 = vsel %vm174_vm0, %v1586_v36, %v1587_v44  ;;  %1704 = vrot.lane.b32.xlu0 %v1685_v19, %s10395_s21 }
 0x213   :  { %v1595_v58 = vsel %vm513_vm1, %v1571_v32, %v1594_v8  ;;  %v1254_v8 = vrot.slane %v11042_v26, 4 }
 0x214   :  { %v11076_v47 = vpop.permute.xlu2 %1304  ;;  %1612 = vst [vmem:[#allocation3 + $0x2d0] sm:$0xff] %v1595_v58  ;;  %v11078_v17 = vpop.permute.xlu0 %1634 }
 0x215   :  { %v1319_v60 = vrot.slane %v11076_v47, 4  ;;  %1436 = vrot.lane.b32.xlu1 %v1417_v29, %s10397_s23 }
 0x217   :  { %v1326_v37 = vsel %vm174_vm0, %v1318_v10, %v1319_v60  ;;  %v1439_v48 = vpop.permute.xlu1 %1438 }
 0x218   :  { %v1327_v6 = vsel %vm241_vm8, %v1303_v9, %v1326_v37  ;;  %v1450_v32 = vrot.slane %v1439_v48, 4 }
 0x219   :  { %1344 = vst [vmem:[#allocation3 + $0x1e0] sm:$0xff] %v1327_v6 }
 0x21a   :  { %1372 = vrot.lane.b32.xlu2 %v1353_v35, %s10398_s24  ;;  %1308 = vrot.lane.b32.xlu0 %v1289_v18, %s10399_s25  ;;  %v1650_v35 = vrot.slane %v11078_v17, 4 }
 0x21c   :  { %v11088_v55 = vpop.permute.xlu2 %1706  ;;  %v11090_v43 = vpop.permute.xlu0 %1514 }
 0x21d   :  { %1712 = vrot.lane.b32.xlu1 %v1689_v40, %s10395_s21 }
 0x21f   :  { %v11093_v62 = vpop.permute.xlu1 %1368 }
 0x220   :  { %v1383_v42 = vrot.slane %v11093_v62, 4 }
 0x222   :  { %1444 = vrot.lane.b32.xlu2 %v1421_v1, %s10397_s23  ;;  %v1390_v24 = vsel %vm174_vm0, %v1382_v22, %v1383_v42  ;;  %1380 = vrot.lane.b32.xlu0 %v1357_v3, %s10398_s24 }
 0x223   :  { %v1391_v54 = vsel %vm306_vm7, %v1367_v2, %v1390_v24 }
 0x224   :  { %v11102_v41 = vpop.permute.xlu2 %1642  ;;  %1408 = vst [vmem:[#allocation3 + $0x210] sm:$0xff] %v1391_v54  ;;  %v11104_v46 = vpop.permute.xlu0 %1432  ;;  %v1590_v54 = vrot.slane %v11047_v27, 4 }
 0x225   :  { %v1447_v23 = vrot.slane %v11104_v46, 4  ;;  %1640 = vrot.lane.b32.xlu1 %v1621_v13, %s10392_s20 }
 0x227   :  { %v1454_v4 = vsel %vm174_vm0, %v1446_v34, %v1447_v23  ;;  %v1247_v20 = vpop.permute.xlu1 %1246 }
 0x228   :  { %v1455_v59 = vsel %vm371_vm5, %v11033_v11, %v1454_v4  ;;  %v1258_v58 = vrot.slane %v1247_v20, 4 }
 0x229   :  { %1472 = vst [vmem:[#allocation3 + $0x240] sm:$0xff] %v1455_v59  ;;  %v1526_v59 = vrot.slane %v11090_v43, 4 }
 0x22a   :  { %1648 = vrot.lane.b32.xlu2 %v1625_v21, %s10392_s20  ;;  %1252 = vrot.lane.b32.xlu0 %v1229_v0, %s10400_s26 }
 0x22c   :  { %v11116_v5 = vpop.permute.xlu2 %1440  ;;  %v11118_v16 = vpop.permute.xlu0 %1310 }
 0x22d   :  { %v1451_v25 = vrot.slane %v11116_v5, 4  ;;  %1316 = vrot.lane.b32.xlu1 %v1293_v30, %s10399_s25 }
 0x22f   :  { %v1460_v11 = vsel %vm174_vm0, %v1450_v32, %v1451_v25  ;;  %v1701_v2 = vpop.permute.xlu1 %1700 }
 0x230   :  { %v1461_v50 = vsel %vm371_vm5, %v1439_v48, %v1460_v11  ;;  %v1715_v9 = vrot.slane %v1701_v2, 4 }
 0x231   :  { %1475 = vst [vmem:[#allocation3 + $0x258] sm:$0xff] %v1461_v50 }
 0x232   :  { %1244 = vrot.lane.b32.xlu2 %v1225_v12, %s10400_s26  ;;  %v1722_v52 = vsel %vm174_vm0, %v1714_v49, %v1715_v9 }
 0x233   :  { %v1723_v28 = vsel %vm643_vm3, %v11064_v56, %v1722_v52  ;;  %v1751_v56 = vld [vmem:[%s12659_s5 + $0x8] sm:$0xff] }
 0x234   :  { %v11134_v19 = vpop.permute.xlu2 %1248  ;;  %1740 = vst [vmem:[#allocation3 + $0x330] sm:$0xff] %v1723_v28  ;;  %v11136_v36 = vpop.permute.xlu0 %1240 }
 0x235   :  { %v1259_v29 = vrot.slane %v11134_v19, 4  ;;  %v1255_v10 = vrot.slane %v11136_v36, 4  ;;  %1862 = vperm.xlu1 %10280, %v1750_v45   ;;  %v1322_v45 = vrot.slane %v11118_v16, 4 }
 0x237   :  { %v1268_v37 = vsel %vm174_vm0, %v1258_v58, %v1259_v29  ;;  %v1262_v48 = vsel %vm174_vm0, %v1254_v8, %v1255_v10  ;;  %v11150_v6 = vpop.permute.xlu1 %1636 }
 0x238   :  { %v1269_v18 = vsel %vm176_vm9, %v1247_v20, %v1268_v37  ;;  %v1263_v40 = vsel %vm176_vm9, %v11042_v26, %v1262_v48  ;;  %v1651_v22 = vrot.slane %v11150_v6, 4  ;;  %v7912_v37 = vld [vmem:[#allocation3 + $0x2d0] sm:$0xf] }
 0x239   :  { %1283 = vst [vmem:[#allocation3 + $0x1c8] sm:$0xff] %v1269_v18  ;;  %v7888_v18 = vld [vmem:[#allocation3 + $0x2a0] sm:$0xf] }
 0x23a   :  { %1867 = vperm.xlu2 %10281, %v1751_v56   ;;  %1280 = vst [vmem:[#allocation3 + $0x1b0] sm:$0xff] %v1263_v40  ;;  %v1658_v1 = vsel %vm174_vm0, %v1650_v35, %v1651_v22 }
 0x23b   :  { %v1659_v3 = vsel %vm578_vm2, %v11078_v17, %v1658_v1 }
 0x23c   :  { %v11162_v24 = vpop.permute.xlu2 %1702  ;;  %1676 = vst [vmem:[#allocation3 + $0x300] sm:$0xff] %v1659_v3  ;;  %v1581_v13 = vpop.permute.xlu0 %1580  ;;  %v1718_v3 = vrot.slane %v11088_v55, 4 }
 0x23d   :  { %v1716_v26 = vrot.slane %v11162_v24, 4  ;;  %v1591_v34 = vrot.slane %v1581_v13, 4 }
 0x23f   :  { %v1724_v21 = vsel %vm174_vm0, %v1715_v9, %v1716_v26  ;;  %v1600_v4 = vsel %vm174_vm0, %v1590_v54, %v1591_v34  ;;  %v11170_v20 = vpop.permute.xlu1 %1516 }
 0x240   :  { %v1725_v17 = vsel %vm643_vm3, %v1701_v2, %v1724_v21  ;;  %v1601_v0 = vsel %vm513_vm1, %v11047_v27, %v1600_v4  ;;  %v1527_v30 = vrot.slane %v11170_v20, 4  ;;  %v1386_v2 = vrot.slane %v11062_v51, 4 }
 0x241   :  { %1741 = vst [vmem:[#allocation3 + $0x338] sm:$0xff] %v1725_v17  ;;  %v9818_v17 = vld [vmem:[#allocation3 + $0x284] sm:$0xf0] }
 0x242   :  { %1615 = vst [vmem:[#allocation3 + $0x2e8] sm:$0xff] %v1601_v0  ;;  %v1536_v32 = vsel %vm174_vm0, %v1526_v59, %v1527_v30  ;;  %v1589_v0 = vrot.slane %v11040_v15, 4 }
 0x243   :  { %v1537_v11 = vsel %vm448_vm4, %v11090_v43, %v1536_v32 }
 0x244   :  { %v11182_v49 = vpop.permute.xlu2 %1306  ;;  %1551 = vst [vmem:[#allocation3 + $0x2b8] sm:$0xff] %v1537_v11  ;;  %v11184_v50 = vpop.permute.xlu0 %1376 }
 0x245   :  { %v1320_v27 = vrot.slane %v11182_v49, 4  ;;  %v1387_v9 = vrot.slane %v11184_v50, 4 }
 0x247   :  { %v1328_v12 = vsel %vm174_vm0, %v1319_v60, %v1320_v27  ;;  %v1396_v43 = vsel %vm174_vm0, %v1386_v2, %v1387_v9  ;;  %v11197_v52 = vpop.permute.xlu1 %1312 }
 0x248   :  { %v1329_v28 = vsel %vm241_vm8, %v11076_v47, %v1328_v12  ;;  %v1397_v8 = vsel %vm306_vm7, %v11062_v51, %v1396_v43  ;;  %v1323_v58 = vrot.slane %v11197_v52, 4  ;;  %v7864_v12 = vld [vmem:[#allocation3 + $0x270] sm:$0xf] }
 0x249   :  { %1345 = vst [vmem:[#allocation3 + $0x1e8] sm:$0xff] %v1329_v28  ;;  %v9830_v56 = vld [vmem:[#allocation3 + $0x2e4] sm:$0xf0]  ;;  %v9812_v28 = vld [vmem:[#allocation3 + $0x254] sm:$0xf0] }
 0x24a   :  { %1411 = vst [vmem:[#allocation3 + $0x228] sm:$0xff] %v1397_v8  ;;  %v1332_v60 = vsel %vm174_vm0, %v1322_v45, %v1323_v58  ;;  %v7913_v48 = vor.u32 %v9830_v56, %v7912_v37  ;;  %v7865_v45 = vor.u32 %v9818_v17, %v7864_v12  ;;  %v1654_v37 = vrot.slane %v11102_v41, 4  ;;  %v9839_v17 = vld [vmem:[#allocation3 + $0x334] sm:$0xf] }
 0x24b   :  { %v1333_v35 = vsel %vm241_vm8, %v11118_v16, %v1332_v60  ;;  %v9824_v40 = vld [vmem:[#allocation3 + $0x2b4] sm:$0xf0]  ;;  %v7840_v60 = vld [vmem:[#allocation3 + $0x240] sm:$0xf] }
 0x24c   :  { %v11210_v47 = vpop.permute.xlu2 %1582  ;;  %1347 = vst [vmem:[#allocation3 + $0x1f8] sm:$0xff] %v1333_v35  ;;  %2443 = vmatpush.bf16.msra.mxu2 %v7913_v48  ;;  %v11212_v51 = vpop.permute.xlu0 %1708  ;;  %v7889_v1 = vor.u32 %v9824_v40, %v7888_v18  ;;  %v7841_v48 = vor.u32 %v9812_v28, %v7840_v60  ;;  %v7816_v40 = vld [vmem:[#allocation3 + $0x210] sm:$0xf] }
 0x24d   :  { %v1592_v54 = vrot.slane %v11210_v47, 4  ;;  %v1719_v21 = vrot.slane %v11212_v51, 4  ;;  %v7768_v28 = vld [vmem:[#allocation3 + $0x1b0] sm:$0xf] }
 0x24f   :  { %v1602_v4 = vsel %vm174_vm0, %v1591_v34, %v1592_v54  ;;  %v1728_v16 = vsel %vm174_vm0, %v1718_v3, %v1719_v21  ;;  %v1575_v59 = vpop.permute.xlu1 %1574 }
 0x250   :  { %v1603_v32 = vsel %vm513_vm1, %v1581_v13, %v1602_v4  ;;  %v1729_v11 = vsel %vm643_vm3, %v11088_v55, %v1728_v16  ;;  %2444 = vmatpush.bf16.msra.mxu2 %v7889_v1  ;;  %v1588_v2 = vrot.slane %v1575_v59, 4 }
 0x251   :  { %1616 = vst [vmem:[#allocation3 + $0x2f0] sm:$0xff] %v1603_v32  ;;  %v9806_v1 = vld [vmem:[#allocation3 + $0x224] sm:$0xf0] }
 0x252   :  { %1743 = vst [vmem:[#allocation3 + $0x348] sm:$0xff] %v1729_v11  ;;  %v1596_v34 = vsel %vm174_vm0, %v1587_v44, %v1588_v2  ;;  %v1598_v43 = vsel %vm174_vm0, %v1588_v2, %v1589_v0  ;;  %v7817_v11 = vor.u32 %v9806_v1, %v7816_v40  ;;  %v7914_v40 = vld [vmem:[#allocation3 + $0x2e8] sm:$0xf0]  ;;  %v7548_v1 = vld [vmem:[%s12658_s4 + $0x8] sm:$0xf] }
 0x253   :  { %v1597_v15 = vsel %vm513_vm1, %v11067_v53, %v1596_v34  ;;  %v1599_v13 = vsel %vm513_vm1, %v1575_v59, %v1598_v43  ;;  %v7960_v59 = vld [vmem:[#allocation3 + $0x330] sm:$0xf]  ;;  %v9800_v12 = vld [vmem:[#allocation3 + $0x1f4] sm:$0xf0] }
 0x254   :  { %v11234_v8 = vpop.permute.xlu2 %1518  ;;  %1613 = vst [vmem:[#allocation3 + $0x2d8] sm:$0xff] %v1597_v15  ;;  %2445 = vmatpush.bf16.msra.mxu2 %v7865_v45  ;;  %v11236_v55 = vpop.permute.xlu0 %1644 }
 0x255   :  { %v1528_v56 = vrot.slane %v11234_v8, 4  ;;  %1614 = vst [vmem:[#allocation3 + $0x2e0] sm:$0xff] %v1599_v13  ;;  %v1655_v44 = vrot.slane %v11236_v55, 4 }
 0x257   :  { %v1538_v53 = vsel %vm174_vm0, %v1527_v30, %v1528_v56  ;;  %v1664_v35 = vsel %vm174_vm0, %v1654_v37, %v1655_v44  ;;  %v11249_v18 = vpop.permute.xlu1 %1510  ;;  %v9794_v37 = vld [vmem:[#allocation3 + $0x1c4] sm:$0xf0] }
 0x258   :  { %v1539_v3 = vsel %vm448_vm4, %v11170_v20, %v1538_v53  ;;  %v1665_v4 = vsel %vm578_vm2, %v11102_v41, %v1664_v35  ;;  %2446 = vmatpush.bf16.msra.mxu2 %v7841_v48  ;;  %v1524_v16 = vrot.slane %v11249_v18, 4  ;;  %v7936_v53 = vld [vmem:[#allocation3 + $0x300] sm:$0xf]  ;;  %v9833_v35 = vld [vmem:[#allocation3 + $0x304] sm:$0xf] }
 0x259   :  { %1552 = vst [vmem:[#allocation3 + $0x2c0] sm:$0xff] %v1539_v3  ;;  %v9842_v30 = vld [vmem:[#allocation3 + $0x344] sm:$0xf0]  ;;  %v7962_v0 = vld [vmem:[#allocation3 + $0x348] sm:$0xf0] }
 0x25a   :  { %1679 = vst [vmem:[#allocation3 + $0x318] sm:$0xff] %v1665_v4  ;;  %v1532_v32 = vsel %vm174_vm0, %v1523_v61, %v1524_v16  ;;  %v7961_v20 = vor.u32 %v9842_v30, %v7960_v59  ;;  %v7965_v2 = vor.u32 %v9839_v17, %v7962_v0  ;;  %v7792_v61 = vld [vmem:[#allocation3 + $0x1e0] sm:$0xf] }
 0x25b   :  { %v1533_v41 = vsel %vm448_vm4, %v11052_v33, %v1532_v32  ;;  %v7793_v13 = vor.u32 %v9800_v12, %v7792_v61  ;;  %v7920_v59 = vld [vmem:[#allocation3 + $0x2d8] sm:$0xf]  ;;  %v7744_v0 = vld [vmem:[#allocation3 + $0x180] sm:$0xf] }
 0x25c   :  { %v11263_v34 = vpop.permute.xlu2 %1378  ;;  %1549 = vst [vmem:[#allocation3 + $0x2a8] sm:$0xff] %v1533_v41  ;;  %2447 = vmatpush.bf16.msra.mxu2 %v7817_v11  ;;  %2463 = vmatpush.bf16.msra.mxu1 %v7961_v20  ;;  %v11265_v43 = vpop.permute.xlu0 %1434  ;;  %v9788_v32 = vld [vmem:[#allocation3 + $0x194] sm:$0xf0] }
 0x25d   :  { %v1388_v45 = vrot.slane %v11263_v34, 4  ;;  %2505 = vmatpush.bf16.msra.mxu3 %v7965_v2  ;;  %v1448_v15 = vrot.slane %v11265_v43, 4  ;;  %v9827_v2 = vld [vmem:[#allocation3 + $0x2d4] sm:$0xf]  ;;  %v7728_v41 = vld [vmem:[#allocation3 + $0x158] sm:$0xf] }
 0x25e   :  { %v7917_v61 = vor.u32 %v9827_v2, %v7914_v40  ;;  %v9783_v40 = vld [vmem:[#allocation3 + $0x16c] sm:$0xf0] }
 0x25f   :  { %v1398_v33 = vsel %vm174_vm0, %v1387_v9, %v1388_v45  ;;  %v1456_v60 = vsel %vm174_vm0, %v1447_v23, %v1448_v15  ;;  %v11279_v48 = vpop.permute.xlu1 %1370  ;;  %v9736_v23 = vld [vmem:[%s12658_s4 + $0x10] sm:$0xf0] }
 0x260   :  { %v1399_v3 = vsel %vm306_vm7, %v11184_v50, %v1398_v33  ;;  %v1457_v9 = vsel %vm371_vm5, %v11104_v46, %v1456_v60  ;;  %2448 = vmatpush.bf16.msra.mxu2 %v7793_v13  ;;  %v1384_v4 = vrot.slane %v11279_v48, 4  ;;  %v7769_v50 = vor.u32 %v9794_v37, %v7768_v28  ;;  %v9831_v13 = vld [vmem:[#allocation3 + $0x2ec] sm:$0xf0]  ;;  %v7890_v33 = vld [vmem:[#allocation3 + $0x2b8] sm:$0xf0] }
 0x261   :  { %1412 = vst [vmem:[#allocation3 + $0x230] sm:$0xff] %v1399_v3  ;;  %v9836_v17 = vld [vmem:[#allocation3 + $0x314] sm:$0xf0]  ;;  %v7938_v30 = vld [vmem:[#allocation3 + $0x318] sm:$0xf0]  ;;  %v11299_v3 = vor.u32 %v9736_v23, %v7548_v1  ;;  %v7921_v28 = vor.u32 %v9831_v13, %v7920_v59  ;;  %v7745_v23 = vor.u32 %v9788_v32, %v7744_v0 }
 0x262   :  { %1473 = vst [vmem:[#allocation3 + $0x248] sm:$0xff] %v1457_v9  ;;  %v1392_v46 = vsel %vm174_vm0, %v1383_v42, %v1384_v4  ;;  %v7937_v11 = vor.u32 %v9836_v17, %v7936_v53  ;;  %v7941_v20 = vor.u32 %v9833_v35, %v7938_v30  ;;  %v9734_v37 = vld [vmem:[%s12658_s4 + $0x4] sm:$0xf]  ;;  %v9825_v1 = vld [vmem:[#allocation3 + $0x2bc] sm:$0xf0]  ;;  %v7729_v17 = vor.u32 %v9783_v40, %v7728_v41 }
 0x263   :  { %v1393_v12 = vsel %vm306_vm7, %v11093_v62, %v1392_v46  ;;  %v7896_v60 = vld [vmem:[#allocation3 + $0x2a8] sm:$0xf]  ;;  %v7542_v62 = vld [vmem:[%s12658_s4 + $0xc] sm:$0xf0]  ;;  %v9821_v59 = vld [vmem:[#allocation3 + $0x2a4] sm:$0xf] }
 0x264   :  { %v11301_v9 = vpop.permute.xlu2 %1250  ;;  %1409 = vst [vmem:[#allocation3 + $0x218] sm:$0xff] %v1393_v12  ;;  %2449 = vmatpush.bf16.msra.mxu2 %v7769_v50  ;;  %2464 = vmatpush.bf16.msra.mxu1 %v7937_v11  ;;  %v11303_v42 = vpop.permute.xlu0 %1638  ;;  %v7897_v30 = vor.u32 %v9825_v1, %v7896_v60  ;;  %v11325_v2 = vor.u32 %v9734_v37, %v7542_v62  ;;  %v9777_v0 = vld [vmem:[#allocation3 + $0x13c] sm:$0xf0]  ;;  %v7866_v12 = vld [vmem:[#allocation3 + $0x288] sm:$0xf0] }
 0x265   :  { %v1260_v53 = vrot.slane %v11301_v9, 4  ;;  %2506 = vmatpush.bf16.msra.mxu3 %v7941_v20  ;;  %v1652_v35 = vrot.slane %v11303_v42, 4  ;;  %v7893_v20 = vor.u32 %v9821_v59, %v7890_v33  ;;  %v7680_v37 = vld [vmem:[#allocation3 + $0xf8] sm:$0xf]  ;;  %v9771_v59 = vld [vmem:[#allocation3 + $0x10c] sm:$0xf0] }
 0x267   :  { %v1270_v46 = vsel %vm174_vm0, %v1259_v29, %v1260_v53  ;;  %v1660_v50 = vsel %vm174_vm0, %v1651_v22, %v1652_v35  ;;  %v11323_v11 = vpop.permute.xlu1 %1242  ;;  %7982 = vmatmul.msk.bf16.vlgmr.msra.gmra.mxu1 %vm2425_vm10, %v11299_v3  ;;  %v7704_v22 = vld [vmem:[#allocation3 + $0x128] sm:$0xf] }
 0x268   :  { %2485 = vmatpush.bf16.msrb.mxu1 %v7917_v61  ;;  %v1271_v32 = vsel %vm176_vm9, %v11134_v19, %v1270_v46  ;;  %v1661_v29 = vsel %vm578_vm2, %v11150_v6, %v1660_v50  ;;  %2450 = vmatpush.bf16.msra.mxu2 %v7745_v23  ;;  %v1256_v41 = vrot.slane %v11323_v11, 4  ;;  %v9819_v61 = vld [vmem:[#allocation3 + $0x28c] sm:$0xf0]  ;;  %v9815_v6 = vld [vmem:[#allocation3 + $0x274] sm:$0xf]  ;;  %v7705_v60 = vor.u32 %v9777_v0, %v7704_v22 }
 0x269   :  { %2527 = vmatpush.bf16.msrb.mxu3 %v7921_v28  ;;  %1284 = vst [vmem:[#allocation3 + $0x1d0] sm:$0xff] %v1271_v32  ;;  %v7869_v33 = vor.u32 %v9815_v6, %v7866_v12  ;;  %v7872_v28 = vld [vmem:[#allocation3 + $0x278] sm:$0xf]  ;;  %v7842_v23 = vld [vmem:[#allocation3 + $0x258] sm:$0xf0] }
 0x26a   :  { %7983 = vmatmul.msk.bf16.vlgmr.msra.gmra.mxu3 %vm2425_vm10, %v11299_v3  ;;  %1677 = vst [vmem:[#allocation3 + $0x308] sm:$0xff] %v1661_v29  ;;  %v1264_v19 = vsel %vm174_vm0, %v1255_v10, %v1256_v41  ;;  %v7873_v1 = vor.u32 %v9819_v61, %v7872_v28  ;;  %v9765_v46 = vld [vmem:[#allocation3 + $0xdc] sm:$0xf0]  ;;  %v7681_v29 = vor.u32 %v9771_v59, %v7680_v37  ;;  %v9803_v6 = vld [vmem:[#allocation3 + $0x214] sm:$0xf] }
 0x26b   :  { %v1265_v13 = vsel %vm176_vm9, %v11136_v36, %v1264_v19  ;;  %2451 = vmatmul.bf16.vlgmr.msra.gmra.mxu2 %v11325_v2  ;;  %v9809_v36 = vld [vmem:[#allocation3 + $0x244] sm:$0xf]  ;;  %v7818_v19 = vld [vmem:[#allocation3 + $0x228] sm:$0xf0]  ;;  %v7794_v28 = vld [vmem:[#allocation3 + $0x1f8] sm:$0xf0] }
 0x26c   :  { %2486 = vmatpush.bf16.msrb.mxu1 %v7893_v20  ;;  %2513 = vmatpush.bf16.msrb.mxu2 %v7729_v17  ;;  %v1513_v62 = vpop.permute.xlu2 %1512  ;;  %1281 = vst [vmem:[#allocation3 + $0x1b8] sm:$0xff] %v1265_v13  ;;  %v11344_v40 = vpop.permute.xlu0 %1710  ;;  %v7845_v32 = vor.u32 %v9809_v36, %v7842_v23  ;;  %v7821_v13 = vor.u32 %v9803_v6, %v7818_v19  ;;  %v9759_v37 = vld [vmem:[#allocation3 + $0xac] sm:$0xf0]  ;;  %v9797_v23 = vld [vmem:[#allocation3 + $0x1e4] sm:$0xf] }
 0x26d   :  { %2528 = vmatpush.bf16.msrb.mxu3 %v7897_v30  ;;  %v1525_v17 = vrot.slane %v1513_v62, 4  ;;  %v1720_v10 = vrot.slane %v11344_v40, 4  ;;  %v7656_v30 = vld [vmem:[#allocation3 + $0xc8] sm:$0xf]  ;;  %v9785_v19 = vld [vmem:[#allocation3 + $0x184] sm:$0xf] }
 0x26e   :  { %v7848_v6 = vld [vmem:[#allocation3 + $0x248] sm:$0xf] }
 0x26f   :  { %v1534_v50 = vsel %vm174_vm0, %v1524_v16, %v1525_v17  ;;  %v1730_v20 = vsel %vm174_vm0, %v1719_v21, %v1720_v10  ;;  %v11355_v0 = vpop.permute.xlu1 %1442  ;;  %v7657_v16 = vor.u32 %v9765_v46, %v7656_v30  ;;  %v7797_v17 = vor.u32 %v9797_v23, %v7794_v28  ;;  %v7608_v30 = vld [vmem:[#allocation3 + $0x68] sm:$0xf]  ;;  %v9753_v46 = vld [vmem:[#allocation3 + $0x7c] sm:$0xf0] }
 0x270   :  { %2487 = vmatpush.bf16.msrb.mxu1 %v7869_v33  ;;  %2514 = vmatpush.bf16.msrb.mxu2 %v7705_v60  ;;  %v1535_v12 = vsel %vm448_vm4, %v11249_v18, %v1534_v50  ;;  %v1731_v22 = vsel %vm643_vm3, %v11212_v51, %v1730_v20  ;;  %v1452_v61 = vrot.slane %v11355_v0, 4  ;;  %v7632_v51 = vld [vmem:[#allocation3 + $0x98] sm:$0xf] }
 0x271   :  { %2529 = vmatpush.bf16.msrb.mxu3 %v7873_v1  ;;  %1550 = vst [vmem:[#allocation3 + $0x2b0] sm:$0xff] %v1535_v12  ;;  %v7633_v36 = vor.u32 %v9759_v37, %v7632_v51  ;;  %v9747_v37 = vld [vmem:[#allocation3 + $0x4c] sm:$0xf0] }
 0x272   :  { %1744 = vst [vmem:[#allocation3 + $0x350] sm:$0xff] %v1731_v22  ;;  %v1462_v21 = vsel %vm174_vm0, %v1451_v25, %v1452_v61 }
 0x273   :  { %v1463_v18 = vsel %vm371_vm5, %v11116_v5, %v1462_v21  ;;  %v7609_v21 = vor.u32 %v9753_v46, %v7608_v30 }
 0x274   :  { %2488 = vmatpush.bf16.msrb.mxu1 %v7845_v32  ;;  %2515 = vmatpush.bf16.msrb.mxu2 %v7681_v29  ;;  %v1373_v33 = vpop.permute.xlu2 %1372  ;;  %1476 = vst [vmem:[#allocation3 + $0x260] sm:$0xff] %v1463_v18  ;;  %v11369_v60 = vpop.permute.xlu0 %1314  ;;  %v9791_v32 = vld [vmem:[#allocation3 + $0x1b4] sm:$0xf]  ;;  %v7770_v29 = vld [vmem:[#allocation3 + $0x1c8] sm:$0xf0] }
 0x275   :  { %v1385_v62 = vrot.slane %v1373_v33, 4  ;;  %v1324_v1 = vrot.slane %v11369_v60, 4 }
 0x277   :  { %v1394_v25 = vsel %vm174_vm0, %v1384_v4, %v1385_v62  ;;  %v1334_v5 = vsel %vm174_vm0, %v1323_v58, %v1324_v1  ;;  %v11380_v59 = vpop.permute.xlu1 %1646  ;;  %v7968_v58 = vld [vmem:[#allocation3 + $0x338] sm:$0xf]  ;;  %v9780_v62 = vld [vmem:[#allocation3 + $0x15c] sm:$0xf] }
 0x278   :  { %2489 = vmatpush.bf16.msrb.mxu1 %v7821_v13  ;;  %2516 = vmatpush.bf16.msrb.mxu2 %v7657_v16  ;;  %v1395_v50 = vsel %vm306_vm7, %v11279_v48, %v1394_v25  ;;  %v1335_v20 = vsel %vm241_vm8, %v11197_v52, %v1334_v5  ;;  %v1656_v4 = vrot.slane %v11380_v59, 4  ;;  %v7773_v16 = vor.u32 %v9791_v32, %v7770_v29  ;;  %v7746_v13 = vld [vmem:[#allocation3 + $0x198] sm:$0xf0]  ;;  %v9807_v32 = vld [vmem:[#allocation3 + $0x22c] sm:$0xf0] }
 0x279   :  { %1410 = vst [vmem:[#allocation3 + $0x220] sm:$0xff] %v1395_v50  ;;  %v9843_v12 = vld [vmem:[#allocation3 + $0x34c] sm:$0xf0]  ;;  %v7749_v5 = vor.u32 %v9785_v19, %v7746_v13  ;;  %v9774_v29 = vld [vmem:[#allocation3 + $0x12c] sm:$0xf] }
 0x27a   :  { %1348 = vst [vmem:[#allocation3 + $0x200] sm:$0xff] %v1335_v20  ;;  %v1666_v22 = vsel %vm174_vm0, %v1655_v44, %v1656_v4  ;;  %v7969_v48 = vor.u32 %v9843_v12, %v7968_v58  ;;  %v7824_v44 = vld [vmem:[#allocation3 + $0x218] sm:$0xf]  ;;  %v7560_v19 = vld [vmem:[#allocation3 + $0x8] sm:$0xf] }
 0x27b   :  { %v1667_v52 = vsel %vm578_vm2, %v11236_v55, %v1666_v22  ;;  %v9813_v18 = vld [vmem:[#allocation3 + $0x25c] sm:$0xf0]  ;;  %v7584_v55 = vld [vmem:[#allocation3 + $0x38] sm:$0xf]  ;;  %v7944_v13 = vld [vmem:[#allocation3 + $0x308] sm:$0xf] }
 0x27c   :  { %2490 = vmatpush.bf16.msrb.mxu1 %v7797_v17  ;;  %2517 = vmatpush.bf16.msrb.mxu2 %v7633_v36  ;;  %v1445_v51 = vpop.permute.xlu2 %1444  ;;  %1680 = vst [vmem:[#allocation3 + $0x320] sm:$0xff] %v1667_v52  ;;  %v1521_v33 = vpop.permute.xlu0 %1520  ;;  %v7849_v28 = vor.u32 %v9813_v18, %v7848_v6  ;;  %v7730_v17 = vld [vmem:[#allocation3 + $0x170] sm:$0xf0]  ;;  %v7585_v50 = vor.u32 %v9747_v37, %v7584_v55  ;;  %v7706_v52 = vld [vmem:[#allocation3 + $0x140] sm:$0xf0] }
 0x27d   :  { %2547 = vmatpush.bf16.msra.mxu0 %v7969_v48  ;;  %v1453_v23 = vrot.slane %v1445_v51, 4  ;;  %v1529_v25 = vrot.slane %v1521_v33, 4  ;;  %v7733_v20 = vor.u32 %v9780_v62, %v7730_v17  ;;  %v7825_v48 = vor.u32 %v9807_v32, %v7824_v44  ;;  %v9768_v6 = vld [vmem:[#allocation3 + $0xfc] sm:$0xf]  ;;  %v7682_v44 = vld [vmem:[#allocation3 + $0x110] sm:$0xf0] }
 0x27e   :  { %2530 = vmatpush.bf16.msrb.mxu3 %v7849_v28  ;;  %v9828_v33 = vld [vmem:[#allocation3 + $0x2dc] sm:$0xf]  ;;  %v7709_v62 = vor.u32 %v9774_v29, %v7706_v52 }
 0x27f   :  { %v1464_v36 = vsel %vm174_vm0, %v1452_v61, %v1453_v23  ;;  %v1540_v30 = vsel %vm174_vm0, %v1528_v56, %v1529_v25  ;;  %v1585_v46 = vpop.permute.xlu1 %1584  ;;  %v9741_v61 = vld [vmem:[#allocation3 + $0x1c] sm:$0xf0]  ;;  %v7970_v56 = vld [vmem:[#allocation3 + $0x350] sm:$0xf0] }
 0x280   :  { %2491 = vmatpush.bf16.msrb.mxu1 %v7773_v16  ;;  %2518 = vmatpush.bf16.msrb.mxu2 %v7609_v21  ;;  %v1465_v58 = vsel %vm371_vm5, %v11355_v0, %v1464_v36  ;;  %v1541_v12 = vsel %vm448_vm4, %v11234_v8, %v1540_v30  ;;  %v1593_v22 = vrot.slane %v1585_v46, 4  ;;  %v9840_v0 = vld [vmem:[#allocation3 + $0x33c] sm:$0xf]  ;;  %v7561_v18 = vor.u32 %v9741_v61, %v7560_v19  ;;  %v7922_v36 = vld [vmem:[#allocation3 + $0x2f0] sm:$0xf0] }
 0x281   :  { %1477 = vst [vmem:[#allocation3 + $0x268] sm:$0xff] %v1465_v58  ;;  %v9801_v21 = vld [vmem:[#allocation3 + $0x1fc] sm:$0xf0]  ;;  %v7973_v23 = vor.u32 %v9840_v0, %v7970_v56  ;;  %v7925_v30 = vor.u32 %v9828_v33, %v7922_v36  ;;  %v7776_v46 = vld [vmem:[#allocation3 + $0x1b8] sm:$0xf]  ;;  %v7685_v58 = vor.u32 %v9768_v6, %v7682_v44 }
 0x282   :  { %1553 = vst [vmem:[#allocation3 + $0x2c8] sm:$0xff] %v1541_v12  ;;  %v1604_v16 = vsel %vm174_vm0, %v1592_v54, %v1593_v22  ;;  %2531 = vmatpush.bf16.msrb.mxu3 %v7825_v48  ;;  %v7800_v54 = vld [vmem:[#allocation3 + $0x1e8] sm:$0xf]  ;;  %v9834_v12 = vld [vmem:[#allocation3 + $0x30c] sm:$0xf] }
 0x283   :  { %v1605_v8 = vsel %vm513_vm1, %v11210_v47, %v1604_v16  ;;  %v9837_v51 = vld [vmem:[#allocation3 + $0x31c] sm:$0xf0]  ;;  %v7801_v17 = vor.u32 %v9801_v21, %v7800_v54  ;;  %v7946_v47 = vld [vmem:[#allocation3 + $0x320] sm:$0xf0]  ;;  %v9762_v22 = vld [vmem:[#allocation3 + $0xcc] sm:$0xf] }
 0x284   :  { %2492 = vmatpush.bf16.msrb.mxu1 %v7749_v5  ;;  %2519 = vmatpush.bf16.msrb.mxu2 %v7585_v50  ;;  %v1649_v28 = vpop.permute.xlu2 %1648  ;;  %1617 = vst [vmem:[#allocation3 + $0x2f8] sm:$0xff] %v1605_v8  ;;  %v1705_v37 = vpop.permute.xlu0 %1704  ;;  %v7945_v25 = vor.u32 %v9837_v51, %v7944_v13  ;;  %v9822_v50 = vld [vmem:[#allocation3 + $0x2ac] sm:$0xf]  ;;  %v7658_v48 = vld [vmem:[#allocation3 + $0xe0] sm:$0xf0]  ;;  %v7949_v61 = vor.u32 %v9834_v12, %v7946_v47 }
 0x285   :  { %v1657_v5 = vrot.slane %v1649_v28, 4  ;;  %v1717_v55 = vrot.slane %v1705_v37, 4  ;;  %v9795_v56 = vld [vmem:[#allocation3 + $0x1cc] sm:$0xf0]  ;;  %v7898_v0 = vld [vmem:[#allocation3 + $0x2c0] sm:$0xf0] }
 0x286   :  { %2532 = vmatpush.bf16.msrb.mxu3 %v7801_v17  ;;  %2548 = vmatpush.bf16.msra.mxu0 %v7945_v25  ;;  %v7777_v16 = vor.u32 %v9795_v56, %v7776_v46  ;;  %v9789_v21 = vld [vmem:[#allocation3 + $0x19c] sm:$0xf0]  ;;  %v7874_v28 = vld [vmem:[#allocation3 + $0x290] sm:$0xf0] }
 0x287   :  { %2493 = vmatmul.bf16.vlgmr.msrb.gmra.mxu1 %v11325_v2  ;;  %v1726_v32 = vsel %vm174_vm0, %v1716_v26, %v1717_v55  ;;  %v1437_v29 = vpop.permute.xlu1 %1436  ;;  %v7752_v26 = vld [vmem:[#allocation3 + $0x188] sm:$0xf]  ;;  %v7736_v8 = vld [vmem:[#allocation3 + $0x160] sm:$0xf]  ;;  %v7634_v55 = vld [vmem:[#allocation3 + $0xb0] sm:$0xf0] }
 0x288   :  { %2555 = vmatpush.bf16.msra.mxu1 %v7733_v20  ;;  %2520 = vmatpush.bf16.msrb.mxu2 %v7561_v18  ;;  %v1668_v20 = vsel %vm174_vm0, %v1656_v4, %v1657_v5  ;;  %v1727_v52 = vsel %vm643_vm3, %v11162_v24, %v1726_v32  ;;  %v1449_v4 = vrot.slane %v1437_v29, 4  ;;  %v7661_v24 = vor.u32 %v9762_v22, %v7658_v48  ;;  %v9784_v18 = vld [vmem:[#allocation3 + $0x174] sm:$0xf0]  ;;  %v7928_v51 = vld [vmem:[#allocation3 + $0x2e0] sm:$0xf] }
 0x289   :  { %v1669_v19 = vsel %vm578_vm2, %v11380_v59, %v1668_v20  ;;  %1742 = vst [vmem:[#allocation3 + $0x340] sm:$0xff] %v1727_v52  ;;  %v7901_v59 = vor.u32 %v9822_v50, %v7898_v0  ;;  %7984 = vmatmul.msk.bf16.vlgmr.msra.gmra.mxu0 %vm2425_vm10, %v11299_v3  ;;  %v7753_v44 = vor.u32 %v9789_v21, %v7752_v26  ;;  %v9816_v5 = vld [vmem:[#allocation3 + $0x27c] sm:$0xf]  ;;  %v9826_v36 = vld [vmem:[#allocation3 + $0x2c4] sm:$0xf0] }
 0x28a   :  { %2569 = vmatpush.bf16.msrb.mxu0 %v7925_v30  ;;  %1681 = vst [vmem:[#allocation3 + $0x328] sm:$0xff] %v1669_v19  ;;  %v1458_v6 = vsel %vm174_vm0, %v1448_v15, %v1449_v4  ;;  %2533 = vmatpush.bf16.msrb.mxu3 %v7777_v16  ;;  %v7737_v17 = vor.u32 %v9784_v18, %v7736_v8  ;;  %v7850_v50 = vld [vmem:[#allocation3 + $0x260] sm:$0xf0]  ;;  %v7712_v20 = vld [vmem:[#allocation3 + $0x130] sm:$0xf] }
 0x28b   :  { %2521 = vmatmul.bf16.vlgmr.msrb.gmra.mxu2 %v11031_v39  ;;  %v1459_v13 = vsel %vm371_vm5, %v11265_v43, %v1458_v6  ;;  %v9832_v33 = vld [vmem:[#allocation3 + $0x2f4] sm:$0xf0]  ;;  %v7877_v43 = vor.u32 %v9816_v5, %v7874_v28  ;;  %v9778_v32 = vld [vmem:[#allocation3 + $0x144] sm:$0xf0]  ;;  %v9750_v48 = vld [vmem:[#allocation3 + $0x6c] sm:$0xf] }
 0x28c   :  { %2556 = vmatpush.bf16.msra.mxu1 %v7709_v62  ;;  %2589 = vmatpush.bf16.msra.mxu2 %v7973_v23  ;;  %v1245_v37 = vpop.permute.xlu2 %1244  ;;  %1474 = vst [vmem:[#allocation3 + $0x250] sm:$0xff] %v1459_v13  ;;  %v1309_v62 = vpop.permute.xlu0 %1308  ;;  %v7929_v15 = vor.u32 %v9832_v33, %v7928_v51  ;;  %v9756_v23 = vld [vmem:[#allocation3 + $0x9c] sm:$0xf]  ;;  %v7610_v52 = vld [vmem:[#allocation3 + $0x80] sm:$0xf0] }
 0x28d   :  { %v1257_v54 = vrot.slane %v1245_v37, 4  ;;  %v1321_v25 = vrot.slane %v1309_v62, 4  ;;  %v7637_v22 = vor.u32 %v9756_v23, %v7634_v55  ;;  %v9804_v26 = vld [vmem:[#allocation3 + $0x21c] sm:$0xf]  ;;  %v7688_v16 = vld [vmem:[#allocation3 + $0x100] sm:$0xf] }
 0x28e   :  { %2570 = vmatpush.bf16.msrb.mxu0 %v7901_v59  ;;  %2534 = vmatpush.bf16.msrb.mxu3 %v7753_v44  ;;  %v9772_v0 = vld [vmem:[#allocation3 + $0x114] sm:$0xf0]  ;;  %v7586_v21 = vld [vmem:[#allocation3 + $0x50] sm:$0xf0]  ;;  %v7613_v59 = vor.u32 %v9750_v48, %v7610_v52  ;;  %v7664_v13 = vld [vmem:[#allocation3 + $0xd0] sm:$0xf] }
 0x28f   :  { %v1266_v47 = vsel %vm174_vm0, %v1256_v41, %v1257_v54  ;;  %v1330_v30 = vsel %vm174_vm0, %v1320_v27, %v1321_v25  ;;  %v1713_v46 = vpop.permute.xlu1 %1712  ;;  %v7904_v41 = vld [vmem:[#allocation3 + $0x2b0] sm:$0xf]  ;;  %v9810_v27 = vld [vmem:[#allocation3 + $0x24c] sm:$0xf]  ;;  %v9766_v51 = vld [vmem:[#allocation3 + $0xe4] sm:$0xf0]  ;;  %v7689_v28 = vor.u32 %v9772_v0, %v7688_v16 }
 0x290   :  { %2557 = vmatpush.bf16.msra.mxu1 %v7685_v58  ;;  %2590 = vmatpush.bf16.msra.mxu2 %v7949_v61  ;;  %v1267_v29 = vsel %vm176_vm9, %v11323_v11, %v1266_v47  ;;  %v1331_v58 = vsel %vm241_vm8, %v11182_v49, %v1330_v30  ;;  %v1721_v12 = vrot.slane %v1713_v46, 4  ;;  %v7905_v19 = vor.u32 %v9826_v36, %v7904_v41  ;;  %v9820_v61 = vld [vmem:[#allocation3 + $0x294] sm:$0xf0]  ;;  %v7802_v23 = vld [vmem:[#allocation3 + $0x200] sm:$0xf0] }
 0x291   :  { %1282 = vst [vmem:[#allocation3 + $0x1c0] sm:$0xff] %v1267_v29  ;;  %2535 = vmatmul.bf16.vlgmr.msrb.gmra.mxu3 %v11325_v2  ;;  %v7853_v11 = vor.u32 %v9810_v27, %v7850_v50  ;;  %v7713_v49 = vor.u32 %v9778_v32, %v7712_v20  ;;  %v9814_v5 = vld [vmem:[#allocation3 + $0x264] sm:$0xf0]  ;;  %v7665_v55 = vor.u32 %v9766_v51, %v7664_v13  ;;  %v9738_v36 = vld [vmem:[#allocation3 + $0xc] sm:$0xf] }
 0x292   :  { %2571 = vmatpush.bf16.msrb.mxu0 %v7877_v43  ;;  %2597 = vmatpush.bf16.msra.mxu3 %v7737_v17  ;;  %1346 = vst [vmem:[#allocation3 + $0x1f0] sm:$0xff] %v1331_v58  ;;  %v1732_v4 = vsel %vm174_vm0, %v1720_v10, %v1721_v12  ;;  %v7880_v10 = vld [vmem:[#allocation3 + $0x280] sm:$0xf]  ;;  %v9798_v17 = vld [vmem:[#allocation3 + $0x1ec] sm:$0xf] }
 0x293   :  { %v1733_v56 = vsel %vm643_vm3, %v11344_v40, %v1732_v4  ;;  %v7881_v18 = vor.u32 %v9820_v61, %v7880_v10  ;;  %v7856_v40 = vld [vmem:[#allocation3 + $0x250] sm:$0xf]  ;;  %v7805_v47 = vor.u32 %v9798_v17, %v7802_v23  ;;  %v7640_v30 = vld [vmem:[#allocation3 + $0xa0] sm:$0xf]  ;;  %v9760_v46 = vld [vmem:[#allocation3 + $0xb4] sm:$0xf0] }
 0x294   :  { %2558 = vmatpush.bf16.msra.mxu1 %v7661_v24  ;;  %2611 = vmatpush.bf16.msrb.mxu2 %v7929_v15  ;;  %1745 = vst [vmem:[#allocation3 + $0x358] sm:$0xff] %v1733_v56  ;;  %v1381_v6 = vpop.permute.xlu0 %1380  ;;  %v7826_v24 = vld [vmem:[#allocation3 + $0x230] sm:$0xf0]  ;;  %v9744_v15 = vld [vmem:[#allocation3 + $0x3c] sm:$0xf]  ;;  %v7857_v43 = vor.u32 %v9814_v5, %v7856_v40 }
 0x295   :  { %v1389_v8 = vrot.slane %v1381_v6, 4  ;;  %v7829_v33 = vor.u32 %v9804_v26, %v7826_v24  ;;  %v7589_v44 = vor.u32 %v9744_v15, %v7586_v21  ;;  %v7976_v20 = vld [vmem:[#allocation3 + $0x340] sm:$0xf]  ;;  %v9792_v29 = vld [vmem:[#allocation3 + $0x1bc] sm:$0xf] }
 0x296   :  { %2572 = vmatpush.bf16.msrb.mxu0 %v7853_v11  ;;  %2598 = vmatpush.bf16.msra.mxu3 %v7713_v49  ;;  %v9786_v27 = vld [vmem:[#allocation3 + $0x18c] sm:$0xf]  ;;  %v7754_v52 = vld [vmem:[#allocation3 + $0x1a0] sm:$0xf0]  ;;  %v9754_v11 = vld [vmem:[#allocation3 + $0x84] sm:$0xf0] }
 0x297   :  { %v1400_v37 = vsel %vm174_vm0, %v1388_v45, %v1389_v8  ;;  %v1641_v62 = vpop.permute.xlu1 %1640  ;;  %v9781_v49 = vld [vmem:[#allocation3 + $0x164] sm:$0xf]  ;;  %v7738_v61 = vld [vmem:[#allocation3 + $0x178] sm:$0xf0]  ;;  %v7832_v16 = vld [vmem:[#allocation3 + $0x220] sm:$0xf] }
 0x298   :  { %2559 = vmatpush.bf16.msra.mxu1 %v7637_v22  ;;  %2612 = vmatpush.bf16.msrb.mxu2 %v7905_v19  ;;  %v1401_v54 = vsel %vm306_vm7, %v11263_v34, %v1400_v37  ;;  %v1653_v25 = vrot.slane %v1641_v62, 4  ;;  %v7562_v34 = vld [vmem:[#allocation3 + $0x20] sm:$0xf0]  ;;  %v7641_v19 = vor.u32 %v9760_v46, %v7640_v30  ;;  %v7616_v6 = vld [vmem:[#allocation3 + $0x70] sm:$0xf] }
 0x299   :  { %1413 = vst [vmem:[#allocation3 + $0x238] sm:$0xff] %v1401_v54  ;;  %v7565_v12 = vor.u32 %v9738_v36, %v7562_v34  ;;  %v7617_v10 = vor.u32 %v9754_v11, %v7616_v6  ;;  %v7592_v24 = vld [vmem:[#allocation3 + $0x40] sm:$0xf]  ;;  %v7930_v8 = vld [vmem:[#allocation3 + $0x2f8] sm:$0xf0] }
 0x29a   :  { %2573 = vmatpush.bf16.msrb.mxu0 %v7829_v33  ;;  %2599 = vmatpush.bf16.msra.mxu3 %v7689_v28  ;;  %v1662_v45 = vsel %vm174_vm0, %v1652_v35, %v1653_v25  ;;  %v7778_v35 = vld [vmem:[#allocation3 + $0x1d0] sm:$0xf0]  ;;  %v9838_v51 = vld [vmem:[#allocation3 + $0x324] sm:$0xf0]  ;;  %v9748_v33 = vld [vmem:[#allocation3 + $0x54] sm:$0xf0] }
 0x29b   :  { %7985 = vmatmul.msk.bf16.vlgmr.msra.gmra.mxu2 %vm2425_vm10, %v11299_v3  ;;  %v1663_v50 = vsel %vm578_vm2, %v11303_v42, %v1662_v45  ;;  %v9844_v32 = vld [vmem:[#allocation3 + $0x354] sm:$0xf0]  ;;  %v7781_v48 = vor.u32 %v9792_v29, %v7778_v35  ;;  %v9829_v40 = vld [vmem:[#allocation3 + $0x2e4] sm:$0xf]  ;;  %v7714_v37 = vld [vmem:[#allocation3 + $0x148] sm:$0xf0]  ;;  %v7593_v62 = vor.u32 %v9748_v33, %v7592_v24 }
 0x29c   :  { %2560 = vmatpush.bf16.msra.mxu1 %v7613_v59  ;;  %2613 = vmatpush.bf16.msrb.mxu2 %v7881_v18  ;;  %1678 = vst [vmem:[#allocation3 + $0x310] sm:$0xff] %v1663_v50  ;;  %v1253_v58 = vpop.permute.xlu0 %1252  ;;  %v7977_v22 = vor.u32 %v9844_v32, %v7976_v20  ;;  %v7757_v59 = vor.u32 %v9786_v27, %v7754_v52  ;;  %v9775_v15 = vld [vmem:[#allocation3 + $0x134] sm:$0xf]  ;;  %v7906_v23 = vld [vmem:[#allocation3 + $0x2c8] sm:$0xf0] }
 0x29d   :  { %v1261_v41 = vrot.slane %v1253_v58, 4  ;;  %v7741_v18 = vor.u32 %v9781_v49, %v7738_v61  ;;  %v9742_v54 = vld [vmem:[#allocation3 + $0x24] sm:$0xf0]  ;;  %v9823_v25 = vld [vmem:[#allocation3 + $0x2b4] sm:$0xf] }
 0x29e   :  { %2574 = vmatpush.bf16.msrb.mxu0 %v7805_v47  ;;  %2600 = vmatpush.bf16.msra.mxu3 %v7665_v55  ;;  %v7978_v5 = vld [vmem:[#allocation3 + $0x358] sm:$0xf0]  ;;  %v7568_v55 = vld [vmem:[#allocation3 + $0x10] sm:$0xf]  ;;  %v9841_v47 = vld [vmem:[#allocation3 + $0x344] sm:$0xf] }
 0x29f   :  { %v1272_v42 = vsel %vm174_vm0, %v1260_v53, %v1261_v41  ;;  %v1317_v4 = vpop.permute.xlu1 %1316  ;;  %v7690_v17 = vld [vmem:[#allocation3 + $0x118] sm:$0xf0]  ;;  %v7569_v45 = vor.u32 %v9742_v54, %v7568_v55  ;;  %v9763_v34 = vld [vmem:[#allocation3 + $0xd4] sm:$0xf]  ;;  %v7666_v30 = vld [vmem:[#allocation3 + $0xe8] sm:$0xf0]  ;;  %v7981_v50 = vor.u32 %v9841_v47, %v7978_v5 }
 0x2a0   :  { %2561 = vmatpush.bf16.msra.mxu1 %v7589_v44  ;;  %2614 = vmatpush.bf16.msrb.mxu2 %v7857_v43  ;;  %v1273_v56 = vsel %vm176_vm9, %v11301_v9, %v1272_v42  ;;  %v1325_v26 = vrot.slane %v1317_v4, 4  ;;  %v9808_v0 = vld [vmem:[#allocation3 + $0x234] sm:$0xf0]  ;;  %v9769_v44 = vld [vmem:[#allocation3 + $0x104] sm:$0xf]  ;;  %v7909_v43 = vor.u32 %v9823_v25, %v7906_v23  ;;  %v7669_v41 = vor.u32 %v9763_v34, %v7666_v30 }
 0x2a1   :  { %1285 = vst [vmem:[#allocation3 + $0x1d8] sm:$0xff] %v1273_v56  ;;  %v7833_v21 = vor.u32 %v9808_v0, %v7832_v16  ;;  %v7882_v36 = vld [vmem:[#allocation3 + $0x298] sm:$0xf0]  ;;  %v7693_v46 = vor.u32 %v9769_v44, %v7690_v17  ;;  %v7808_v20 = vld [vmem:[#allocation3 + $0x1f0] sm:$0xf] }
 0x2a2   :  { %2575 = vmatpush.bf16.msrb.mxu0 %v7781_v48  ;;  %2601 = vmatpush.bf16.msra.mxu3 %v7641_v19  ;;  %v1336_v53 = vsel %vm174_vm0, %v1324_v1, %v1325_v26  ;;  %v7933_v1 = vor.u32 %v9829_v40, %v7930_v8  ;;  %v9817_v58 = vld [vmem:[#allocation3 + $0x284] sm:$0xf]  ;;  %v9942_v35 = vld [vmem:[#allocation3 + $0x2e4] sm:$0xf0]  ;;  %v7954_v19 = vld [vmem:[#allocation3 + $0x328] sm:$0xf0] }
 0x2a3   :  { %v1337_v9 = vsel %vm241_vm8, %v11369_v60, %v1336_v53  ;;  %v7952_v13 = vld [vmem:[#allocation3 + $0x310] sm:$0xf]  ;;  %v7717_v60 = vor.u32 %v9775_v15, %v7714_v37  ;;  %v9811_v27 = vld [vmem:[#allocation3 + $0x254] sm:$0xf]  ;;  %v7784_v4 = vld [vmem:[#allocation3 + $0x1c0] sm:$0xf] }
 0x2a4   :  { %2562 = vmatpush.bf16.msra.mxu1 %v7565_v12  ;;  %2615 = vmatpush.bf16.msrb.mxu2 %v7833_v21  ;;  %1349 = vst [vmem:[#allocation3 + $0x208] sm:$0xff] %v1337_v9  ;;  %v7953_v28 = vor.u32 %v9838_v51, %v7952_v13  ;;  %v9835_v12 = vld [vmem:[#allocation3 + $0x314] sm:$0xf]  ;;  %v8366_v42 = vld [vmem:[#allocation3 + $0x2d0] sm:$0xf] }
 0x2a5   :  { %v7957_v52 = vor.u32 %v9835_v12, %v7954_v19  ;;  %v8367_v11 = vor.u32 %v9942_v35, %v8366_v42  ;;  %v7858_v61 = vld [vmem:[#allocation3 + $0x268] sm:$0xf0]  ;;  %v9757_v56 = vld [vmem:[#allocation3 + $0xa4] sm:$0xf]  ;;  %v7642_v26 = vld [vmem:[#allocation3 + $0xb8] sm:$0xf0] }
 0x2a6   :  { %2576 = vmatpush.bf16.msrb.mxu0 %v7757_v59  ;;  %2602 = vmatpush.bf16.msra.mxu3 %v7617_v10  ;;  %v7861_v16 = vor.u32 %v9811_v27, %v7858_v61  ;;  %v9936_v0 = vld [vmem:[#allocation3 + $0x2b4] sm:$0xf0]  ;;  %v7760_v21 = vld [vmem:[#allocation3 + $0x190] sm:$0xf]  ;;  %v7834_v6 = vld [vmem:[#allocation3 + $0x238] sm:$0xf0]  ;;  %v7645_v10 = vor.u32 %v9757_v56, %v7642_v26 }
 0x2a7   :  { %2563 = vmatmul.bf16.vlgmr.msra.gmra.mxu1 %v11031_v39  ;;  %v8174_v53 = vld [vmem:[#allocation3 + $0x150] sm:$0xf]  ;;  %v9894_v59 = vld [vmem:[#allocation3 + $0x164] sm:$0xf0]  ;;  %v8342_v24 = vld [vmem:[#allocation3 + $0x2a0] sm:$0xf] }
 0x2a8   :  { %2631 = vmatpush.bf16.msrb.mxu1 %v7977_v22  ;;  %v7885_v22 = vor.u32 %v9817_v58, %v7882_v36  ;;  %v9796_v48 = vld [vmem:[#allocation3 + $0x1d4] sm:$0xf0]  ;;  %v9790_v8 = vld [vmem:[#allocation3 + $0x1a4] sm:$0xf0]  ;;  %v8343_v9 = vor.u32 %v9936_v0, %v8342_v24  ;;  %v9805_v13 = vld [vmem:[#allocation3 + $0x224] sm:$0xf] }
 0x2a9   :  { %2577 = vmatmul.bf16.vlgmr.msrb.gmra.mxu0 %v11325_v2  ;;  %v7785_v49 = vor.u32 %v9796_v48, %v7784_v4  ;;  %v7618_v51 = vld [vmem:[#allocation3 + $0x88] sm:$0xf0]  ;;  %v7837_v33 = vor.u32 %v9805_v13, %v7834_v6  ;;  %v9930_v40 = vld [vmem:[#allocation3 + $0x284] sm:$0xf0]  ;;  %v9751_v37 = vld [vmem:[#allocation3 + $0x74] sm:$0xf] }
 0x2aa   :  { %2639 = vmatpush.bf16.msra.mxu0 %v7741_v18  ;;  %2603 = vmatpush.bf16.msra.mxu3 %v7593_v62  ;;  %v7761_v18 = vor.u32 %v9790_v8, %v7760_v21  ;;  %v9888_v62 = vld [vmem:[#allocation3 + $0x134] sm:$0xf0]  ;;  %v7621_v15 = vor.u32 %v9751_v37, %v7618_v51  ;;  %v8318_v23 = vld [vmem:[#allocation3 + $0x270] sm:$0xf]  ;;  %v9799_v25 = vld [vmem:[#allocation3 + $0x1f4] sm:$0xf] }
 0x2ab   :  { %v9802_v32 = vld [vmem:[#allocation3 + $0x204] sm:$0xf0]  ;;  %v8319_v54 = vor.u32 %v9930_v40, %v8318_v23  ;;  %v9745_v44 = vld [vmem:[#allocation3 + $0x44] sm:$0xf]  ;;  %v7594_v5 = vld [vmem:[#allocation3 + $0x58] sm:$0xf0] }
 0x2ac   :  { %2632 = vmatpush.bf16.msrb.mxu1 %v7953_v28  ;;  %v7809_v29 = vor.u32 %v9802_v32, %v7808_v20  ;;  %v8175_v28 = vor.u32 %v9894_v59, %v8174_v53  ;;  %v9924_v17 = vld [vmem:[#allocation3 + $0x254] sm:$0xf0]  ;;  %v7786_v36 = vld [vmem:[#allocation3 + $0x1d8] sm:$0xf0]  ;;  %v7597_v47 = vor.u32 %v9745_v44, %v7594_v5  ;;  %v8294_v34 = vld [vmem:[#allocation3 + $0x240] sm:$0xf] }
 0x2ad   :  { %v8126_v30 = vld [vmem:[#allocation3 + $0xf0] sm:$0xf]  ;;  %v9793_v20 = vld [vmem:[#allocation3 + $0x1c4] sm:$0xf]  ;;  %v8102_v32 = vld [vmem:[#allocation3 + $0xc0] sm:$0xf] }
 0x2ae   :  { %2640 = vmatpush.bf16.msra.mxu0 %v7717_v60  ;;  %2604 = vmatpush.bf16.msra.mxu3 %v7569_v45  ;;  %v8150_v60 = vld [vmem:[#allocation3 + $0x120] sm:$0xf]  ;;  %v9882_v45 = vld [vmem:[#allocation3 + $0x104] sm:$0xf0]  ;;  %v7789_v58 = vor.u32 %v9793_v20, %v7786_v36  ;;  %v9787_v35 = vld [vmem:[#allocation3 + $0x194] sm:$0xf] }
 0x2af   :  { %2616 = vmatpush.bf16.msrb.mxu2 %v7809_v29  ;;  %v9876_v29 = vld [vmem:[#allocation3 + $0xd4] sm:$0xf0]  ;;  %v8127_v12 = vor.u32 %v9882_v45, %v8126_v30  ;;  %v8270_v19 = vld [vmem:[#allocation3 + $0x210] sm:$0xf]  ;;  %v7762_v42 = vld [vmem:[#allocation3 + $0x1a8] sm:$0xf0] }
 0x2b0   :  { %2653 = vmatpush.bf16.msra.mxu1 %v7933_v1  ;;  %v7810_v1 = vld [vmem:[#allocation3 + $0x208] sm:$0xf0]  ;;  %v8103_v27 = vor.u32 %v9876_v29, %v8102_v32  ;;  %v7765_v4 = vor.u32 %v9787_v35, %v7762_v42  ;;  %v9870_v61 = vld [vmem:[#allocation3 + $0xa4] sm:$0xf0]  ;;  %v8246_v56 = vld [vmem:[#allocation3 + $0x1e0] sm:$0xf] }
 0x2b1   :  { %2605 = vmatmul.bf16.vlgmr.msra.gmra.mxu3 %v11031_v39  ;;  %v7813_v55 = vor.u32 %v9799_v25, %v7810_v1  ;;  %v8222_v0 = vld [vmem:[#allocation3 + $0x1b0] sm:$0xf]  ;;  %v9906_v21 = vld [vmem:[#allocation3 + $0x1c4] sm:$0xf0]  ;;  %v9864_v6 = vld [vmem:[#allocation3 + $0x74] sm:$0xf0] }
 0x2b2   :  { %2641 = vmatpush.bf16.msra.mxu0 %v7693_v46  ;;  %2673 = vmatpush.bf16.msrb.mxu3 %v7981_v50  ;;  %v7570_v46 = vld [vmem:[#allocation3 + $0x28] sm:$0xf0]  ;;  %v8295_v50 = vor.u32 %v9924_v17, %v8294_v34  ;;  %v8223_v53 = vor.u32 %v9906_v21, %v8222_v0  ;;  %v9900_v24 = vld [vmem:[#allocation3 + $0x194] sm:$0xf0]  ;;  %v8030_v8 = vld [vmem:[#allocation3 + $0x30] sm:$0xf] }
 0x2b3   :  { %2617 = vmatpush.bf16.msrb.mxu2 %v7785_v49  ;;  %v8078_v49 = vld [vmem:[#allocation3 + $0x90] sm:$0xf]  ;;  %v8006_v13 = vld [vmem:[#allocation3] sm:$0xf]  ;;  %v9852_v51 = vld [vmem:[#allocation3 + $0x14] sm:$0xf0] }
 0x2b4   :  { %2654 = vmatpush.bf16.msra.mxu1 %v7909_v43  ;;  %v8151_v43 = vor.u32 %v9888_v62, %v8150_v60  ;;  %v8152_v37 = vld [vmem:[#allocation3 + $0x138] sm:$0xf0]  ;;  %v9885_v1 = vld [vmem:[#allocation3 + $0x124] sm:$0xf]  ;;  %v7990_v62 = vld [vmem:[%s12660_s6] sm:$0xf] }
 0x2b5   :  { %v8155_v23 = vor.u32 %v9885_v1, %v8152_v37  ;;  %v9879_v25 = vld [vmem:[#allocation3 + $0xf4] sm:$0xf]  ;;  %v9873_v44 = vld [vmem:[#allocation3 + $0xc4] sm:$0xf]  ;;  %v8104_v5 = vld [vmem:[#allocation3 + $0xd8] sm:$0xf0] }
 0x2b6   :  { %2642 = vmatpush.bf16.msra.mxu0 %v7669_v41  ;;  %2674 = vmatpush.bf16.msrb.mxu3 %v7957_v52  ;;  %v9739_v41 = vld [vmem:[#allocation3 + $0x14] sm:$0xf]  ;;  %v8080_v36 = vld [vmem:[#allocation3 + $0xa8] sm:$0xf0]  ;;  %v8056_v34 = vld [vmem:[#allocation3 + $0x78] sm:$0xf0] }
 0x2b7   :  { %7986 = vmatmul.msk.bf16.vlgmr.msrb.gmra.mxu1 %vm2425_vm10, %v11299_v3  ;;  %2618 = vmatpush.bf16.msrb.mxu2 %v7761_v18  ;;  %v7573_v48 = vor.u32 %v9739_v41, %v7570_v46  ;;  %v9867_v17 = vld [vmem:[#allocation3 + $0x94] sm:$0xf]  ;;  %v9849_v32 = vld [vmem:[#allocation3 + $0x4] sm:$0xf]  ;;  %v8008_v29 = vld [vmem:[#allocation3 + $0x18] sm:$0xf0] }
 0x2b8   :  { %2655 = vmatpush.bf16.msra.mxu1 %v7885_v22  ;;  %v9918_v22 = vld [vmem:[#allocation3 + $0x224] sm:$0xf0]  ;;  %v8083_v45 = vor.u32 %v9867_v17, %v8080_v36  ;;  %v9855_v46 = vld [vmem:[#allocation3 + $0x34] sm:$0xf]  ;;  %v9943_v41 = vld [vmem:[#allocation3 + $0x2ec] sm:$0xf0] }
 0x2b9   :  { %v8271_v52 = vor.u32 %v9918_v22, %v8270_v19  ;;  %v8011_v22 = vor.u32 %v9849_v32, %v8008_v29  ;;  %v8350_v19 = vld [vmem:[#allocation3 + $0x2a8] sm:$0xf] }
 0x2ba   :  { %4266 = vmatpush.bf16.msra.mxu3 %v8367_v11  ;;  %2643 = vmatpush.bf16.msra.mxu0 %v7645_v10  ;;  %v9912_v11 = vld [vmem:[#allocation3 + $0x1f4] sm:$0xf0]  ;;  %v8198_v10 = vld [vmem:[#allocation3 + $0x180] sm:$0xf]  ;;  %v8254_v37 = vld [vmem:[#allocation3 + $0x1e8] sm:$0xf] }
 0x2bb   :  { %4252 = vmatpush.bf16.msra.mxu2 %v8175_v28  ;;  %v8247_v26 = vor.u32 %v9912_v11, %v8246_v56  ;;  %v8199_v18 = vor.u32 %v9900_v24, %v8198_v10  ;;  %v8176_v28 = vld [vmem:[#allocation3 + $0x168] sm:$0xf0]  ;;  %v8326_v11 = vld [vmem:[#allocation3 + $0x278] sm:$0xf]  ;;  %v9919_v24 = vld [vmem:[#allocation3 + $0x22c] sm:$0xf0] }
 0x2bc   :  { %2656 = vmatpush.bf16.msra.mxu1 %v7861_v16  ;;  %2619 = vmatmul.bf16.vlgmr.msrb.gmra.mxu2 %v11325_v2  ;;  %v8079_v16 = vor.u32 %v9870_v61, %v8078_v49  ;;  %v11487_v49 = vpop.permute.xlu1 %1862  ;;  %v8278_v10 = vld [vmem:[#allocation3 + $0x218] sm:$0xf] }
 0x2be   :  { %4267 = vmatpush.bf16.msra.mxu3 %v8343_v9  ;;  %2644 = vmatpush.bf16.msra.mxu0 %v7621_v15  ;;  %v9858_v9 = vld [vmem:[#allocation3 + $0x44] sm:$0xf0]  ;;  %v9847_v15 = vld [vmem:[%s12660_s6 + $0xc] sm:$0xf0] }
 0x2bf   :  { %4253 = vmatpush.bf16.msra.mxu2 %v8151_v43  ;;  %v11482_v60 = vor.u32 %v9847_v15, %v7990_v62  ;;  %v8107_v43 = vor.u32 %v9873_v44, %v8104_v5  ;;  %v9907_v5 = vld [vmem:[#allocation3 + $0x1cc] sm:$0xf0] }
 0x2c0   :  { %2657 = vmatpush.bf16.msra.mxu1 %v7837_v33  ;;  %v9891_v33 = vld [vmem:[#allocation3 + $0x154] sm:$0xf] }
 0x2c1   :  { %7987 = vmatmul.msk.bf16.vlgmr.msrb.gmra.mxu3 %vm2425_vm10, %v11299_v3  ;;  %v8054_v3 = vld [vmem:[#allocation3 + $0x60] sm:$0xf]  ;;  %v8179_v40 = vor.u32 %v9891_v33, %v8176_v28 }
 0x2c2   :  { %4268 = vmatpush.bf16.msra.mxu3 %v8319_v54  ;;  %2645 = vmatpush.bf16.msra.mxu0 %v7597_v47  ;;  %v8055_v59 = vor.u32 %v9864_v6, %v8054_v3  ;;  %v8128_v54 = vld [vmem:[#allocation3 + $0x108] sm:$0xf0]  ;;  %v9861_v47 = vld [vmem:[#allocation3 + $0x64] sm:$0xf]  ;;  %v8302_v3 = vld [vmem:[#allocation3 + $0x248] sm:$0xf]  ;;  %v2480_v6 = vpop.f32.mrf.mxu0 }
 0x2c3   :  { %4254 = vmatpush.bf16.msra.mxu2 %v8127_v12  ;;  %v8059_v30 = vor.u32 %v9861_v47, %v8056_v34  ;;  %v2438_v12 = vpop.f32.mrf.mxu3  ;;  %v8206_v47 = vld [vmem:[#allocation3 + $0x188] sm:$0xf]  ;;  %v9901_v34 = vld [vmem:[#allocation3 + $0x19c] sm:$0xf0] }
 0x2c4   :  { %2658 = vmatpush.bf16.msra.mxu1 %v7813_v55  ;;  %v8131_v55 = vor.u32 %v9879_v25, %v8128_v54  ;;  %v2439_v21 = vadd.f32 %v2438_v12, %v11487_v49  ;;  %v8230_v54 = vld [vmem:[#allocation3 + $0x1b8] sm:$0xf]  ;;  %v8207_v32 = vor.u32 %v9901_v34, %v8206_v47 }
 0x2c6   :  { %4269 = vmatpush.bf16.msra.mxu3 %v8295_v50  ;;  %2646 = vmatpush.bf16.msra.mxu0 %v7573_v48  ;;  %v8032_v50 = vld [vmem:[#allocation3 + $0x48] sm:$0xf0] }
 0x2c7   :  { %4255 = vmatpush.bf16.msra.mxu2 %v8103_v27  ;;  %v8035_v20 = vor.u32 %v9855_v46, %v8032_v50  ;;  %v2988_v27 = vld [vmem:[#allocation2 + $0x9c] sm:$0xf] }
 0x2c8   :  { %2659 = vmatpush.bf16.msra.mxu1 %v7789_v58  ;;  %v8374_v58 = vld [vmem:[#allocation3 + $0x2d8] sm:$0xf]  ;;  %3007 = vrot.lane.b32.xlu0 %v2988_v27, %s10396_s22 }
 0x2c9   :  { %2647 = vmatmul.bf16.vlgmr.msra.gmra.mxu0 %v11031_v39  ;;  %v8031_v39 = vor.u32 %v9858_v9, %v8030_v8  ;;  %v8375_v48 = vor.u32 %v9943_v41, %v8374_v58  ;;  %v11490_v8 = vpop.permute.xlu2 %1867  ;;  %v8279_v9 = vor.u32 %v9919_v24, %v8278_v10 }
 0x2ca   :  { %4270 = vmatpush.bf16.msra.mxu3 %v8271_v52  ;;  %v9937_v52 = vld [vmem:[#allocation3 + $0x2bc] sm:$0xf0]  ;;  %v2482_v25 = vpop.f32.mrf.mxu0 }
 0x2cb   :  { %4256 = vmatpush.bf16.msra.mxu2 %v8079_v16  ;;  %v8351_v42 = vor.u32 %v9937_v52, %v8350_v19  ;;  %v9925_v16 = vld [vmem:[#allocation3 + $0x25c] sm:$0xf0] }
 0x2cc   :  { %2660 = vmatpush.bf16.msra.mxu1 %v7765_v4  ;;  %v9931_v4 = vld [vmem:[#allocation3 + $0x28c] sm:$0xf0] }
 0x2cd   :  { %v8327_v56 = vor.u32 %v9931_v4, %v8326_v11 }
 0x2ce   :  { %4271 = vmatpush.bf16.msra.mxu3 %v8247_v26  ;;  %v2440_v26 = vpop.f32.mrf.mxu3 }
 0x2cf   :  { %2661 = vmatmul.bf16.vlgmr.msra.gmra.mxu1 %v11325_v2  ;;  %4257 = vmatpush.bf16.msra.mxu2 %v8055_v59  ;;  %v8007_v2 = vor.u32 %v9852_v51, %v8006_v13  ;;  %v2481_v13 = vadd.f32 %v2480_v6, %v11487_v49  ;;  %v9913_v51 = vld [vmem:[#allocation3 + $0x1fc] sm:$0xf0] }
 0x2d0   :  { %v8255_v1 = vor.u32 %v9913_v51, %v8254_v37 }
 0x2d2   :  { %4272 = vmatpush.bf16.msra.mxu3 %v8223_v53  ;;  %v8303_v53 = vor.u32 %v9925_v16, %v8302_v3 }
 0x2d3   :  { %4258 = vmatpush.bf16.msra.mxu2 %v8031_v39 }
 0x2d6   :  { %4273 = vmatpush.bf16.msra.mxu3 %v8199_v18 }
 0x2d7   :  { %4259 = vmatpush.bf16.msra.mxu2 %v8007_v2  ;;  %v2441_v2 = vadd.f32 %v2440_v26, %v11490_v8 }
 0x2da   :  { %4260 = vmatmul.bf16.vlgmr.msra.gmra.mxu2 %v11482_v60 }
 0x2db   :  { %4308 = vmatpush.bf16.msrb.mxu2 %v8179_v40 }
 0x2df   :  { %4309 = vmatpush.bf16.msrb.mxu2 %v8155_v23 }
 0x2e3   :  { %4310 = vmatpush.bf16.msrb.mxu2 %v8131_v55  ;;  %v8231_v55 = vor.u32 %v9907_v5, %v8230_v54 }
 0x2e4   :  { %v2466_v35 = vpop.f32.mrf.mxu1 }
 0x2e7   :  { %4311 = vmatpush.bf16.msrb.mxu2 %v8107_v43 }
 0x2eb   :  { %4312 = vmatpush.bf16.msrb.mxu2 %v8083_v45  ;;  %v2483_v45 = vadd.f32 %v2482_v25, %v11490_v8 }
 0x2ec   :  { %v2468_v0 = vpop.f32.mrf.mxu1 }
 0x2ed   :  { %v2508_v39 = vpop.f32.mrf.mxu3 }
 0x2ee   :  { %v2452_v61 = vpop.f32.mrf.mxu2 }
 0x2ef   :  { %4313 = vmatpush.bf16.msrb.mxu2 %v8059_v30  ;;  %v2453_v59 = vadd.f32 %v2452_v61, %v2439_v21 }
 0x2f1   :  { %v2467_v18 = vadd.f32 %v2466_v35, %v2453_v59 }
 0x2f3   :  { %4314 = vmatpush.bf16.msrb.mxu2 %v8035_v20  ;;  %v2681_v62 = vmax.f32 %v2467_v18, 0.0 }
 0x2f5   :  { %v2693_v43 = vmul.f32 %v2681_v62, %v10940_v63  ;;  %v2510_v20 = vpop.f32.mrf.mxu3 }
 0x2f6   :  { %v2454_v33 = vpop.f32.mrf.mxu2 }
 0x2f7   :  { %4315 = vmatpush.bf16.msrb.mxu2 %v8011_v22  ;;  %v2455_v15 = vadd.f32 %v2454_v33, %v2441_v2 }
 0x2f9   :  { %v2469_v17 = vadd.f32 %v2468_v0, %v2455_v15 }
 0x2fa   :  { %4316 = vmatmul.bf16.vlgmr.msrb.gmra.mxu2 %v11482_v60 }
 0x2fb   :  { %4378 = vmatpush.bf16.msra.mxu2 %v8375_v48  ;;  %v2687_v29 = vmax.f32 %v2469_v17, 0.0 }
 0x2fd   :  { %v2699_v41 = vmul.f32 %v2687_v29, %v10940_v63 }
 0x2ff   :  { %4379 = vmatpush.bf16.msra.mxu2 %v8351_v42 }
 0x303   :  { %4380 = vmatpush.bf16.msra.mxu2 %v8327_v56 }
 0x304   :  { %v2494_v28 = vpop.f32.mrf.mxu1 }
 0x305   :  { %v2495_v40 = vadd.f32 %v2494_v28, %v2481_v13 }
 0x306   :  { %v2550_v22 = vpop.f32.mrf.mxu0 }
 0x307   :  { %4381 = vmatpush.bf16.msra.mxu2 %v8303_v53  ;;  %v2509_v23 = vadd.f32 %v2508_v39, %v2495_v40 }
 0x309   :  { %v2682_v44 = vmax.f32 %v2509_v23, 0.0 }
 0x30b   :  { %4382 = vmatpush.bf16.msra.mxu2 %v8279_v9  ;;  %v2694_v36 = vmul.f32 %v2682_v44, %v10944_v38 }
 0x30c   :  { %v2496_v30 = vpop.f32.mrf.mxu1 }
 0x30d   :  { %v2705_v46 = vpack.c.bf16 %v2694_v36, %v2693_v43  ;;  %v2497_v50 = vadd.f32 %v2496_v30, %v2483_v45 }
 0x30e   :  { %v2522_v48 = vpop.f32.mrf.mxu2  ;;  %v2552_v52 = vpop.f32.mrf.mxu0 }
 0x30f   :  { %4383 = vmatpush.bf16.msra.mxu2 %v8255_v1  ;;  %2711 = vst [vmem:[#allocation2 + $0x84] sm:$0xff] %v2705_v46  ;;  %v2511_v58 = vadd.f32 %v2510_v20, %v2497_v50  ;;  %3001 = vrot.lane.b32.xlu0 %v2705_v46, %s10396_s22  ;;  %v2523_v11 = vadd.f32 %v2522_v48, %v11487_v49 }
 0x310   :  { %2979 = vst [vmem:[#allocation3 + $0x420] sm:$0xff] %v2705_v46 }
 0x311   :  { %v2688_v12 = vmax.f32 %v2511_v58, 0.0 }
 0x313   :  { %4384 = vmatpush.bf16.msra.mxu2 %v8231_v55  ;;  %v2700_v35 = vmul.f32 %v2688_v12, %v10944_v38 }
 0x314   :  { %v2536_v4 = vpop.f32.mrf.mxu3 }
 0x315   :  { %v2708_v19 = vpack.c.bf16 %v2700_v35, %v2699_v41  ;;  %v2537_v56 = vadd.f32 %v2536_v4, %v2523_v11 }
 0x316   :  { %v2909_v27 = vld [vmem:[#allocation2 + $0x80] sm:$0xff]  ;;  %v2524_v42 = vpop.f32.mrf.mxu2 }
 0x317   :  { %4385 = vmatpush.bf16.msra.mxu2 %v8207_v32  ;;  %2714 = vst [vmem:[#allocation2 + $0xa4] sm:$0xff] %v2708_v19  ;;  %2925 = vrot.lane.b32.xlu1 %v2909_v27, %s10397_s23  ;;  %v2551_v16 = vadd.f32 %v2550_v22, %v2537_v56  ;;  %v2525_v53 = vadd.f32 %v2524_v42, %v11490_v8 }
 0x318   :  { %2861 = vrot.lane.b32.xlu2 %v2909_v27, %s10398_s24  ;;  %2797 = vrot.lane.b32.xlu0 %v2909_v27, %s10399_s25  ;;  %2982 = vst [vmem:[#allocation3 + $0x438] sm:$0xff] %v2708_v19 }
 0x319   :  { %v2683_v10 = vmax.f32 %v2551_v16, 0.0 }
 0x31b   :  { %v2695_v13 = vmul.f32 %v2683_v10, %v10964_v31 }
 0x31c   :  { %v2538_v21 = vpop.f32.mrf.mxu3 }
 0x31d   :  { %v2539_v24 = vadd.f32 %v2538_v21, %v2525_v53 }
 0x31e   :  { %v2592_v26 = vpop.f32.mrf.mxu2  ;;  %v2913_v6 = vld [vmem:[#allocation2 + $0xa0] sm:$0xff] }
 0x31f   :  { %2733 = vrot.lane.b32.xlu1 %v2909_v27, %s10400_s26  ;;  %v2553_v51 = vadd.f32 %v2552_v52, %v2539_v24 }
 0x320   :  { %3193 = vrot.lane.b32.xlu2 %v2705_v46, %s10395_s21  ;;  %3129 = vrot.lane.b32.xlu0 %v2705_v46, %s10392_s20 }
 0x321   :  { %v2689_v62 = vmax.f32 %v2553_v51, 0.0 }
 0x323   :  { %v2701_v44 = vmul.f32 %v2689_v62, %v10964_v31 }
 0x324   :  { %v2564_v61 = vpop.f32.mrf.mxu1 }
 0x325   :  { %v2565_v0 = vadd.f32 %v2564_v61, %v11487_v49 }
 0x326   :  { %v2578_v3 = vpop.f32.mrf.mxu0  ;;  %v2594_v40 = vpop.f32.mrf.mxu2 }
 0x327   :  { %3065 = vrot.lane.b32.xlu1 %v2705_v46, %s10393_s8  ;;  %v2579_v59 = vadd.f32 %v2578_v3, %v2565_v0 }
 0x328   :  { %3009 = vrot.lane.b32.xlu2 %v2708_v19, %s10396_s22  ;;  %2933 = vrot.lane.b32.xlu0 %v2913_v6, %s10397_s23 }
 0x329   :  { %v2593_v9 = vadd.f32 %v2592_v26, %v2579_v59 }
 0x32b   :  { %v2684_v39 = vmax.f32 %v2593_v9, 0.0  ;;  %v9845_v9 = vld [vmem:[%s12660_s6 + $0x4] sm:$0xf] }
 0x32c   :  { %v2566_v18 = vpop.f32.mrf.mxu1 }
 0x32d   :  { %v2696_v33 = vmul.f32 %v2684_v39, %v10967_v7  ;;  %v2567_v28 = vadd.f32 %v2566_v18, %v11490_v8  ;;  %v7992_v18 = vld [vmem:[%s12660_s6 + $0x10] sm:$0xf0] }
 0x32e   :  { %v2580_v2 = vpop.f32.mrf.mxu0  ;;  %v11558_v39 = vor.u32 %v9845_v9, %v7992_v18 }
 0x32f   :  { %2869 = vrot.lane.b32.xlu1 %v2913_v6, %s10398_s24  ;;  %v2706_v37 = vpack.c.bf16 %v2696_v33, %v2695_v13  ;;  %v2581_v1 = vadd.f32 %v2580_v2, %v2567_v28 }
 0x330   :  { %2805 = vrot.lane.b32.xlu2 %v2913_v6, %s10399_s25  ;;  %2741 = vrot.lane.b32.xlu0 %v2913_v6, %s10400_s26 }
 0x331   :  { %2712 = vst [vmem:[#allocation2 + $0x8c] sm:$0xff] %v2706_v37  ;;  %v2595_v15 = vadd.f32 %v2594_v40, %v2581_v1  ;;  %4274 = vmatmul.bf16.vlgmr.msra.gmra.mxu3 %v11558_v39  ;;  %4386 = vmatmul.bf16.vlgmr.msra.gmra.mxu2 %v11558_v39 }
 0x333   :  { %v2690_v23 = vmax.f32 %v2595_v15, 0.0 }
 0x334   :  { %v2634_v54 = vpop.f32.mrf.mxu1  ;;  %v2606_v25 = vpop.f32.mrf.mxu3 }
 0x335   :  { %v2702_v5 = vmul.f32 %v2690_v23, %v10967_v7  ;;  %v2607_v47 = vadd.f32 %v2606_v25, %v11487_v49 }
 0x337   :  { %3201 = vrot.lane.b32.xlu1 %v2708_v19, %s10395_s21  ;;  %v2709_v55 = vpack.c.bf16 %v2702_v5, %v2701_v44  ;;  %v2992_v44 = vld [vmem:[#allocation2 + $0xbc] sm:$0xf] }
 0x338   :  { %3137 = vrot.lane.b32.xlu2 %v2708_v19, %s10392_s20  ;;  %3073 = vrot.lane.b32.xlu0 %v2708_v19, %s10393_s8  ;;  %v2974_v43 = vld [vmem:[#allocation2 + $0x8c] sm:$0xff]  ;;  %v3120_v5 = vld [vmem:[#allocation2 + $0xbc] sm:$0xf] }
 0x339   :  { %2715 = vst [vmem:[#allocation2 + $0xac] sm:$0xff] %v2709_v55  ;;  %v2910_v45 = vld [vmem:[#allocation2 + $0x88] sm:$0xff] }
 0x33a   :  { %2980 = vst [vmem:[#allocation3 + $0x428] sm:$0xff] %v2974_v43  ;;  %v11566_v51 = vpop.permute.xlu0 %3007 }
 0x33b   :  { %2983 = vst [vmem:[#allocation3 + $0x440] sm:$0xff] %v2709_v55 }
 0x33c   :  { %v2636_v17 = vpop.f32.mrf.mxu1  ;;  %v2608_v36 = vpop.f32.mrf.mxu3 }
 0x33d   :  { %v2609_v58 = vadd.f32 %v2608_v36, %v11490_v8 }
 0x33f   :  { %3003 = vrot.lane.b32.xlu1 %v2706_v37, %s10396_s22  ;;  %v2620_v34 = vpop.f32.mrf.mxu2 }
 0x340   :  { %2927 = vrot.lane.b32.xlu2 %v2910_v45, %s10397_s23  ;;  %2863 = vrot.lane.b32.xlu0 %v2910_v45, %s10398_s24  ;;  %v2621_v30 = vadd.f32 %v2620_v34, %v2607_v47  ;;  %v2914_v53 = vld [vmem:[#allocation2 + $0xa8] sm:$0xff] }
 0x342   :  { %v2635_v50 = vadd.f32 %v2634_v54, %v2621_v30  ;;  %v3184_v30 = vld [vmem:[#allocation2 + $0xbc] sm:$0xf] }
 0x344   :  { %v2676_v29 = vpop.f32.mrf.mxu3  ;;  %v2685_v41 = vmax.f32 %v2635_v50, 0.0 }
 0x346   :  { %v2648_v46 = vpop.f32.mrf.mxu0  ;;  %v2697_v52 = vmul.f32 %v2685_v41, %v10998_v14 }
 0x347   :  { %v2649_v20 = vadd.f32 %v2648_v46, %v11487_v49  ;;  %2799 = vrot.lane.b32.xlu1 %v2910_v45, %s10399_s25  ;;  %v2622_v22 = vpop.f32.mrf.mxu2  ;;  %v3180_v46 = vld [vmem:[#allocation2 + $0x9c] sm:$0xf] }
 0x348   :  { %2735 = vrot.lane.b32.xlu2 %v2910_v45, %s10400_s26  ;;  %3195 = vrot.lane.b32.xlu0 %v2706_v37, %s10395_s21  ;;  %v2623_v35 = vadd.f32 %v2622_v22, %v2609_v58 }
 0x34a   :  { %v2637_v49 = vadd.f32 %v2636_v17, %v2623_v35  ;;  %v3116_v35 = vld [vmem:[#allocation2 + $0x9c] sm:$0xf] }
 0x34c   :  { %v2662_v32 = vpop.f32.mrf.mxu1  ;;  %v2678_v61 = vpop.f32.mrf.mxu3  ;;  %v2691_v16 = vmax.f32 %v2637_v49, 0.0 }
 0x34d   :  { %v2663_v12 = vadd.f32 %v2662_v32, %v2649_v20 }
 0x34e   :  { %v2650_v27 = vpop.f32.mrf.mxu0  ;;  %v2703_v3 = vmul.f32 %v2691_v16, %v10998_v14 }
 0x34f   :  { %v2677_v48 = vadd.f32 %v2676_v29, %v2663_v12  ;;  %v2651_v4 = vadd.f32 %v2650_v27, %v11490_v8  ;;  %3131 = vrot.lane.b32.xlu1 %v2706_v37, %s10392_s20 }
 0x350   :  { %3067 = vrot.lane.b32.xlu2 %v2706_v37, %s10393_s8  ;;  %3011 = vrot.lane.b32.xlu0 %v2709_v55, %s10396_s22 }
 0x351   :  { %v2686_v19 = vmax.f32 %v2677_v48, 0.0 }
 0x353   :  { %v2698_v42 = vmul.f32 %v2686_v19, %v10995_v57  ;;  %v3052_v19 = vld [vmem:[#allocation2 + $0x9c] sm:$0xf] }
 0x354   :  { %v2664_v11 = vpop.f32.mrf.mxu1 }
 0x355   :  { %v2707_v56 = vpack.c.bf16 %v2698_v42, %v2697_v52  ;;  %v2665_v26 = vadd.f32 %v2664_v11, %v2651_v4 }
 0x357   :  { %2713 = vst [vmem:[#allocation2 + $0x94] sm:$0xff] %v2707_v56  ;;  %v2679_v0 = vadd.f32 %v2678_v61, %v2665_v26  ;;  %2935 = vrot.lane.b32.xlu1 %v2914_v53, %s10397_s23 }
 0x358   :  { %2871 = vrot.lane.b32.xlu2 %v2914_v53, %s10398_s24  ;;  %2807 = vrot.lane.b32.xlu0 %v2914_v53, %s10399_s25 }
 0x359   :  { %v2692_v21 = vmax.f32 %v2679_v0, 0.0 }
 0x35b   :  { %v2704_v6 = vmul.f32 %v2692_v21, %v10995_v57 }
 0x35d   :  { %v2710_v8 = vpack.c.bf16 %v2704_v6, %v2703_v3 }
 0x35e   :  { %v2975_v59 = vld [vmem:[#allocation2 + $0x94] sm:$0xff] }
 0x35f   :  { %2716 = vst [vmem:[#allocation2 + $0xb4] sm:$0xff] %v2710_v8  ;;  %2743 = vrot.lane.b32.xlu1 %v2914_v53, %s10400_s26  ;;  %v2847_v24 = vld [vmem:[#allocation2 + $0x90] sm:$0xff]  ;;  %v2848_v15 = vld [vmem:[#allocation2 + $0x98] sm:$0xf] }
 0x360   :  { %2981 = vst [vmem:[#allocation3 + $0x430] sm:$0xff] %v2975_v59  ;;  %3203 = vrot.lane.b32.xlu2 %v2709_v55, %s10395_s21  ;;  %3139 = vrot.lane.b32.xlu0 %v2709_v55, %s10392_s20  ;;  %v2784_v27 = vld [vmem:[#allocation2 + $0x98] sm:$0xf] }
 0x366   :  { %v2978_v10 = vld [vmem:[#allocation2 + $0xb4] sm:$0xff] }
 0x367   :  { %2984 = vst [vmem:[#allocation3 + $0x448] sm:$0xff] %v2978_v10  ;;  %3075 = vrot.lane.b32.xlu1 %v2709_v55, %s10393_s8  ;;  %v2915_v28 = vld [vmem:[#allocation2 + $0xb0] sm:$0xff]  ;;  %v2912_v55 = vld [vmem:[#allocation2 + $0x98] sm:$0xf] }
 0x368   :  { %3005 = vrot.lane.b32.xlu2 %v2707_v56, %s10396_s22  ;;  %3197 = vrot.lane.b32.xlu0 %v2707_v56, %s10395_s21  ;;  %v2916_v20 = vld [vmem:[#allocation2 + $0xb8] sm:$0xf] }
 0x369   :  { %v2788_v26 = vld [vmem:[#allocation2 + $0xb8] sm:$0xf] }
 0x36a   :  { %v2852_v16 = vld [vmem:[#allocation2 + $0xb8] sm:$0xf] }
 0x36b   :  { %v2724_v0 = vld [vmem:[#allocation2 + $0xb8] sm:$0xf] }
 0x36f   :  { %2929 = vrot.lane.b32.xlu1 %v2847_v24, %s10397_s23 }
 0x370   :  { %2865 = vrot.lane.b32.xlu2 %v2847_v24, %s10398_s24  ;;  %2801 = vrot.lane.b32.xlu0 %v2847_v24, %s10399_s25 }
 0x372   :  { %v11560_v13 = vpop.permute.xlu2 %2861 }
 0x377   :  { %3133 = vrot.lane.b32.xlu1 %v2707_v56, %s10392_s20 }
 0x378   :  { %3069 = vrot.lane.b32.xlu2 %v2707_v56, %s10393_s8  ;;  %3013 = vrot.lane.b32.xlu0 %v2710_v8, %s10396_s22 }
 0x37a   :  { %v11569_v33 = vpop.permute.xlu2 %3193 }
 0x37f   :  { %2737 = vrot.lane.b32.xlu1 %v2847_v24, %s10400_s26  ;;  %v2877_v24 = vrot.slane %v11560_v13, 4 }
 0x380   :  { %2937 = vrot.lane.b32.xlu2 %v2915_v28, %s10397_s23  ;;  %2873 = vrot.lane.b32.xlu0 %v2915_v28, %s10398_s24 }
 0x381   :  { %v11576_v40 = vpop.permute.xlu0 %3001 }
 0x382   :  { %v11574_v2 = vpop.permute.xlu2 %3009  ;;  %v3017_v6 = vrot.slane %v11576_v40, 4 }
 0x387   :  { %3205 = vrot.lane.b32.xlu1 %v2710_v8, %s10395_s21 }
 0x388   :  { %3141 = vrot.lane.b32.xlu2 %v2710_v8, %s10392_s20  ;;  %3077 = vrot.lane.b32.xlu0 %v2710_v8, %s10393_s8 }
 0x389   :  { %v2926_v37 = vpop.permute.xlu1 %2925 }
 0x38a   :  { %v11581_v1 = vpop.permute.xlu2 %2805  ;;  %v11583_v62 = vpop.permute.xlu0 %2797  ;;  %v2941_v36 = vrot.slane %v2926_v37, 4 }
 0x38f   :  { %2809 = vrot.lane.b32.xlu1 %v2915_v28, %s10399_s25 }
 0x390   :  { %2745 = vrot.lane.b32.xlu2 %v2915_v28, %s10400_s26  ;;  %2867 = vrot.lane.b32.xlu0 %v2848_v15, %s10398_s24 }
 0x391   :  { %v2734_v23 = vpop.permute.xlu1 %2733 }
 0x392   :  { %v11588_v54 = vpop.permute.xlu2 %3137  ;;  %v11590_v25 = vpop.permute.xlu0 %3129  ;;  %v2749_v58 = vrot.slane %v2734_v23, 4 }
 0x397   :  { %3015 = vrot.lane.b32.xlu1 %v2992_v44, %s10396_s22 }
 0x398   :  { %2931 = vrot.lane.b32.xlu2 %v2912_v55, %s10397_s23  ;;  %3143 = vrot.lane.b32.xlu0 %v3120_v5, %s10392_s20  ;;  %v2720_v5 = vld [vmem:[#allocation2 + $0x98] sm:$0xf] }
 0x399   :  { %v3066_v43 = vpop.permute.xlu1 %3065 }
 0x39a   :  { %v11595_v17 = vpop.permute.xlu2 %2927  ;;  %v11598_v47 = vpop.permute.xlu0 %2933  ;;  %v3081_v42 = vrot.slane %v3066_v43, 4 }
 0x39b   :  { %v2942_v45 = vrot.slane %v11595_v17, 4 }
 0x39d   :  { %v2949_v34 = vsel %vm174_vm0, %v2941_v36, %v2942_v45  ;;  %v2813_v36 = vrot.slane %v11583_v62, 4 }
 0x39e   :  { %v2950_v50 = vsel %vm371_vm5, %v2926_v37, %v2949_v34  ;;  %v3056_v37 = vld [vmem:[#allocation2 + $0xbc] sm:$0xf] }
 0x39f   :  { %2967 = vst [vmem:[#allocation3 + $0x3f0] sm:$0xff] %v2950_v50  ;;  %3199 = vrot.lane.b32.xlu1 %v3180_v46, %s10395_s21 }
 0x3a0   :  { %3207 = vrot.lane.b32.xlu2 %v3184_v30, %s10395_s21  ;;  %2939 = vrot.lane.b32.xlu0 %v2916_v20, %s10397_s23 }
 0x3a1   :  { %v2870_v32 = vpop.permute.xlu1 %2869 }
 0x3a2   :  { %v11607_v29 = vpop.permute.xlu2 %2735  ;;  %v11610_v22 = vpop.permute.xlu0 %2741  ;;  %v2881_v53 = vrot.slane %v2870_v32, 4 }
 0x3a3   :  { %v2750_v12 = vrot.slane %v11607_v29, 4 }
 0x3a5   :  { %v2757_v41 = vsel %vm174_vm0, %v2749_v58, %v2750_v12 }
 0x3a6   :  { %v2758_v48 = vsel %vm176_vm9, %v2734_v23, %v2757_v41  ;;  %v3246_v41 = vld [vmem:[%s12661_s7 + $0x8] sm:$0xff] }
 0x3a7   :  { %2775 = vst [vmem:[#allocation3 + $0x360] sm:$0xff] %v2758_v48  ;;  %2803 = vrot.lane.b32.xlu1 %v2784_v27, %s10399_s25 }
 0x3a8   :  { %3135 = vrot.lane.b32.xlu2 %v3116_v35, %s10392_s20  ;;  %3071 = vrot.lane.b32.xlu0 %v3052_v19, %s10393_s8  ;;  %v3245_v35 = vld [vmem:[%s12661_s7] sm:$0xff] }
 0x3a9   :  { %v3202_v52 = vpop.permute.xlu1 %3201 }
 0x3aa   :  { %v11619_v49 = vpop.permute.xlu2 %3067  ;;  %v11622_v11 = vpop.permute.xlu0 %3073  ;;  %v3213_v34 = vrot.slane %v3202_v52, 4 }
 0x3ab   :  { %v3082_v4 = vrot.slane %v11619_v49, 4 }
 0x3ad   :  { %v3089_v61 = vsel %vm174_vm0, %v3081_v42, %v3082_v4 }
 0x3ae   :  { %v3090_v56 = vsel %vm513_vm1, %v3066_v43, %v3089_v61 }
 0x3af   :  { %3107 = vst [vmem:[#allocation3 + $0x480] sm:$0xff] %v3090_v56  ;;  %2875 = vrot.lane.b32.xlu1 %v2852_v16, %s10398_s24 }
 0x3b0   :  { %2811 = vrot.lane.b32.xlu2 %v2788_v26, %s10399_s25  ;;  %2747 = vrot.lane.b32.xlu0 %v2724_v0, %s10400_s26  ;;  %v3020_v26 = vrot.slane %v11566_v51, 4 }
 0x3b1   :  { %v3004_v21 = vpop.permute.xlu1 %3003 }
 0x3b2   :  { %v11631_v3 = vpop.permute.xlu2 %2871  ;;  %v3018_v8 = vrot.slane %v3004_v21, 4  ;;  %v11635_v10 = vpop.permute.xlu0 %2863 }
 0x3b3   :  { %v2882_v59 = vrot.slane %v11631_v3, 4  ;;  %v2878_v9 = vrot.slane %v11635_v10, 4 }
 0x3b4   :  { %v3025_v18 = vsel %vm174_vm0, %v3017_v6, %v3018_v8  ;;  %v3021_v6 = vrot.slane %v11574_v2, 4 }
 0x3b5   :  { %v2891_v28 = vsel %vm174_vm0, %v2881_v53, %v2882_v59  ;;  %v3026_v15 = vsel %vm448_vm4, %v11576_v40, %v3025_v18  ;;  %v2885_v44 = vsel %vm174_vm0, %v2877_v24, %v2878_v9 }
 0x3b6   :  { %v2892_v23 = vsel %vm306_vm7, %v2870_v32, %v2891_v28  ;;  %3043 = vst [vmem:[#allocation3 + $0x450] sm:$0xff] %v3026_v15  ;;  %v2886_v55 = vsel %vm306_vm7, %v11560_v13, %v2885_v44  ;;  %v3209_v13 = vrot.slane %v11569_v33, 4 }
 0x3b7   :  { %2906 = vst [vmem:[#allocation3 + $0x3d8] sm:$0xff] %v2892_v23  ;;  %3079 = vrot.lane.b32.xlu1 %v3056_v37, %s10393_s8 }
 0x3b8   :  { %2739 = vrot.lane.b32.xlu2 %v2720_v5, %s10400_s26  ;;  %2903 = vst [vmem:[#allocation3 + $0x3c0] sm:$0xff] %v2886_v55 }
 0x3b9   :  { %v11653_v43 = vpop.permute.xlu1 %2799 }
 0x3ba   :  { %v11655_v40 = vpop.permute.xlu2 %3203  ;;  %v2814_v30 = vrot.slane %v11653_v43, 4  ;;  %v11660_v50 = vpop.permute.xlu0 %3195 }
 0x3bb   :  { %v3214_v46 = vrot.slane %v11655_v40, 4  ;;  %v3210_v20 = vrot.slane %v11660_v50, 4 }
 0x3bc   :  { %v2821_v32 = vsel %vm174_vm0, %v2813_v36, %v2814_v30 }
 0x3bd   :  { %v3223_v58 = vsel %vm174_vm0, %v3213_v34, %v3214_v46  ;;  %v2822_v48 = vsel %vm241_vm8, %v11583_v62, %v2821_v32  ;;  %v3217_v27 = vsel %vm174_vm0, %v3209_v13, %v3210_v20  ;;  %v3145_v62 = vrot.slane %v11590_v25, 4 }
 0x3be   :  { %v3224_v19 = vsel %vm643_vm3, %v3202_v52, %v3223_v58  ;;  %2839 = vst [vmem:[#allocation3 + $0x390] sm:$0xff] %v2822_v48  ;;  %v3218_v42 = vsel %vm643_vm3, %v11569_v33, %v3217_v27 }
 0x3bf   :  { %3238 = vst [vmem:[#allocation3 + $0x4f8] sm:$0xff] %v3224_v19  ;;  %3411 = vperm.xlu1 %10280, %v3245_v35  }
 0x3c0   :  { %3416 = vperm.xlu2 %10281, %v3246_v41   ;;  %3235 = vst [vmem:[#allocation3 + $0x4e0] sm:$0xff] %v3218_v42  ;;  %v8558_v42 = vld [vmem:[#allocation3 + $0x450] sm:$0xf] }
 0x3c1   :  { %v11684_v61 = vpop.permute.xlu1 %3131 }
 0x3c2   :  { %v3006_v56 = vpop.permute.xlu2 %3005  ;;  %v3146_v52 = vrot.slane %v11684_v61, 4  ;;  %v11689_v0 = vpop.permute.xlu0 %3011 }
 0x3c3   :  { %v3019_v16 = vrot.slane %v3006_v56, 4  ;;  %v3022_v33 = vrot.slane %v11689_v0, 4 }
 0x3c4   :  { %v3153_v53 = vsel %vm174_vm0, %v3145_v62, %v3146_v52 }
 0x3c5   :  { %v3027_v24 = vsel %vm174_vm0, %v3018_v8, %v3019_v16  ;;  %v3029_v18 = vsel %vm174_vm0, %v3019_v16, %v3020_v26  ;;  %v3154_v51 = vsel %vm578_vm2, %v11590_v25, %v3153_v53  ;;  %v3031_v15 = vsel %vm174_vm0, %v3021_v6, %v3022_v33  ;;  %v9984_v6 = vld [vmem:[#allocation3 + $0x434] sm:$0xf0] }
 0x3c6   :  { %v3028_v28 = vsel %vm448_vm4, %v3004_v21, %v3027_v24  ;;  %v3030_v37 = vsel %vm448_vm4, %v3006_v56, %v3029_v18  ;;  %3171 = vst [vmem:[#allocation3 + $0x4b0] sm:$0xff] %v3154_v51  ;;  %v3032_v23 = vsel %vm448_vm4, %v11574_v2, %v3031_v15  ;;  %v10008_v44 = vld [vmem:[#allocation3 + $0x4f4] sm:$0xf0]  ;;  %v2945_v21 = vrot.slane %v11598_v47, 4  ;;  %v9987_v56 = vld [vmem:[#allocation3 + $0x454] sm:$0xf] }
 0x3c7   :  { %3044 = vst [vmem:[#allocation3 + $0x458] sm:$0xff] %v3028_v28  ;;  %v8630_v8 = vld [vmem:[#allocation3 + $0x4e0] sm:$0xf]  ;;  %v2817_v2 = vrot.slane %v11581_v1, 4  ;;  %v2753_v53 = vrot.slane %v11610_v22, 4  ;;  %v3149_v28 = vrot.slane %v11588_v54, 4 }
 0x3c8   :  { %3045 = vst [vmem:[#allocation3 + $0x460] sm:$0xff] %v3030_v37  ;;  %v8631_v5 = vor.u32 %v10008_v44, %v8630_v8  ;;  %v8536_v51 = vld [vmem:[#allocation3 + $0x438] sm:$0xf0]  ;;  %v8534_v15 = vld [vmem:[#allocation3 + $0x420] sm:$0xf] }
 0x3c9   :  { %v11707_v55 = vpop.permute.xlu1 %2935  ;;  %3046 = vst [vmem:[#allocation3 + $0x468] sm:$0xff] %v3032_v23  ;;  %v8535_v8 = vor.u32 %v9984_v6, %v8534_v15 }
 0x3ca   :  { %v11709_v25 = vpop.permute.xlu2 %2865  ;;  %v2946_v36 = vrot.slane %v11707_v55, 4  ;;  %4299 = vmatpush.bf16.msrb.mxu1 %v8631_v5  ;;  %v11714_v13 = vpop.permute.xlu0 %2807  ;;  %v9981_v5 = vld [vmem:[#allocation3 + $0x424] sm:$0xf] }
 0x3cb   :  { %v2879_v34 = vrot.slane %v11709_v25, 4  ;;  %v2818_v32 = vrot.slane %v11714_v13, 4 }
 0x3cc   :  { %v2955_v58 = vsel %vm174_vm0, %v2945_v21, %v2946_v36 }
 0x3cd   :  { %v2887_v41 = vsel %vm174_vm0, %v2878_v9, %v2879_v34  ;;  %v2956_v35 = vsel %vm371_vm5, %v11598_v47, %v2955_v58  ;;  %v2827_v19 = vsel %vm174_vm0, %v2817_v2, %v2818_v32 }
 0x3ce   :  { %v2888_v48 = vsel %vm306_vm7, %v11635_v10, %v2887_v41  ;;  %2970 = vst [vmem:[#allocation3 + $0x408] sm:$0xff] %v2956_v35  ;;  %v2828_v27 = vsel %vm241_vm8, %v11581_v1, %v2827_v19  ;;  %v8539_v41 = vor.u32 %v9981_v5, %v8536_v51  ;;  %v8488_v51 = vld [vmem:[#allocation3 + $0x3d8] sm:$0xf0] }
 0x3cf   :  { %2904 = vst [vmem:[#allocation3 + $0x3c8] sm:$0xff] %v2888_v48 }
 0x3d0   :  { %2842 = vst [vmem:[#allocation3 + $0x3a8] sm:$0xff] %v2828_v27  ;;  %v9990_v26 = vld [vmem:[#allocation3 + $0x464] sm:$0xf0]  ;;  %v8560_v9 = vld [vmem:[#allocation3 + $0x468] sm:$0xf0] }
 0x3d1   :  { %v11735_v62 = vpop.permute.xlu1 %2743  ;;  %v8559_v16 = vor.u32 %v9990_v26, %v8558_v42  ;;  %v8563_v10 = vor.u32 %v9987_v56, %v8560_v9  ;;  %v9975_v27 = vld [vmem:[#allocation3 + $0x3f4] sm:$0xf]  ;;  %v8486_v9 = vld [vmem:[#allocation3 + $0x3c0] sm:$0xf] }
 0x3d2   :  { %v11737_v47 = vpop.permute.xlu2 %3069  ;;  %v2754_v24 = vrot.slane %v11735_v62, 4  ;;  %v11742_v1 = vpop.permute.xlu0 %3139 }
 0x3d3   :  { %v3083_v18 = vrot.slane %v11737_v47, 4  ;;  %4280 = vmatpush.bf16.msrb.mxu0 %v8559_v16  ;;  %4336 = vmatpush.bf16.msrb.mxu3 %v8563_v10  ;;  %v3150_v37 = vrot.slane %v11742_v1, 4  ;;  %v9972_v16 = vld [vmem:[#allocation3 + $0x3d4] sm:$0xf0] }
 0x3d4   :  { %v2763_v23 = vsel %vm174_vm0, %v2753_v53, %v2754_v24  ;;  %v9969_v53 = vld [vmem:[#allocation3 + $0x3c4] sm:$0xf] }
 0x3d5   :  { %v3091_v44 = vsel %vm174_vm0, %v3082_v4, %v3083_v18  ;;  %v2764_v21 = vsel %vm176_vm9, %v11610_v22, %v2763_v23  ;;  %v3159_v58 = vsel %vm174_vm0, %v3149_v28, %v3150_v37  ;;  %v9978_v35 = vld [vmem:[#allocation3 + $0x404] sm:$0xf0]  ;;  %v8512_v48 = vld [vmem:[#allocation3 + $0x408] sm:$0xf0]  ;;  %v8510_v4 = vld [vmem:[#allocation3 + $0x3f0] sm:$0xf] }
 0x3d6   :  { %v3092_v2 = vsel %vm513_vm1, %v11619_v49, %v3091_v44  ;;  %2778 = vst [vmem:[#allocation3 + $0x378] sm:$0xff] %v2764_v21  ;;  %v3160_v19 = vsel %vm578_vm2, %v11588_v54, %v3159_v58  ;;  %v8511_v22 = vor.u32 %v9978_v35, %v8510_v4  ;;  %v8515_v42 = vor.u32 %v9975_v27, %v8512_v48 }
 0x3d7   :  { %3108 = vst [vmem:[#allocation3 + $0x488] sm:$0xff] %v3092_v2  ;;  %4281 = vmatpush.bf16.msrb.mxu0 %v8535_v8  ;;  %4337 = vmatpush.bf16.msrb.mxu3 %v8539_v41  ;;  %v3085_v49 = vrot.slane %v11622_v11, 4  ;;  %v8487_v44 = vor.u32 %v9972_v16, %v8486_v9  ;;  %v8491_v2 = vor.u32 %v9969_v53, %v8488_v51  ;;  %v9966_v41 = vld [vmem:[#allocation3 + $0x3a4] sm:$0xf0]  ;;  %v8438_v51 = vld [vmem:[#allocation3 + $0x360] sm:$0xf] }
 0x3d8   :  { %3174 = vst [vmem:[#allocation3 + $0x4c8] sm:$0xff] %v3160_v19  ;;  %v9963_v19 = vld [vmem:[#allocation3 + $0x394] sm:$0xf] }
 0x3d9   :  { %v11764_v56 = vpop.permute.xlu1 %3075 }
 0x3da   :  { %v11766_v26 = vpop.permute.xlu2 %2937  ;;  %v3086_v10 = vrot.slane %v11764_v56, 4  ;;  %v11770_v6 = vpop.permute.xlu0 %3197 }
 0x3db   :  { %v2947_v54 = vrot.slane %v11766_v26, 4  ;;  %4282 = vmatpush.bf16.msrb.mxu0 %v8511_v22  ;;  %4338 = vmatpush.bf16.msrb.mxu3 %v8515_v42  ;;  %v3211_v28 = vrot.slane %v11770_v6, 4 }
 0x3dc   :  { %v3095_v15 = vsel %vm174_vm0, %v3085_v49, %v3086_v10 }
 0x3dd   :  { %v2957_v23 = vsel %vm174_vm0, %v2946_v36, %v2947_v54  ;;  %v3096_v8 = vsel %vm513_vm1, %v11622_v11, %v3095_v15  ;;  %v3219_v21 = vsel %vm174_vm0, %v3210_v20, %v3211_v28  ;;  %v8464_v36 = vld [vmem:[#allocation3 + $0x3a8] sm:$0xf0]  ;;  %v8606_v11 = vld [vmem:[#allocation3 + $0x4b0] sm:$0xf]  ;;  %v9960_v42 = vld [vmem:[#allocation3 + $0x374] sm:$0xf0] }
 0x3de   :  { %v2958_v5 = vsel %vm371_vm5, %v11707_v55, %v2957_v23  ;;  %3110 = vst [vmem:[#allocation3 + $0x498] sm:$0xff] %v3096_v8  ;;  %v3220_v58 = vsel %vm643_vm3, %v11660_v50, %v3219_v21  ;;  %v8462_v55 = vld [vmem:[#allocation3 + $0x390] sm:$0xf]  ;;  %v8467_v22 = vor.u32 %v9963_v19, %v8464_v36  ;;  %v8440_v16 = vld [vmem:[#allocation3 + $0x378] sm:$0xf0] }
 0x3df   :  { %2971 = vst [vmem:[#allocation3 + $0x410] sm:$0xff] %v2958_v5  ;;  %4283 = vmatpush.bf16.msrb.mxu0 %v8487_v44  ;;  %4339 = vmatpush.bf16.msrb.mxu3 %v8491_v2  ;;  %v10002_v35 = vld [vmem:[#allocation3 + $0x4c4] sm:$0xf0]  ;;  %v8463_v20 = vor.u32 %v9966_v41, %v8462_v55  ;;  %v8439_v44 = vor.u32 %v9960_v42, %v8438_v51  ;;  %v8582_v8 = vld [vmem:[#allocation3 + $0x480] sm:$0xf] }
 0x3e0   :  { %3236 = vst [vmem:[#allocation3 + $0x4e8] sm:$0xff] %v3220_v58  ;;  %v8607_v48 = vor.u32 %v10002_v35, %v8606_v11  ;;  %v9957_v5 = vld [vmem:[#allocation3 + $0x364] sm:$0xf]  ;;  %v9939_v21 = vld [vmem:[#allocation3 + $0x2d4] sm:$0xf] }
 0x3e1   :  { %v11792_v4 = vpop.permute.xlu1 %2929  ;;  %v8368_v2 = vld [vmem:[#allocation3 + $0x2e8] sm:$0xf0]  ;;  %v8443_v11 = vor.u32 %v9957_v5, %v8440_v16  ;;  %v8000_v35 = vld [vmem:[%s12660_s6 + $0x18] sm:$0xf0]  ;;  %v9954_v55 = vld [vmem:[#allocation3 + $0x344] sm:$0xf0] }
 0x3e2   :  { %v11794_v27 = vpop.permute.xlu2 %3141  ;;  %v2943_v50 = vrot.slane %v11792_v4, 4  ;;  %4300 = vmatpush.bf16.msrb.mxu1 %v8607_v48  ;;  %v11798_v9 = vpop.permute.xlu0 %2801  ;;  %v8416_v48 = vld [vmem:[#allocation3 + $0x348] sm:$0xf0]  ;;  %v8414_v19 = vld [vmem:[#allocation3 + $0x330] sm:$0xf] }
 0x3e3   :  { %v3151_v49 = vrot.slane %v11794_v27, 4  ;;  %4284 = vmatpush.bf16.msrb.mxu0 %v8463_v20  ;;  %4340 = vmatpush.bf16.msrb.mxu3 %v8467_v22  ;;  %v2815_v53 = vrot.slane %v11798_v9, 4  ;;  %v9951_v20 = vld [vmem:[#allocation3 + $0x334] sm:$0xf]  ;;  %v9933_v22 = vld [vmem:[#allocation3 + $0x2a4] sm:$0xf] }
 0x3e4   :  { %v2951_v15 = vsel %vm174_vm0, %v2942_v45, %v2943_v50  ;;  %v8344_v42 = vld [vmem:[#allocation3 + $0x2b8] sm:$0xf0]  ;;  %v9948_v5 = vld [vmem:[#allocation3 + $0x314] sm:$0xf0] }
 0x3e5   :  { %v3161_v23 = vsel %vm174_vm0, %v3150_v37, %v3151_v49  ;;  %v2952_v58 = vsel %vm371_vm5, %v11595_v17, %v2951_v15  ;;  %v2823_v45 = vsel %vm174_vm0, %v2814_v30, %v2815_v53  ;;  %v9996_v36 = vld [vmem:[#allocation3 + $0x494] sm:$0xf0]  ;;  %v9846_v37 = vld [vmem:[%s12660_s6 + $0xc] sm:$0xf]  ;;  %v8371_v30 = vor.u32 %v9939_v21, %v8368_v2 }
 0x3e6   :  { %v3162_v41 = vsel %vm578_vm2, %v11742_v1, %v3161_v23  ;;  %2968 = vst [vmem:[#allocation3 + $0x3f8] sm:$0xff] %v2952_v58  ;;  %v2824_v17 = vsel %vm241_vm8, %v11653_v43, %v2823_v45  ;;  %v8583_v1 = vor.u32 %v9996_v36, %v8582_v8  ;;  %v11828_v16 = vor.u32 %v9846_v37, %v8000_v35  ;;  %v8390_v8 = vld [vmem:[#allocation3 + $0x300] sm:$0xf]  ;;  %v8632_v45 = vld [vmem:[#allocation3 + $0x4f8] sm:$0xf0] }
 0x3e7   :  { %3175 = vst [vmem:[#allocation3 + $0x4d0] sm:$0xff] %v3162_v41  ;;  %4285 = vmatpush.bf16.msrb.mxu0 %v8439_v44  ;;  %4341 = vmatpush.bf16.msrb.mxu3 %v8443_v11  ;;  %v8415_v43 = vor.u32 %v9954_v55, %v8414_v19  ;;  %v8419_v23 = vor.u32 %v9951_v20, %v8416_v48  ;;  %v8392_v44 = vld [vmem:[#allocation3 + $0x318] sm:$0xf0]  ;;  %v10005_v41 = vld [vmem:[#allocation3 + $0x4e4] sm:$0xf] }
 0x3e8   :  { %2840 = vst [vmem:[#allocation3 + $0x398] sm:$0xff] %v2824_v17  ;;  %4301 = vmatpush.bf16.msrb.mxu1 %v8583_v1  ;;  %v8347_v11 = vor.u32 %v9933_v22, %v8344_v42  ;;  %v7998_v37 = vld [vmem:[%s12660_s6 + $0x8] sm:$0xf]  ;;  %v9848_v35 = vld [vmem:[%s12660_s6 + $0x14] sm:$0xf0]  ;;  %v8391_v55 = vor.u32 %v9948_v5, %v8390_v8 }
 0x3e9   :  { %v11830_v51 = vpop.permute.xlu1 %3133  ;;  %v9945_v48 = vld [vmem:[#allocation3 + $0x304] sm:$0xf]  ;;  %v9927_v42 = vld [vmem:[#allocation3 + $0x274] sm:$0xf]  ;;  %v8296_v8 = vld [vmem:[#allocation3 + $0x258] sm:$0xf0] }
 0x3ea   :  { %v11832_v15 = vpop.permute.xlu2 %2745  ;;  %v3147_v21 = vrot.slane %v11830_v51, 4  ;;  %v11836_v58 = vpop.permute.xlu0 %3013 }
 0x3eb   :  { %v2755_v2 = vrot.slane %v11832_v15, 4  ;;  %4286 = vmatpush.bf16.msrb.mxu0 %v8415_v43  ;;  %4342 = vmatpush.bf16.msrb.mxu3 %v8419_v23  ;;  %v3023_v36 = vrot.slane %v11836_v58, 4  ;;  %v8635_v43 = vor.u32 %v10005_v41, %v8632_v45  ;;  %v11868_v23 = vor.u32 %v9848_v35, %v7998_v37  ;;  %v9921_v45 = vld [vmem:[#allocation3 + $0x244] sm:$0xf] }
 0x3ec   :  { %4322 = vmatpush.bf16.msra.mxu1 %v8371_v30  ;;  %v3155_v17 = vsel %vm174_vm0, %v3146_v52, %v3147_v21  ;;  %v8320_v30 = vld [vmem:[#allocation3 + $0x288] sm:$0xf0] }
 0x3ed   :  { %v2765_v1 = vsel %vm174_vm0, %v2754_v24, %v2755_v2  ;;  %8652 = vmatmul.msk.bf16.vlgmr.msrb.gmra.mxu1 %vm4248_vm11, %v11828_v16  ;;  %v3156_v19 = vsel %vm578_vm2, %v11684_v61, %v3155_v17  ;;  %v3033_v52 = vsel %vm174_vm0, %v3022_v33, %v3023_v36  ;;  %v8395_v24 = vor.u32 %v9945_v48, %v8392_v44  ;;  %v9999_v44 = vld [vmem:[#allocation3 + $0x4b4] sm:$0xf] }
 0x3ee   :  { %v2766_v20 = vsel %vm176_vm9, %v11735_v62, %v2765_v1  ;;  %3172 = vst [vmem:[#allocation3 + $0x4b8] sm:$0xff] %v3156_v19  ;;  %v3034_v22 = vsel %vm448_vm4, %v11689_v0, %v3033_v52  ;;  %v8323_v61 = vor.u32 %v9927_v42, %v8320_v30  ;;  %v8608_v62 = vld [vmem:[#allocation3 + $0x4c8] sm:$0xf0]  ;;  %v8299_v17 = vor.u32 %v9921_v45, %v8296_v8  ;;  %v8584_v1 = vld [vmem:[#allocation3 + $0x498] sm:$0xf0] }
 0x3ef   :  { %2779 = vst [vmem:[#allocation3 + $0x380] sm:$0xff] %v2766_v20  ;;  %4287 = vmatpush.bf16.msrb.mxu0 %v8391_v55  ;;  %4343 = vmatpush.bf16.msrb.mxu3 %v8395_v24  ;;  %v8611_v37 = vor.u32 %v9999_v44, %v8608_v62  ;;  %v8272_v30 = vld [vmem:[#allocation3 + $0x228] sm:$0xf0]  ;;  %v8182_v19 = vld [vmem:[#allocation3 + $0x158] sm:$0xf] }
 0x3f0   :  { %4323 = vmatpush.bf16.msra.mxu1 %v8347_v11  ;;  %3047 = vst [vmem:[#allocation3 + $0x470] sm:$0xff] %v3034_v22  ;;  %v9895_v22 = vld [vmem:[#allocation3 + $0x16c] sm:$0xf0]  ;;  %v9915_v42 = vld [vmem:[#allocation3 + $0x214] sm:$0xf] }
 0x3f1   :  { %v11870_v5 = vpop.permute.xlu1 %2737  ;;  %v8183_v62 = vor.u32 %v9895_v22, %v8182_v19  ;;  %v8248_v44 = vld [vmem:[#allocation3 + $0x1f8] sm:$0xf0] }
 0x3f2   :  { %v2932_v33 = vpop.permute.xlu2 %2931  ;;  %v2751_v11 = vrot.slane %v11870_v5, 4  ;;  %4288 = vmatmul.bf16.vlgmr.msrb.gmra.mxu0 %v11868_v23  ;;  %v11874_v41 = vpop.permute.xlu0 %2873  ;;  %4344 = vmatmul.bf16.vlgmr.msrb.gmra.mxu3 %v11868_v23 }
 0x3f3   :  { %4355 = vmatpush.bf16.msra.mxu0 %v8635_v43  ;;  %v2944_v0 = vrot.slane %v2932_v33, 4  ;;  %v2883_v35 = vrot.slane %v11874_v41, 4 }
 0x3f4   :  { %4324 = vmatpush.bf16.msra.mxu1 %v8323_v61  ;;  %v2759_v55 = vsel %vm174_vm0, %v2750_v12, %v2751_v11  ;;  %v9993_v12 = vld [vmem:[#allocation3 + $0x484] sm:$0xf]  ;;  %v8158_v61 = vld [vmem:[#allocation3 + $0x128] sm:$0xf] }
 0x3f5   :  { %v2953_v48 = vsel %vm174_vm0, %v2943_v50, %v2944_v0  ;;  %v2760_v20 = vsel %vm176_vm9, %v11607_v29, %v2759_v55  ;;  %v2893_v24 = vsel %vm174_vm0, %v2882_v59, %v2883_v35  ;;  %v8587_v43 = vor.u32 %v9993_v12, %v8584_v1  ;;  %v9889_v59 = vld [vmem:[#allocation3 + $0x13c] sm:$0xf0] }
 0x3f6   :  { %v2954_v52 = vsel %vm371_vm5, %v11792_v4, %v2953_v48  ;;  %2776 = vst [vmem:[#allocation3 + $0x368] sm:$0xff] %v2760_v20  ;;  %v2894_v50 = vsel %vm306_vm7, %v11631_v3, %v2893_v24  ;;  %v8275_v29 = vor.u32 %v9915_v42, %v8272_v30  ;;  %v9988_v4 = vld [vmem:[#allocation3 + $0x45c] sm:$0xf]  ;;  %v9909_v48 = vld [vmem:[#allocation3 + $0x1e4] sm:$0xf]  ;;  %v8159_v20 = vor.u32 %v9889_v59, %v8158_v61 }
 0x3f7   :  { %4356 = vmatpush.bf16.msra.mxu0 %v8611_v37  ;;  %2969 = vst [vmem:[#allocation3 + $0x400] sm:$0xff] %v2954_v52  ;;  %v8568_v8 = vld [vmem:[#allocation3 + $0x470] sm:$0xf0]  ;;  %v9982_v37 = vld [vmem:[#allocation3 + $0x42c] sm:$0xf]  ;;  %v8251_v19 = vor.u32 %v9909_v48, %v8248_v44 }
 0x3f8   :  { %4325 = vmatpush.bf16.msra.mxu1 %v8299_v17  ;;  %2907 = vst [vmem:[#allocation3 + $0x3e0] sm:$0xff] %v2894_v50  ;;  %v8571_v33 = vor.u32 %v9988_v4, %v8568_v8  ;;  %v8544_v17 = vld [vmem:[#allocation3 + $0x440] sm:$0xf0]  ;;  %v8134_v52 = vld [vmem:[#allocation3 + $0xf8] sm:$0xf] }
 0x3f9   :  { %v3206_v0 = vpop.permute.xlu1 %3205  ;;  %v8547_v22 = vor.u32 %v9982_v37, %v8544_v17  ;;  %v9903_v50 = vld [vmem:[#allocation3 + $0x1b4] sm:$0xf]  ;;  %v8224_v42 = vld [vmem:[#allocation3 + $0x1c8] sm:$0xf0]  ;;  %v8110_v8 = vld [vmem:[#allocation3 + $0xc8] sm:$0xf] }
 0x3fa   :  { %v3208_v45 = vpop.permute.xlu2 %3207  ;;  %v3215_v3 = vrot.slane %v3206_v0, 4  ;;  %4448 = vmatpush.bf16.msrb.mxu2 %v8571_v33  ;;  %v11897_v1 = vpop.permute.xlu0 %3077  ;;  %v9877_v33 = vld [vmem:[#allocation3 + $0xdc] sm:$0xf0]  ;;  %v8520_v59 = vld [vmem:[#allocation3 + $0x410] sm:$0xf0] }
 0x3fb   :  { %4357 = vmatpush.bf16.msra.mxu0 %v8587_v43  ;;  %v3216_v55 = vrot.slane %v3208_v45, 4  ;;  %v3087_v30 = vrot.slane %v11897_v1, 4  ;;  %v9883_v43 = vld [vmem:[#allocation3 + $0x10c] sm:$0xf0]  ;;  %v9897_v45 = vld [vmem:[#allocation3 + $0x184] sm:$0xf] }
 0x3fc   :  { %4326 = vmatpush.bf16.msra.mxu1 %v8275_v29  ;;  %v3225_v24 = vsel %vm174_vm0, %v3214_v46, %v3215_v3  ;;  %v9976_v46 = vld [vmem:[#allocation3 + $0x3fc] sm:$0xf]  ;;  %v8135_v44 = vor.u32 %v9883_v43, %v8134_v52 }
 0x3fd   :  { %v3227_v12 = vsel %vm174_vm0, %v3215_v3, %v3216_v55  ;;  %v3226_v29 = vsel %vm643_vm3, %v11655_v40, %v3225_v24  ;;  %v3097_v61 = vsel %vm174_vm0, %v3086_v10, %v3087_v30  ;;  %v8227_v40 = vor.u32 %v9903_v50, %v8224_v42  ;;  %v8200_v37 = vld [vmem:[#allocation3 + $0x198] sm:$0xf0]  ;;  %v9991_v55 = vld [vmem:[#allocation3 + $0x46c] sm:$0xf0] }
 0x3fe   :  { %3239 = vst [vmem:[#allocation3 + $0x500] sm:$0xff] %v3226_v29  ;;  %v3098_v4 = vsel %vm513_vm1, %v11764_v56, %v3097_v61  ;;  %4449 = vmatpush.bf16.msrb.mxu2 %v8547_v22  ;;  %v8111_v3 = vor.u32 %v9877_v33, %v8110_v8  ;;  %v8203_v24 = vor.u32 %v9897_v45, %v8200_v37  ;;  %v9970_v22 = vld [vmem:[#allocation3 + $0x3cc] sm:$0xf]  ;;  %v9871_v61 = vld [vmem:[#allocation3 + $0xac] sm:$0xf0] }
 0x3ff   :  { %4364 = vmatpush.bf16.msrb.mxu0 %v8183_v62  ;;  %v3228_v62 = vsel %vm643_vm3, %v3206_v0, %v3227_v12  ;;  %3111 = vst [vmem:[#allocation3 + $0x4a0] sm:$0xff] %v3098_v4  ;;  %v8523_v0 = vor.u32 %v9976_v46, %v8520_v59  ;;  %v8496_v48 = vld [vmem:[#allocation3 + $0x3e0] sm:$0xf0]  ;;  %v8566_v12 = vld [vmem:[#allocation3 + $0x458] sm:$0xf] }
 0x400   :  { %4327 = vmatpush.bf16.msra.mxu1 %v8251_v19  ;;  %3240 = vst [vmem:[#allocation3 + $0x508] sm:$0xff] %v3228_v62  ;;  %v8567_v43 = vor.u32 %v9991_v55, %v8566_v12  ;;  %v8499_v29 = vor.u32 %v9970_v22, %v8496_v48  ;;  %v8086_v62 = vld [vmem:[#allocation3 + $0x98] sm:$0xf]  ;;  %v8542_v46 = vld [vmem:[#allocation3 + $0x428] sm:$0xf] }
 0x401   :  { %v11914_v17 = vpop.permute.xlu1 %2809  ;;  %v8638_v33 = vld [vmem:[#allocation3 + $0x4e8] sm:$0xf]  ;;  %v8518_v55 = vld [vmem:[#allocation3 + $0x3f8] sm:$0xf]  ;;  %v9979_v22 = vld [vmem:[#allocation3 + $0x40c] sm:$0xf0] }
 0x402   :  { %v3136_v10 = vpop.permute.xlu2 %3135  ;;  %v2819_v56 = vrot.slane %v11914_v17, 4  ;;  %4450 = vmatpush.bf16.msrb.mxu2 %v8523_v0  ;;  %8653 = vmatmul.msk.bf16.vlgmr.msra.gmra.mxu0 %vm4248_vm11, %v11828_v16  ;;  %v8087_v0 = vor.u32 %v9871_v61, %v8086_v62  ;;  %v8062_v45 = vld [vmem:[#allocation3 + $0x68] sm:$0xf]  ;;  %v8184_v62 = vld [vmem:[#allocation3 + $0x170] sm:$0xf0]  ;;  %v8519_v61 = vor.u32 %v9979_v22, %v8518_v55 }
 0x403   :  { %4365 = vmatpush.bf16.msrb.mxu0 %v8159_v20  ;;  %v3148_v19 = vrot.slane %v3136_v10, 4  ;;  %v2868_v20 = vpop.permute.xlu0 %2867  ;;  %v9940_v55 = vld [vmem:[#allocation3 + $0x2dc] sm:$0xf]  ;;  %v8424_v22 = vld [vmem:[#allocation3 + $0x350] sm:$0xf0] }
 0x404   :  { %4328 = vmatpush.bf16.msra.mxu1 %v8227_v40  ;;  %v2880_v52 = vrot.slane %v2868_v20, 4  ;;  %v2829_v50 = vsel %vm174_vm0, %v2818_v32, %v2819_v56 }
 0x405   :  { %v3157_v42 = vsel %vm174_vm0, %v3147_v21, %v3148_v19  ;;  %v2830_v4 = vsel %vm241_vm8, %v11714_v13, %v2829_v50  ;;  %v10009_v40 = vld [vmem:[#allocation3 + $0x4fc] sm:$0xf0]  ;;  %v8614_v13 = vld [vmem:[#allocation3 + $0x4b8] sm:$0xf] }
 0x406   :  { %v3158_v8 = vsel %vm578_vm2, %v11830_v51, %v3157_v42  ;;  %v2889_v32 = vsel %vm174_vm0, %v2879_v34, %v2880_v52  ;;  %v9985_v21 = vld [vmem:[#allocation3 + $0x43c] sm:$0xf0]  ;;  %2843 = vst [vmem:[#allocation3 + $0x3b0] sm:$0xff] %v2830_v4  ;;  %4451 = vmatpush.bf16.msrb.mxu2 %v8499_v29  ;;  %v9892_v29 = vld [vmem:[#allocation3 + $0x15c] sm:$0xf] }
 0x407   :  { %4366 = vmatpush.bf16.msrb.mxu0 %v8135_v44  ;;  %v8639_v44 = vor.u32 %v10009_v40, %v8638_v33  ;;  %v2890_v59 = vsel %vm306_vm7, %v11709_v25, %v2889_v32  ;;  %3173 = vst [vmem:[#allocation3 + $0x4c0] sm:$0xff] %v3158_v8  ;;  %v8543_v51 = vor.u32 %v9985_v21, %v8542_v46  ;;  %v9865_v34 = vld [vmem:[#allocation3 + $0x7c] sm:$0xf0]  ;;  %v9859_v46 = vld [vmem:[#allocation3 + $0x4c] sm:$0xf0] }
 0x408   :  { %4329 = vmatpush.bf16.msra.mxu1 %v8203_v24  ;;  %2905 = vst [vmem:[#allocation3 + $0x3d0] sm:$0xff] %v2890_v59  ;;  %v9997_v52 = vld [vmem:[#allocation3 + $0x49c] sm:$0xf0]  ;;  %v8063_v12 = vor.u32 %v9865_v34, %v8062_v45  ;;  %v9964_v33 = vld [vmem:[#allocation3 + $0x39c] sm:$0xf] }
 0x409   :  { %4411 = vmatpush.bf16.msra.mxu3 %v8639_v44  ;;  %v3016_v37 = vpop.permute.xlu1 %3015  ;;  %v9886_v59 = vld [vmem:[#allocation3 + $0x12c] sm:$0xf]  ;;  %v8014_v34 = vld [vmem:[#allocation3 + $0x8] sm:$0xf] }
 0x40a   :  { %v2812_v10 = vpop.permute.xlu2 %2811  ;;  %v3024_v48 = vrot.slane %v3016_v37, 4 }
 0x40b   :  { %4367 = vmatpush.bf16.msrb.mxu0 %v8111_v3  ;;  %4330 = vmatmul.bf16.vlgmr.msra.gmra.mxu1 %v11558_v39  ;;  %v10003_v3 = vld [vmem:[#allocation3 + $0x4cc] sm:$0xf0]  ;;  %v2820_v19 = vrot.slane %v2812_v10, 4  ;;  %v3144_v20 = vpop.permute.xlu0 %3143 }
 0x40c   :  { %4392 = vmatpush.bf16.msrb.mxu1 %v8567_v43  ;;  %v8615_v25 = vor.u32 %v10003_v3, %v8614_v13  ;;  %v3152_v24 = vrot.slane %v3144_v20, 4  ;;  %v3035_v50 = vsel %vm174_vm0, %v3023_v36, %v3024_v48  ;;  %v8590_v43 = vld [vmem:[#allocation3 + $0x488] sm:$0xf]  ;;  %v8187_v13 = vor.u32 %v9892_v29, %v8184_v62  ;;  %v8448_v3 = vld [vmem:[#allocation3 + $0x380] sm:$0xf0] }
 0x40d   :  { %v2831_v42 = vsel %vm174_vm0, %v2819_v56, %v2820_v19  ;;  %v3036_v4 = vsel %vm448_vm4, %v11836_v58, %v3035_v50  ;;  %v8472_v40 = vld [vmem:[#allocation3 + $0x3b0] sm:$0xf0]  ;;  %v9973_v56 = vld [vmem:[#allocation3 + $0x3dc] sm:$0xf0]  ;;  %v8591_v32 = vor.u32 %v9997_v52, %v8590_v43  ;;  %v8038_v58 = vld [vmem:[#allocation3 + $0x38] sm:$0xf] }
 0x40e   :  { %4412 = vmatpush.bf16.msra.mxu3 %v8615_v25  ;;  %v2832_v8 = vsel %vm241_vm8, %v11914_v17, %v2831_v42  ;;  %v3163_v36 = vsel %vm174_vm0, %v3151_v49, %v3152_v24  ;;  %3048 = vst [vmem:[#allocation3 + $0x478] sm:$0xff] %v3036_v4  ;;  %v8475_v21 = vor.u32 %v9964_v33, %v8472_v40  ;;  %v9958_v17 = vld [vmem:[#allocation3 + $0x36c] sm:$0xf]  ;;  %v8160_v49 = vld [vmem:[#allocation3 + $0x140] sm:$0xf0] }
 0x40f   :  { %4368 = vmatpush.bf16.msrb.mxu0 %v8087_v0  ;;  %v3164_v44 = vsel %vm578_vm2, %v11794_v27, %v3163_v36  ;;  %2844 = vst [vmem:[#allocation3 + $0x3b8] sm:$0xff] %v2832_v8  ;;  %v8039_v0 = vor.u32 %v9859_v46, %v8038_v58  ;;  %v9967_v27 = vld [vmem:[#allocation3 + $0x3ac] sm:$0xf0]  ;;  %v8451_v25 = vor.u32 %v9958_v17, %v8448_v3  ;;  %v9853_v52 = vld [vmem:[#allocation3 + $0x1c] sm:$0xf0] }
 0x410   :  { %4393 = vmatpush.bf16.msrb.mxu1 %v8543_v51  ;;  %v8494_v51 = vld [vmem:[#allocation3 + $0x3c8] sm:$0xf]  ;;  %4452 = vmatpush.bf16.msrb.mxu2 %v8475_v21  ;;  %3176 = vst [vmem:[#allocation3 + $0x4d8] sm:$0xff] %v3164_v44  ;;  %v8376_v24 = vld [vmem:[#allocation3 + $0x2f0] sm:$0xf0]  ;;  %v8015_v42 = vor.u32 %v9853_v52, %v8014_v34 }
 0x411   :  { %v8495_v45 = vor.u32 %v9973_v56, %v8494_v51  ;;  %v3200_v37 = vpop.permute.xlu1 %3199  ;;  %v8470_v43 = vld [vmem:[#allocation3 + $0x398] sm:$0xf]  ;;  %v9880_v46 = vld [vmem:[#allocation3 + $0xfc] sm:$0xf]  ;;  %v8136_v4 = vld [vmem:[#allocation3 + $0x110] sm:$0xf0]  ;;  %v8379_v33 = vor.u32 %v9940_v55, %v8376_v24 }
 0x412   :  { %4413 = vmatpush.bf16.msra.mxu3 %v8591_v32  ;;  %v2740_v10 = vpop.permute.xlu2 %2739  ;;  %v3212_v48 = vrot.slane %v3200_v37, 4  ;;  %v8471_v8 = vor.u32 %v9967_v27, %v8470_v43  ;;  %v8446_v56 = vld [vmem:[#allocation3 + $0x368] sm:$0xf]  ;;  %v8352_v32 = vld [vmem:[#allocation3 + $0x2c0] sm:$0xf0] }
 0x413   :  { %4369 = vmatpush.bf16.msrb.mxu0 %v8063_v12  ;;  %v2752_v19 = vrot.slane %v2740_v10, 4  ;;  %v2940_v20 = vpop.permute.xlu0 %2939  ;;  %v8163_v12 = vor.u32 %v9886_v59, %v8160_v49  ;;  %v8112_v59 = vld [vmem:[#allocation3 + $0xe0] sm:$0xf0]  ;;  %v9946_v51 = vld [vmem:[#allocation3 + $0x30c] sm:$0xf] }
 0x414   :  { %4394 = vmatpush.bf16.msrb.mxu1 %v8519_v61  ;;  %v2948_v50 = vrot.slane %v2940_v20, 4  ;;  %v3221_v29 = vsel %vm174_vm0, %v3211_v28, %v3212_v48  ;;  %4453 = vmatpush.bf16.msrb.mxu2 %v8451_v25  ;;  %v9952_v61 = vld [vmem:[#allocation3 + $0x33c] sm:$0xf]  ;;  %v8400_v58 = vld [vmem:[#allocation3 + $0x320] sm:$0xf0] }
 0x415   :  { %8654 = vmatmul.msk.bf16.vlgmr.msra.gmra.mxu3 %vm4248_vm11, %v11828_v16  ;;  %v2761_v62 = vsel %vm174_vm0, %v2751_v11, %v2752_v19  ;;  %v3222_v40 = vsel %vm643_vm3, %v11770_v6, %v3221_v29  ;;  %v9934_v11 = vld [vmem:[#allocation3 + $0x2ac] sm:$0xf]  ;;  %v8427_v21 = vor.u32 %v9952_v61, %v8424_v22  ;;  %v8403_v37 = vor.u32 %v9946_v51, %v8400_v58  ;;  %v8422_v27 = vld [vmem:[#allocation3 + $0x338] sm:$0xf]  ;;  %v9928_v55 = vld [vmem:[#allocation3 + $0x27c] sm:$0xf] }
 0x416   :  { %4420 = vmatpush.bf16.msrb.mxu3 %v8187_v13  ;;  %v2762_v36 = vsel %vm176_vm9, %v11870_v5, %v2761_v62  ;;  %v2959_v28 = vsel %vm174_vm0, %v2947_v54, %v2948_v50  ;;  %3237 = vst [vmem:[#allocation3 + $0x4f0] sm:$0xff] %v3222_v40  ;;  %v9874_v6 = vld [vmem:[#allocation3 + $0xcc] sm:$0xf]  ;;  %v8139_v5 = vor.u32 %v9880_v46, %v8136_v4  ;;  %v9961_v13 = vld [vmem:[#allocation3 + $0x37c] sm:$0xf0] }
 0x417   :  { %4370 = vmatpush.bf16.msrb.mxu0 %v8039_v0  ;;  %v2960_v44 = vsel %vm371_vm5, %v11766_v26, %v2959_v28  ;;  %2777 = vst [vmem:[#allocation3 + $0x370] sm:$0xff] %v2762_v36  ;;  %v8447_v54 = vor.u32 %v9961_v13, %v8446_v56  ;;  %v8355_v17 = vor.u32 %v9934_v11, %v8352_v32  ;;  %v8328_v26 = vld [vmem:[#allocation3 + $0x290] sm:$0xf0]  ;;  %v9868_v19 = vld [vmem:[#allocation3 + $0x9c] sm:$0xf] }
 0x418   :  { %4395 = vmatpush.bf16.msrb.mxu1 %v8495_v45  ;;  %4454 = vmatpush.bf16.msrb.mxu2 %v8427_v21  ;;  %2972 = vst [vmem:[#allocation3 + $0x418] sm:$0xff] %v2960_v44  ;;  %v8115_v49 = vor.u32 %v9874_v6, %v8112_v59  ;;  %v9955_v45 = vld [vmem:[#allocation3 + $0x34c] sm:$0xf0]  ;;  %v8088_v25 = vld [vmem:[#allocation3 + $0xb0] sm:$0xf0]  ;;  %v8331_v52 = vor.u32 %v9928_v55, %v8328_v26 }
 0x419   :  { %v2804_v0 = vpop.permute.xlu1 %2803  ;;  %v8423_v20 = vor.u32 %v9955_v45, %v8422_v27  ;;  %v8304_v24 = vld [vmem:[#allocation3 + $0x260] sm:$0xf0]  ;;  %v10010_v50 = vld [vmem:[#allocation3 + $0x504] sm:$0xf0]  ;;  %v9949_v43 = vld [vmem:[#allocation3 + $0x31c] sm:$0xf0]  ;;  %v8091_v46 = vor.u32 %v9868_v19, %v8088_v25 }
 0x41a   :  { %4421 = vmatpush.bf16.msrb.mxu3 %v8163_v12  ;;  %v2816_v34 = vrot.slane %v2804_v0, 4  ;;  %v9922_v62 = vld [vmem:[#allocation3 + $0x24c] sm:$0xf]  ;;  %v8640_v61 = vld [vmem:[#allocation3 + $0x500] sm:$0xf0] }
 0x41b   :  { %4371 = vmatpush.bf16.msrb.mxu0 %v8015_v42  ;;  %v3072_v10 = vpop.permute.xlu0 %3071  ;;  %v8398_v4 = vld [vmem:[#allocation3 + $0x308] sm:$0xf]  ;;  %v8307_v40 = vor.u32 %v9922_v62, %v8304_v24  ;;  %v10006_v36 = vld [vmem:[#allocation3 + $0x4ec] sm:$0xf]  ;;  %v8622_v56 = vld [vmem:[#allocation3 + $0x4c0] sm:$0xf] }
 0x41c   :  { %4396 = vmatpush.bf16.msrb.mxu1 %v8471_v8  ;;  %v3084_v3 = vrot.slane %v3072_v10, 4  ;;  %v2825_v48 = vsel %vm174_vm0, %v2815_v53, %v2816_v34  ;;  %4455 = vmatpush.bf16.msrb.mxu2 %v8403_v37  ;;  %v9862_v8 = vld [vmem:[#allocation3 + $0x6c] sm:$0xf]  ;;  %v9916_v11 = vld [vmem:[#allocation3 + $0x21c] sm:$0xf] }
 0x41d   :  { %v2826_v12 = vsel %vm241_vm8, %v11798_v9, %v2825_v48  ;;  %v8646_v22 = vld [vmem:[#allocation3 + $0x4f0] sm:$0xf]  ;;  %v10004_v9 = vld [vmem:[#allocation3 + $0x4d4] sm:$0xf0]  ;;  %v10000_v6 = vld [vmem:[#allocation3 + $0x4bc] sm:$0xf] }
 0x41e   :  { %4372 = vmatmul.bf16.vlgmr.msrb.gmra.mxu0 %v11482_v60  ;;  %4422 = vmatpush.bf16.msrb.mxu3 %v8139_v5  ;;  %v3093_v42 = vsel %vm174_vm0, %v3083_v18, %v3084_v3  ;;  %2841 = vst [vmem:[#allocation3 + $0x3a0] sm:$0xff] %v2826_v12  ;;  %v8647_v29 = vor.u32 %v10010_v50, %v8646_v22  ;;  %v8280_v58 = vld [vmem:[#allocation3 + $0x230] sm:$0xf0]  ;;  %v9856_v45 = vld [vmem:[#allocation3 + $0x3c] sm:$0xf] }
 0x41f   :  { %4434 = vmatpush.bf16.msra.mxu0 %v8379_v33  ;;  %v3094_v53 = vsel %vm513_vm1, %v11737_v47, %v3093_v42  ;;  %4456 = vmatmul.bf16.vlgmr.msrb.gmra.mxu2 %v11868_v23  ;;  %v8064_v33 = vld [vmem:[#allocation3 + $0x80] sm:$0xf0]  ;;  %v8399_v18 = vor.u32 %v9949_v43, %v8398_v4  ;;  %v8643_v47 = vor.u32 %v10006_v36, %v8640_v61  ;;  %v8616_v0 = vld [vmem:[#allocation3 + $0x4d0] sm:$0xf0]  ;;  %v8190_v10 = vld [vmem:[#allocation3 + $0x160] sm:$0xf] }
 0x420   :  { %4397 = vmatpush.bf16.msrb.mxu1 %v8447_v54  ;;  %3109 = vst [vmem:[#allocation3 + $0x490] sm:$0xff] %v3094_v53  ;;  %4523 = vmatpush.bf16.msra.mxu2 %v8647_v29  ;;  %v8623_v21 = vor.u32 %v10004_v9, %v8622_v56  ;;  %v8067_v59 = vor.u32 %v9862_v8, %v8064_v33  ;;  %v8040_v54 = vld [vmem:[#allocation3 + $0x50] sm:$0xf0]  ;;  %v8256_v34 = vld [vmem:[#allocation3 + $0x200] sm:$0xf0] }
 0x421   :  { %v2876_v28 = vpop.permute.xlu1 %2875  ;;  %v8619_v26 = vor.u32 %v10000_v6, %v8616_v0  ;;  %v8592_v37 = vld [vmem:[#allocation3 + $0x4a0] sm:$0xf0]  ;;  %v8043_v3 = vor.u32 %v9856_v45, %v8040_v54  ;;  %v9896_v27 = vld [vmem:[#allocation3 + $0x174] sm:$0xf0]  ;;  %v9850_v55 = vld [vmem:[#allocation3 + $0xc] sm:$0xf] }
 0x422   :  { %4423 = vmatpush.bf16.msrb.mxu3 %v8115_v49  ;;  %v2884_v32 = vrot.slane %v2876_v28, 4  ;;  %v9944_v25 = vld [vmem:[#allocation3 + $0x2f4] sm:$0xf0]  ;;  %v8016_v12 = vld [vmem:[#allocation3 + $0x20] sm:$0xf0] }
 0x423   :  { %4435 = vmatpush.bf16.msra.mxu0 %v8355_v17  ;;  %v2748_v44 = vpop.permute.xlu0 %2747  ;;  %v8283_v17 = vor.u32 %v9916_v11, %v8280_v58  ;;  %v8019_v22 = vor.u32 %v9850_v55, %v8016_v12  ;;  %v8382_v50 = vld [vmem:[#allocation3 + $0x2e0] sm:$0xf]  ;;  %v8232_v42 = vld [vmem:[#allocation3 + $0x1d0] sm:$0xf0]  ;;  %v9890_v43 = vld [vmem:[#allocation3 + $0x144] sm:$0xf0] }
 0x424   :  { %4398 = vmatpush.bf16.msrb.mxu1 %v8423_v20  ;;  %v2756_v5 = vrot.slane %v2748_v44, 4  ;;  %v2895_v13 = vsel %vm174_vm0, %v2883_v35, %v2884_v32  ;;  %4524 = vmatpush.bf16.msra.mxu2 %v8623_v21  ;;  %v8383_v53 = vor.u32 %v9944_v25, %v8382_v50  ;;  %v9898_v61 = vld [vmem:[#allocation3 + $0x18c] sm:$0xf]  ;;  %v9938_v9 = vld [vmem:[#allocation3 + $0x2c4] sm:$0xf0] }
 0x425   :  { %v2896_v51 = vsel %vm306_vm7, %v11874_v41, %v2895_v13  ;;  %v9910_v41 = vld [vmem:[#allocation3 + $0x1ec] sm:$0xf]  ;;  %v8166_v4 = vld [vmem:[#allocation3 + $0x130] sm:$0xf]  ;;  %v8208_v8 = vld [vmem:[#allocation3 + $0x1a0] sm:$0xf0] }
 0x426   :  { %4424 = vmatpush.bf16.msrb.mxu3 %v8091_v46  ;;  %v2767_v49 = vsel %vm174_vm0, %v2755_v2, %v2756_v5  ;;  %2908 = vst [vmem:[#allocation3 + $0x3e8] sm:$0xff] %v2896_v51  ;;  %v8259_v48 = vor.u32 %v9910_v41, %v8256_v34  ;;  %v9994_v2 = vld [vmem:[#allocation3 + $0x48c] sm:$0xf]  ;;  %v8167_v33 = vor.u32 %v9890_v43, %v8166_v4  ;;  %v8142_v36 = vld [vmem:[#allocation3 + $0x100] sm:$0xf] }
 0x427   :  { %4436 = vmatpush.bf16.msra.mxu0 %v8331_v52  ;;  %v2768_v35 = vsel %vm176_vm9, %v11832_v15, %v2767_v49  ;;  %v8595_v20 = vor.u32 %v9994_v2, %v8592_v37  ;;  %v9904_v52 = vld [vmem:[#allocation3 + $0x1bc] sm:$0xf]  ;;  %v8191_v15 = vor.u32 %v9896_v27, %v8190_v10  ;;  %v8211_v28 = vor.u32 %v9898_v61, %v8208_v8  ;;  %v9884_v56 = vld [vmem:[#allocation3 + $0x114] sm:$0xf0]  ;;  %v8118_v32 = vld [vmem:[#allocation3 + $0xd0] sm:$0xf] }
 0x428   :  { %4399 = vmatpush.bf16.msrb.mxu1 %v8399_v18  ;;  %2780 = vst [vmem:[#allocation3 + $0x388] sm:$0xff] %v2768_v35  ;;  %v8235_v62 = vor.u32 %v9904_v52, %v8232_v42  ;;  %v9992_v18 = vld [vmem:[#allocation3 + $0x474] sm:$0xf0]  ;;  %v9878_v21 = vld [vmem:[#allocation3 + $0xe4] sm:$0xf0]  ;;  %v8143_v44 = vor.u32 %v9884_v56, %v8142_v36 }
 0x429   :  { %v3080_v19 = vpop.permute.xlu1 %3079  ;;  %v9932_v11 = vld [vmem:[#allocation3 + $0x294] sm:$0xf0]  ;;  %v9986_v6 = vld [vmem:[#allocation3 + $0x444] sm:$0xf0]  ;;  %v9893_v58 = vld [vmem:[#allocation3 + $0x164] sm:$0xf]  ;;  %v8119_v54 = vor.u32 %v9878_v21, %v8118_v32 }
 0x42a   :  { %4425 = vmatpush.bf16.msrb.mxu3 %v8067_v59  ;;  %v3088_v24 = vrot.slane %v3080_v19, 4  ;;  %v8334_v59 = vld [vmem:[#allocation3 + $0x280] sm:$0xf]  ;;  %v8192_v13 = vld [vmem:[#allocation3 + $0x178] sm:$0xf0] }
 0x42b   :  { %4437 = vmatpush.bf16.msra.mxu0 %v8307_v40  ;;  %4400 = vmatmul.bf16.vlgmr.msrb.gmra.mxu1 %v11868_v23  ;;  %v8358_v40 = vld [vmem:[#allocation3 + $0x2b0] sm:$0xf]  ;;  %v8335_v5 = vor.u32 %v9932_v11, %v8334_v59  ;;  %v9980_v34 = vld [vmem:[#allocation3 + $0x414] sm:$0xf0]  ;;  %v8195_v35 = vor.u32 %v9893_v58, %v8192_v13  ;;  %v9926_v37 = vld [vmem:[#allocation3 + $0x264] sm:$0xf0] }
 0x42c   :  { %4467 = vmatpush.bf16.msra.mxu1 %v8643_v47  ;;  %v3099_v29 = vsel %vm174_vm0, %v3087_v30, %v3088_v24  ;;  %v8359_v30 = vor.u32 %v9938_v9, %v8358_v40  ;;  %v8574_v47 = vld [vmem:[#allocation3 + $0x460] sm:$0xf]  ;;  %v8598_v0 = vld [vmem:[#allocation3 + $0x490] sm:$0xf]  ;;  %v8168_v27 = vld [vmem:[#allocation3 + $0x148] sm:$0xf0] }
 0x42d   :  { %v3100_v46 = vsel %vm513_vm1, %v11897_v1, %v3099_v29  ;;  %v8575_v1 = vor.u32 %v9992_v18, %v8574_v47  ;;  %v8310_v49 = vld [vmem:[#allocation3 + $0x250] sm:$0xf]  ;;  %v8094_v10 = vld [vmem:[#allocation3 + $0xa0] sm:$0xf]  ;;  %v9887_v19 = vld [vmem:[#allocation3 + $0x134] sm:$0xf] }
 0x42e   :  { %4426 = vmatpush.bf16.msrb.mxu3 %v8043_v3  ;;  %3112 = vst [vmem:[#allocation3 + $0x4a8] sm:$0xff] %v3100_v46  ;;  %v9872_v3 = vld [vmem:[#allocation3 + $0xb4] sm:$0xf0]  ;;  %v8311_v41 = vor.u32 %v9926_v37, %v8310_v49  ;;  %v8526_v55 = vld [vmem:[#allocation3 + $0x400] sm:$0xf]  ;;  %v8171_v52 = vor.u32 %v9887_v19, %v8168_v27 }
 0x42f   :  { %4438 = vmatpush.bf16.msra.mxu0 %v8283_v17  ;;  %v8550_v17 = vld [vmem:[#allocation3 + $0x430] sm:$0xf]  ;;  %v8527_v2 = vor.u32 %v9980_v34, %v8526_v55  ;;  %v8095_v25 = vor.u32 %v9872_v3, %v8094_v10  ;;  %v8286_v24 = vld [vmem:[#allocation3 + $0x220] sm:$0xf]  ;;  %v9866_v12 = vld [vmem:[#allocation3 + $0x84] sm:$0xf0] }
 0x430   :  { %4468 = vmatpush.bf16.msra.mxu1 %v8619_v26  ;;  %v8551_v45 = vor.u32 %v9986_v6, %v8550_v17  ;;  %v8502_v50 = vld [vmem:[#allocation3 + $0x3d0] sm:$0xf]  ;;  %v8144_v42 = vld [vmem:[#allocation3 + $0x118] sm:$0xf0]  ;;  %v9914_v43 = vld [vmem:[#allocation3 + $0x204] sm:$0xf0] }
 0x431   :  { %v8070_v29 = vld [vmem:[#allocation3 + $0x70] sm:$0xf]  ;;  %v9875_v61 = vld [vmem:[#allocation3 + $0xd4] sm:$0xf]  ;;  %v8120_v46 = vld [vmem:[#allocation3 + $0xe8] sm:$0xf0] }
 0x432   :  { %4427 = vmatpush.bf16.msrb.mxu3 %v8019_v22  ;;  %v9881_v22 = vld [vmem:[#allocation3 + $0x104] sm:$0xf]  ;;  %v8478_v9 = vld [vmem:[#allocation3 + $0x3a0] sm:$0xf]  ;;  %v8262_v8 = vld [vmem:[#allocation3 + $0x1f0] sm:$0xf] }
 0x433   :  { %4439 = vmatpush.bf16.msra.mxu0 %v8259_v48  ;;  %v9920_v48 = vld [vmem:[#allocation3 + $0x234] sm:$0xf0]  ;;  %v8147_v4 = vor.u32 %v9881_v22, %v8144_v42  ;;  %v8263_v40 = vor.u32 %v9914_v43, %v8262_v8  ;;  %v9962_v11 = vld [vmem:[#allocation3 + $0x384] sm:$0xf0]  ;;  %v9869_v32 = vld [vmem:[#allocation3 + $0xa4] sm:$0xf] }
 0x434   :  { %4469 = vmatpush.bf16.msra.mxu1 %v8595_v20  ;;  %v9974_v20 = vld [vmem:[#allocation3 + $0x3e4] sm:$0xf0]  ;;  %v9860_v18 = vld [vmem:[#allocation3 + $0x54] sm:$0xf0]  ;;  %v8096_v6 = vld [vmem:[#allocation3 + $0xb8] sm:$0xf0] }
 0x435   :  { %4428 = vmatmul.bf16.vlgmr.msrb.gmra.mxu3 %v11482_v60  ;;  %v9998_v51 = vld [vmem:[#allocation3 + $0x4a4] sm:$0xf0]  ;;  %v9968_v36 = vld [vmem:[#allocation3 + $0x3b4] sm:$0xf0]  ;;  %v8454_v59 = vld [vmem:[#allocation3 + $0x370] sm:$0xf]  ;;  %v8099_v49 = vor.u32 %v9869_v32, %v8096_v6 }
 0x436   :  { %4490 = vmatpush.bf16.msra.mxu3 %v8383_v53  ;;  %v8599_v26 = vor.u32 %v9998_v51, %v8598_v0  ;;  %v8503_v53 = vor.u32 %v9974_v20, %v8502_v50  ;;  %v8479_v56 = vor.u32 %v9968_v36, %v8478_v9  ;;  %v9854_v21 = vld [vmem:[#allocation3 + $0x24] sm:$0xf0]  ;;  %v8214_v58 = vld [vmem:[#allocation3 + $0x190] sm:$0xf]  ;;  %v8576_v17 = vld [vmem:[#allocation3 + $0x478] sm:$0xf0] }
 0x437   :  { %4440 = vmatpush.bf16.msra.mxu0 %v8235_v62  ;;  %v8071_v62 = vor.u32 %v9866_v12, %v8070_v29  ;;  %v8022_v13 = vld [vmem:[#allocation3 + $0x10] sm:$0xf]  ;;  %v9941_v51 = vld [vmem:[#allocation3 + $0x2e4] sm:$0xf]  ;;  %v9956_v34 = vld [vmem:[#allocation3 + $0x354] sm:$0xf0] }
 0x438   :  { %4476 = vmatpush.bf16.msrb.mxu1 %v8191_v15  ;;  %4525 = vmatpush.bf16.msra.mxu2 %v8599_v26  ;;  %v8287_v15 = vor.u32 %v9920_v48, %v8286_v24  ;;  %v8023_v0 = vor.u32 %v9854_v21, %v8022_v13  ;;  %v9989_v37 = vld [vmem:[#allocation3 + $0x464] sm:$0xf]  ;;  %v8072_v10 = vld [vmem:[#allocation3 + $0x88] sm:$0xf0]  ;;  %v9863_v55 = vld [vmem:[#allocation3 + $0x74] sm:$0xf] }
 0x439   :  { %v8579_v3 = vor.u32 %v9989_v37, %v8576_v17  ;;  %v8360_v27 = vld [vmem:[#allocation3 + $0x2c8] sm:$0xf0]  ;;  %v8075_v19 = vor.u32 %v9863_v55, %v8072_v10  ;;  %v9935_v20 = vld [vmem:[#allocation3 + $0x2b4] sm:$0xf]  ;;  %v8048_v12 = vld [vmem:[#allocation3 + $0x58] sm:$0xf0] }
 0x43a   :  { %4491 = vmatpush.bf16.msra.mxu3 %v8359_v30  ;;  %v8123_v30 = vor.u32 %v9875_v61, %v8120_v46  ;;  %v8552_v48 = vld [vmem:[#allocation3 + $0x448] sm:$0xf0]  ;;  %v9983_v24 = vld [vmem:[#allocation3 + $0x434] sm:$0xf]  ;;  %v9950_v42 = vld [vmem:[#allocation3 + $0x324] sm:$0xf0] }
 0x43b   :  { %4441 = vmatpush.bf16.msra.mxu0 %v8211_v28  ;;  %8655 = vmatmul.msk.bf16.vlgmr.msra.gmra.mxu1 %vm4248_vm11, %v11828_v16  ;;  %v9908_v28 = vld [vmem:[#allocation3 + $0x1d4] sm:$0xf0]  ;;  %v10007_v22 = vld [vmem:[#allocation3 + $0x4f4] sm:$0xf]  ;;  %v8555_v50 = vor.u32 %v9983_v24, %v8552_v48  ;;  %v8336_v43 = vld [vmem:[#allocation3 + $0x298] sm:$0xf0] }
 0x43c   :  { %4477 = vmatpush.bf16.msrb.mxu1 %v8167_v33  ;;  %4532 = vmatpush.bf16.msrb.mxu2 %v8195_v35  ;;  %v8046_v33 = vld [vmem:[#allocation3 + $0x40] sm:$0xf]  ;;  %v8528_v29 = vld [vmem:[#allocation3 + $0x418] sm:$0xf0]  ;;  %v9929_v46 = vld [vmem:[#allocation3 + $0x284] sm:$0xf] }
 0x43d   :  { %8656 = vmatmul.msk.bf16.vlgmr.msra.gmra.mxu2 %vm4248_vm11, %v11828_v16  ;;  %v8047_v47 = vor.u32 %v9860_v18, %v8046_v33  ;;  %v8024_v8 = vld [vmem:[#allocation3 + $0x28] sm:$0xf0]  ;;  %v8339_v33 = vor.u32 %v9929_v46, %v8336_v43  ;;  %v8624_v18 = vld [vmem:[#allocation3 + $0x4d8] sm:$0xf0]  ;;  %v10109_v36 = vld [vmem:[#allocation3 + $0x2e4] sm:$0xf0] }
 0x43e   :  { %4442 = vmatmul.bf16.vlgmr.msra.gmra.mxu0 %v11558_v39  ;;  %4492 = vmatpush.bf16.msra.mxu3 %v8335_v5  ;;  %v8384_v5 = vld [vmem:[#allocation3 + $0x2f8] sm:$0xf0]  ;;  %v8312_v32 = vld [vmem:[#allocation3 + $0x268] sm:$0xf0]  ;;  %v9971_v6 = vld [vmem:[#allocation3 + $0x3d4] sm:$0xf] }
 0x43f   :  { %4504 = vmatpush.bf16.msrb.mxu0 %v8575_v1  ;;  %v8238_v1 = vld [vmem:[#allocation3 + $0x1c0] sm:$0xf]  ;;  %v8387_v26 = vor.u32 %v9941_v51, %v8384_v5  ;;  %v8600_v5 = vld [vmem:[#allocation3 + $0x4a8] sm:$0xf0]  ;;  %v10103_v13 = vld [vmem:[#allocation3 + $0x2b4] sm:$0xf0] }
 0x440   :  { %4478 = vmatpush.bf16.msrb.mxu1 %v8143_v44  ;;  %4533 = vmatpush.bf16.msrb.mxu2 %v8171_v52  ;;  %v8239_v44 = vor.u32 %v9908_v28, %v8238_v1  ;;  %v8406_v52 = vld [vmem:[#allocation3 + $0x310] sm:$0xf]  ;;  %v9851_v28 = vld [vmem:[#allocation3 + $0x14] sm:$0xf]  ;;  %v8480_v37 = vld [vmem:[#allocation3 + $0x3b8] sm:$0xf0] }
 0x441   :  { %v9040_v1 = vld [vmem:[#allocation3 + $0x2d0] sm:$0xf]  ;;  %v9995_v51 = vld [vmem:[#allocation3 + $0x494] sm:$0xf]  ;;  %v8264_v55 = vld [vmem:[#allocation3 + $0x208] sm:$0xf0] }
 0x442   :  { %4493 = vmatpush.bf16.msra.mxu3 %v8311_v41  ;;  %v8430_v41 = vld [vmem:[#allocation3 + $0x340] sm:$0xf]  ;;  %v8848_v17 = vld [vmem:[#allocation3 + $0x150] sm:$0xf]  ;;  %v8456_v48 = vld [vmem:[#allocation3 + $0x388] sm:$0xf0] }
 0x443   :  { %4505 = vmatpush.bf16.msrb.mxu0 %v8551_v45  ;;  %v9902_v45 = vld [vmem:[#allocation3 + $0x1a4] sm:$0xf0]  ;;  %v9953_v46 = vld [vmem:[#allocation3 + $0x344] sm:$0xf] }
 0x444   :  { %4479 = vmatpush.bf16.msrb.mxu1 %v8119_v54  ;;  %4534 = vmatpush.bf16.msrb.mxu2 %v8147_v4  ;;  %v8455_v54 = vor.u32 %v9962_v11, %v8454_v59  ;;  %v8215_v35 = vor.u32 %v9902_v45, %v8214_v58  ;;  %v9977_v4 = vld [vmem:[#allocation3 + $0x404] sm:$0xf]  ;;  %v8027_v11 = vor.u32 %v9851_v28, %v8024_v8  ;;  %v9016_v45 = vld [vmem:[#allocation3 + $0x2a0] sm:$0xf]  ;;  %v10049_v43 = vld [vmem:[#allocation3 + $0x104] sm:$0xf0] }
 0x445   :  { %v10043_v8 = vld [vmem:[#allocation3 + $0xd4] sm:$0xf0]  ;;  %v8944_v28 = vld [vmem:[#allocation3 + $0x210] sm:$0xf] }
 0x446   :  { %4494 = vmatpush.bf16.msra.mxu3 %v8287_v15  ;;  %v8363_v15 = vor.u32 %v9935_v20, %v8360_v27  ;;  %v10097_v27 = vld [vmem:[#allocation3 + $0x284] sm:$0xf0] }
 0x447   :  { %4506 = vmatpush.bf16.msrb.mxu0 %v8527_v2  ;;  %v8431_v2 = vor.u32 %v9956_v34, %v8430_v41  ;;  %v8603_v34 = vor.u32 %v9995_v51, %v8600_v5 }
 0x448   :  { %4480 = vmatpush.bf16.msrb.mxu1 %v8095_v25  ;;  %4535 = vmatpush.bf16.msrb.mxu2 %v8123_v30  ;;  %v9857_v25 = vld [vmem:[#allocation3 + $0x44] sm:$0xf]  ;;  %v9923_v30 = vld [vmem:[#allocation3 + $0x254] sm:$0xf] }
 0x449   :  { %v8051_v61 = vor.u32 %v9857_v25, %v8048_v12  ;;  %v8315_v59 = vor.u32 %v9923_v30, %v8312_v32  ;;  %v9911_v25 = vld [vmem:[#allocation3 + $0x1f4] sm:$0xf]  ;;  %v8408_v32 = vld [vmem:[#allocation3 + $0x328] sm:$0xf0] }
 0x44a   :  { %4495 = vmatpush.bf16.msra.mxu3 %v8263_v40  ;;  %v8531_v40 = vor.u32 %v9977_v4, %v8528_v29  ;;  %v8267_v24 = vor.u32 %v9911_v25, %v8264_v55  ;;  %v8968_v29 = vld [vmem:[#allocation3 + $0x240] sm:$0xf]  ;;  %v9947_v30 = vld [vmem:[#allocation3 + $0x314] sm:$0xf]  ;;  %v8704_v25 = vld [vmem:[#allocation3 + $0x30] sm:$0xf] }
 0x44b   :  { %4507 = vmatpush.bf16.msrb.mxu0 %v8503_v53  ;;  %v8407_v53 = vor.u32 %v9950_v42, %v8406_v52  ;;  %v9959_v52 = vld [vmem:[#allocation3 + $0x374] sm:$0xf]  ;;  %v8432_v42 = vld [vmem:[#allocation3 + $0x358] sm:$0xf0]  ;;  %v8776_v4 = vld [vmem:[#allocation3 + $0xc0] sm:$0xf] }
 0x44c   :  { %4481 = vmatpush.bf16.msrb.mxu1 %v8071_v62  ;;  %4536 = vmatpush.bf16.msrb.mxu2 %v8099_v49  ;;  %v8648_v62 = vld [vmem:[#allocation3 + $0x508] sm:$0xf0]  ;;  %v10061_v49 = vld [vmem:[#allocation3 + $0x164] sm:$0xf0]  ;;  %v8459_v12 = vor.u32 %v9959_v52, %v8456_v48  ;;  %v8872_v55 = vld [vmem:[#allocation3 + $0x180] sm:$0xf] }
 0x44d   :  { %v8651_v9 = vor.u32 %v10007_v22, %v8648_v62  ;;  %v8849_v41 = vor.u32 %v10061_v49, %v8848_v17  ;;  %v10091_v22 = vld [vmem:[#allocation3 + $0x254] sm:$0xf0]  ;;  %v8800_v62 = vld [vmem:[#allocation3 + $0xf0] sm:$0xf] }
 0x44e   :  { %4496 = vmatpush.bf16.msra.mxu3 %v8239_v44  ;;  %v9041_v44 = vor.u32 %v10109_v36, %v9040_v1  ;;  %v9899_v36 = vld [vmem:[#allocation3 + $0x194] sm:$0xf]  ;;  %v10151_v17 = vld [vmem:[#allocation3 + $0x434] sm:$0xf0]  ;;  %v8896_v49 = vld [vmem:[#allocation3 + $0x1b0] sm:$0xf] }
 0x44f   :  { %4508 = vmatpush.bf16.msrb.mxu0 %v8479_v56  ;;  %v8504_v56 = vld [vmem:[#allocation3 + $0x3e8] sm:$0xf0]  ;;  %v10067_v48 = vld [vmem:[#allocation3 + $0x194] sm:$0xf0] }
 0x450   :  { %4482 = vmatpush.bf16.msrb.mxu1 %v8047_v47  ;;  %4537 = vmatpush.bf16.msrb.mxu2 %v8075_v19  ;;  %v10001_v47 = vld [vmem:[#allocation3 + $0x4c4] sm:$0xf]  ;;  %v8507_v58 = vor.u32 %v9971_v6, %v8504_v56  ;;  %v8992_v19 = vld [vmem:[#allocation3 + $0x270] sm:$0xf]  ;;  %v8216_v56 = vld [vmem:[#allocation3 + $0x1a8] sm:$0xf0] }
 0x451   :  { %v8627_v21 = vor.u32 %v10001_v47, %v8624_v18  ;;  %v8993_v20 = vor.u32 %v10097_v27, %v8992_v19  ;;  %v8801_v18 = vor.u32 %v10049_v43, %v8800_v62  ;;  %v8777_v47 = vor.u32 %v10043_v8, %v8776_v4  ;;  %v10079_v6 = vld [vmem:[#allocation3 + $0x1f4] sm:$0xf0]  ;;  %v8850_v19 = vld [vmem:[#allocation3 + $0x168] sm:$0xf0]  ;;  %v10052_v62 = vld [vmem:[#allocation3 + $0x124] sm:$0xf] }
 0x452   :  { %4497 = vmatpush.bf16.msra.mxu3 %v8215_v35  ;;  %v9017_v35 = vor.u32 %v10103_v13, %v9016_v45  ;;  %v10037_v13 = vld [vmem:[#allocation3 + $0xa4] sm:$0xf0]  ;;  %v10139_v52 = vld [vmem:[#allocation3 + $0x3d4] sm:$0xf0]  ;;  %v9136_v8 = vld [vmem:[#allocation3 + $0x390] sm:$0xf] }
 0x453   :  { %4509 = vmatpush.bf16.msrb.mxu0 %v8455_v54  ;;  %v8288_v54 = vld [vmem:[#allocation3 + $0x238] sm:$0xf0]  ;;  %v10073_v45 = vld [vmem:[#allocation3 + $0x1c4] sm:$0xf0]  ;;  %v10019_v43 = vld [vmem:[#allocation3 + $0x14] sm:$0xf0] }
 0x454   :  { %4483 = vmatpush.bf16.msrb.mxu1 %v8023_v0  ;;  %4538 = vmatpush.bf16.msrb.mxu2 %v8051_v61  ;;  %v9965_v0 = vld [vmem:[#allocation3 + $0x3a4] sm:$0xf]  ;;  %v8969_v61 = vor.u32 %v10091_v22, %v8968_v29 }
 0x455   :  { %4498 = vmatmul.bf16.vlgmr.msra.gmra.mxu3 %v11558_v39 }
 0x456   :  { %4560 = vmatpush.bf16.msrb.mxu3 %v8579_v3  ;;  %v8483_v3 = vor.u32 %v9965_v0, %v8480_v37  ;;  %v4261_v37 = vpop.f32.mrf.mxu2 }
 0x457   :  { %4484 = vmatmul.bf16.vlgmr.msrb.gmra.mxu1 %v11482_v60  ;;  %4510 = vmatpush.bf16.msrb.mxu0 %v8431_v2  ;;  %v10055_v2 = vld [vmem:[#allocation3 + $0x134] sm:$0xf0] }
 0x458   :  { %4546 = vmatpush.bf16.msra.mxu1 %v8387_v26  ;;  %4539 = vmatpush.bf16.msrb.mxu2 %v8027_v11  ;;  %v9917_v26 = vld [vmem:[#allocation3 + $0x224] sm:$0xf]  ;;  %v10157_v11 = vld [vmem:[#allocation3 + $0x464] sm:$0xf0] }
 0x459   :  { %v8291_v10 = vor.u32 %v9917_v26, %v8288_v54  ;;  %v8920_v54 = vld [vmem:[#allocation3 + $0x1e0] sm:$0xf] }
 0x45a   :  { %4561 = vmatpush.bf16.msrb.mxu3 %v8555_v50  ;;  %v8240_v50 = vld [vmem:[#allocation3 + $0x1d8] sm:$0xf0]  ;;  %v8921_v0 = vor.u32 %v10079_v6, %v8920_v54  ;;  %v8754_v54 = vld [vmem:[#allocation3 + $0xa8] sm:$0xf0] }
 0x45b   :  { %4511 = vmatpush.bf16.msrb.mxu0 %v8407_v53  ;;  %4540 = vmatmul.bf16.vlgmr.msrb.gmra.mxu2 %v11482_v60  ;;  %v8824_v60 = vld [vmem:[#allocation3 + $0x120] sm:$0xf]  ;;  %v9905_v53 = vld [vmem:[#allocation3 + $0x1c4] sm:$0xf] }
 0x45c   :  { %4547 = vmatpush.bf16.msra.mxu1 %v8363_v15  ;;  %6505 = vmatpush.bf16.msra.mxu2 %v9041_v44  ;;  %v8825_v15 = vor.u32 %v10055_v2, %v8824_v60  ;;  %v8411_v44 = vor.u32 %v9947_v30, %v8408_v32  ;;  %v4275_v60 = vpop.f32.mrf.mxu3  ;;  %v10040_v30 = vld [vmem:[#allocation3 + $0xc4] sm:$0xf] }
 0x45e   :  { %4562 = vmatpush.bf16.msrb.mxu3 %v8531_v40  ;;  %4512 = vmatmul.bf16.vlgmr.msrb.gmra.mxu0 %v11868_v23  ;;  %v10085_v40 = vld [vmem:[#allocation3 + $0x224] sm:$0xf0] }
 0x45f   :  { %4579 = vmatpush.bf16.msra.mxu0 %v8651_v9  ;;  %v8243_v9 = vor.u32 %v9905_v53, %v8240_v50  ;;  %v8945_v1 = vor.u32 %v10085_v40, %v8944_v28  ;;  %v8826_v50 = vld [vmem:[#allocation3 + $0x138] sm:$0xf0]  ;;  %v10133_v53 = vld [vmem:[#allocation3 + $0x3a4] sm:$0xf0]  ;;  %v10127_v40 = vld [vmem:[#allocation3 + $0x374] sm:$0xf0] }
 0x460   :  { %4548 = vmatpush.bf16.msra.mxu1 %v8339_v33  ;;  %6506 = vmatpush.bf16.msra.mxu2 %v9017_v35  ;;  %v8435_v33 = vor.u32 %v9953_v46, %v8432_v42  ;;  %v10031_v35 = vld [vmem:[#allocation3 + $0x74] sm:$0xf0]  ;;  %v8680_v42 = vld [vmem:[#allocation3] sm:$0xf]  ;;  %v8778_v28 = vld [vmem:[#allocation3 + $0xd8] sm:$0xf0] }
 0x461   :  { %v8681_v4 = vor.u32 %v10019_v43, %v8680_v42 }
 0x462   :  { %4563 = vmatpush.bf16.msrb.mxu3 %v8507_v58  ;;  %v8752_v58 = vld [vmem:[#allocation3 + $0x90] sm:$0xf] }
 0x463   :  { %4580 = vmatpush.bf16.msra.mxu0 %v8627_v21  ;;  %v8219_v21 = vor.u32 %v9899_v36, %v8216_v56  ;;  %v8753_v51 = vor.u32 %v10037_v13, %v8752_v58  ;;  %v10046_v36 = vld [vmem:[#allocation3 + $0xf4] sm:$0xf]  ;;  %v12007_v56 = vpop.permute.xlu1 %3411 }
 0x464   :  { %4549 = vmatpush.bf16.msra.mxu1 %v8315_v59  ;;  %6507 = vmatpush.bf16.msra.mxu2 %v8993_v20  ;;  %v9232_v59 = vld [vmem:[#allocation3 + $0x450] sm:$0xf]  ;;  %v10025_v20 = vld [vmem:[#allocation3 + $0x44] sm:$0xf0]  ;;  %v4277_v32 = vpop.f32.mrf.mxu3  ;;  %v4262_v6 = vadd.f32 %v4261_v37, %v12007_v56  ;;  %v10034_v13 = vld [vmem:[#allocation3 + $0x94] sm:$0xf] }
 0x465   :  { %v9233_v5 = vor.u32 %v10157_v11, %v9232_v59  ;;  %v9112_v11 = vld [vmem:[#allocation3 + $0x360] sm:$0xf]  ;;  %v10014_v37 = vld [vmem:[#allocation9 + $0x18] sm:$0xf0] }
 0x466   :  { %4564 = vmatpush.bf16.msrb.mxu3 %v8483_v3  ;;  %v8897_v3 = vor.u32 %v10073_v45, %v8896_v49  ;;  %v4276_v49 = vadd.f32 %v4275_v60, %v4262_v6  ;;  %v9042_v45 = vld [vmem:[#allocation3 + $0x2e8] sm:$0xf0] }
 0x467   :  { %4581 = vmatpush.bf16.msra.mxu0 %v8603_v34  ;;  %v8728_v34 = vld [vmem:[#allocation3 + $0x60] sm:$0xf] }
 0x468   :  { %4550 = vmatpush.bf16.msra.mxu1 %v8291_v10  ;;  %6508 = vmatpush.bf16.msra.mxu2 %v8969_v61  ;;  %v10145_v10 = vld [vmem:[#allocation3 + $0x404] sm:$0xf0]  ;;  %v8729_v27 = vor.u32 %v10031_v35, %v8728_v34  ;;  %v4263_v61 = vpop.f32.mrf.mxu2  ;;  %v9064_v34 = vld [vmem:[#allocation3 + $0x300] sm:$0xf] }
 0x469   :  { %v8668_v35 = vld [vmem:[#allocation9 + $0x8] sm:$0xf] }
 0x46a   :  { %4565 = vmatpush.bf16.msrb.mxu3 %v8459_v12  ;;  %v4303_v29 = vpop.f32.mrf.mxu1 }
 0x46b   :  { %6491 = vmatpush.bf16.msrb.mxu0 %v8849_v41  ;;  %v10058_v41 = vld [vmem:[#allocation3 + $0x154] sm:$0xf] }
 0x46c   :  { %4551 = vmatpush.bf16.msra.mxu1 %v8267_v24  ;;  %6509 = vmatpush.bf16.msra.mxu2 %v8945_v1  ;;  %v8873_v24 = vor.u32 %v10067_v48, %v8872_v55  ;;  %v8853_v12 = vor.u32 %v10058_v41, %v8850_v19  ;;  %v9113_v1 = vor.u32 %v10127_v40, %v9112_v11  ;;  %v10028_v41 = vld [vmem:[#allocation3 + $0x64] sm:$0xf]  ;;  %v10106_v55 = vld [vmem:[#allocation3 + $0x2d4] sm:$0xf] }
 0x46d   :  { %v9045_v48 = vor.u32 %v10106_v55, %v9042_v45  ;;  %v10082_v45 = vld [vmem:[#allocation3 + $0x214] sm:$0xf]  ;;  %v8898_v55 = vld [vmem:[#allocation3 + $0x1c8] sm:$0xf0] }
 0x46e   :  { %4566 = vmatpush.bf16.msrb.mxu3 %v8435_v33  ;;  %8657 = vmatmul.msk.bf16.vlgmr.msra.gmra.mxu0 %vm4248_vm11, %v11828_v16  ;;  %v9208_v16 = vld [vmem:[#allocation3 + $0x420] sm:$0xf]  ;;  %v9137_v33 = vor.u32 %v10133_v53, %v9136_v8 }
 0x46f   :  { %6492 = vmatpush.bf16.msrb.mxu0 %v8825_v15  ;;  %v9209_v26 = vor.u32 %v10151_v17, %v9208_v16  ;;  %v8705_v15 = vor.u32 %v10025_v20, %v8704_v25  ;;  %v4289_v46 = vpop.f32.mrf.mxu0  ;;  %v12012_v16 = vpop.permute.xlu2 %3416  ;;  %v9018_v20 = vld [vmem:[#allocation3 + $0x2b8] sm:$0xf0] }
 0x470   :  { %4552 = vmatpush.bf16.msra.mxu1 %v8243_v9  ;;  %6510 = vmatpush.bf16.msra.mxu2 %v8921_v0  ;;  %v8829_v9 = vor.u32 %v10052_v62, %v8826_v50  ;;  %v4317_v17 = vpop.f32.mrf.mxu2  ;;  %v4264_v19 = vadd.f32 %v4263_v61, %v12012_v16  ;;  %v8994_v62 = vld [vmem:[#allocation3 + $0x288] sm:$0xf0] }
 0x471   :  { %v4318_v25 = vadd.f32 %v4317_v17, %v12007_v56  ;;  %v8946_v17 = vld [vmem:[#allocation3 + $0x228] sm:$0xf0] }
 0x472   :  { %4567 = vmatpush.bf16.msrb.mxu3 %v8411_v44  ;;  %v10121_v44 = vld [vmem:[#allocation3 + $0x344] sm:$0xf0]  ;;  %v12010_v59 = vpop.f32.mrf.mxu1  ;;  %v4278_v43 = vadd.f32 %v4277_v32, %v4264_v19  ;;  %v10064_v19 = vld [vmem:[#allocation3 + $0x184] sm:$0xf] }
 0x473   :  { %6493 = vmatpush.bf16.msrb.mxu0 %v8801_v18  ;;  %v8802_v18 = vld [vmem:[#allocation3 + $0x108] sm:$0xf0] }
 0x474   :  { %4553 = vmatpush.bf16.msra.mxu1 %v8219_v21  ;;  %6511 = vmatpush.bf16.msra.mxu2 %v8897_v3  ;;  %v8781_v21 = vor.u32 %v10040_v30, %v8778_v28  ;;  %v8970_v28 = vld [vmem:[#allocation3 + $0x258] sm:$0xf0] }
 0x475   :  { %4568 = vmatmul.bf16.vlgmr.msrb.gmra.mxu3 %v11868_v23  ;;  %v9160_v23 = vld [vmem:[#allocation3 + $0x3c0] sm:$0xf] }
 0x476   :  { %v9161_v22 = vor.u32 %v10139_v52, %v9160_v23 }
 0x477   :  { %6494 = vmatpush.bf16.msrb.mxu0 %v8777_v47  ;;  %4554 = vmatmul.bf16.vlgmr.msra.gmra.mxu1 %v11558_v39  ;;  %v9184_v39 = vld [vmem:[#allocation3 + $0x3f0] sm:$0xf]  ;;  %v8805_v47 = vor.u32 %v10046_v36, %v8802_v18  ;;  %v4291_v0 = vpop.f32.mrf.mxu0  ;;  %v10094_v18 = vld [vmem:[#allocation3 + $0x274] sm:$0xf] }
 0x478   :  { %6519 = vmatpush.bf16.msrb.mxu1 %v9233_v5  ;;  %v9185_v2 = vor.u32 %v10145_v10, %v9184_v39  ;;  %6512 = vmatpush.bf16.msra.mxu2 %v8873_v24  ;;  %v9088_v5 = vld [vmem:[#allocation3 + $0x330] sm:$0xf]  ;;  %v4290_v10 = vadd.f32 %v4289_v46, %v4276_v49  ;;  %v4345_v39 = vpop.f32.mrf.mxu3  ;;  %v4319_v61 = vpop.f32.mrf.mxu2  ;;  %v4292_v8 = vadd.f32 %v4291_v0, %v4278_v43 }
 0x479   :  { %v9089_v58 = vor.u32 %v10121_v44, %v9088_v5  ;;  %v8997_v40 = vor.u32 %v10094_v18, %v8994_v62  ;;  %v4320_v30 = vadd.f32 %v4319_v61, %v12012_v16  ;;  %v10088_v5 = vld [vmem:[#allocation3 + $0x244] sm:$0xf] }
 0x47a   :  { %v4304_v24 = vadd.f32 %v4303_v29, %v4290_v10  ;;  %v8682_v29 = vld [vmem:[#allocation3 + $0x18] sm:$0xf0]  ;;  %v10076_v10 = vld [vmem:[#allocation3 + $0x1e4] sm:$0xf] }
 0x47b   :  { %6495 = vmatpush.bf16.msrb.mxu0 %v8753_v51  ;;  %v10115_v51 = vld [vmem:[#allocation3 + $0x314] sm:$0xf0] }
 0x47c   :  { %6520 = vmatpush.bf16.msrb.mxu1 %v9209_v26  ;;  %6561 = vmatpush.bf16.msrb.mxu2 %v8853_v12  ;;  %v8757_v26 = vor.u32 %v10034_v13, %v8754_v54  ;;  %v9065_v3 = vor.u32 %v10115_v51, %v9064_v34  ;;  %v10022_v12 = vld [vmem:[#allocation3 + $0x34] sm:$0xf]  ;;  %v8922_v34 = vld [vmem:[#allocation3 + $0x1f8] sm:$0xf0] }
 0x47f   :  { %6496 = vmatpush.bf16.msrb.mxu0 %v8729_v27  ;;  %v8730_v27 = vld [vmem:[#allocation3 + $0x78] sm:$0xf0]  ;;  %v4359_v50 = vpop.f32.mrf.mxu0 }
 0x480   :  { %6521 = vmatpush.bf16.msrb.mxu1 %v9185_v2  ;;  %6562 = vmatpush.bf16.msrb.mxu2 %v8829_v9  ;;  %v12014_v2 = vor.u32 %v10014_v37, %v8668_v35  ;;  %v8733_v23 = vor.u32 %v10028_v41, %v8730_v27  ;;  %v10016_v9 = vld [vmem:[#allocation3 + $0x4] sm:$0xf]  ;;  %v10070_v27 = vld [vmem:[#allocation3 + $0x1b4] sm:$0xf]  ;;  %v4387_v43 = vpop.f32.mrf.mxu2 }
 0x483   :  { %6497 = vmatpush.bf16.msrb.mxu0 %v8705_v15  ;;  %v8706_v15 = vld [vmem:[#allocation3 + $0x48] sm:$0xf0] }
 0x484   :  { %6522 = vmatpush.bf16.msrb.mxu1 %v9161_v22  ;;  %6563 = vmatpush.bf16.msrb.mxu2 %v8805_v47  ;;  %v10100_v22 = vld [vmem:[#allocation3 + $0x2a4] sm:$0xf]  ;;  %v8709_v46 = vor.u32 %v10022_v12, %v8706_v15  ;;  %v8685_v47 = vor.u32 %v10016_v9, %v8682_v29  ;;  %v8832_v15 = vld [vmem:[#allocation3 + $0x128] sm:$0xf]  ;;  %v10050_v9 = vld [vmem:[#allocation3 + $0x10c] sm:$0xf0] }
 0x485   :  { %v9021_v42 = vor.u32 %v10100_v22, %v9018_v20  ;;  %v8856_v20 = vld [vmem:[#allocation3 + $0x158] sm:$0xf]  ;;  %v10056_v22 = vld [vmem:[#allocation3 + $0x13c] sm:$0xf0] }
 0x486   :  { %v8833_v61 = vor.u32 %v10056_v22, %v8832_v15 }
 0x487   :  { %6498 = vmatpush.bf16.msrb.mxu0 %v8681_v4  ;;  %v4588_v4 = vmax.f32 %v4304_v24, 0.0  ;;  %v4361_v0 = vpop.f32.mrf.mxu0 }
 0x488   :  { %6523 = vmatpush.bf16.msrb.mxu1 %v9137_v33  ;;  %6564 = vmatpush.bf16.msrb.mxu2 %v8781_v21  ;;  %v4331_v52 = vpop.f32.mrf.mxu1  ;;  %v4306_v21 = vadd.f32 %v12010_v59, %v4292_v8  ;;  %v8949_v59 = vor.u32 %v10082_v45, %v8946_v17  ;;  %v10044_v8 = vld [vmem:[#allocation3 + $0xdc] sm:$0xf0]  ;;  %v10026_v45 = vld [vmem:[#allocation3 + $0x4c] sm:$0xf0] }
 0x489   :  { %v4332_v60 = vadd.f32 %v4331_v52, %v4318_v25  ;;  %v4600_v32 = vmul.f32 %v4588_v4, %v10940_v63  ;;  %v8874_v25 = vld [vmem:[#allocation3 + $0x198] sm:$0xf0]  ;;  %v10062_v52 = vld [vmem:[#allocation3 + $0x16c] sm:$0xf0]  ;;  %v8784_v4 = vld [vmem:[#allocation3 + $0xc8] sm:$0xf] }
 0x48a   :  { %v4594_v51 = vmax.f32 %v4306_v21, 0.0  ;;  %v8857_v24 = vor.u32 %v10062_v52, %v8856_v20  ;;  %v8785_v18 = vor.u32 %v10044_v8, %v8784_v4 }
 0x48b   :  { %v4346_v53 = vadd.f32 %v4345_v39, %v4332_v60  ;;  %v8901_v39 = vor.u32 %v10070_v27, %v8898_v55  ;;  %v8688_v27 = vld [vmem:[#allocation3 + $0x8] sm:$0xf] }
 0x48c   :  { %6524 = vmatpush.bf16.msrb.mxu1 %v9113_v1  ;;  %6565 = vmatpush.bf16.msrb.mxu2 %v8757_v26  ;;  %v4347_v1 = vpop.f32.mrf.mxu3  ;;  %v4606_v35 = vmul.f32 %v4594_v51, %v10940_v63 }
 0x48d   :  { %v4360_v33 = vadd.f32 %v4359_v50, %v4346_v53 }
 0x48f   :  { %v4589_v36 = vmax.f32 %v4360_v33, 0.0 }
 0x490   :  { %6525 = vmatpush.bf16.msrb.mxu1 %v9089_v58  ;;  %6566 = vmatpush.bf16.msrb.mxu2 %v8733_v23  ;;  %v4333_v11 = vpop.f32.mrf.mxu1  ;;  %v8973_v58 = vor.u32 %v10088_v5, %v8970_v28  ;;  %v8877_v23 = vor.u32 %v10064_v19, %v8874_v25  ;;  %v4389_v28 = vpop.f32.mrf.mxu2  ;;  %v10020_v25 = vld [vmem:[#allocation3 + $0x1c] sm:$0xf0] }
 0x491   :  { %v4601_v44 = vmul.f32 %v4589_v36, %v10944_v38  ;;  %v4334_v6 = vadd.f32 %v4333_v11, %v4320_v30  ;;  %v8760_v11 = vld [vmem:[#allocation3 + $0x98] sm:$0xf]  ;;  %v8689_v52 = vor.u32 %v10020_v25, %v8688_v27 }
 0x493   :  { %v12023_v13 = vpack.c.bf16 %v4601_v44, %v4600_v32  ;;  %v4348_v54 = vadd.f32 %v4347_v1, %v4334_v6  ;;  %v10038_v1 = vld [vmem:[#allocation3 + $0xac] sm:$0xf0]  ;;  %v8736_v44 = vld [vmem:[#allocation3 + $0x68] sm:$0xf]  ;;  %v10032_v6 = vld [vmem:[#allocation3 + $0x7c] sm:$0xf0] }
 0x494   :  { %6526 = vmatpush.bf16.msrb.mxu1 %v9065_v3  ;;  %6567 = vmatpush.bf16.msrb.mxu2 %v8709_v46  ;;  %v8925_v3 = vor.u32 %v10076_v10, %v8922_v34  ;;  %v8808_v46 = vld [vmem:[#allocation3 + $0xf8] sm:$0xf]  ;;  %v8761_v21 = vor.u32 %v10038_v1, %v8760_v11  ;;  %v8737_v51 = vor.u32 %v10032_v6, %v8736_v44 }
 0x495   :  { %4618 = vst [vmem:[#allocation2 + $0xc4] sm:$0xff] %v12023_v13  ;;  %v4362_v49 = vadd.f32 %v4361_v0, %v4348_v54  ;;  %v8809_v33 = vor.u32 %v10050_v9, %v8808_v46 }
 0x496   :  { %4886 = vst [vmem:[#allocation3 + $0x5d0] sm:$0xff] %v12023_v13 }
 0x497   :  { %6527 = vmatmul.bf16.vlgmr.msrb.gmra.mxu1 %v12014_v2  ;;  %v4595_v26 = vmax.f32 %v4362_v49, 0.0 }
 0x498   :  { %6575 = vmatpush.bf16.msra.mxu1 %v9045_v48  ;;  %6568 = vmatpush.bf16.msrb.mxu2 %v8685_v47  ;;  %v4415_v12 = vpop.f32.mrf.mxu3 }
 0x499   :  { %v4607_v37 = vmul.f32 %v4595_v26, %v10944_v38 }
 0x49b   :  { %v12029_v41 = vpack.c.bf16 %v4607_v37, %v4606_v35  ;;  %v4373_v60 = vpop.f32.mrf.mxu0  ;;  %v8712_v35 = vld [vmem:[#allocation3 + $0x38] sm:$0xf] }
 0x49c   :  { %6576 = vmatpush.bf16.msra.mxu1 %v9021_v42  ;;  %v4816_v48 = vld [vmem:[#allocation2 + $0xc0] sm:$0xff]  ;;  %v4374_v30 = vadd.f32 %v4373_v60, %v12007_v56 }
 0x49d   :  { %4621 = vst [vmem:[#allocation2 + $0xe4] sm:$0xff] %v12029_v41  ;;  %4832 = vrot.lane.b32.xlu0 %v4816_v48, %s10397_s23  ;;  %4768 = vrot.lane.b32.xlu1 %v4816_v48, %s10398_s24  ;;  %v9424_v50 = vld [vmem:[#allocation3 + $0x5d0] sm:$0xf] }
 0x49e   :  { %4704 = vrot.lane.b32.xlu2 %v4816_v48, %s10399_s25  ;;  %4889 = vst [vmem:[#allocation3 + $0x5e8] sm:$0xff] %v12029_v41  ;;  %v4388_v32 = vadd.f32 %v4387_v43, %v4374_v30 }
 0x4a0   :  { %6577 = vmatpush.bf16.msra.mxu1 %v8997_v40  ;;  %v4417_v36 = vpop.f32.mrf.mxu3 }
 0x4a2   :  { %v4457_v49 = vpop.f32.mrf.mxu2 }
 0x4a3   :  { %v4375_v40 = vpop.f32.mrf.mxu0 }
 0x4a4   :  { %6578 = vmatpush.bf16.msra.mxu1 %v8973_v58  ;;  %v4820_v29 = vld [vmem:[#allocation2 + $0xe0] sm:$0xff]  ;;  %v4376_v17 = vadd.f32 %v4375_v40, %v12012_v16 }
 0x4a5   :  { %5100 = vrot.lane.b32.xlu1 %v12023_v13, %s10395_s21  ;;  %v10205_v42 = vld [vmem:[#allocation3 + $0x5e4] sm:$0xf0]  ;;  %4640 = vrot.lane.b32.xlu0 %v4816_v48, %s10400_s26 }
 0x4a6   :  { %5036 = vrot.lane.b32.xlu2 %v12023_v13, %s10392_s20  ;;  %v9425_v62 = vor.u32 %v10205_v42, %v9424_v50  ;;  %v4390_v37 = vadd.f32 %v4389_v28, %v4376_v17 }
 0x4a8   :  { %6579 = vmatpush.bf16.msra.mxu1 %v8949_v59  ;;  %v4401_v53 = vpop.f32.mrf.mxu1  ;;  %6533 = vmatpush.bf16.msra.mxu3 %v9425_v62 }
 0x4a9   :  { %v4402_v5 = vadd.f32 %v4401_v53, %v4388_v32 }
 0x4aa   :  { %v4459_v50 = vpop.f32.mrf.mxu2 }
 0x4ab   :  { %v4416_v59 = vadd.f32 %v4415_v12, %v4402_v5 }
 0x4ac   :  { %6580 = vmatpush.bf16.msra.mxu1 %v8925_v3  ;;  %v8713_v3 = vor.u32 %v10026_v45, %v8712_v35 }
 0x4ad   :  { %4712 = vrot.lane.b32.xlu1 %v4820_v29, %s10399_s25  ;;  %4972 = vrot.lane.b32.xlu0 %v12023_v13, %s10393_s8  ;;  %v4590_v55 = vmax.f32 %v4416_v59, 0.0 }
 0x4ae   :  { %4840 = vrot.lane.b32.xlu2 %v4820_v29, %s10397_s23 }
 0x4af   :  { %v4602_v60 = vmul.f32 %v4590_v55, %v10964_v31 }
 0x4b0   :  { %6581 = vmatpush.bf16.msra.mxu1 %v8901_v39  ;;  %v4403_v47 = vpop.f32.mrf.mxu1 }
 0x4b1   :  { %v4404_v48 = vadd.f32 %v4403_v47, %v4390_v37 }
 0x4b3   :  { %v4418_v12 = vadd.f32 %v4417_v36, %v4404_v48 }
 0x4b4   :  { %6582 = vmatpush.bf16.msra.mxu1 %v8877_v23 }
 0x4b5   :  { %5044 = vrot.lane.b32.xlu1 %v12029_v41, %s10392_s20  ;;  %4776 = vrot.lane.b32.xlu0 %v4820_v29, %s10398_s24  ;;  %v4596_v62 = vmax.f32 %v4418_v12, 0.0 }
 0x4b6   :  { %4648 = vrot.lane.b32.xlu2 %v4820_v29, %s10400_s26 }
 0x4b7   :  { %v4608_v9 = vmul.f32 %v4596_v62, %v10964_v31 }
 0x4b8   :  { %6631 = vmatpush.bf16.msrb.mxu1 %v8857_v24  ;;  %v4429_v58 = vpop.f32.mrf.mxu3  ;;  %v4471_v34 = vpop.f32.mrf.mxu1 }
 0x4b9   :  { %v4430_v0 = vadd.f32 %v4429_v58, %v12007_v56 }
 0x4bb   :  { %v4443_v54 = vpop.f32.mrf.mxu0 }
 0x4bc   :  { %6632 = vmatpush.bf16.msrb.mxu1 %v8833_v61  ;;  %v4444_v26 = vadd.f32 %v4443_v54, %v4430_v0 }
 0x4bd   :  { %5108 = vrot.lane.b32.xlu0 %v12029_v41, %s10395_s21 }
 0x4be   :  { %v4458_v10 = vadd.f32 %v4457_v49, %v4444_v26  ;;  %4980 = vrot.lane.b32.xlu2 %v12029_v41, %s10393_s8 }
 0x4c0   :  { %6633 = vmatpush.bf16.msrb.mxu1 %v8809_v33  ;;  %v4472_v39 = vadd.f32 %v4471_v34, %v4458_v10  ;;  %v4431_v19 = vpop.f32.mrf.mxu3  ;;  %v4473_v53 = vpop.f32.mrf.mxu1 }
 0x4c1   :  { %v4432_v23 = vadd.f32 %v4431_v19, %v12012_v16  ;;  %v4527_v29 = vpop.f32.mrf.mxu2 }
 0x4c2   :  { %v4591_v20 = vmax.f32 %v4472_v39, 0.0 }
 0x4c3   :  { %v4445_v24 = vpop.f32.mrf.mxu0 }
 0x4c4   :  { %6634 = vmatpush.bf16.msrb.mxu1 %v8785_v18  ;;  %v4603_v15 = vmul.f32 %v4591_v20, %v10967_v7  ;;  %v4446_v22 = vadd.f32 %v4445_v24, %v4432_v23 }
 0x4c6   :  { %v4613_v42 = vpack.c.bf16 %v4603_v15, %v4602_v60  ;;  %v4460_v43 = vadd.f32 %v4459_v50, %v4446_v22 }
 0x4c8   :  { %6635 = vmatpush.bf16.msrb.mxu1 %v8761_v21  ;;  %4619 = vst [vmem:[#allocation2 + $0xcc] sm:$0xff] %v4613_v42  ;;  %v4474_v61 = vadd.f32 %v4473_v53, %v4460_v43 }
 0x4c9   :  { %4887 = vst [vmem:[#allocation3 + $0x5d8] sm:$0xff] %v4613_v42  ;;  %v4529_v28 = vpop.f32.mrf.mxu2 }
 0x4ca   :  { %v4597_v46 = vmax.f32 %v4474_v61, 0.0  ;;  %v8660_v61 = vld [vmem:[#allocation9] sm:$0xf] }
 0x4cc   :  { %6636 = vmatpush.bf16.msrb.mxu1 %v8737_v51  ;;  %v4609_v4 = vmul.f32 %v4597_v46, %v10967_v7  ;;  %v10013_v46 = vld [vmem:[#allocation9 + $0x10] sm:$0xf0] }
 0x4ce   :  { %v12061_v8 = vpack.c.bf16 %v4609_v4, %v4608_v9  ;;  %v12112_v9 = vor.u32 %v10013_v46, %v8660_v61 }
 0x4cf   :  { %v4689_v33 = vld [vmem:[#allocation2 + $0xc8] sm:$0xff] }
 0x4d0   :  { %6637 = vmatpush.bf16.msrb.mxu1 %v8713_v3  ;;  %4622 = vst [vmem:[#allocation2 + $0xec] sm:$0xff] %v12061_v8  ;;  %4706 = vrot.lane.b32.xlu0 %v4689_v33, %s10399_s25  ;;  %v8662_v3 = vld [vmem:[#allocation9 + $0x14] sm:$0xf0] }
 0x4d1   :  { %4834 = vrot.lane.b32.xlu1 %v4689_v33, %s10397_s23  ;;  %4770 = vrot.lane.b32.xlu2 %v4689_v33, %s10398_s24  ;;  %4890 = vst [vmem:[#allocation3 + $0x5f0] sm:$0xff] %v12061_v8 }
 0x4d2   :  { %6499 = vmatmul.bf16.vlgmr.msrb.gmra.mxu0 %v12112_v9 }
 0x4d4   :  { %6638 = vmatpush.bf16.msrb.mxu1 %v8689_v52  ;;  %v4485_v18 = vpop.f32.mrf.mxu1 }
 0x4d5   :  { %v4486_v11 = vadd.f32 %v4485_v18, %v12007_v56 }
 0x4d7   :  { %v4821_v36 = vld [vmem:[#allocation2 + $0xe8] sm:$0xff] }
 0x4d8   :  { %5038 = vrot.lane.b32.xlu0 %v4613_v42, %s10392_s20  ;;  %v4499_v30 = vpop.f32.mrf.mxu3 }
 0x4d9   :  { %4642 = vrot.lane.b32.xlu1 %v4689_v33, %s10400_s26  ;;  %5102 = vrot.lane.b32.xlu2 %v4613_v42, %s10395_s21  ;;  %v4500_v32 = vadd.f32 %v4499_v30, %v4486_v11 }
 0x4db   :  { %v4513_v40 = vpop.f32.mrf.mxu0 }
 0x4dc   :  { %v4487_v47 = vpop.f32.mrf.mxu1  ;;  %v4514_v5 = vadd.f32 %v4513_v40, %v4500_v32 }
 0x4dd   :  { %v4488_v58 = vadd.f32 %v4487_v47, %v12012_v16 }
 0x4de   :  { %v4541_v44 = vpop.f32.mrf.mxu2  ;;  %v4528_v0 = vadd.f32 %v4527_v29, %v4514_v5 }
 0x4df   :  { %v4542_v54 = vadd.f32 %v4541_v44, %v12007_v56 }
 0x4e0   :  { %4842 = vrot.lane.b32.xlu0 %v4821_v36, %s10397_s23  ;;  %v4501_v21 = vpop.f32.mrf.mxu3  ;;  %v4592_v34 = vmax.f32 %v4528_v0, 0.0 }
 0x4e1   :  { %4974 = vrot.lane.b32.xlu1 %v4613_v42, %s10393_s8  ;;  %4714 = vrot.lane.b32.xlu2 %v4821_v36, %s10399_s25  ;;  %v4502_v51 = vadd.f32 %v4501_v21, %v4488_v58 }
 0x4e2   :  { %v4604_v55 = vmul.f32 %v4592_v34, %v10998_v14 }
 0x4e3   :  { %v4515_v1 = vpop.f32.mrf.mxu0 }
 0x4e4   :  { %v4516_v35 = vadd.f32 %v4515_v1, %v4502_v51 }
 0x4e6   :  { %v4543_v26 = vpop.f32.mrf.mxu2  ;;  %v4530_v48 = vadd.f32 %v4529_v28, %v4516_v35 }
 0x4e7   :  { %v4544_v10 = vadd.f32 %v4543_v26, %v12012_v16 }
 0x4e8   :  { %4650 = vrot.lane.b32.xlu0 %v4821_v36, %s10400_s26  ;;  %v4598_v24 = vmax.f32 %v4530_v48, 0.0 }
 0x4e9   :  { %4778 = vrot.lane.b32.xlu1 %v4821_v36, %s10398_s24  ;;  %4910 = vrot.lane.b32.xlu2 %v4613_v42, %s10396_s22 }
 0x4ea   :  { %v4610_v15 = vmul.f32 %v4598_v24, %v10998_v14 }
 0x4eb   :  { %v4583_v17 = vpop.f32.mrf.mxu0 }
 0x4f0   :  { %4916 = vrot.lane.b32.xlu0 %v12029_v41, %s10396_s22  ;;  %v10011_v41 = vld [vmem:[#allocation9 + $0x4] sm:$0xf] }
 0x4f1   :  { %4908 = vrot.lane.b32.xlu1 %v12023_v13, %s10396_s22  ;;  %5046 = vrot.lane.b32.xlu2 %v12061_v8, %s10392_s20  ;;  %v12091_v27 = vor.u32 %v10011_v41, %v8662_v3 }
 0x4f3   :  { %v4585_v25 = vpop.f32.mrf.mxu0  ;;  %6513 = vmatmul.bf16.vlgmr.msra.gmra.mxu2 %v12091_v27  ;;  %6583 = vmatmul.bf16.vlgmr.msra.gmra.mxu1 %v12091_v27 }
 0x4f4   :  { %v4555_v6 = vpop.f32.mrf.mxu1 }
 0x4f5   :  { %v4556_v49 = vadd.f32 %v4555_v6, %v4542_v54 }
 0x4f8   :  { %v4569_v45 = vpop.f32.mrf.mxu3  ;;  %4982 = vrot.lane.b32.xlu0 %v12061_v8, %s10393_s8  ;;  %v12095_v16 = vpop.permute.xlu2 %4704 }
 0x4f9   :  { %v4570_v59 = vadd.f32 %v4569_v45, %v4556_v49  ;;  %5110 = vrot.lane.b32.xlu1 %v12061_v8, %s10395_s21  ;;  %v4720_v48 = vrot.slane %v12095_v16, 4 }
 0x4fb   :  { %v4584_v37 = vadd.f32 %v4583_v17, %v4570_v59 }
 0x4fc   :  { %v4557_v56 = vpop.f32.mrf.mxu1 }
 0x4fd   :  { %v4593_v13 = vmax.f32 %v4584_v37, 0.0  ;;  %v4558_v19 = vadd.f32 %v4557_v56, %v4544_v10 }
 0x4ff   :  { %v4605_v39 = vmul.f32 %v4593_v13, %v10995_v57 }
 0x500   :  { %v4571_v20 = vpop.f32.mrf.mxu3  ;;  %v12103_v43 = vpop.permute.xlu2 %5036 }
 0x501   :  { %v4614_v23 = vpack.c.bf16 %v4605_v39, %v4604_v55  ;;  %v4572_v52 = vadd.f32 %v4571_v20, %v4558_v19  ;;  %4918 = vrot.lane.b32.xlu1 %v12061_v8, %s10396_s22 }
 0x503   :  { %4620 = vst [vmem:[#allocation2 + $0xd4] sm:$0xff] %v4614_v23  ;;  %v4586_v60 = vadd.f32 %v4585_v25, %v4572_v52  ;;  %6569 = vmatmul.bf16.vlgmr.msrb.gmra.mxu2 %v12112_v9  ;;  %6639 = vmatmul.bf16.vlgmr.msrb.gmra.mxu1 %v12112_v9 }
 0x504   :  { %4888 = vst [vmem:[#allocation3 + $0x5e0] sm:$0xff] %v4614_v23 }
 0x505   :  { %v4599_v12 = vmax.f32 %v4586_v60, 0.0 }
 0x507   :  { %v4611_v22 = vmul.f32 %v4599_v12, %v10995_v57  ;;  %v5023_v12 = vld [vmem:[#allocation2 + $0xdc] sm:$0xf] }
 0x508   :  { %v12109_v62 = vpop.permute.xlu2 %4840 }
 0x509   :  { %v4617_v50 = vpack.c.bf16 %v4611_v22, %v4610_v15 }
 0x50a   :  { %v4818_v42 = vld [vmem:[#allocation2 + $0xd0] sm:$0xff]  ;;  %v4819_v11 = vld [vmem:[#allocation2 + $0xd8] sm:$0xf] }
 0x50b   :  { %4623 = vst [vmem:[#allocation2 + $0xf4] sm:$0xff] %v4617_v50  ;;  %4836 = vrot.lane.b32.xlu2 %v4818_v42, %s10397_s23  ;;  %4772 = vrot.lane.b32.xlu1 %v4818_v42, %s10398_s24  ;;  %v4755_v17 = vld [vmem:[#allocation2 + $0xd8] sm:$0xf] }
 0x50c   :  { %4891 = vst [vmem:[#allocation3 + $0x5f8] sm:$0xff] %v4617_v50  ;;  %v4691_v49 = vld [vmem:[#allocation2 + $0xd8] sm:$0xf] }
 0x50d   :  { %v4627_v60 = vld [vmem:[#allocation2 + $0xd8] sm:$0xf] }
 0x50f   :  { %v12114_v4 = vpop.permute.xlu0 %4832  ;;  %v4769_v33 = vpop.permute.xlu1 %4768 }
 0x510   :  { %v12122_v8 = vpop.permute.xlu2 %4648  ;;  %v4784_v28 = vrot.slane %v4769_v33, 4  ;;  %v4848_v39 = vrot.slane %v12114_v4, 4 }
 0x512   :  { %v4822_v53 = vld [vmem:[#allocation2 + $0xf0] sm:$0xff]  ;;  %v4823_v21 = vld [vmem:[#allocation2 + $0xf8] sm:$0xf] }
 0x513   :  { %4844 = vrot.lane.b32.xlu0 %v4822_v53, %s10397_s23  ;;  %4780 = vrot.lane.b32.xlu2 %v4822_v53, %s10398_s24  ;;  %v4759_v37 = vld [vmem:[#allocation2 + $0xf8] sm:$0xf] }
 0x514   :  { %4716 = vrot.lane.b32.xlu1 %v4822_v53, %s10399_s25  ;;  %v4695_v56 = vld [vmem:[#allocation2 + $0xf8] sm:$0xf] }
 0x515   :  { %v4631_v41 = vld [vmem:[#allocation2 + $0xf8] sm:$0xf] }
 0x517   :  { %v12124_v29 = vpop.permute.xlu0 %4640  ;;  %v5101_v40 = vpop.permute.xlu1 %5100 }
 0x518   :  { %v12129_v18 = vpop.permute.xlu2 %4980  ;;  %v5116_v58 = vrot.slane %v5101_v40, 4 }
 0x51b   :  { %4708 = vrot.lane.b32.xlu0 %v4818_v42, %s10399_s25  ;;  %4644 = vrot.lane.b32.xlu2 %v4818_v42, %s10400_s26  ;;  %v4656_v42 = vrot.slane %v12124_v29, 4 }
 0x51c   :  { %5104 = vrot.lane.b32.xlu1 %v4614_v23, %s10395_s21 }
 0x51f   :  { %v12131_v36 = vpop.permute.xlu0 %4972  ;;  %v4713_v44 = vpop.permute.xlu1 %4712 }
 0x520   :  { %v4724_v34 = vrot.slane %v4713_v44, 4 }
 0x523   :  { %4652 = vrot.lane.b32.xlu0 %v4822_v53, %s10400_s26  ;;  %4976 = vrot.lane.b32.xlu2 %v4614_v23, %s10393_s8 }
 0x524   :  { %4912 = vrot.lane.b32.xlu1 %v4614_v23, %s10396_s22 }
 0x527   :  { %v12145_v6 = vpop.permute.xlu0 %4776  ;;  %v5045_v45 = vpop.permute.xlu1 %5044 }
 0x52b   :  { %5040 = vrot.lane.b32.xlu0 %v4614_v23, %s10392_s20  ;;  %5112 = vrot.lane.b32.xlu2 %v4617_v50, %s10395_s21  ;;  %v12136_v30 = vpop.permute.xlu2 %4770  ;;  %v5087_v23 = vld [vmem:[#allocation2 + $0xdc] sm:$0xf] }
 0x52c   :  { %5048 = vrot.lane.b32.xlu1 %v4617_v50, %s10392_s20  ;;  %v4785_v47 = vrot.slane %v12136_v30, 4 }
 0x52e   :  { %v4792_v1 = vsel %vm174_vm0, %v4784_v28, %v4785_v47  ;;  %v5056_v28 = vrot.slane %v5045_v45, 4 }
 0x52f   :  { %v4793_v32 = vsel %vm306_vm7, %v4769_v33, %v4792_v1  ;;  %v12158_v59 = vpop.permute.xlu0 %5108  ;;  %v5091_v33 = vld [vmem:[#allocation2 + $0xfc] sm:$0xf] }
 0x530   :  { %4810 = vst [vmem:[#allocation3 + $0x570] sm:$0xff] %v4793_v32 }
 0x533   :  { %4838 = vrot.lane.b32.xlu0 %v4819_v11, %s10397_s23  ;;  %4920 = vrot.lane.b32.xlu2 %v4617_v50, %s10396_s22  ;;  %v12148_v5 = vpop.permute.xlu2 %5102 }
 0x534   :  { %4846 = vrot.lane.b32.xlu1 %v4823_v21, %s10397_s23  ;;  %v5117_v54 = vrot.slane %v12148_v5, 4  ;;  %v4963_v21 = vld [vmem:[#allocation2 + $0xfc] sm:$0xf] }
 0x536   :  { %v5124_v0 = vsel %vm174_vm0, %v5116_v58, %v5117_v54 }
 0x537   :  { %v5125_v51 = vsel %vm643_vm3, %v5101_v40, %v5124_v0  ;;  %v5027_v40 = vld [vmem:[#allocation2 + $0xfc] sm:$0xf] }
 0x538   :  { %5142 = vst [vmem:[#allocation3 + $0x690] sm:$0xff] %v5125_v51  ;;  %v4988_v51 = vrot.slane %v12131_v36, 4 }
 0x53b   :  { %4984 = vrot.lane.b32.xlu0 %v4617_v50, %s10393_s8  ;;  %4774 = vrot.lane.b32.xlu2 %v4755_v17, %s10398_s24  ;;  %v12160_v26 = vpop.permute.xlu2 %4714  ;;  %v5052_v50 = vrot.slane %v12103_v43, 4 }
 0x53c   :  { %4710 = vrot.lane.b32.xlu1 %v4691_v49, %s10399_s25  ;;  %v4725_v35 = vrot.slane %v12160_v26, 4 }
 0x53e   :  { %v4734_v10 = vsel %vm174_vm0, %v4724_v34, %v4725_v35 }
 0x53f   :  { %v4735_v13 = vsel %vm241_vm8, %v4713_v44, %v4734_v10  ;;  %v4895_v10 = vld [vmem:[#allocation2 + $0xdc] sm:$0xf] }
 0x540   :  { %4749 = vst [vmem:[#allocation3 + $0x558] sm:$0xff] %v4735_v13 }
 0x542   :  { %v12170_v3 = vpop.permute.xlu0 %4706 }
 0x543   :  { %4782 = vrot.lane.b32.xlu0 %v4759_v37, %s10398_s24  ;;  %4718 = vrot.lane.b32.xlu2 %v4695_v56, %s10399_s25  ;;  %v12172_v55 = vpop.permute.xlu1 %4834  ;;  %v4721_v19 = vrot.slane %v12170_v3, 4  ;;  %v12178_v20 = vpop.permute.xlu2 %4910  ;;  %v4959_v56 = vld [vmem:[#allocation2 + $0xdc] sm:$0xf] }
 0x544   :  { %4654 = vrot.lane.b32.xlu1 %v4631_v41, %s10400_s26  ;;  %v4849_v25 = vrot.slane %v12172_v55, 4  ;;  %v5154_v41 = vld [vmem:[%s12663_s9] sm:$0xff] }
 0x545   :  { %v4728_v52 = vsel %vm174_vm0, %v4720_v48, %v4721_v19 }
 0x546   :  { %v4856_v24 = vsel %vm174_vm0, %v4848_v39, %v4849_v25  ;;  %v4729_v15 = vsel %vm241_vm8, %v12095_v16, %v4728_v52 }
 0x547   :  { %v4857_v22 = vsel %vm371_vm5, %v12114_v4, %v4856_v24  ;;  %4746 = vst [vmem:[#allocation3 + $0x540] sm:$0xff] %v4729_v15  ;;  %v4899_v15 = vld [vmem:[#allocation2 + $0xfc] sm:$0xf] }
 0x548   :  { %4874 = vst [vmem:[#allocation3 + $0x5a0] sm:$0xff] %v4857_v22 }
 0x54a   :  { %v12195_v53 = vpop.permute.xlu0 %5038 }
 0x54b   :  { %4646 = vrot.lane.b32.xlu0 %v4627_v60, %s10400_s26  ;;  %5106 = vrot.lane.b32.xlu2 %v5087_v23, %s10395_s21  ;;  %v12197_v61 = vpop.permute.xlu1 %4642  ;;  %v5053_v16 = vrot.slane %v12195_v53, 4  ;;  %v12201_v4 = vpop.permute.xlu2 %5046  ;;  %v4660_v23 = vrot.slane %v12122_v8, 4  ;;  %v4788_v60 = vrot.slane %v12145_v6, 4 }
 0x54c   :  { %5042 = vrot.lane.b32.xlu1 %v5023_v12, %s10392_s20  ;;  %v4657_v46 = vrot.slane %v12197_v61, 4  ;;  %v5057_v11 = vrot.slane %v12201_v4, 4 }
 0x54d   :  { %v5060_v1 = vsel %vm174_vm0, %v5052_v50, %v5053_v16 }
 0x54e   :  { %v4664_v32 = vsel %vm174_vm0, %v4656_v42, %v4657_v46  ;;  %v5061_v44 = vsel %vm578_vm2, %v12103_v43, %v5060_v1  ;;  %v5066_v17 = vsel %vm174_vm0, %v5056_v28, %v5057_v11  ;;  %v4852_v43 = vrot.slane %v12109_v62, 4  ;;  %v6950_v42 = vld [vmem:[%s12665_s11 + $0x8] sm:$0xff] }
 0x54f   :  { %v4665_v58 = vsel %vm176_vm9, %v12124_v29, %v4664_v32  ;;  %5078 = vst [vmem:[#allocation3 + $0x660] sm:$0xff] %v5061_v44  ;;  %v5067_v0 = vsel %vm578_vm2, %v5045_v45, %v5066_v17  ;;  %v9400_v28 = vld [vmem:[#allocation3 + $0x5a0] sm:$0xf] }
 0x550   :  { %4682 = vst [vmem:[#allocation3 + $0x510] sm:$0xff] %v4665_v58 }
 0x551   :  { %5081 = vst [vmem:[#allocation3 + $0x678] sm:$0xff] %v5067_v0 }
 0x552   :  { %v12223_v29 = vpop.permute.xlu0 %4842 }
 0x553   :  { %5114 = vrot.lane.b32.xlu0 %v5091_v33, %s10395_s21  ;;  %5050 = vrot.lane.b32.xlu2 %v5027_v40, %s10392_s20  ;;  %v12225_v49 = vpop.permute.xlu1 %4974  ;;  %v4853_v34 = vrot.slane %v12223_v29, 4 }
 0x554   :  { %4986 = vrot.lane.b32.xlu1 %v4963_v21, %s10393_s8  ;;  %v4989_v37 = vrot.slane %v12225_v49, 4 }
 0x555   :  { %v4862_v45 = vsel %vm174_vm0, %v4852_v43, %v4853_v34 }
 0x556   :  { %v4996_v13 = vsel %vm174_vm0, %v4988_v51, %v4989_v37  ;;  %v4863_v48 = vsel %vm371_vm5, %v12109_v62, %v4862_v45 }
 0x557   :  { %v4997_v39 = vsel %vm513_vm1, %v12131_v36, %v4996_v13  ;;  %4877 = vst [vmem:[#allocation3 + $0x5b8] sm:$0xff] %v4863_v48  ;;  %v5155_v36 = vld [vmem:[%s12663_s9 + $0x8] sm:$0xff]  ;;  %v9352_v48 = vld [vmem:[#allocation3 + $0x540] sm:$0xf] }
 0x558   :  { %5014 = vst [vmem:[#allocation3 + $0x630] sm:$0xff] %v4997_v39  ;;  %v4992_v39 = vrot.slane %v12129_v18, 4 }
 0x55a   :  { %v12245_v24 = vpop.permute.xlu0 %4650 }
 0x55b   :  { %4978 = vrot.lane.b32.xlu0 %v4959_v56, %s10393_s8  ;;  %4914 = vrot.lane.b32.xlu2 %v4895_v10, %s10396_s22  ;;  %v4779_v52 = vpop.permute.xlu1 %4778  ;;  %v4661_v62 = vrot.slane %v12245_v24, 4  ;;  %v9376_v10 = vld [vmem:[#allocation3 + $0x570] sm:$0xf] }
 0x55c   :  { %5374 = vperm.xlu1 %10280, %v5154_v41   ;;  %v4789_v12 = vrot.slane %v4779_v52, 4 }
 0x55d   :  { %v4670_v50 = vsel %vm174_vm0, %v4660_v23, %v4661_v62 }
 0x55e   :  { %v4798_v22 = vsel %vm174_vm0, %v4788_v60, %v4789_v12  ;;  %v4671_v40 = vsel %vm176_vm9, %v12122_v8, %v4670_v50  ;;  %v10199_v1 = vld [vmem:[#allocation3 + $0x5b4] sm:$0xf0] }
 0x55f   :  { %v4799_v33 = vsel %vm306_vm7, %v12145_v6, %v4798_v22  ;;  %v9401_v32 = vor.u32 %v10199_v1, %v9400_v28  ;;  %4685 = vst [vmem:[#allocation3 + $0x528] sm:$0xff] %v4671_v40  ;;  %v4925_v6 = vrot.slane %v12178_v20, 4 }
 0x560   :  { %4813 = vst [vmem:[#allocation3 + $0x588] sm:$0xff] %v4799_v33 }
 0x561   :  { %6534 = vmatpush.bf16.msra.mxu3 %v9401_v32 }
 0x562   :  { %v4917_v17 = vpop.permute.xlu0 %4916 }
 0x563   :  { %4922 = vrot.lane.b32.xlu0 %v4899_v15, %s10396_s22  ;;  %5379 = vperm.xlu2 %10281, %v5155_v36   ;;  %v4909_v58 = vpop.permute.xlu1 %4908  ;;  %v10187_v15 = vld [vmem:[#allocation3 + $0x554] sm:$0xf0] }
 0x564   :  { %6988 = vperm.xlu1 %10280, %v6950_v42   ;;  %v4924_v0 = vrot.slane %v4909_v58, 4  ;;  %v9353_v42 = vor.u32 %v10187_v15, %v9352_v48  ;;  %v10169_v48 = vld [vmem:[#allocation3 + $0x4c4] sm:$0xf0]  ;;  %v9520_v15 = vld [vmem:[#allocation3 + $0x690] sm:$0xf] }
 0x565   :  { %v12264_v21 = vpop.permute.xlu2 %4836 }
 0x566   :  { %v4850_v44 = vrot.slane %v12264_v21, 4  ;;  %v4932_v51 = vsel %vm174_vm0, %v4924_v0, %v4925_v6  ;;  %v10181_v40 = vld [vmem:[#allocation3 + $0x524] sm:$0xf0]  ;;  %v9304_v0 = vld [vmem:[#allocation3 + $0x4e0] sm:$0xf] }
 0x567   :  { %v4933_v56 = vsel %vm448_vm4, %v4909_v58, %v4932_v51  ;;  %v10193_v45 = vld [vmem:[#allocation3 + $0x584] sm:$0xf0]  ;;  %v9328_v58 = vld [vmem:[#allocation3 + $0x510] sm:$0xf] }
 0x568   :  { %v4858_v8 = vsel %vm174_vm0, %v4849_v25, %v4850_v44  ;;  %4950 = vst [vmem:[#allocation3 + $0x600] sm:$0xff] %v4933_v56  ;;  %v9377_v13 = vor.u32 %v10193_v45, %v9376_v10  ;;  %v4928_v10 = vrot.slane %v4917_v17, 4 }
 0x569   :  { %v4859_v43 = vsel %vm371_vm5, %v12172_v55, %v4858_v8  ;;  %v5120_v55 = vrot.slane %v12158_v59, 4 }
 0x56a   :  { %4875 = vst [vmem:[#allocation3 + $0x5a8] sm:$0xff] %v4859_v43  ;;  %6535 = vmatpush.bf16.msra.mxu3 %v9377_v13  ;;  %v12286_v60 = vpop.permute.xlu0 %4982  ;;  %v10175_v43 = vld [vmem:[#allocation3 + $0x4f4] sm:$0xf0] }
 0x56b   :  { %v12284_v23 = vpop.permute.xlu1 %5110  ;;  %v4993_v50 = vrot.slane %v12286_v60, 4  ;;  %v9305_v45 = vor.u32 %v10175_v43, %v9304_v0  ;;  %v10220_v0 = vld [vmem:[#allocation3 + $0x664] sm:$0xf]  ;;  %v9498_v43 = vld [vmem:[#allocation3 + $0x678] sm:$0xf0] }
 0x56c   :  { %v5121_v22 = vrot.slane %v12284_v23, 4 }
 0x56d   :  { %v12279_v41 = vpop.permute.xlu2 %4780  ;;  %v5002_v1 = vsel %vm174_vm0, %v4992_v39, %v4993_v50 }
 0x56e   :  { %v4790_v25 = vrot.slane %v12279_v41, 4  ;;  %v5130_v28 = vsel %vm174_vm0, %v5120_v55, %v5121_v22  ;;  %6536 = vmatpush.bf16.msra.mxu3 %v9353_v42  ;;  %v5003_v32 = vsel %vm513_vm1, %v12129_v18, %v5002_v1  ;;  %v9280_v55 = vld [vmem:[#allocation3 + $0x4b0] sm:$0xf] }
 0x56f   :  { %5017 = vst [vmem:[#allocation3 + $0x648] sm:$0xff] %v5003_v32  ;;  %v9234_v32 = vld [vmem:[#allocation3 + $0x468] sm:$0xf0] }
 0x570   :  { %v4800_v36 = vsel %vm174_vm0, %v4789_v12, %v4790_v25  ;;  %v5131_v12 = vsel %vm643_vm3, %v12158_v59, %v5130_v28 }
 0x571   :  { %v4801_v33 = vsel %vm306_vm7, %v4779_v52, %v4800_v36  ;;  %5145 = vst [vmem:[#allocation3 + $0x6a8] sm:$0xff] %v5131_v12  ;;  %v9329_v52 = vor.u32 %v10181_v40, %v9328_v58  ;;  %v9281_v40 = vor.u32 %v10169_v48, %v9280_v55  ;;  %v10163_v12 = vld [vmem:[#allocation3 + $0x494] sm:$0xf0] }
 0x572   :  { %4814 = vst [vmem:[#allocation3 + $0x590] sm:$0xff] %v4801_v33  ;;  %v10226_v33 = vld [vmem:[#allocation3 + $0x694] sm:$0xf] }
 0x573   :  { %6537 = vmatpush.bf16.msra.mxu3 %v9329_v52  ;;  %v12307_v56 = vpop.permute.xlu1 %4918  ;;  %v10223_v52 = vld [vmem:[#allocation3 + $0x674] sm:$0xf0] }
 0x574   :  { %v4929_v59 = vrot.slane %v12307_v56, 4 }
 0x575   :  { %v12304_v8 = vpop.permute.xlu2 %4644 }
 0x576   :  { %v4658_v51 = vrot.slane %v12304_v8, 4  ;;  %v4938_v39 = vsel %vm174_vm0, %v4928_v10, %v4929_v59 }
 0x577   :  { %6538 = vmatpush.bf16.msra.mxu3 %v9305_v45  ;;  %v4939_v36 = vsel %vm448_vm4, %v4917_v17, %v4938_v39  ;;  %v10012_v17 = vld [vmem:[#allocation9 + $0xc] sm:$0xf] }
 0x578   :  { %v4666_v18 = vsel %vm174_vm0, %v4657_v46, %v4658_v51  ;;  %v10229_v42 = vld [vmem:[#allocation3 + $0x6a4] sm:$0xf0]  ;;  %v9522_v46 = vld [vmem:[#allocation3 + $0x6a8] sm:$0xf0]  ;;  %4953 = vst [vmem:[#allocation3 + $0x618] sm:$0xff] %v4939_v36 }
 0x579   :  { %v4667_v13 = vsel %vm176_vm9, %v12197_v61, %v4666_v18  ;;  %v9521_v28 = vor.u32 %v10229_v42, %v9520_v15  ;;  %v9525_v1 = vor.u32 %v10226_v33, %v9522_v46  ;;  %v9496_v61 = vld [vmem:[#allocation3 + $0x660] sm:$0xf]  ;;  %v8670_v18 = vld [vmem:[#allocation9 + $0x1c] sm:$0xf0]  ;;  %v9501_v33 = vor.u32 %v10220_v0, %v9498_v43  ;;  %v9186_v43 = vld [vmem:[#allocation3 + $0x408] sm:$0xf0] }
 0x57a   :  { %4683 = vst [vmem:[#allocation3 + $0x518] sm:$0xff] %v4667_v13  ;;  %v9256_v13 = vld [vmem:[#allocation3 + $0x480] sm:$0xf]  ;;  %v9497_v15 = vor.u32 %v10223_v52, %v9496_v61  ;;  %v10154_v36 = vld [vmem:[#allocation3 + $0x454] sm:$0xf] }
 0x57b   :  { %6539 = vmatpush.bf16.msra.mxu3 %v9281_v40  ;;  %6551 = vmatpush.bf16.msra.mxu0 %v9521_v28  ;;  %v9257_v55 = vor.u32 %v10163_v12, %v9256_v13  ;;  %v9237_v46 = vor.u32 %v10154_v36, %v9234_v32  ;;  %v12334_v40 = vor.u32 %v10012_v17, %v8670_v18  ;;  %v10217_v28 = vld [vmem:[#allocation3 + $0x644] sm:$0xf0]  ;;  %v9210_v12 = vld [vmem:[#allocation3 + $0x438] sm:$0xf0]  ;;  %v10148_v32 = vld [vmem:[#allocation3 + $0x424] sm:$0xf] }
 0x57c   :  { %6621 = vmatpush.bf16.msra.mxu2 %v9525_v1  ;;  %v9474_v1 = vld [vmem:[#allocation3 + $0x648] sm:$0xf0]  ;;  %v10214_v0 = vld [vmem:[#allocation3 + $0x634] sm:$0xf]  ;;  %v9213_v13 = vor.u32 %v10148_v32, %v9210_v12 }
 0x57d   :  { %v12321_v58 = vpop.permute.xlu2 %4976  ;;  %v12324_v45 = vpop.permute.xlu1 %4772 }
 0x57e   :  { %v12667_v10 = vrot.slane %v12321_v58, 4  ;;  %v4786_v39 = vrot.slane %v12324_v45, 4 }
 0x57f   :  { %6540 = vmatpush.bf16.msra.mxu3 %v9257_v55  ;;  %6552 = vmatpush.bf16.msra.mxu0 %v9497_v15  ;;  %v10142_v55 = vld [vmem:[#allocation3 + $0x3f4] sm:$0xf]  ;;  %v8676_v15 = vld [vmem:[#allocation9 + $0x10] sm:$0xf] }
 0x580   :  { %v4998_v48 = vsel %vm174_vm0, %v4989_v37, %v12667_v10  ;;  %v4794_v37 = vsel %vm174_vm0, %v4785_v47, %v4786_v39  ;;  %6622 = vmatpush.bf16.msra.mxu2 %v9501_v33  ;;  %v9477_v47 = vor.u32 %v10214_v0, %v9474_v1  ;;  %v10015_v33 = vld [vmem:[#allocation9 + $0x20] sm:$0xf0]  ;;  %v10208_v0 = vld [vmem:[#allocation3 + $0x604] sm:$0xf] }
 0x581   :  { %v4999_v42 = vsel %vm513_vm1, %v12225_v49, %v4998_v48  ;;  %v4795_v61 = vsel %vm306_vm7, %v12136_v30, %v4794_v37  ;;  %v9472_v49 = vld [vmem:[#allocation3 + $0x630] sm:$0xf]  ;;  %v10211_v48 = vld [vmem:[#allocation3 + $0x614] sm:$0xf0]  ;;  %v9189_v37 = vor.u32 %v10142_v55, %v9186_v43  ;;  %v10202_v55 = vld [vmem:[#allocation3 + $0x5d4] sm:$0xf] }
 0x582   :  { %5015 = vst [vmem:[#allocation3 + $0x638] sm:$0xff] %v4999_v42  ;;  %v9473_v52 = vor.u32 %v10217_v28, %v9472_v49  ;;  %6541 = vmatmul.bf16.vlgmr.msra.gmra.mxu3 %v12334_v40  ;;  %v9450_v42 = vld [vmem:[#allocation3 + $0x618] sm:$0xf0]  ;;  %v9448_v28 = vld [vmem:[#allocation3 + $0x600] sm:$0xf] }
 0x583   :  { %6589 = vmatpush.bf16.msrb.mxu3 %v9237_v46  ;;  %4811 = vst [vmem:[#allocation3 + $0x578] sm:$0xff] %v4795_v61  ;;  %v9426_v61 = vld [vmem:[#allocation3 + $0x5e8] sm:$0xf0]  ;;  %v10206_v49 = vld [vmem:[#allocation3 + $0x5ec] sm:$0xf0] }
 0x584   :  { %6553 = vmatpush.bf16.msra.mxu0 %v9473_v52  ;;  %6623 = vmatpush.bf16.msra.mxu2 %v9477_v47  ;;  %v9449_v52 = vor.u32 %v10211_v48, %v9448_v28  ;;  %v9432_v10 = vld [vmem:[#allocation3 + $0x5d8] sm:$0xf]  ;;  %v9429_v48 = vor.u32 %v10202_v55, %v9426_v61 }
 0x585   :  { %v12343_v17 = vpop.permute.xlu0 %4844  ;;  %v12345_v18 = vpop.permute.xlu2 %5112  ;;  %v9433_v28 = vor.u32 %v10206_v49, %v9432_v10  ;;  %v10196_v10 = vld [vmem:[#allocation3 + $0x5a4] sm:$0xf] }
 0x586   :  { %v4854_v30 = vrot.slane %v12343_v17, 4  ;;  %v5122_v36 = vrot.slane %v12345_v18, 4  ;;  %v12350_v46 = vpop.permute.xlu1 %4716 }
 0x587   :  { %6590 = vmatpush.bf16.msrb.mxu3 %v9213_v13  ;;  %v4726_v32 = vrot.slane %v12350_v46, 4  ;;  %v9453_v13 = vor.u32 %v10208_v0, %v9450_v42 }
 0x588   :  { %v4864_v1 = vsel %vm174_vm0, %v4853_v34, %v4854_v30  ;;  %v5132_v12 = vsel %vm174_vm0, %v5121_v22, %v5122_v36  ;;  %v12367_v34 = vor.u32 %v10015_v33, %v8676_v15  ;;  %6554 = vmatpush.bf16.msra.mxu0 %v9449_v52  ;;  %v9402_v15 = vld [vmem:[#allocation3 + $0x5b8] sm:$0xf0]  ;;  %v9378_v52 = vld [vmem:[#allocation3 + $0x588] sm:$0xf0] }
 0x589   :  { %v4865_v43 = vsel %vm371_vm5, %v12223_v29, %v4864_v1  ;;  %v5133_v47 = vsel %vm643_vm3, %v12284_v23, %v5132_v12  ;;  %v4736_v22 = vsel %vm174_vm0, %v4725_v35, %v4726_v32  ;;  %v10136_v29 = vld [vmem:[#allocation3 + $0x3c4] sm:$0xf]  ;;  %v9162_v1 = vld [vmem:[#allocation3 + $0x3d8] sm:$0xf0]  ;;  %6624 = vmatpush.bf16.msra.mxu2 %v9453_v13  ;;  %v9138_v12 = vld [vmem:[#allocation3 + $0x3a8] sm:$0xf0] }
 0x58a   :  { %4878 = vst [vmem:[#allocation3 + $0x5c0] sm:$0xff] %v4865_v43  ;;  %v4737_v23 = vsel %vm241_vm8, %v12160_v26, %v4736_v22  ;;  %v9165_v35 = vor.u32 %v10136_v29, %v9162_v1  ;;  %v9405_v26 = vor.u32 %v10196_v10, %v9402_v15  ;;  %v10130_v13 = vld [vmem:[#allocation3 + $0x394] sm:$0xf]  ;;  %v9114_v15 = vld [vmem:[#allocation3 + $0x378] sm:$0xf0] }
 0x58b   :  { %5146 = vst [vmem:[#allocation3 + $0x6b0] sm:$0xff] %v5133_v47  ;;  %6591 = vmatpush.bf16.msrb.mxu3 %v9189_v37  ;;  %9542 = vmatmul.msk.bf16.vlgmr.msra.gmra.mxu0 %vm6487_vm12, %v12367_v34  ;;  %v9141_v29 = vor.u32 %v10130_v13, %v9138_v12  ;;  %v10124_v10 = vld [vmem:[#allocation3 + $0x364] sm:$0xf] }
 0x58c   :  { %4750 = vst [vmem:[#allocation3 + $0x560] sm:$0xff] %v4737_v23  ;;  %6603 = vmatpush.bf16.msrb.mxu0 %v9429_v48  ;;  %9543 = vmatmul.msk.bf16.vlgmr.msra.gmra.mxu2 %vm6487_vm12, %v12367_v34  ;;  %v9408_v48 = vld [vmem:[#allocation3 + $0x5a8] sm:$0xf] }
 0x58d   :  { %6673 = vmatpush.bf16.msrb.mxu2 %v9433_v28  ;;  %v12376_v42 = vpop.permute.xlu0 %4708  ;;  %v12378_v33 = vpop.permute.xlu2 %4920 }
 0x58e   :  { %v4722_v61 = vrot.slane %v12376_v42, 4  ;;  %v4930_v49 = vrot.slane %v12378_v33, 4  ;;  %v12386_v37 = vpop.permute.xlu1 %5104 }
 0x58f   :  { %6592 = vmatpush.bf16.msrb.mxu3 %v9165_v35  ;;  %v5118_v47 = vrot.slane %v12386_v37, 4  ;;  %v10184_v35 = vld [vmem:[#allocation3 + $0x544] sm:$0xf] }
 0x590   :  { %v4730_v0 = vsel %vm174_vm0, %v4721_v19, %v4722_v61  ;;  %v4940_v43 = vsel %vm174_vm0, %v4929_v59, %v4930_v49  ;;  %6604 = vmatpush.bf16.msrb.mxu0 %v9405_v26  ;;  %v10190_v19 = vld [vmem:[#allocation3 + $0x574] sm:$0xf] }
 0x591   :  { %v4731_v55 = vsel %vm241_vm8, %v12170_v3, %v4730_v0  ;;  %v4941_v22 = vsel %vm448_vm4, %v12307_v56, %v4940_v43  ;;  %v10200_v28 = vld [vmem:[#allocation3 + $0x5bc] sm:$0xf0]  ;;  %v5126_v59 = vsel %vm174_vm0, %v5117_v54, %v5118_v47  ;;  %v9381_v23 = vor.u32 %v10190_v19, %v9378_v52  ;;  %v9384_v56 = vld [vmem:[#allocation3 + $0x578] sm:$0xf]  ;;  %v10194_v0 = vld [vmem:[#allocation3 + $0x58c] sm:$0xf0] }
 0x592   :  { %4747 = vst [vmem:[#allocation3 + $0x548] sm:$0xff] %v4731_v55  ;;  %v9409_v1 = vor.u32 %v10200_v28, %v9408_v48  ;;  %v5127_v3 = vsel %vm643_vm3, %v12148_v5, %v5126_v59  ;;  %v9117_v43 = vor.u32 %v10124_v10, %v9114_v15  ;;  %v9354_v54 = vld [vmem:[#allocation3 + $0x558] sm:$0xf0]  ;;  %v9385_v55 = vor.u32 %v10194_v0, %v9384_v56  ;;  %v9090_v48 = vld [vmem:[#allocation3 + $0x348] sm:$0xf0] }
 0x593   :  { %4954 = vst [vmem:[#allocation3 + $0x620] sm:$0xff] %v4941_v22  ;;  %6593 = vmatpush.bf16.msrb.mxu3 %v9141_v29  ;;  %v9357_v22 = vor.u32 %v10184_v35, %v9354_v54  ;;  %v9330_v28 = vld [vmem:[#allocation3 + $0x528] sm:$0xf0]  ;;  %v10188_v35 = vld [vmem:[#allocation3 + $0x55c] sm:$0xf0] }
 0x594   :  { %5143 = vst [vmem:[#allocation3 + $0x698] sm:$0xff] %v5127_v3  ;;  %6674 = vmatpush.bf16.msrb.mxu2 %v9409_v1  ;;  %6605 = vmatpush.bf16.msrb.mxu0 %v9381_v23  ;;  %v10118_v1 = vld [vmem:[#allocation3 + $0x334] sm:$0xf]  ;;  %v9066_v23 = vld [vmem:[#allocation3 + $0x318] sm:$0xf0] }
 0x595   :  { %v12410_v26 = vpop.permute.xlu0 %4652  ;;  %v4775_v12 = vpop.permute.xlu2 %4774  ;;  %v9093_v10 = vor.u32 %v10118_v1, %v9090_v48  ;;  %v10172_v54 = vld [vmem:[#allocation3 + $0x4e4] sm:$0xf]  ;;  %v10110_v1 = vld [vmem:[#allocation3 + $0x2ec] sm:$0xf0] }
 0x596   :  { %v4662_v52 = vrot.slane %v12410_v26, 4  ;;  %v4787_v13 = vrot.slane %v4775_v12, 4  ;;  %v12413_v5 = vpop.permute.xlu1 %4912  ;;  %v9048_v12 = vld [vmem:[#allocation3 + $0x2d8] sm:$0xf]  ;;  %v10112_v48 = vld [vmem:[#allocation3 + $0x304] sm:$0xf] }
 0x597   :  { %6594 = vmatpush.bf16.msrb.mxu3 %v9117_v43  ;;  %v4926_v59 = vrot.slane %v12413_v5, 4 }
 0x598   :  { %v4672_v29 = vsel %vm174_vm0, %v4661_v62, %v4662_v52  ;;  %v4796_v19 = vsel %vm174_vm0, %v4786_v39, %v4787_v13  ;;  %6675 = vmatpush.bf16.msrb.mxu2 %v9385_v55  ;;  %6606 = vmatpush.bf16.msrb.mxu0 %v9357_v22  ;;  %v10178_v62 = vld [vmem:[#allocation3 + $0x514] sm:$0xf]  ;;  %v9306_v13 = vld [vmem:[#allocation3 + $0x4f8] sm:$0xf0]  ;;  %v10230_v55 = vld [vmem:[#allocation3 + $0x6ac] sm:$0xf0] }
 0x599   :  { %v4673_v15 = vsel %vm176_vm9, %v12245_v24, %v4672_v29  ;;  %v4797_v3 = vsel %vm306_vm7, %v12324_v45, %v4796_v19  ;;  %v9360_v56 = vld [vmem:[#allocation3 + $0x548] sm:$0xf]  ;;  %v4934_v39 = vsel %vm174_vm0, %v4925_v6, %v4926_v59  ;;  %v9333_v43 = vor.u32 %v10178_v62, %v9330_v28 }
 0x59a   :  { %4686 = vst [vmem:[#allocation3 + $0x530] sm:$0xff] %v4673_v15  ;;  %v9361_v0 = vor.u32 %v10188_v35, %v9360_v56  ;;  %v4935_v24 = vsel %vm448_vm4, %v12178_v20, %v4934_v39  ;;  %v9069_v6 = vor.u32 %v10112_v48, %v9066_v23  ;;  %v9049_v56 = vor.u32 %v10110_v1, %v9048_v12  ;;  %v9282_v35 = vld [vmem:[#allocation3 + $0x4c8] sm:$0xf0]  ;;  %v9024_v39 = vld [vmem:[#allocation3 + $0x2a8] sm:$0xf] }
 0x59b   :  { %4812 = vst [vmem:[#allocation3 + $0x580] sm:$0xff] %v4797_v3  ;;  %6595 = vmatpush.bf16.msrb.mxu3 %v9093_v10  ;;  %v9528_v45 = vld [vmem:[#allocation3 + $0x698] sm:$0xf]  ;;  %v9309_v3 = vor.u32 %v10172_v54, %v9306_v13  ;;  %v10166_v13 = vld [vmem:[#allocation3 + $0x4b4] sm:$0xf] }
 0x59c   :  { %4951 = vst [vmem:[#allocation3 + $0x608] sm:$0xff] %v4935_v24  ;;  %6676 = vmatpush.bf16.msrb.mxu2 %v9361_v0  ;;  %6607 = vmatpush.bf16.msrb.mxu0 %v9333_v43  ;;  %v9529_v22 = vor.u32 %v10230_v55, %v9528_v45  ;;  %v9336_v43 = vld [vmem:[#allocation3 + $0x518] sm:$0xf]  ;;  %v9285_v24 = vor.u32 %v10166_v13, %v9282_v35  ;;  %v10104_v45 = vld [vmem:[#allocation3 + $0x2bc] sm:$0xf0] }
 0x59d   :  { %v12435_v29 = vpop.permute.xlu0 %5040  ;;  %v4719_v19 = vpop.permute.xlu2 %4718  ;;  %v10176_v55 = vld [vmem:[#allocation3 + $0x4fc] sm:$0xf0]  ;;  %v10098_v48 = vld [vmem:[#allocation3 + $0x28c] sm:$0xf0] }
 0x59e   :  { %v5054_v28 = vrot.slane %v12435_v29, 4  ;;  %v4727_v15 = vrot.slane %v4719_v19, 4  ;;  %6691 = vmatpush.bf16.msra.mxu1 %v9529_v22  ;;  %v12438_v20 = vpop.permute.xlu1 %5048  ;;  %v9258_v22 = vld [vmem:[#allocation3 + $0x498] sm:$0xf0]  ;;  %v10158_v19 = vld [vmem:[#allocation3 + $0x46c] sm:$0xf0] }
 0x59f   :  { %6596 = vmatpush.bf16.msrb.mxu3 %v9069_v6  ;;  %v5058_v62 = vrot.slane %v12438_v20, 4 }
 0x5a0   :  { %v5062_v10 = vsel %vm174_vm0, %v5053_v16, %v5054_v28  ;;  %v4738_v23 = vsel %vm174_vm0, %v4726_v32, %v4727_v15  ;;  %6608 = vmatpush.bf16.msrb.mxu0 %v9309_v3  ;;  %v10160_v15 = vld [vmem:[#allocation3 + $0x484] sm:$0xf] }
 0x5a1   :  { %v5063_v12 = vsel %vm578_vm2, %v12195_v53, %v5062_v10  ;;  %v4739_v0 = vsel %vm241_vm8, %v12350_v46, %v4738_v23  ;;  %v10182_v54 = vld [vmem:[#allocation3 + $0x52c] sm:$0xf0]  ;;  %v5068_v16 = vsel %vm174_vm0, %v5057_v11, %v5058_v62  ;;  %v9025_v46 = vor.u32 %v10104_v45, %v9024_v39  ;;  %v9312_v11 = vld [vmem:[#allocation3 + $0x4e8] sm:$0xf]  ;;  %v9000_v23 = vld [vmem:[#allocation3 + $0x278] sm:$0xf] }
 0x5a2   :  { %5079 = vst [vmem:[#allocation3 + $0x668] sm:$0xff] %v5063_v12  ;;  %6597 = vmatmul.bf16.vlgmr.msrb.gmra.mxu3 %v12014_v2  ;;  %v9337_v32 = vor.u32 %v10182_v54, %v9336_v43  ;;  %v5069_v53 = vsel %vm578_vm2, %v12201_v4, %v5068_v16  ;;  %v9313_v35 = vor.u32 %v10176_v55, %v9312_v11  ;;  %v9240_v12 = vld [vmem:[#allocation3 + $0x458] sm:$0xf]  ;;  %v10092_v54 = vld [vmem:[#allocation3 + $0x25c] sm:$0xf0] }
 0x5a3   :  { %6645 = vmatpush.bf16.msra.mxu3 %v9049_v56  ;;  %4751 = vst [vmem:[#allocation3 + $0x568] sm:$0xff] %v4739_v0  ;;  %v9261_v10 = vor.u32 %v10160_v15, %v9258_v22  ;;  %v9001_v39 = vor.u32 %v10098_v48, %v9000_v23  ;;  %v9241_v0 = vor.u32 %v10158_v19, %v9240_v12  ;;  %v9288_v43 = vld [vmem:[#allocation3 + $0x4b8] sm:$0xf]  ;;  %v10152_v45 = vld [vmem:[#allocation3 + $0x43c] sm:$0xf0] }
 0x5a4   :  { %5082 = vst [vmem:[#allocation3 + $0x680] sm:$0xff] %v5069_v53  ;;  %6677 = vmatpush.bf16.msrb.mxu2 %v9337_v32  ;;  %6609 = vmatpush.bf16.msrb.mxu0 %v9285_v24  ;;  %v9216_v24 = vld [vmem:[#allocation3 + $0x428] sm:$0xf]  ;;  %v10170_v55 = vld [vmem:[#allocation3 + $0x4cc] sm:$0xf0] }
 0x5a5   :  { %v4839_v6 = vpop.permute.xlu0 %4838  ;;  %v5107_v1 = vpop.permute.xlu2 %5106  ;;  %v8976_v22 = vld [vmem:[#allocation3 + $0x248] sm:$0xf]  ;;  %v10164_v48 = vld [vmem:[#allocation3 + $0x49c] sm:$0xf0]  ;;  %v9242_v15 = vld [vmem:[#allocation3 + $0x470] sm:$0xf0] }
 0x5a6   :  { %v4851_v3 = vrot.slane %v4839_v6, 4  ;;  %v5119_v56 = vrot.slane %v5107_v1, 4  ;;  %v4847_v4 = vpop.permute.xlu1 %4846  ;;  %v9217_v6 = vor.u32 %v10152_v45, %v9216_v24 }
 0x5a7   :  { %6646 = vmatpush.bf16.msra.mxu3 %v9025_v46  ;;  %v4855_v32 = vrot.slane %v4847_v4, 4  ;;  %v10155_v4 = vld [vmem:[#allocation3 + $0x45c] sm:$0xf] }
 0x5a8   :  { %v4860_v13 = vsel %vm174_vm0, %v4850_v44, %v4851_v3  ;;  %v5128_v16 = vsel %vm174_vm0, %v5118_v47, %v5119_v56  ;;  %6678 = vmatpush.bf16.msrb.mxu2 %v9313_v35  ;;  %6610 = vmatpush.bf16.msrb.mxu0 %v9261_v10  ;;  %v9289_v47 = vor.u32 %v10170_v55, %v9288_v43  ;;  %v8952_v3 = vld [vmem:[#allocation3 + $0x218] sm:$0xf]  ;;  %v9264_v35 = vld [vmem:[#allocation3 + $0x488] sm:$0xf]  ;;  %v9218_v55 = vld [vmem:[#allocation3 + $0x440] sm:$0xf0] }
 0x5a9   :  { %v4861_v53 = vsel %vm371_vm5, %v12264_v21, %v4860_v13  ;;  %v5129_v46 = vsel %vm643_vm3, %v12386_v37, %v5128_v16  ;;  %v4866_v44 = vsel %vm174_vm0, %v4854_v30, %v4855_v32  ;;  %v8977_v21 = vor.u32 %v10092_v54, %v8976_v22  ;;  %v9504_v37 = vld [vmem:[#allocation3 + $0x668] sm:$0xf]  ;;  %v9192_v10 = vld [vmem:[#allocation3 + $0x3f8] sm:$0xf]  ;;  %v10146_v13 = vld [vmem:[#allocation3 + $0x40c] sm:$0xf0] }
 0x5aa   :  { %4876 = vst [vmem:[#allocation3 + $0x5b0] sm:$0xff] %v4861_v53  ;;  %v4867_v19 = vsel %vm371_vm5, %v12343_v17, %v4866_v44  ;;  %v9265_v12 = vor.u32 %v10164_v48, %v9264_v35  ;;  %v9245_v43 = vor.u32 %v10155_v4, %v9242_v15  ;;  %v10080_v16 = vld [vmem:[#allocation3 + $0x1fc] sm:$0xf0]  ;;  %v9193_v53 = vor.u32 %v10146_v13, %v9192_v10  ;;  %v10074_v35 = vld [vmem:[#allocation3 + $0x1cc] sm:$0xf0] }
 0x5ab   :  { %6647 = vmatpush.bf16.msra.mxu3 %v9001_v39  ;;  %5144 = vst [vmem:[#allocation3 + $0x6a0] sm:$0xff] %v5129_v46  ;;  %6611 = vmatmul.bf16.vlgmr.msrb.gmra.mxu0 %v12334_v40  ;;  %v10224_v1 = vld [vmem:[#allocation3 + $0x67c] sm:$0xf0]  ;;  %v10086_v39 = vld [vmem:[#allocation3 + $0x22c] sm:$0xf0] }
 0x5ac   :  { %6659 = vmatpush.bf16.msra.mxu0 %v9241_v0  ;;  %4879 = vst [vmem:[#allocation3 + $0x5c8] sm:$0xff] %v4867_v19  ;;  %6679 = vmatpush.bf16.msrb.mxu2 %v9289_v47  ;;  %v9505_v11 = vor.u32 %v10224_v1, %v9504_v37  ;;  %v8953_v54 = vor.u32 %v10086_v39, %v8952_v3  ;;  %v10149_v46 = vld [vmem:[#allocation3 + $0x42c] sm:$0xf]  ;;  %v10140_v22 = vld [vmem:[#allocation3 + $0x3dc] sm:$0xf0] }
 0x5ad   :  { %v12477_v56 = vpop.permute.xlu0 %4984  ;;  %v5051_v30 = vpop.permute.xlu2 %5050  ;;  %v9221_v19 = vor.u32 %v10149_v46, %v9218_v55  ;;  %v8904_v37 = vld [vmem:[#allocation3 + $0x1b8] sm:$0xf]  ;;  %v8880_v4 = vld [vmem:[#allocation3 + $0x188] sm:$0xf]  ;;  %v10068_v39 = vld [vmem:[#allocation3 + $0x19c] sm:$0xf0] }
 0x5ae   :  { %v4994_v17 = vrot.slane %v12477_v56, 4  ;;  %v5059_v23 = vrot.slane %v5051_v30, 4  ;;  %6692 = vmatpush.bf16.msra.mxu1 %v9505_v11  ;;  %v4711_v0 = vpop.permute.xlu1 %4710  ;;  %v9194_v30 = vld [vmem:[#allocation3 + $0x410] sm:$0xf0]  ;;  %v9120_v55 = vld [vmem:[#allocation3 + $0x368] sm:$0xf] }
 0x5af   :  { %6648 = vmatpush.bf16.msra.mxu3 %v8977_v21  ;;  %v4723_v45 = vrot.slane %v4711_v0, 4 }
 0x5b0   :  { %6660 = vmatpush.bf16.msra.mxu0 %v9217_v6  ;;  %v5004_v32 = vsel %vm174_vm0, %v4993_v50, %v4994_v17  ;;  %v5070_v24 = vsel %vm174_vm0, %v5058_v62, %v5059_v23  ;;  %6680 = vmatpush.bf16.msrb.mxu2 %v9265_v12  ;;  %v8928_v62 = vld [vmem:[#allocation3 + $0x1e8] sm:$0xf]  ;;  %v10143_v6 = vld [vmem:[#allocation3 + $0x3fc] sm:$0xf]  ;;  %v8905_v23 = vor.u32 %v10074_v35, %v8904_v37  ;;  %v9144_v12 = vld [vmem:[#allocation3 + $0x398] sm:$0xf] }
 0x5b1   :  { %v5005_v44 = vsel %vm513_vm1, %v12286_v60, %v5004_v32  ;;  %v5071_v47 = vsel %vm578_vm2, %v12438_v20, %v5070_v24  ;;  %v4732_v50 = vsel %vm174_vm0, %v4722_v61, %v4723_v45  ;;  %v8929_v21 = vor.u32 %v10080_v16, %v8928_v62  ;;  %v9168_v60 = vld [vmem:[#allocation3 + $0x3c8] sm:$0xf]  ;;  %v10134_v61 = vld [vmem:[#allocation3 + $0x3ac] sm:$0xf0]  ;;  %v9170_v16 = vld [vmem:[#allocation3 + $0x3e0] sm:$0xf0] }
 0x5b2   :  { %5018 = vst [vmem:[#allocation3 + $0x650] sm:$0xff] %v5005_v44  ;;  %v4733_v48 = vsel %vm241_vm8, %v12376_v42, %v4732_v50  ;;  %v9169_v20 = vor.u32 %v10140_v22, %v9168_v60  ;;  %v9197_v10 = vor.u32 %v10143_v6, %v9194_v30  ;;  %v9145_v13 = vor.u32 %v10134_v61, %v9144_v12  ;;  %v10059_v32 = vld [vmem:[#allocation3 + $0x15c] sm:$0xf]  ;;  %v10137_v44 = vld [vmem:[#allocation3 + $0x3cc] sm:$0xf] }
 0x5b3   :  { %6649 = vmatpush.bf16.msra.mxu3 %v8953_v54  ;;  %5083 = vst [vmem:[#allocation3 + $0x688] sm:$0xff] %v5071_v47  ;;  %6681 = vmatmul.bf16.vlgmr.msrb.gmra.mxu2 %v12334_v40  ;;  %v8858_v47 = vld [vmem:[#allocation3 + $0x170] sm:$0xf0]  ;;  %v9173_v22 = vor.u32 %v10137_v44, %v9170_v16  ;;  %v10128_v50 = vld [vmem:[#allocation3 + $0x37c] sm:$0xf0] }
 0x5b4   :  { %6729 = vmatpush.bf16.msra.mxu2 %v9245_v43  ;;  %6661 = vmatpush.bf16.msra.mxu0 %v9193_v53  ;;  %4748 = vst [vmem:[#allocation3 + $0x550] sm:$0xff] %v4733_v48  ;;  %v9480_v53 = vld [vmem:[#allocation3 + $0x638] sm:$0xf]  ;;  %v9456_v62 = vld [vmem:[#allocation3 + $0x608] sm:$0xf] }
 0x5b5   :  { %v4783_v1 = vpop.permute.xlu0 %4782  ;;  %v4915_v11 = vpop.permute.xlu2 %4914  ;;  %v10053_v48 = vld [vmem:[#allocation3 + $0x12c] sm:$0xf]  ;;  %v9146_v60 = vld [vmem:[#allocation3 + $0x3b0] sm:$0xf0]  ;;  %v10212_v6 = vld [vmem:[#allocation3 + $0x61c] sm:$0xf0] }
 0x5b6   :  { %v4791_v15 = vrot.slane %v4783_v1, 4  ;;  %v4927_v3 = vrot.slane %v4915_v11, 4  ;;  %v4655_v42 = vpop.permute.xlu1 %4654  ;;  %v10122_v37 = vld [vmem:[#allocation3 + $0x34c] sm:$0xf0]  ;;  %v8834_v1 = vld [vmem:[#allocation3 + $0x140] sm:$0xf0] }
 0x5b7   :  { %6650 = vmatpush.bf16.msra.mxu3 %v8929_v21  ;;  %v4663_v54 = vrot.slane %v4655_v42, 4  ;;  %v8861_v21 = vor.u32 %v10059_v32, %v8858_v47  ;;  %v10131_v61 = vld [vmem:[#allocation3 + $0x39c] sm:$0xf]  ;;  %v9096_v42 = vld [vmem:[#allocation3 + $0x338] sm:$0xf] }
 0x5b8   :  { %6730 = vmatpush.bf16.msra.mxu2 %v9221_v19  ;;  %6662 = vmatpush.bf16.msra.mxu0 %v9169_v20  ;;  %v4802_v0 = vsel %vm174_vm0, %v4790_v25, %v4791_v15  ;;  %v4936_v43 = vsel %vm174_vm0, %v4926_v59, %v4927_v3  ;;  %v9121_v19 = vor.u32 %v10128_v50, %v9120_v55  ;;  %v9434_v20 = vld [vmem:[#allocation3 + $0x5f0] sm:$0xf0]  ;;  %v10203_v15 = vld [vmem:[#allocation3 + $0x5dc] sm:$0xf] }
 0x5b9   :  { %v4803_v24 = vsel %vm306_vm7, %v12279_v41, %v4802_v0  ;;  %v4937_v45 = vsel %vm448_vm4, %v12413_v5, %v4936_v43  ;;  %v10218_v46 = vld [vmem:[#allocation3 + $0x64c] sm:$0xf0]  ;;  %v4674_v25 = vsel %vm174_vm0, %v4662_v52, %v4663_v54  ;;  %v8881_v5 = vor.u32 %v10068_v39, %v8880_v4  ;;  %v10125_v0 = vld [vmem:[#allocation3 + $0x36c] sm:$0xf]  ;;  %v9410_v43 = vld [vmem:[#allocation3 + $0x5c0] sm:$0xf0] }
 0x5ba   :  { %4815 = vst [vmem:[#allocation3 + $0x598] sm:$0xff] %v4803_v24  ;;  %v9481_v59 = vor.u32 %v10218_v46, %v9480_v53  ;;  %v4675_v41 = vsel %vm176_vm9, %v12410_v26, %v4674_v25  ;;  %v9457_v26 = vor.u32 %v10212_v6, %v9456_v62  ;;  %v9149_v30 = vor.u32 %v10131_v61, %v9146_v60  ;;  %v8810_v16 = vld [vmem:[#allocation3 + $0x110] sm:$0xf0]  ;;  %v10107_v32 = vld [vmem:[#allocation3 + $0x2dc] sm:$0xf] }
 0x5bb   :  { %6651 = vmatpush.bf16.msra.mxu3 %v8905_v23  ;;  %4952 = vst [vmem:[#allocation3 + $0x610] sm:$0xff] %v4937_v45  ;;  %v9437_v35 = vor.u32 %v10203_v15, %v9434_v20  ;;  %v9097_v4 = vor.u32 %v10122_v37, %v9096_v42  ;;  %v8837_v39 = vor.u32 %v10053_v48, %v8834_v1  ;;  %v9122_v24 = vld [vmem:[#allocation3 + $0x380] sm:$0xf0]  ;;  %v10197_v45 = vld [vmem:[#allocation3 + $0x5ac] sm:$0xf] }
 0x5bc   :  { %6731 = vmatpush.bf16.msra.mxu2 %v9197_v10  ;;  %6663 = vmatpush.bf16.msra.mxu0 %v9145_v13  ;;  %4687 = vst [vmem:[#allocation3 + $0x538] sm:$0xff] %v4675_v41  ;;  %v10047_v10 = vld [vmem:[#allocation3 + $0xfc] sm:$0xf]  ;;  %v10116_v13 = vld [vmem:[#allocation3 + $0x31c] sm:$0xf0]  ;;  %v9125_v46 = vor.u32 %v10125_v0, %v9122_v24  ;;  %v9413_v55 = vor.u32 %v10197_v45, %v9410_v43 }
 0x5bd   :  { %6693 = vmatpush.bf16.msra.mxu1 %v9481_v59  ;;  %v4647_v52 = vpop.permute.xlu0 %4646  ;;  %v10041_v25 = vld [vmem:[#allocation3 + $0xcc] sm:$0xf]  ;;  %v8786_v59 = vld [vmem:[#allocation3 + $0xe0] sm:$0xf0]  ;;  %v8813_v47 = vor.u32 %v10047_v10, %v8810_v16  ;;  %v9050_v41 = vld [vmem:[#allocation3 + $0x2f0] sm:$0xf0] }
 0x5be   :  { %v4659_v11 = vrot.slane %v4647_v52, 4  ;;  %v5043_v3 = vpop.permute.xlu1 %5042  ;;  %v10191_v50 = vld [vmem:[#allocation3 + $0x57c] sm:$0xf]  ;;  %v8789_v48 = vor.u32 %v10041_v25, %v8786_v59  ;;  %v9386_v20 = vld [vmem:[#allocation3 + $0x590] sm:$0xf0] }
 0x5bf   :  { %6652 = vmatpush.bf16.msra.mxu3 %v8881_v5  ;;  %v5055_v12 = vrot.slane %v5043_v3, 4  ;;  %v9053_v5 = vor.u32 %v10107_v32, %v9050_v41  ;;  %v9389_v37 = vor.u32 %v10191_v50, %v9386_v20  ;;  %v9026_v1 = vld [vmem:[#allocation3 + $0x2c0] sm:$0xf0]  ;;  %v10185_v3 = vld [vmem:[#allocation3 + $0x54c] sm:$0xf] }
 0x5c0   :  { %6732 = vmatpush.bf16.msra.mxu2 %v9173_v22  ;;  %6664 = vmatpush.bf16.msra.mxu0 %v9121_v19  ;;  %v4668_v23 = vsel %vm174_vm0, %v4658_v51, %v4659_v11  ;;  %v10101_v19 = vld [vmem:[#allocation3 + $0x2ac] sm:$0xf]  ;;  %v9074_v11 = vld [vmem:[#allocation3 + $0x320] sm:$0xf0]  ;;  %v9002_v10 = vld [vmem:[#allocation3 + $0x290] sm:$0xf0] }
 0x5c1   :  { %6694 = vmatpush.bf16.msra.mxu1 %v9457_v26  ;;  %v4669_v54 = vsel %vm176_vm9, %v12304_v8, %v4668_v23  ;;  %v5064_v51 = vsel %vm174_vm0, %v5054_v28, %v5055_v12  ;;  %v9072_v8 = vld [vmem:[#allocation3 + $0x308] sm:$0xf]  ;;  %v9098_v28 = vld [vmem:[#allocation3 + $0x350] sm:$0xf0]  ;;  %v10035_v26 = vld [vmem:[#allocation3 + $0x9c] sm:$0xf]  ;;  %v9029_v15 = vor.u32 %v10101_v19, %v9026_v1 }
 0x5c2   :  { %6653 = vmatmul.bf16.vlgmr.msra.gmra.mxu3 %v12091_v27  ;;  %4684 = vst [vmem:[#allocation3 + $0x520] sm:$0xff] %v4669_v54  ;;  %v5065_v53 = vsel %vm578_vm2, %v12435_v29, %v5064_v51  ;;  %v9073_v44 = vor.u32 %v10116_v13, %v9072_v8  ;;  %v10119_v29 = vld [vmem:[#allocation3 + $0x33c] sm:$0xf]  ;;  %v10113_v42 = vld [vmem:[#allocation3 + $0x30c] sm:$0xf] }
 0x5c3   :  { %6701 = vmatpush.bf16.msrb.mxu3 %v8861_v21  ;;  %5080 = vst [vmem:[#allocation3 + $0x670] sm:$0xff] %v5065_v53  ;;  %v9101_v60 = vor.u32 %v10119_v29, %v9098_v28  ;;  %v9362_v12 = vld [vmem:[#allocation3 + $0x560] sm:$0xf0]  ;;  %v10095_v43 = vld [vmem:[#allocation3 + $0x27c] sm:$0xf] }
 0x5c4   :  { %6733 = vmatpush.bf16.msra.mxu2 %v9149_v30  ;;  %6665 = vmatpush.bf16.msra.mxu0 %v9097_v4  ;;  %v10111_v30 = vld [vmem:[#allocation3 + $0x2f4] sm:$0xf0]  ;;  %v9056_v4 = vld [vmem:[#allocation3 + $0x2e0] sm:$0xf]  ;;  %v9005_v16 = vor.u32 %v10095_v43, %v9002_v10  ;;  %v10105_v32 = vld [vmem:[#allocation3 + $0x2c4] sm:$0xf0] }
 0x5c5   :  { %6743 = vmatpush.bf16.msrb.mxu1 %v9437_v35  ;;  %v5115_v22 = vpop.permute.xlu0 %5114  ;;  %v8762_v35 = vld [vmem:[#allocation3 + $0xb0] sm:$0xf0]  ;;  %v9057_v0 = vor.u32 %v10111_v30, %v9056_v4  ;;  %v10029_v51 = vld [vmem:[#allocation3 + $0x6c] sm:$0xf]  ;;  %v8738_v45 = vld [vmem:[#allocation3 + $0x80] sm:$0xf0] }
 0x5c6   :  { %9544 = vmatmul.msk.bf16.vlgmr.msra.gmra.mxu1 %vm6487_vm12, %v12367_v34  ;;  %v5123_v62 = vrot.slane %v5115_v22, 4  ;;  %v4987_v21 = vpop.permute.xlu1 %4986  ;;  %v8765_v13 = vor.u32 %v10035_v26, %v8762_v35  ;;  %v10179_v53 = vld [vmem:[#allocation3 + $0x51c] sm:$0xf]  ;;  %v8741_v41 = vor.u32 %v10029_v51, %v8738_v45  ;;  %v9314_v22 = vld [vmem:[#allocation3 + $0x500] sm:$0xf0] }
 0x5c7   :  { %6702 = vmatpush.bf16.msrb.mxu3 %v8837_v39  ;;  %v4995_v6 = vrot.slane %v4987_v21, 4  ;;  %v9365_v39 = vor.u32 %v10185_v3, %v9362_v12  ;;  %v8714_v50 = vld [vmem:[#allocation3 + $0x50] sm:$0xf0]  ;;  %v10173_v29 = vld [vmem:[#allocation3 + $0x4ec] sm:$0xf] }
 0x5c8   :  { %6734 = vmatpush.bf16.msra.mxu2 %v9125_v46  ;;  %6666 = vmatpush.bf16.msra.mxu0 %v9073_v44  ;;  %v5134_v52 = vsel %vm174_vm0, %v5122_v36, %v5123_v62  ;;  %v9032_v46 = vld [vmem:[#allocation3 + $0x2b0] sm:$0xf]  ;;  %v10089_v44 = vld [vmem:[#allocation3 + $0x24c] sm:$0xf]  ;;  %v10083_v62 = vld [vmem:[#allocation3 + $0x21c] sm:$0xf]  ;;  %v9317_v19 = vor.u32 %v10173_v29, %v9314_v22 }
 0x5c9   :  { %6744 = vmatpush.bf16.msrb.mxu1 %v9413_v55  ;;  %v5135_v61 = vsel %vm643_vm3, %v12345_v18, %v5134_v52  ;;  %v5006_v36 = vsel %vm174_vm0, %v4994_v17, %v4995_v6  ;;  %v9077_v18 = vor.u32 %v10113_v42, %v9074_v11  ;;  %v9338_v17 = vld [vmem:[#allocation3 + $0x530] sm:$0xf0]  ;;  %v12668_v55 = vrot.slane %v12321_v58, 4  ;;  %v8984_v1 = vld [vmem:[#allocation3 + $0x250] sm:$0xf] }
 0x5ca   :  { %5147 = vst [vmem:[#allocation3 + $0x6b8] sm:$0xff] %v5135_v61  ;;  %v5007_v23 = vsel %vm513_vm1, %v12477_v56, %v5006_v36  ;;  %v8978_v56 = vld [vmem:[#allocation3 + $0x260] sm:$0xf0]  ;;  %v9341_v25 = vor.u32 %v10179_v53, %v9338_v17  ;;  %v9033_v59 = vor.u32 %v10105_v32, %v9032_v46  ;;  %v8954_v20 = vld [vmem:[#allocation3 + $0x230] sm:$0xf0] }
 0x5cb   :  { %6703 = vmatpush.bf16.msrb.mxu3 %v8813_v47  ;;  %6667 = vmatmul.bf16.vlgmr.msra.gmra.mxu0 %v12014_v2  ;;  %5019 = vst [vmem:[#allocation3 + $0x658] sm:$0xff] %v5007_v23  ;;  %v8981_v28 = vor.u32 %v10089_v44, %v8978_v56  ;;  %v10017_v26 = vld [vmem:[#allocation3 + $0xc] sm:$0xf]  ;;  %v8930_v61 = vld [vmem:[#allocation3 + $0x200] sm:$0xf0] }
 0x5cc   :  { %6715 = vmatpush.bf16.msrb.mxu0 %v9053_v5  ;;  %6735 = vmatpush.bf16.msra.mxu2 %v9101_v60  ;;  %v10099_v5 = vld [vmem:[#allocation3 + $0x294] sm:$0xf0]  ;;  %v10023_v60 = vld [vmem:[#allocation3 + $0x3c] sm:$0xf]  ;;  %v10093_v3 = vld [vmem:[#allocation3 + $0x264] sm:$0xf0] }
 0x5cd   :  { %6745 = vmatpush.bf16.msrb.mxu1 %v9389_v37  ;;  %v4979_v54 = vpop.permute.xlu0 %4978  ;;  %v8717_v6 = vor.u32 %v10023_v60, %v8714_v50  ;;  %v10167_v37 = vld [vmem:[#allocation3 + $0x4bc] sm:$0xf]  ;;  %v8985_v42 = vor.u32 %v10093_v3, %v8984_v1  ;;  %v8690_v10 = vld [vmem:[#allocation3 + $0x20] sm:$0xf0]  ;;  %v10077_v23 = vld [vmem:[#allocation3 + $0x1ec] sm:$0xf] }
 0x5ce   :  { %v4991_v24 = vrot.slane %v4979_v54, 4  ;;  %v10227_v30 = vld [vmem:[#allocation3 + $0x69c] sm:$0xf]  ;;  %v8693_v12 = vor.u32 %v10017_v26, %v8690_v10  ;;  %v8933_v4 = vor.u32 %v10077_v23, %v8930_v61  ;;  %v10087_v54 = vld [vmem:[#allocation3 + $0x234] sm:$0xf0] }
 0x5cf   :  { %6704 = vmatpush.bf16.msrb.mxu3 %v8789_v48  ;;  %v9008_v48 = vld [vmem:[#allocation3 + $0x280] sm:$0xf]  ;;  %v9506_v17 = vld [vmem:[#allocation3 + $0x680] sm:$0xf0]  ;;  %v8906_v56 = vld [vmem:[#allocation3 + $0x1d0] sm:$0xf0] }
 0x5d0   :  { %6716 = vmatpush.bf16.msrb.mxu0 %v9029_v15  ;;  %6736 = vmatpush.bf16.msra.mxu2 %v9077_v18  ;;  %v5000_v8 = vsel %vm174_vm0, %v12668_v55, %v4991_v24  ;;  %v9009_v21 = vor.u32 %v10099_v5, %v9008_v48  ;;  %v9290_v15 = vld [vmem:[#allocation3 + $0x4d0] sm:$0xf0]  ;;  %v8960_v51 = vld [vmem:[#allocation3 + $0x220] sm:$0xf]  ;;  %v10221_v53 = vld [vmem:[#allocation3 + $0x66c] sm:$0xf] }
 0x5d1   :  { %6746 = vmatpush.bf16.msrb.mxu1 %v9365_v39  ;;  %v5001_v47 = vsel %vm513_vm1, %v12321_v58, %v5000_v8  ;;  %v8957_v58 = vor.u32 %v10083_v62, %v8954_v20  ;;  %v9293_v36 = vor.u32 %v10167_v37, %v9290_v15  ;;  %v9530_v39 = vld [vmem:[#allocation3 + $0x6b0] sm:$0xf0]  ;;  %v9248_v24 = vld [vmem:[#allocation3 + $0x460] sm:$0xf]  ;;  %v9509_v55 = vor.u32 %v10221_v53, %v9506_v17  ;;  %v10081_v8 = vld [vmem:[#allocation3 + $0x204] sm:$0xf0] }
 0x5d2   :  { %5016 = vst [vmem:[#allocation3 + $0x640] sm:$0xff] %v5001_v47  ;;  %v9533_v43 = vor.u32 %v10227_v30, %v9530_v39  ;;  %v8882_v44 = vld [vmem:[#allocation3 + $0x1a0] sm:$0xf0]  ;;  %v9482_v47 = vld [vmem:[#allocation3 + $0x650] sm:$0xf0] }
 0x5d3   :  { %6705 = vmatpush.bf16.msrb.mxu3 %v8765_v13  ;;  %6737 = vmatmul.bf16.vlgmr.msra.gmra.mxu2 %v12014_v2  ;;  %v10159_v13 = vld [vmem:[#allocation3 + $0x474] sm:$0xf0]  ;;  %v9224_v22 = vld [vmem:[#allocation3 + $0x430] sm:$0xf]  ;;  %v10215_v29 = vld [vmem:[#allocation3 + $0x63c] sm:$0xf] }
 0x5d4   :  { %6785 = vmatpush.bf16.msrb.mxu2 %v9057_v0  ;;  %6717 = vmatpush.bf16.msrb.mxu0 %v9005_v16  ;;  %v9266_v0 = vld [vmem:[#allocation3 + $0x4a0] sm:$0xf0]  ;;  %v10071_v16 = vld [vmem:[#allocation3 + $0x1bc] sm:$0xf]  ;;  %v9249_v45 = vor.u32 %v10159_v13, %v9248_v24  ;;  %v10063_v5 = vld [vmem:[#allocation3 + $0x174] sm:$0xf0] }
 0x5d5   :  { %6747 = vmatpush.bf16.msrb.mxu1 %v9341_v25  ;;  %v4923_v52 = vpop.permute.xlu0 %4922  ;;  %v8909_v46 = vor.u32 %v10071_v16, %v8906_v56  ;;  %v10153_v25 = vld [vmem:[#allocation3 + $0x444] sm:$0xf0]  ;;  %v10147_v20 = vld [vmem:[#allocation3 + $0x414] sm:$0xf0]  ;;  %v9458_v26 = vld [vmem:[#allocation3 + $0x620] sm:$0xf0] }
 0x5d6   :  { %v4931_v11 = vrot.slane %v4923_v52, 4  ;;  %v9225_v62 = vor.u32 %v10153_v25, %v9224_v22  ;;  %v10209_v52 = vld [vmem:[#allocation3 + $0x60c] sm:$0xf]  ;;  %v10207_v37 = vld [vmem:[#allocation3 + $0x5f4] sm:$0xf0] }
 0x5d7   :  { %6706 = vmatpush.bf16.msrb.mxu3 %v8741_v41  ;;  %v8864_v41 = vld [vmem:[#allocation3 + $0x160] sm:$0xf]  ;;  %v9461_v15 = vor.u32 %v10209_v52, %v9458_v26  ;;  %v8840_v3 = vld [vmem:[#allocation3 + $0x130] sm:$0xf]  ;;  %v10141_v10 = vld [vmem:[#allocation3 + $0x3e4] sm:$0xf0] }
 0x5d8   :  { %6786 = vmatpush.bf16.msrb.mxu2 %v9033_v59  ;;  %6718 = vmatpush.bf16.msrb.mxu0 %v8981_v28  ;;  %v4942_v35 = vsel %vm174_vm0, %v4930_v49, %v4931_v11  ;;  %v10161_v49 = vld [vmem:[#allocation3 + $0x48c] sm:$0xf]  ;;  %v8936_v28 = vld [vmem:[#allocation3 + $0x1f0] sm:$0xf]  ;;  %v8865_v60 = vor.u32 %v10063_v5, %v8864_v41  ;;  %v9200_v11 = vld [vmem:[#allocation3 + $0x400] sm:$0xf] }
 0x5d9   :  { %6748 = vmatpush.bf16.msrb.mxu1 %v9317_v19  ;;  %v4943_v18 = vsel %vm448_vm4, %v12378_v33, %v4942_v35  ;;  %v9269_v32 = vor.u32 %v10161_v49, %v9266_v0  ;;  %v8961_v33 = vor.u32 %v10087_v54, %v8960_v51  ;;  %v10065_v59 = vld [vmem:[#allocation3 + $0x18c] sm:$0xf]  ;;  %v8937_v50 = vor.u32 %v10081_v8, %v8936_v28  ;;  %v9440_v30 = vld [vmem:[#allocation3 + $0x5e0] sm:$0xf]  ;;  %v8888_v35 = vld [vmem:[#allocation3 + $0x190] sm:$0xf] }
 0x5da   :  { %4955 = vst [vmem:[#allocation3 + $0x628] sm:$0xff] %v4943_v18  ;;  %v8885_v48 = vor.u32 %v10065_v59, %v8882_v44  ;;  %v9485_v19 = vor.u32 %v10215_v29, %v9482_v47  ;;  %v9201_v61 = vor.u32 %v10147_v20, %v9200_v11  ;;  %v10060_v23 = vld [vmem:[#allocation3 + $0x164] sm:$0xf]  ;;  %v8866_v18 = vld [vmem:[#allocation3 + $0x178] sm:$0xf0] }
 0x5db   :  { %6707 = vmatpush.bf16.msrb.mxu3 %v8717_v6  ;;  %v8912_v6 = vld [vmem:[#allocation3 + $0x1c0] sm:$0xf]  ;;  %v10201_v39 = vld [vmem:[#allocation3 + $0x5c4] sm:$0xf0]  ;;  %v10051_v54 = vld [vmem:[#allocation3 + $0x114] sm:$0xf0]  ;;  %v8869_v49 = vor.u32 %v10060_v23, %v8866_v18 }
 0x5dc   :  { %6787 = vmatpush.bf16.msrb.mxu2 %v9009_v21  ;;  %6719 = vmatpush.bf16.msrb.mxu0 %v8957_v58  ;;  %v10075_v21 = vld [vmem:[#allocation3 + $0x1d4] sm:$0xf0]  ;;  %v10057_v58 = vld [vmem:[#allocation3 + $0x144] sm:$0xf0]  ;;  %v9416_v16 = vld [vmem:[#allocation3 + $0x5b0] sm:$0xf] }
 0x5dd   :  { %6749 = vmatpush.bf16.msrb.mxu1 %v9293_v36  ;;  %v8913_v1 = vor.u32 %v10075_v21, %v8912_v6  ;;  %v8841_v36 = vor.u32 %v10057_v58, %v8840_v3  ;;  %v8792_v17 = vld [vmem:[#allocation3 + $0xd0] sm:$0xf]  ;;  %v9417_v24 = vor.u32 %v10201_v39, %v9416_v16  ;;  %v10195_v56 = vld [vmem:[#allocation3 + $0x594] sm:$0xf0]  ;;  %v9392_v59 = vld [vmem:[#allocation3 + $0x580] sm:$0xf] }
 0x5de   :  { %v10135_v53 = vld [vmem:[#allocation3 + $0x3b4] sm:$0xf0]  ;;  %v9393_v44 = vor.u32 %v10195_v56, %v9392_v59  ;;  %v10129_v47 = vld [vmem:[#allocation3 + $0x384] sm:$0xf0]  ;;  %v10048_v41 = vld [vmem:[#allocation3 + $0x104] sm:$0xf] }
 0x5df   :  { %6708 = vmatpush.bf16.msrb.mxu3 %v8693_v12  ;;  %v10069_v12 = vld [vmem:[#allocation3 + $0x1a4] sm:$0xf0]  ;;  %v8818_v28 = vld [vmem:[#allocation3 + $0x118] sm:$0xf0]  ;;  %v8768_v22 = vld [vmem:[#allocation3 + $0xa0] sm:$0xf] }
 0x5e0   :  { %6788 = vmatpush.bf16.msrb.mxu2 %v8985_v42  ;;  %6720 = vmatpush.bf16.msrb.mxu0 %v8933_v4  ;;  %v9441_v42 = vor.u32 %v10207_v37, %v9440_v30  ;;  %v8816_v4 = vld [vmem:[#allocation3 + $0x100] sm:$0xf]  ;;  %v8889_v0 = vor.u32 %v10069_v12, %v8888_v35  ;;  %v10039_v5 = vld [vmem:[#allocation3 + $0xb4] sm:$0xf0]  ;;  %v10042_v29 = vld [vmem:[#allocation3 + $0xd4] sm:$0xf]  ;;  %v8821_v21 = vor.u32 %v10048_v41, %v8818_v28  ;;  %v12555_v41 = vpop.f32.mrf.mxu2 }
 0x5e1   :  { %6750 = vmatpush.bf16.msrb.mxu1 %v9269_v32  ;;  %v10045_v32 = vld [vmem:[#allocation3 + $0xe4] sm:$0xf0]  ;;  %v8817_v51 = vor.u32 %v10051_v54, %v8816_v4  ;;  %v8769_v20 = vor.u32 %v10039_v5, %v8768_v22  ;;  %v10123_v6 = vld [vmem:[#allocation3 + $0x354] sm:$0xf0]  ;;  %v9104_v11 = vld [vmem:[#allocation3 + $0x340] sm:$0xf] }
 0x5e2   :  { %6709 = vmatmul.bf16.vlgmr.msrb.gmra.mxu3 %v12112_v9  ;;  %v10033_v37 = vld [vmem:[#allocation3 + $0x84] sm:$0xf0]  ;;  %v9105_v26 = vor.u32 %v10123_v6, %v9104_v11  ;;  %v9080_v35 = vld [vmem:[#allocation3 + $0x310] sm:$0xf]  ;;  %v8720_v23 = vld [vmem:[#allocation3 + $0x40] sm:$0xf]  ;;  %v12557_v6 = vpop.f32.mrf.mxu0 }
 0x5e3   :  { %6761 = vmatpush.bf16.msra.mxu3 %v9533_v43  ;;  %v9176_v43 = vld [vmem:[#allocation3 + $0x3d0] sm:$0xf]  ;;  %v10027_v18 = vld [vmem:[#allocation3 + $0x54] sm:$0xf0]  ;;  %v10117_v12 = vld [vmem:[#allocation3 + $0x324] sm:$0xf0] }
 0x5e4   :  { %6789 = vmatpush.bf16.msrb.mxu2 %v8961_v33  ;;  %6721 = vmatpush.bf16.msrb.mxu0 %v8909_v46  ;;  %v9177_v13 = vor.u32 %v10141_v10, %v9176_v43  ;;  %v9152_v33 = vld [vmem:[#allocation3 + $0x3a0] sm:$0xf]  ;;  %v10054_v46 = vld [vmem:[#allocation3 + $0x134] sm:$0xf]  ;;  %v9058_v10 = vld [vmem:[#allocation3 + $0x2f8] sm:$0xf0]  ;;  %v9081_v39 = vor.u32 %v10117_v12, %v9080_v35 }
 0x5e5   :  { %6799 = vmatpush.bf16.msra.mxu1 %v9249_v45  ;;  %v8842_v45 = vld [vmem:[#allocation3 + $0x148] sm:$0xf0]  ;;  %v9153_v8 = vor.u32 %v10135_v53, %v9152_v33  ;;  %v9320_v4 = vld [vmem:[#allocation3 + $0x4f0] sm:$0xf]  ;;  %v10108_v43 = vld [vmem:[#allocation3 + $0x2e4] sm:$0xf] }
 0x5e6   :  { %6751 = vmatmul.bf16.vlgmr.msrb.gmra.mxu1 %v12334_v40  ;;  %v8845_v25 = vor.u32 %v10054_v46, %v8842_v45  ;;  %v9061_v54 = vor.u32 %v10108_v43, %v9058_v10  ;;  %v8746_v16 = vld [vmem:[#allocation3 + $0x88] sm:$0xf0]  ;;  %v10171_v33 = vld [vmem:[#allocation3 + $0x4d4] sm:$0xf0]  ;;  %v10102_v53 = vld [vmem:[#allocation3 + $0x2b4] sm:$0xf] }
 0x5e7   :  { %6762 = vmatpush.bf16.msra.mxu3 %v9509_v55  ;;  %v8793_v55 = vor.u32 %v10045_v32, %v8792_v17  ;;  %v9034_v32 = vld [vmem:[#allocation3 + $0x2c8] sm:$0xf0]  ;;  %v10231_v45 = vld [vmem:[#allocation3 + $0x6b4] sm:$0xf0]  ;;  %v8696_v46 = vld [vmem:[#allocation3 + $0x10] sm:$0xf] }
 0x5e8   :  { %6790 = vmatpush.bf16.msrb.mxu2 %v8937_v50  ;;  %6722 = vmatpush.bf16.msrb.mxu0 %v8885_v48  ;;  %v9368_v50 = vld [vmem:[#allocation3 + $0x550] sm:$0xf]  ;;  %v8794_v48 = vld [vmem:[#allocation3 + $0xe8] sm:$0xf0]  ;;  %v9296_v59 = vld [vmem:[#allocation3 + $0x4c0] sm:$0xf] }
 0x5e9   :  { %6800 = vmatpush.bf16.msra.mxu1 %v9225_v62  ;;  %v9128_v62 = vld [vmem:[#allocation3 + $0x370] sm:$0xf]  ;;  %v8797_v58 = vor.u32 %v10042_v29, %v8794_v48  ;;  %v9297_v28 = vor.u32 %v10171_v33, %v9296_v59  ;;  %v9010_v5 = vld [vmem:[#allocation3 + $0x298] sm:$0xf0]  ;;  %v10096_v48 = vld [vmem:[#allocation3 + $0x284] sm:$0xf] }
 0x5ea   :  { %v10090_v11 = vld [vmem:[#allocation3 + $0x254] sm:$0xf]  ;;  %v8986_v35 = vld [vmem:[#allocation3 + $0x268] sm:$0xf0]  ;;  %v10228_v10 = vld [vmem:[#allocation3 + $0x6a4] sm:$0xf] }
 0x5eb   :  { %6763 = vmatpush.bf16.msra.mxu3 %v9485_v19  ;;  %6723 = vmatmul.bf16.vlgmr.msrb.gmra.mxu0 %v12091_v27  ;;  %v9129_v19 = vor.u32 %v10129_v47, %v9128_v62  ;;  %v8722_v47 = vld [vmem:[#allocation3 + $0x58] sm:$0xf0]  ;;  %v9512_v62 = vld [vmem:[#allocation3 + $0x670] sm:$0xf]  ;;  %v10222_v43 = vld [vmem:[#allocation3 + $0x674] sm:$0xf] }
 0x5ec   :  { %6771 = vmatpush.bf16.msra.mxu0 %v8865_v60  ;;  %6791 = vmatpush.bf16.msrb.mxu2 %v8913_v1  ;;  %v10189_v60 = vld [vmem:[#allocation3 + $0x564] sm:$0xf0]  ;;  %v9344_v1 = vld [vmem:[#allocation3 + $0x520] sm:$0xf]  ;;  %v10216_v59 = vld [vmem:[#allocation3 + $0x644] sm:$0xf] }
 0x5ed   :  { %6801 = vmatpush.bf16.msra.mxu1 %v9201_v61  ;;  %v9369_v52 = vor.u32 %v10189_v60, %v9368_v50  ;;  %v8744_v61 = vld [vmem:[#allocation3 + $0x70] sm:$0xf]  ;;  %v10165_v50 = vld [vmem:[#allocation3 + $0x4a4] sm:$0xf0] }
 0x5ee   :  { %v8745_v3 = vor.u32 %v10033_v37, %v8744_v61  ;;  %v9272_v60 = vld [vmem:[#allocation3 + $0x490] sm:$0xf]  ;;  %v10018_v61 = vld [vmem:[#allocation3 + $0x14] sm:$0xf] }
 0x5ef   :  { %6764 = vmatpush.bf16.msra.mxu3 %v9461_v15  ;;  %v10183_v15 = vld [vmem:[#allocation3 + $0x534] sm:$0xf0] }
 0x5f0   :  { %6772 = vmatpush.bf16.msra.mxu0 %v8841_v36  ;;  %6792 = vmatpush.bf16.msrb.mxu2 %v8889_v0  ;;  %v9345_v30 = vor.u32 %v10183_v15, %v9344_v1  ;;  %v10036_v36 = vld [vmem:[#allocation3 + $0xa4] sm:$0xf]  ;;  %v9538_v15 = vld [vmem:[#allocation3 + $0x6b8] sm:$0xf0] }
 0x5f1   :  { %6802 = vmatpush.bf16.msra.mxu1 %v9177_v13  ;;  %v8721_v13 = vor.u32 %v10027_v18, %v8720_v23  ;;  %v10156_v1 = vld [vmem:[#allocation3 + $0x464] sm:$0xf]  ;;  %v10219_v23 = vld [vmem:[#allocation3 + $0x654] sm:$0xf0]  ;;  %v9541_v18 = vor.u32 %v10228_v10, %v9538_v15  ;;  %v9154_v15 = vld [vmem:[#allocation3 + $0x3b8] sm:$0xf0] }
 0x5f2   :  { %9545 = vmatmul.msk.bf16.vlgmr.msra.gmra.mxu3 %vm6487_vm12, %v12367_v34 }
 0x5f3   :  { %6813 = vmatpush.bf16.msrb.mxu3 %v9441_v42  ;;  %6793 = vmatmul.bf16.vlgmr.msrb.gmra.mxu2 %v12091_v27  ;;  %v8770_v42 = vld [vmem:[#allocation3 + $0xb8] sm:$0xf0] }
 0x5f4   :  { %6841 = vmatpush.bf16.msra.mxu2 %v8869_v49  ;;  %6773 = vmatpush.bf16.msra.mxu0 %v8817_v51  ;;  %v8773_v0 = vor.u32 %v10036_v36, %v8770_v42  ;;  %v10177_v49 = vld [vmem:[#allocation3 + $0x504] sm:$0xf0]  ;;  %v9226_v36 = vld [vmem:[#allocation3 + $0x448] sm:$0xf0]  ;;  %v8989_v42 = vor.u32 %v10090_v11, %v8986_v35  ;;  %v10210_v11 = vld [vmem:[#allocation3 + $0x614] sm:$0xf] }
 0x5f5   :  { %6803 = vmatpush.bf16.msra.mxu1 %v9153_v8  ;;  %v9321_v17 = vor.u32 %v10177_v49, %v9320_v4  ;;  %v10021_v51 = vld [vmem:[#allocation3 + $0x24] sm:$0xf0]  ;;  %v9037_v8 = vor.u32 %v10102_v53, %v9034_v32  ;;  %v10150_v4 = vld [vmem:[#allocation3 + $0x434] sm:$0xf]  ;;  %v10084_v49 = vld [vmem:[#allocation3 + $0x224] sm:$0xf] }
 0x5f6   :  { %v10204_v53 = vld [vmem:[#allocation3 + $0x5e4] sm:$0xf] }
 0x5f7   :  { %6814 = vmatpush.bf16.msrb.mxu3 %v9417_v24  ;;  %v10030_v24 = vld [vmem:[#allocation3 + $0x74] sm:$0xf] }
 0x5f8   :  { %6842 = vmatpush.bf16.msra.mxu2 %v8845_v25  ;;  %6774 = vmatpush.bf16.msra.mxu0 %v8793_v55  ;;  %v8749_v56 = vor.u32 %v10030_v24, %v8746_v16  ;;  %v10024_v55 = vld [vmem:[#allocation3 + $0x44] sm:$0xf]  ;;  %v8697_v25 = vor.u32 %v10021_v51, %v8696_v46  ;;  %v9202_v16 = vld [vmem:[#allocation3 + $0x418] sm:$0xf0]  ;;  %v9514_v51 = vld [vmem:[#allocation3 + $0x688] sm:$0xf0] }
 0x5f9   :  { %6804 = vmatpush.bf16.msra.mxu1 %v9129_v19  ;;  %v8725_v29 = vor.u32 %v10024_v55, %v8722_v47  ;;  %v9250_v19 = vld [vmem:[#allocation3 + $0x478] sm:$0xf0]  ;;  %v9464_v24 = vld [vmem:[#allocation3 + $0x610] sm:$0xf]  ;;  %v9517_v33 = vor.u32 %v10222_v43, %v9514_v51  ;;  %v8938_v46 = vld [vmem:[#allocation3 + $0x208] sm:$0xf0]  ;;  %v12564_v55 = vpop.f32.mrf.mxu1 }
 0x5fa   :  { %v9178_v47 = vld [vmem:[#allocation3 + $0x3e8] sm:$0xf0]  ;;  %v10120_v51 = vld [vmem:[#allocation3 + $0x344] sm:$0xf] }
 0x5fb   :  { %6815 = vmatpush.bf16.msrb.mxu3 %v9393_v44  ;;  %v9536_v44 = vld [vmem:[#allocation3 + $0x6a0] sm:$0xf]  ;;  %v9370_v43 = vld [vmem:[#allocation3 + $0x568] sm:$0xf0] }
 0x5fc   :  { %6843 = vmatpush.bf16.msra.mxu2 %v8821_v21  ;;  %6775 = vmatpush.bf16.msra.mxu0 %v8769_v20  ;;  %v9537_v22 = vor.u32 %v10231_v45, %v9536_v44  ;;  %v9013_v21 = vor.u32 %v10096_v48, %v9010_v5  ;;  %v10225_v20 = vld [vmem:[#allocation3 + $0x684] sm:$0xf0]  ;;  %v12566_v44 = vpop.f32.mrf.mxu0  ;;  %v9490_v5 = vld [vmem:[#allocation3 + $0x658] sm:$0xf0] }
 0x5fd   :  { %6805 = vmatpush.bf16.msra.mxu1 %v9105_v26  ;;  %v9513_v37 = vor.u32 %v10225_v20, %v9512_v62  ;;  %v9253_v26 = vor.u32 %v10156_v1, %v9250_v19  ;;  %v10138_v62 = vld [vmem:[#allocation3 + $0x3d4] sm:$0xf]  ;;  %v8914_v48 = vld [vmem:[#allocation3 + $0x1d8] sm:$0xf0]  ;;  %v10072_v20 = vld [vmem:[#allocation3 + $0x1c4] sm:$0xf] }
 0x5fe   :  { %v9181_v19 = vor.u32 %v10138_v62, %v9178_v47  ;;  %v8917_v1 = vor.u32 %v10072_v20, %v8914_v48 }
 0x5ff   :  { %6816 = vmatpush.bf16.msrb.mxu3 %v9369_v52  ;;  %v8698_v52 = vld [vmem:[#allocation3 + $0x28] sm:$0xf0] }
 0x600   :  { %6844 = vmatpush.bf16.msra.mxu2 %v8797_v58  ;;  %6776 = vmatpush.bf16.msra.mxu0 %v8745_v3  ;;  %v9273_v58 = vor.u32 %v10165_v50, %v9272_v60  ;;  %v9488_v3 = vld [vmem:[#allocation3 + $0x640] sm:$0xf]  ;;  %v9493_v50 = vor.u32 %v10216_v59, %v9490_v5  ;;  %v9466_v60 = vld [vmem:[#allocation3 + $0x628] sm:$0xf0] }
 0x601   :  { %6806 = vmatpush.bf16.msra.mxu1 %v9081_v39  ;;  %v9489_v12 = vor.u32 %v10219_v23, %v9488_v3  ;;  %v8962_v39 = vld [vmem:[#allocation3 + $0x238] sm:$0xf0]  ;;  %v10192_v3 = vld [vmem:[#allocation3 + $0x584] sm:$0xf]  ;;  %v8890_v23 = vld [vmem:[#allocation3 + $0x1a8] sm:$0xf0] }
 0x602   :  { %v8965_v32 = vor.u32 %v10084_v49, %v8962_v39 }
 0x603   :  { %6817 = vmatpush.bf16.msrb.mxu3 %v9345_v30  ;;  %v8701_v30 = vor.u32 %v10018_v61, %v8698_v52  ;;  %v10132_v52 = vld [vmem:[#allocation3 + $0x3a4] sm:$0xf]  ;;  %v9469_v61 = vor.u32 %v10210_v11, %v9466_v60 }
 0x604   :  { %6845 = vmatpush.bf16.msra.mxu2 %v8773_v0  ;;  %6777 = vmatpush.bf16.msra.mxu0 %v8721_v13  ;;  %v9229_v0 = vor.u32 %v10150_v4, %v9226_v36  ;;  %v12561_v13 = vpop.f32.mrf.mxu2  ;;  %v9157_v35 = vor.u32 %v10132_v52, %v9154_v15  ;;  %v6530_v4 = vpop.f32.mrf.mxu1  ;;  %v9274_v52 = vld [vmem:[#allocation3 + $0x4a8] sm:$0xf0] }
 0x605   :  { %6855 = vmatpush.bf16.msrb.mxu1 %v9061_v54  ;;  %v10213_v54 = vld [vmem:[#allocation3 + $0x624] sm:$0xf0] }
 0x606   :  { %6807 = vmatmul.bf16.vlgmr.msra.gmra.mxu1 %v12014_v2  ;;  %v9465_v45 = vor.u32 %v10213_v54, %v9464_v24  ;;  %v9346_v24 = vld [vmem:[#allocation3 + $0x538] sm:$0xf0] }
 0x607   :  { %6818 = vmatpush.bf16.msrb.mxu3 %v9321_v17  ;;  %v9442_v17 = vld [vmem:[#allocation3 + $0x5f8] sm:$0xf0] }
 0x608   :  { %6846 = vmatpush.bf16.msra.mxu2 %v8749_v56  ;;  %6778 = vmatpush.bf16.msra.mxu0 %v8697_v25  ;;  %v10144_v56 = vld [vmem:[#allocation3 + $0x404] sm:$0xf]  ;;  %v9445_v25 = vor.u32 %v10204_v53, %v9442_v17  ;;  %v6556_v10 = vpop.f32.mrf.mxu0  ;;  %v9106_v17 = vld [vmem:[#allocation3 + $0x358] sm:$0xf0] }
 0x609   :  { %6856 = vmatpush.bf16.msrb.mxu1 %v9037_v8  ;;  %v9205_v8 = vor.u32 %v10144_v56, %v9202_v16  ;;  %v9109_v56 = vor.u32 %v10120_v51, %v9106_v17 }
 0x60b   :  { %6819 = vmatpush.bf16.msrb.mxu3 %v9297_v28  ;;  %6779 = vmatmul.bf16.vlgmr.msra.gmra.mxu0 %v12112_v9  ;;  %v9418_v28 = vld [vmem:[#allocation3 + $0x5c8] sm:$0xf0] }
 0x60c   :  { %6831 = vmatpush.bf16.msrb.mxu0 %v9537_v22  ;;  %6847 = vmatpush.bf16.msra.mxu2 %v8725_v29  ;;  %v10198_v29 = vld [vmem:[#allocation3 + $0x5b4] sm:$0xf] }
 0x60d   :  { %6857 = vmatpush.bf16.msrb.mxu1 %v9013_v21  ;;  %v9421_v21 = vor.u32 %v10198_v29, %v9418_v28  ;;  %v6584_v28 = vpop.f32.mrf.mxu1  ;;  %v10168_v29 = vld [vmem:[#allocation3 + $0x4c4] sm:$0xf] }
 0x60f   :  { %6820 = vmatpush.bf16.msrb.mxu3 %v9273_v58  ;;  %v9394_v58 = vld [vmem:[#allocation3 + $0x598] sm:$0xf0] }
 0x610   :  { %6832 = vmatpush.bf16.msrb.mxu0 %v9513_v37  ;;  %6848 = vmatpush.bf16.msra.mxu2 %v8701_v30  ;;  %v6542_v37 = vpop.f32.mrf.mxu3  ;;  %v10066_v30 = vld [vmem:[#allocation3 + $0x194] sm:$0xf]  ;;  %v9397_v36 = vor.u32 %v10192_v3, %v9394_v58  ;;  %v6558_v59 = vpop.f32.mrf.mxu0 }
 0x611   :  { %6858 = vmatpush.bf16.msrb.mxu1 %v8989_v42  ;;  %v12570_v42 = vpop.permute.xlu1 %5374  ;;  %v8893_v39 = vor.u32 %v10066_v30, %v8890_v23 }
 0x612   :  { %6821 = vmatmul.bf16.vlgmr.msrb.gmra.mxu3 %v12334_v40  ;;  %v6501_v54 = vadd.f32 %v12557_v6, %v12570_v42 }
 0x613   :  { %6869 = vmatpush.bf16.msra.mxu3 %v9253_v26  ;;  %6849 = vmatmul.bf16.vlgmr.msra.gmra.mxu2 %v12112_v9  ;;  %v10078_v9 = vld [vmem:[#allocation3 + $0x1f4] sm:$0xf]  ;;  %v6570_v26 = vpop.f32.mrf.mxu2 }
 0x614   :  { %6901 = vmatpush.bf16.msrb.mxu2 %v9541_v18  ;;  %6833 = vmatpush.bf16.msrb.mxu0 %v9489_v12  ;;  %v8941_v22 = vor.u32 %v10078_v9, %v8938_v46  ;;  %v9130_v18 = vld [vmem:[#allocation3 + $0x388] sm:$0xf0]  ;;  %v10186_v12 = vld [vmem:[#allocation3 + $0x554] sm:$0xf]  ;;  %v12578_v46 = vpop.permute.xlu2 %5379  ;;  %v6571_v47 = vadd.f32 %v6570_v26, %v12570_v42 }
 0x615   :  { %6859 = vmatpush.bf16.msrb.mxu1 %v8965_v32  ;;  %v9373_v16 = vor.u32 %v10186_v12, %v9370_v43  ;;  %v10180_v32 = vld [vmem:[#allocation3 + $0x524] sm:$0xf]  ;;  %v9082_v9 = vld [vmem:[#allocation3 + $0x328] sm:$0xf0]  ;;  %v6586_v15 = vpop.f32.mrf.mxu1 }
 0x616   :  { %v9349_v53 = vor.u32 %v10180_v32, %v9346_v24  ;;  %v6585_v48 = vadd.f32 %v6584_v28, %v6571_v47  ;;  %v10248_v28 = vld [vmem:[#allocation2 + $0xa0] sm:$0xf0] }
 0x617   :  { %6870 = vmatpush.bf16.msra.mxu3 %v9229_v0  ;;  %v10126_v0 = vld [vmem:[#allocation3 + $0x374] sm:$0xf] }
 0x618   :  { %6902 = vmatpush.bf16.msrb.mxu2 %v9517_v33  ;;  %6834 = vmatpush.bf16.msrb.mxu0 %v9465_v45  ;;  %v9133_v49 = vor.u32 %v10126_v0, %v9130_v18  ;;  %v6515_v33 = vadd.f32 %v12555_v41, %v6501_v54  ;;  %v6544_v45 = vpop.f32.mrf.mxu3  ;;  %v6503_v41 = vadd.f32 %v12566_v44, %v12578_v46 }
 0x619   :  { %6860 = vmatpush.bf16.msrb.mxu1 %v8941_v22 }
 0x61b   :  { %6871 = vmatpush.bf16.msra.mxu3 %v9205_v8  ;;  %9546 = vmatmul.msk.bf16.vlgmr.msrb.gmra.mxu0 %vm6487_vm12, %v12367_v34  ;;  %v6572_v6 = vpop.f32.mrf.mxu2  ;;  %v10114_v8 = vld [vmem:[#allocation3 + $0x314] sm:$0xf] }
 0x61c   :  { %6883 = vmatpush.bf16.msra.mxu0 %v9445_v25  ;;  %6903 = vmatpush.bf16.msrb.mxu2 %v9493_v50  ;;  %v10174_v25 = vld [vmem:[#allocation3 + $0x4f4] sm:$0xf]  ;;  %v9085_v22 = vor.u32 %v10114_v8, %v9082_v9  ;;  %v9298_v50 = vld [vmem:[#allocation3 + $0x4d8] sm:$0xf0]  ;;  %v6573_v11 = vadd.f32 %v6572_v6, %v12578_v46  ;;  %v10254_v6 = vld [vmem:[#allocation2 + $0xe0] sm:$0xf0] }
 0x61d   :  { %6861 = vmatpush.bf16.msrb.mxu1 %v8917_v1  ;;  %v10162_v1 = vld [vmem:[#allocation3 + $0x494] sm:$0xf]  ;;  %v9628_v8 = vld [vmem:[#allocation2 + $0xe4] sm:$0xf0]  ;;  %v6640_v9 = vpop.f32.mrf.mxu1 }
 0x61f   :  { %6872 = vmatpush.bf16.msra.mxu3 %v9181_v19  ;;  %v6517_v19 = vadd.f32 %v12561_v13, %v6503_v41  ;;  %v9602_v41 = vld [vmem:[#allocation2 + $0x84] sm:$0xf] }
 0x620   :  { %6884 = vmatpush.bf16.msra.mxu0 %v9421_v21  ;;  %6904 = vmatpush.bf16.msrb.mxu2 %v9469_v61  ;;  %v9301_v21 = vor.u32 %v10168_v29, %v9298_v50  ;;  %v9277_v61 = vor.u32 %v10162_v1, %v9274_v52  ;;  %v9580_v29 = vld [vmem:[#allocation2 + $0x64] sm:$0xf0] }
 0x621   :  { %6862 = vmatpush.bf16.msrb.mxu1 %v8893_v39  ;;  %v9556_v52 = vld [vmem:[#allocation2 + $0x24] sm:$0xf0] }
 0x623   :  { %6873 = vmatpush.bf16.msra.mxu3 %v9157_v35  ;;  %9547 = vmatmul.msk.bf16.vlgmr.msrb.gmra.mxu2 %vm6487_vm12, %v12367_v34  ;;  %v6529_v34 = vadd.f32 %v12564_v55, %v6515_v33  ;;  %v6626_v55 = vpop.f32.mrf.mxu2  ;;  %v6587_v35 = vadd.f32 %v6586_v15, %v6573_v11 }
 0x624   :  { %6885 = vmatpush.bf16.msra.mxu0 %v9397_v36  ;;  %6863 = vmatmul.bf16.vlgmr.msrb.gmra.mxu1 %v12091_v27  ;;  %v9322_v27 = vld [vmem:[#allocation3 + $0x508] sm:$0xf0] }
 0x625   :  { %v9325_v5 = vor.u32 %v10174_v25, %v9322_v27  ;;  %v6543_v62 = vadd.f32 %v6542_v37, %v6529_v34  ;;  %v6598_v60 = vpop.f32.mrf.mxu3  ;;  %v6531_v37 = vadd.f32 %v6530_v4, %v6517_v19  ;;  %v9626_v25 = vld [vmem:[#allocation2 + $0xc4] sm:$0xf]  ;;  %v9604_v34 = vld [vmem:[#allocation2 + $0xa4] sm:$0xf0]  ;;  %v6642_v1 = vpop.f32.mrf.mxu1 }
 0x626   :  { %v6599_v20 = vadd.f32 %v6598_v60, %v6585_v48  ;;  %v9627_v27 = vor.u32 %v10254_v6, %v9626_v25  ;;  %v9578_v48 = vld [vmem:[#allocation2 + $0x44] sm:$0xf]  ;;  %v10239_v19 = vld [vmem:[#allocation2 + $0x48] sm:$0xf] }
 0x627   :  { %6874 = vmatpush.bf16.msra.mxu3 %v9133_v49  ;;  %v6557_v58 = vadd.f32 %v6556_v10, %v6543_v62  ;;  %v6545_v30 = vadd.f32 %v6544_v45, %v6531_v37  ;;  %v10242_v62 = vld [vmem:[#allocation2 + $0x60] sm:$0xf0] }
 0x628   :  { %6886 = vmatpush.bf16.msra.mxu0 %v9373_v16  ;;  %v6612_v44 = vpop.f32.mrf.mxu0  ;;  %v10236_v60 = vld [vmem:[#allocation2 + $0x20] sm:$0xf0] }
 0x629   :  { %v6613_v26 = vadd.f32 %v6612_v44, %v6599_v20  ;;  %v6911_v3 = vmax.f32 %v6557_v58, 0.0  ;;  %v6559_v18 = vadd.f32 %v6558_v59, %v6545_v30  ;;  %v10251_v59 = vld [vmem:[#allocation2 + $0xc8] sm:$0xf]  ;;  %v9579_v58 = vor.u32 %v10242_v62, %v9578_v48 }
 0x62a   :  { %v9631_v47 = vor.u32 %v10251_v59, %v9628_v8  ;;  %v10233_v20 = vld [vmem:[#allocation2 + $0x8] sm:$0xf]  ;;  %v9583_v44 = vor.u32 %v10239_v19, %v9580_v29 }
 0x62b   :  { %6875 = vmatpush.bf16.msra.mxu3 %v9109_v56  ;;  %v6627_v13 = vadd.f32 %v6626_v55, %v6613_v26  ;;  %v6923_v10 = vmul.f32 %v6911_v3, %v10940_v63  ;;  %v6628_v4 = vpop.f32.mrf.mxu2  ;;  %v6917_v54 = vmax.f32 %v6559_v18, 0.0  ;;  %v9559_v37 = vor.u32 %v10233_v20, %v9556_v52 }
 0x62c   :  { %6887 = vmatpush.bf16.msra.mxu0 %v9349_v53 }
 0x62d   :  { %v6912_v36 = vmax.f32 %v6627_v13, 0.0  ;;  %v6929_v17 = vmul.f32 %v6917_v54, %v10940_v63 }
 0x62f   :  { %6876 = vmatpush.bf16.msra.mxu3 %v9085_v22  ;;  %v6924_v12 = vmul.f32 %v6912_v36, %v10944_v38  ;;  %v10245_v22 = vld [vmem:[#allocation2 + $0x88] sm:$0xf]  ;;  %v6641_v36 = vadd.f32 %v6640_v9, %v12570_v42 }
 0x630   :  { %6888 = vmatpush.bf16.msra.mxu0 %v9325_v5  ;;  %v6614_v39 = vpop.f32.mrf.mxu0  ;;  %v9603_v5 = vor.u32 %v10248_v28, %v9602_v41  ;;  %v9607_v50 = vor.u32 %v10245_v22, %v9604_v34 }
 0x631   :  { %v6935_v0 = vpack.c.bf16 %v6924_v12, %v6923_v10 }
 0x632   :  { %6877 = vmatmul.bf16.vlgmr.msra.gmra.mxu3 %v12014_v2  ;;  %v6600_v2 = vpop.f32.mrf.mxu3 }
 0x633   :  { %v6601_v23 = vadd.f32 %v6600_v2, %v6587_v35  ;;  %6941 = vst [vmem:[#allocation2 + $0x104] sm:$0xff] %v6935_v0  ;;  %v6643_v0 = vadd.f32 %v6642_v1, %v12578_v46 }
 0x634   :  { %6889 = vmatpush.bf16.msra.mxu0 %v9301_v21  ;;  %v9554_v21 = vld [vmem:[#allocation2 + $0x4] sm:$0xf] }
 0x635   :  { %v6615_v43 = vadd.f32 %v6614_v39, %v6601_v23  ;;  %v9555_v11 = vor.u32 %v10236_v60, %v9554_v21 }
 0x636   :  { %v6682_v15 = vpop.f32.mrf.mxu2 }
 0x637   :  { %v6629_v49 = vadd.f32 %v6628_v4, %v6615_v43 }
 0x638   :  { %6890 = vmatpush.bf16.msra.mxu0 %v9277_v61  ;;  %v12595_v61 = vld [vmem:[%s12664_s10] sm:$0xff] }
 0x639   :  { %v6918_v16 = vmax.f32 %v6629_v49, 0.0 }
 0x63a   :  { %v10257_v33 = vld [vmem:[#allocation2 + $0x108] sm:$0xf] }
 0x63b   :  { %6891 = vmatmul.bf16.vlgmr.msra.gmra.mxu0 %v12334_v40  ;;  %v6930_v32 = vmul.f32 %v6918_v16, %v10944_v38  ;;  %v9650_v40 = vld [vmem:[#allocation2 + $0x104] sm:$0xf] }
 0x63d   :  { %v6938_v51 = vpack.c.bf16 %v6930_v32, %v6929_v17 }
 0x63e   :  { %v6684_v35 = vpop.f32.mrf.mxu2 }
 0x63f   :  { %6944 = vst [vmem:[#allocation2 + $0x124] sm:$0xff] %v6938_v51 }
 0x643   :  { %v6696_v3 = vpop.f32.mrf.mxu1 }
 0x645   :  { %v6654_v55 = vpop.f32.mrf.mxu3 }
 0x646   :  { %v10260_v24 = vld [vmem:[#allocation2 + $0x120] sm:$0xf0]  ;;  %v9652_v45 = vld [vmem:[#allocation2 + $0x124] sm:$0xf0]  ;;  %v6655_v23 = vadd.f32 %v6654_v55, %v6641_v36 }
 0x647   :  { %v9651_v56 = vor.u32 %v10260_v24, %v9650_v40  ;;  %v9655_v53 = vor.u32 %v10257_v33, %v9652_v45 }
 0x648   :  { %v6668_v26 = vpop.f32.mrf.mxu0 }
 0x649   :  { %7153 = vmatpush.bf16.msra.mxu1 %v9651_v56  ;;  %7167 = vmatpush.bf16.msrb.mxu3 %v9655_v53  ;;  %v6669_v39 = vadd.f32 %v6668_v26, %v6655_v23  ;;  %v10255_v26 = vld [vmem:[#allocation2 + $0xe8] sm:$0xf0] }
 0x64a   :  { %v10249_v23 = vld [vmem:[#allocation2 + $0xa8] sm:$0xf0] }
 0x64b   :  { %v6698_v10 = vpop.f32.mrf.mxu1  ;;  %v6683_v49 = vadd.f32 %v6682_v15, %v6669_v39  ;;  %v9636_v15 = vld [vmem:[#allocation2 + $0xec] sm:$0xf0] }
 0x64c   :  { %v10246_v39 = vld [vmem:[#allocation2 + $0x90] sm:$0xf] }
 0x64d   :  { %7154 = vmatpush.bf16.msra.mxu1 %v9627_v27  ;;  %7168 = vmatpush.bf16.msrb.mxu3 %v9631_v47  ;;  %v6656_v30 = vpop.f32.mrf.mxu3  ;;  %v6697_v24 = vadd.f32 %v6696_v3, %v6683_v49  ;;  %v9634_v3 = vld [vmem:[#allocation2 + $0xcc] sm:$0xf] }
 0x64e   :  { %v6657_v16 = vadd.f32 %v6656_v30, %v6643_v0  ;;  %v10252_v30 = vld [vmem:[#allocation2 + $0xd0] sm:$0xf]  ;;  %v9586_v49 = vld [vmem:[#allocation2 + $0x4c] sm:$0xf] }
 0x64f   :  { %v6913_v8 = vmax.f32 %v6697_v24, 0.0  ;;  %v9639_v36 = vor.u32 %v10252_v30, %v9636_v15 }
 0x650   :  { %v6670_v13 = vpop.f32.mrf.mxu0 }
 0x651   :  { %7155 = vmatpush.bf16.msra.mxu1 %v9603_v5  ;;  %7169 = vmatpush.bf16.msrb.mxu3 %v9607_v50  ;;  %v6671_v33 = vadd.f32 %v6670_v13, %v6657_v16  ;;  %v6925_v28 = vmul.f32 %v6913_v8, %v10964_v31  ;;  %v10240_v16 = vld [vmem:[#allocation2 + $0x50] sm:$0xf] }
 0x653   :  { %v6685_v25 = vadd.f32 %v6684_v35, %v6671_v33  ;;  %v9635_v35 = vor.u32 %v10255_v26, %v9634_v3 }
 0x655   :  { %7156 = vmatpush.bf16.msra.mxu1 %v9579_v58  ;;  %7170 = vmatpush.bf16.msrb.mxu3 %v9583_v44  ;;  %v6699_v34 = vadd.f32 %v6698_v10, %v6685_v25  ;;  %v9612_v10 = vld [vmem:[#allocation2 + $0xac] sm:$0xf0] }
 0x656   :  { %v6738_v4 = vpop.f32.mrf.mxu2  ;;  %v9615_v0 = vor.u32 %v10246_v39, %v9612_v10 }
 0x657   :  { %v6919_v62 = vmax.f32 %v6699_v34, 0.0 }
 0x659   :  { %7157 = vmatpush.bf16.msra.mxu1 %v9555_v11  ;;  %7171 = vmatpush.bf16.msrb.mxu3 %v9559_v37  ;;  %v6931_v19 = vmul.f32 %v6919_v62, %v10964_v31 }
 0x65c   :  { %9672 = vmatmul.msk.bf16.vlgmr.msra.gmra.mxu1 %vm7146_vm13, %v12595_v61  ;;  %9673 = vmatmul.msk.bf16.vlgmr.msrb.gmra.mxu3 %vm7146_vm13, %v12595_v61 }
 0x65e   :  { %v6740_v53 = vpop.f32.mrf.mxu2 }
 0x663   :  { %v6752_v17 = vpop.f32.mrf.mxu1 }
 0x665   :  { %v6710_v2 = vpop.f32.mrf.mxu3 }
 0x666   :  { %v6711_v18 = vadd.f32 %v6710_v2, %v12570_v42 }
 0x668   :  { %v6724_v12 = vpop.f32.mrf.mxu0 }
 0x669   :  { %v6725_v43 = vadd.f32 %v6724_v12, %v6711_v18  ;;  %v9610_v12 = vld [vmem:[#allocation2 + $0x8c] sm:$0xf] }
 0x66b   :  { %v6739_v32 = vadd.f32 %v6738_v4, %v6725_v43  ;;  %v6754_v47 = vpop.f32.mrf.mxu1  ;;  %v9611_v4 = vor.u32 %v10249_v23, %v9610_v12  ;;  %v10243_v43 = vld [vmem:[#allocation2 + $0x68] sm:$0xf0] }
 0x66c   :  { %v9587_v24 = vor.u32 %v10243_v43, %v9586_v49 }
 0x66d   :  { %v6712_v54 = vpop.f32.mrf.mxu3  ;;  %v6753_v45 = vadd.f32 %v6752_v17, %v6739_v32  ;;  %v9562_v17 = vld [vmem:[#allocation2 + $0xc] sm:$0xf] }
 0x66e   :  { %v6713_v51 = vadd.f32 %v6712_v54, %v12578_v46  ;;  %v9588_v54 = vld [vmem:[#allocation2 + $0x6c] sm:$0xf0]  ;;  %v10237_v32 = vld [vmem:[#allocation2 + $0x28] sm:$0xf0] }
 0x66f   :  { %v9591_v33 = vor.u32 %v10240_v16, %v9588_v54 }
 0x670   :  { %v6726_v40 = vpop.f32.mrf.mxu0 }
 0x671   :  { %v6727_v56 = vadd.f32 %v6726_v40, %v6713_v51  ;;  %v10234_v51 = vld [vmem:[#allocation2 + $0x10] sm:$0xf] }
 0x672   :  { %v9564_v40 = vld [vmem:[#allocation2 + $0x2c] sm:$0xf0] }
 0x673   :  { %v6741_v9 = vadd.f32 %v6740_v53, %v6727_v56  ;;  %v9563_v53 = vor.u32 %v10237_v32, %v9562_v17 }
 0x675   :  { %v6766_v6 = vpop.f32.mrf.mxu3  ;;  %v6755_v22 = vadd.f32 %v6754_v47, %v6741_v9 }
 0x676   :  { %v6767_v59 = vadd.f32 %v6766_v6, %v6753_v45  ;;  %v6794_v20 = vpop.f32.mrf.mxu2  ;;  %v9567_v6 = vor.u32 %v10234_v51, %v9564_v40  ;;  %v10256_v40 = vld [vmem:[#allocation2 + $0xf0] sm:$0xf0] }
 0x678   :  { %v6914_v27 = vmax.f32 %v6767_v59, 0.0 }
 0x67a   :  { %v6926_v41 = vmul.f32 %v6914_v27, %v10967_v7 }
 0x67c   :  { %v6936_v5 = vpack.c.bf16 %v6926_v41, %v6925_v28 }
 0x67d   :  { %v6768_v50 = vpop.f32.mrf.mxu3 }
 0x67e   :  { %6942 = vst [vmem:[#allocation2 + $0x10c] sm:$0xff] %v6936_v5  ;;  %v6769_v29 = vadd.f32 %v6768_v50, %v6755_v22  ;;  %v6796_v13 = vpop.f32.mrf.mxu2 }
 0x680   :  { %v6920_v48 = vmax.f32 %v6769_v29, 0.0 }
 0x682   :  { %v6932_v21 = vmul.f32 %v6920_v48, %v10967_v7 }
 0x683   :  { %v6808_v18 = vpop.f32.mrf.mxu1 }
 0x684   :  { %v6939_v60 = vpack.c.bf16 %v6932_v21, %v6931_v19 }
 0x685   :  { %v9658_v55 = vld [vmem:[#allocation2 + $0x10c] sm:$0xf]  ;;  %v10258_v44 = vld [vmem:[#allocation2 + $0x110] sm:$0xf] }
 0x686   :  { %6945 = vst [vmem:[#allocation2 + $0x12c] sm:$0xff] %v6939_v60 }
 0x688   :  { %v6780_v52 = vpop.f32.mrf.mxu0 }
 0x689   :  { %v6781_v59 = vadd.f32 %v6780_v52, %v12570_v42 }
 0x68b   :  { %v6810_v25 = vpop.f32.mrf.mxu1  ;;  %v6795_v27 = vadd.f32 %v6794_v20, %v6781_v59  ;;  %v10247_v59 = vld [vmem:[#allocation2 + $0x98] sm:$0xf] }
 0x68d   :  { %v10261_v58 = vld [vmem:[#allocation2 + $0x128] sm:$0xf0]  ;;  %v9660_v1 = vld [vmem:[#allocation2 + $0x12c] sm:$0xf0]  ;;  %v6809_v41 = vadd.f32 %v6808_v18, %v6795_v27 }
 0x68e   :  { %v9659_v11 = vor.u32 %v10261_v58, %v9658_v55  ;;  %v9663_v37 = vor.u32 %v10258_v44, %v9660_v1 }
 0x690   :  { %7181 = vmatpush.bf16.msrb.mxu0 %v9659_v11  ;;  %7195 = vmatpush.bf16.msra.mxu2 %v9663_v37  ;;  %v6782_v2 = vpop.f32.mrf.mxu0 }
 0x691   :  { %v6783_v22 = vadd.f32 %v6782_v2, %v12578_v46 }
 0x693   :  { %v6797_v48 = vadd.f32 %v6796_v13, %v6783_v22  ;;  %v9570_v22 = vld [vmem:[#allocation2 + $0x14] sm:$0xf] }
 0x694   :  { %7182 = vmatpush.bf16.msrb.mxu0 %v9635_v35  ;;  %7196 = vmatpush.bf16.msra.mxu2 %v9639_v36 }
 0x695   :  { %v6822_v45 = vpop.f32.mrf.mxu3  ;;  %v6811_v44 = vadd.f32 %v6810_v25, %v6797_v48  ;;  %v9618_v25 = vld [vmem:[#allocation2 + $0x94] sm:$0xf] }
 0x696   :  { %v6850_v56 = vpop.f32.mrf.mxu2  ;;  %v6823_v50 = vadd.f32 %v6822_v45, %v6809_v41  ;;  %v10253_v45 = vld [vmem:[#allocation2 + $0xd8] sm:$0xf] }
 0x697   :  { %v6851_v5 = vadd.f32 %v6850_v56, %v12570_v42  ;;  %v10241_v41 = vld [vmem:[#allocation2 + $0x58] sm:$0xf] }
 0x698   :  { %7183 = vmatpush.bf16.msrb.mxu0 %v9611_v4  ;;  %7197 = vmatpush.bf16.msra.mxu2 %v9615_v0  ;;  %v6836_v8 = vpop.f32.mrf.mxu0  ;;  %v6949_v0 = vld [vmem:[%s12665_s11] sm:$0xff]  ;;  %s10401_s11 = smov [#allocation10]  }
 0x699   :  { %v6837_v19 = vadd.f32 %v6836_v8, %v6823_v50  ;;  %6983 = vperm.xlu0 %10282, %v6949_v0   ;;  %v9620_v8 = vld [vmem:[#allocation2 + $0xb4] sm:$0xf0]  ;;  %v7247_v0 = vld [vmem:[#allocation2 + $0xc] sm:$0xff]  ;;  %s7292_s26 = sshll.u32 %s10401_s11, 4  ;;  %s7293_s26 = int_to_ptr.vmem [resolvable:$true] %s7292_s26 }
 0x69a   :  { %v9623_v27 = vor.u32 %v10247_v59, %v9620_v8  ;;  %v10235_v50 = vld [vmem:[#allocation2 + $0x18] sm:$0xf] }
 0x69b   :  { %v6915_v20 = vmax.f32 %v6837_v19, 0.0 }
 0x69c   :  { %7184 = vmatpush.bf16.msrb.mxu0 %v9587_v24  ;;  %7198 = vmatpush.bf16.msra.mxu2 %v9591_v33  ;;  %v9644_v24 = vld [vmem:[#allocation2 + $0xf4] sm:$0xf0]  ;;  %v9642_v33 = vld [vmem:[#allocation2 + $0xd4] sm:$0xf] }
 0x69d   :  { %v6824_v9 = vpop.f32.mrf.mxu3  ;;  %v6927_v42 = vmul.f32 %v6915_v20, %v10998_v14  ;;  %v9643_v56 = vor.u32 %v10256_v40, %v9642_v33  ;;  %v7249_v20 = vld [vmem:[#allocation2 + $0x24] sm:$0xff] }
 0x69e   :  { %v6852_v47 = vpop.f32.mrf.mxu2  ;;  %v6825_v37 = vadd.f32 %v6824_v9, %v6811_v44 }
 0x69f   :  { %v6853_v1 = vadd.f32 %v6852_v47, %v12578_v46  ;;  %v10244_v47 = vld [vmem:[#allocation2 + $0x70] sm:$0xf0] }
 0x6a0   :  { %7185 = vmatpush.bf16.msrb.mxu0 %v9563_v53  ;;  %7199 = vmatpush.bf16.msra.mxu2 %v9567_v6  ;;  %v6838_v34 = vpop.f32.mrf.mxu0  ;;  %v9647_v53 = vor.u32 %v10253_v45, %v9644_v24  ;;  %v10250_v6 = vld [vmem:[#allocation2 + $0xb0] sm:$0xf0]  ;;  %v7255_v45 = vunpack.c.h.bf16 %v7247_v0 }
 0x6a1   :  { %v6864_v28 = vpop.f32.mrf.mxu1  ;;  %v6839_v30 = vadd.f32 %v6838_v34, %v6825_v37  ;;  %v9619_v9 = vor.u32 %v10250_v6, %v9618_v25  ;;  %v9594_v34 = vld [vmem:[#allocation2 + $0x54] sm:$0xf]  ;;  %v7258_v37 = vunpack.c.l.bf16 %v7249_v20 }
 0x6a2   :  { %v6865_v62 = vadd.f32 %v6864_v28, %v6851_v5  ;;  %v9596_v28 = vld [vmem:[#allocation2 + $0x74] sm:$0xf0]  ;;  %v10238_v5 = vld [vmem:[#allocation2 + $0x30] sm:$0xf0] }
 0x6a3   :  { %9674 = vmatmul.msk.bf16.vlgmr.msrb.gmra.mxu0 %vm7146_vm13, %v12595_v61  ;;  %9675 = vmatmul.msk.bf16.vlgmr.msra.gmra.mxu2 %vm7146_vm13, %v12595_v61  ;;  %v6921_v18 = vmax.f32 %v6839_v30, 0.0  ;;  %v9599_v48 = vor.u32 %v10241_v41, %v9596_v28  ;;  %v9571_v19 = vor.u32 %v10238_v5, %v9570_v22 }
 0x6a5   :  { %v6933_v46 = vmul.f32 %v6921_v18, %v10998_v14 }
 0x6a6   :  { %v6906_v60 = vpop.f32.mrf.mxu2 }
 0x6a9   :  { %v6866_v58 = vpop.f32.mrf.mxu1 }
 0x6aa   :  { %v6867_v26 = vadd.f32 %v6866_v58, %v6853_v1  ;;  %v12628_v58 = vpop.permute.xlu1 %6988 }
 0x6ae   :  { %v6908_v10 = vpop.f32.mrf.mxu2 }
 0x6b5   :  { %v6878_v29 = vpop.f32.mrf.mxu3 }
 0x6b6   :  { %v6879_v21 = vadd.f32 %v6878_v29, %v6865_v62  ;;  %v9572_v62 = vld [vmem:[#allocation2 + $0x34] sm:$0xf0]  ;;  %v9595_v29 = vor.u32 %v10244_v47, %v9594_v34 }
 0x6b8   :  { %v6892_v52 = vpop.f32.mrf.mxu0 }
 0x6b9   :  { %v6893_v55 = vadd.f32 %v6892_v52, %v6879_v21  ;;  %v9575_v21 = vor.u32 %v10235_v50, %v9572_v62  ;;  %v7248_v50 = vld [vmem:[#allocation2 + $0x14] sm:$0xff] }
 0x6ba   :  { %v7256_v62 = vunpack.c.l.bf16 %v7248_v50 }
 0x6bb   :  { %v6907_v11 = vadd.f32 %v6906_v60, %v6893_v55 }
 0x6bd   :  { %v6916_v15 = vmax.f32 %v6907_v11, 0.0  ;;  %v6880_v3 = vpop.f32.mrf.mxu3 }
 0x6be   :  { %v6881_v35 = vadd.f32 %v6880_v3, %v6867_v26 }
 0x6bf   :  { %v6928_v13 = vmul.f32 %v6916_v15, %v10995_v57  ;;  %v7259_v15 = vunpack.c.h.bf16 %v7249_v20 }
 0x6c0   :  { %v6894_v36 = vpop.f32.mrf.mxu0 }
 0x6c1   :  { %v6937_v2 = vpack.c.bf16 %v6928_v13, %v6927_v42  ;;  %v6895_v23 = vadd.f32 %v6894_v36, %v6881_v35 }
 0x6c3   :  { %6943 = vst [vmem:[#allocation2 + $0x114] sm:$0xff] %v6937_v2  ;;  %v6909_v12 = vadd.f32 %v6908_v10, %v6895_v23  ;;  %v7250_v23 = vld [vmem:[#allocation2 + $0x2c] sm:$0xff] }
 0x6c4   :  { %v7260_v18 = vunpack.c.l.bf16 %v7250_v23 }
 0x6c5   :  { %v6922_v39 = vmax.f32 %v6909_v12, 0.0 }
 0x6c7   :  { %v6934_v4 = vmul.f32 %v6922_v39, %v10995_v57 }
 0x6c9   :  { %v6940_v43 = vpack.c.bf16 %v6934_v4, %v6933_v46  ;;  %v7261_v46 = vunpack.c.h.bf16 %v7250_v23  ;;  %v7246_v4 = vld [vmem:[#allocation2 + $0x4] sm:$0xff] }
 0x6ca   :  { %v9666_v54 = vld [vmem:[#allocation2 + $0x114] sm:$0xf]  ;;  %v10259_v16 = vld [vmem:[#allocation2 + $0x118] sm:$0xf] }
 0x6cb   :  { %6946 = vst [vmem:[#allocation2 + $0x134] sm:$0xff] %v6940_v43 }
 0x6d2   :  { %v10262_v49 = vld [vmem:[#allocation2 + $0x130] sm:$0xf0]  ;;  %v9668_v17 = vld [vmem:[#allocation2 + $0x134] sm:$0xf0] }
 0x6d3   :  { %v9667_v32 = vor.u32 %v10262_v49, %v9666_v54  ;;  %v9671_v51 = vor.u32 %v10259_v16, %v9668_v17  ;;  %v7252_v49 = vunpack.c.l.bf16 %v7246_v4  ;;  %v7253_v16 = vunpack.c.h.bf16 %v7246_v4 }
 0x6d4   :  { %v7254_v17 = vunpack.c.l.bf16 %v7247_v0 }
 0x6d5   :  { %7209 = vmatpush.bf16.msrb.mxu1 %v9667_v32  ;;  %7223 = vmatpush.bf16.msra.mxu3 %v9671_v51 }
 0x6d9   :  { %7210 = vmatpush.bf16.msrb.mxu1 %v9643_v56  ;;  %7224 = vmatpush.bf16.msra.mxu3 %v9647_v53  ;;  %v7159_v60 = vpop.f32.mrf.mxu1 }
 0x6dd   :  { %7211 = vmatpush.bf16.msrb.mxu1 %v9619_v9  ;;  %7225 = vmatpush.bf16.msra.mxu3 %v9623_v27 }
 0x6df   :  { %v7173_v52 = vpop.f32.mrf.mxu3 }
 0x6e1   :  { %7212 = vmatpush.bf16.msrb.mxu1 %v9595_v29  ;;  %7226 = vmatpush.bf16.msra.mxu3 %v9599_v48  ;;  %v7161_v55 = vpop.f32.mrf.mxu1 }
 0x6e2   :  { %v7162_v44 = vadd.f32 %v7161_v55, %v12628_v58 }
 0x6e4   :  { %v7240_v11 = vmul.f32 %v7162_v44, %v10940_v63 }
 0x6e5   :  { %7213 = vmatpush.bf16.msrb.mxu1 %v9571_v19  ;;  %7227 = vmatpush.bf16.msra.mxu3 %v9575_v21 }
 0x6e6   :  { %v7270_v42 = vadd.f32 %v7258_v37, %v7240_v11 }
 0x6e7   :  { %v7175_v1 = vpop.f32.mrf.mxu3 }
 0x6e8   :  { %9676 = vmatmul.msk.bf16.vlgmr.msrb.gmra.mxu1 %vm7146_vm13, %v12595_v61  ;;  %9677 = vmatmul.msk.bf16.vlgmr.msra.gmra.mxu3 %vm7146_vm13, %v12595_v61  ;;  %v7176_v26 = vadd.f32 %v7175_v1, %v12628_v58 }
 0x6ea   :  { %v7241_v3 = vmul.f32 %v7176_v26, %v10944_v38 }
 0x6ec   :  { %v7271_v30 = vadd.f32 %v7259_v15, %v7241_v3 }
 0x6ee   :  { %v7279_v13 = vpack.c.bf16 %v7271_v30, %v7270_v42 }
 0x6f0   :  { %7285 = vst [vmem:[#allocation10 + $0x18] sm:$0xff] %v7279_v13 }
 0x70b   :  { %v6984_v32 = vpop.permute.xlu0 %6983 }
 0x70c   :  { %v7160_v40 = vadd.f32 %v7159_v60, %v6984_v32  ;;  %v7174_v24 = vadd.f32 %v7173_v52, %v6984_v32  ;;  %v7251_v52 = vld [vmem:[#allocation2 + $0x34] sm:$0xff] }
 0x70d   :  { %v7262_v1 = vunpack.c.l.bf16 %v7251_v52  ;;  %v7263_v37 = vunpack.c.h.bf16 %v7251_v52 }
 0x70e   :  { %v7234_v6 = vmul.f32 %v7160_v40, %v10940_v63  ;;  %v7235_v8 = vmul.f32 %v7174_v24, %v10944_v38 }
 0x710   :  { %v7264_v9 = vadd.f32 %v7252_v49, %v7234_v6  ;;  %v7265_v27 = vadd.f32 %v7253_v16, %v7235_v8 }
 0x712   :  { %v7276_v34 = vpack.c.bf16 %v7265_v27, %v7264_v9 }
 0x714   :  { %7282 = vst [vmem:[#allocation10] sm:$0xff] %v7276_v34 }
 0x720   :  { %v7187_v61 = vpop.f32.mrf.mxu0 }
 0x721   :  { %v7188_v33 = vadd.f32 %v7187_v61, %v6984_v32 }
 0x723   :  { %v7236_v25 = vmul.f32 %v7188_v33, %v10964_v31 }
 0x725   :  { %v7266_v47 = vadd.f32 %v7254_v17, %v7236_v25 }
 0x726   :  { %v7201_v35 = vpop.f32.mrf.mxu2 }
 0x727   :  { %v7202_v56 = vadd.f32 %v7201_v35, %v6984_v32 }
 0x728   :  { %v7189_v36 = vpop.f32.mrf.mxu0 }
 0x729   :  { %v7190_v2 = vadd.f32 %v7189_v36, %v12628_v58  ;;  %v7237_v59 = vmul.f32 %v7202_v56, %v10967_v7 }
 0x72b   :  { %v7242_v10 = vmul.f32 %v7190_v2, %v10964_v31  ;;  %v7267_v28 = vadd.f32 %v7255_v45, %v7237_v59  ;;  %v7257_v31 = vunpack.c.h.bf16 %v7248_v50 }
 0x72d   :  { %v7272_v54 = vadd.f32 %v7260_v18, %v7242_v10  ;;  %v7277_v41 = vpack.c.bf16 %v7267_v28, %v7266_v47 }
 0x72e   :  { %v7203_v12 = vpop.f32.mrf.mxu2 }
 0x72f   :  { %v7204_v39 = vadd.f32 %v7203_v12, %v12628_v58  ;;  %7283 = vst [vmem:[#allocation10 + $0x8] sm:$0xff] %v7277_v41 }
 0x731   :  { %v7243_v43 = vmul.f32 %v7204_v39, %v10967_v7 }
 0x733   :  { %v7273_v51 = vadd.f32 %v7261_v46, %v7243_v43 }
 0x735   :  { %v7280_v53 = vpack.c.bf16 %v7273_v51, %v7272_v54 }
 0x737   :  { %7286 = vst [vmem:[#allocation10 + $0x20] sm:$0xff] %v7280_v53 }
 0x765   :  { %v7215_v22 = vpop.f32.mrf.mxu1 }
 0x766   :  { %v7216_v5 = vadd.f32 %v7215_v22, %v6984_v32 }
 0x768   :  { %v7238_v63 = vmul.f32 %v7216_v5, %v10998_v14 }
 0x76a   :  { %v7268_v7 = vadd.f32 %v7256_v62, %v7238_v63 }
 0x76b   :  { %v7229_v38 = vpop.f32.mrf.mxu3 }
 0x76c   :  { %v7230_v29 = vadd.f32 %v7229_v38, %v6984_v32 }
 0x76d   :  { %v7217_v48 = vpop.f32.mrf.mxu1 }
 0x76e   :  { %v7239_v19 = vmul.f32 %v7230_v29, %v10995_v57  ;;  %v7218_v60 = vadd.f32 %v7217_v48, %v12628_v58 }
 0x770   :  { %v7269_v21 = vadd.f32 %v7257_v31, %v7239_v19  ;;  %v7244_v20 = vmul.f32 %v7218_v60, %v10998_v14 }
 0x772   :  { %v7278_v55 = vpack.c.bf16 %v7269_v21, %v7268_v7  ;;  %v7274_v15 = vadd.f32 %v7262_v1, %v7244_v20 }
 0x773   :  { %v7231_v44 = vpop.f32.mrf.mxu3 }
 0x774   :  { %7284 = vst [vmem:[#allocation10 + $0x10] sm:$0xff] %v7278_v55  ;;  %v7232_v11 = vadd.f32 %v7231_v44, %v12628_v58 }
 0x776   :  { %v7245_v26 = vmul.f32 %v7232_v11, %v10995_v57 }
 0x778   :  { %v7275_v3 = vadd.f32 %v7263_v37, %v7245_v26 }
 0x77a   :  { %v7281_v42 = vpack.c.bf16 %v7275_v3, %v7274_v15 }
 0x77c   :  { %7287 = vst [vmem:[#allocation10 + $0x28] sm:$0xff] %v7281_v42 }
 0x77d   :  { %7300 = dma.vmem_to_hbm [thread:$0]  %s7293_s26, 768, %s7295_s16, [#allocation6], %s10387_s13, %s10387_s13, %s10388_s14  }
 0x77e   :  { %10383 = dma.done.wait [#allocation6], 768  }
 0x77f   :  { %10384 = vsyncadd [#allocation6], 4294966528 }
 0x780   :  { %7305 = vsyncpa [#allocation5], 1 }
 0x781   :  { %7306 = vsyncpa [#allocation8], 1 }
 0x782   :  { %7307 = vsyncpa [#allocation6], 1 }

</bundles_post_ra>
